<compile_context>
chip_gen: v5e
topology: v5e:2x2
jax: 0.10.0
libtpu: 0.0.40
codegen_flags: <defaults>
</compile_context>

<pallas_src>
import jax
import jax.numpy as jnp
from jax.experimental import pallas as pl
from jax.experimental.pallas import tpu as pltpu

_LANE = 128
_SUBLANE = 8
# Cross-generation resident-VMEM budget (v7x: 64 MiB physical per core).
_VMEM_BUDGET = 40 * 1024 * 1024


def _sigmoid_1eup(x):
    # sigmoid(x) = 0.5 * (tanh(x / 2) + 1): a single EUP push per gate.
    return 0.5 * (jnp.tanh(0.5 * x) + 1.0)


def _make_time_lstm_kernel(Ts, seq_len, has_td, needs_mask):
    """Builds the recurrence kernel (one grid step = Ts timesteps).

    Refs (in order): gates_x block (Tb,Ts,4Hp) bf16, [td block (Tb,Ts,1) f32],
    W_hh raw HBM ref (4,Hp,Hp) bf16, out block (Tb,Ts,Hp) f32, final-c (Tb,Hp)
    f32, then scratch: resident W_hh VMEM copy, its DMA sem, carried h, c.
    """

    def kernel(*refs):
        if has_td:
            (gx_ref, td_ref, whh_hbm, out_ref, cn_ref,
             whh_vmem, w_sem, h_sc, c_sc) = refs
        else:
            (gx_ref, whh_hbm, out_ref, cn_ref,
             whh_vmem, w_sem, h_sc, c_sc) = refs
            td_ref = None

        t = pl.program_id(1)

        @pl.when(t == 0)
        def _init():
            # Fresh recurrent state per batch block and a single resident copy
            # of W_hh (no pipeline double-buffering of a never-changing tile).
            cp = pltpu.make_async_copy(whh_hbm, whh_vmem, w_sem)
            cp.start()
            h_sc[...] = jnp.zeros_like(h_sc)
            c_sc[...] = jnp.zeros_like(c_sc)
            cp.wait()

        Hp = h_sc.shape[-1]
        h = h_sc[...]
        c = c_sc[...]

        # Static unroll: every gx / gate slice offset is a compile-time
        # constant (cheap packed-bf16 sublane loads).  Ts <= 32 by wrapper.
        for i in range(Ts):
            c_adj = c * td_ref[:, i, :] if has_td else c
            gx = gx_ref[:, i, :].astype(jnp.float32)            # (Tb, 4*Hp)
            hb = h.astype(jnp.bfloat16)                         # bf16 MXU LHS

            # Per-gate bf16 matmul (f32 accumulation) + immediate activation:
            # interleaves MXU result drain with EUP/VPU work.  PyTorch LSTMCell
            # gate order: i, f, g, o.
            def gate(k):
                return gx[:, k * Hp:(k + 1) * Hp] + jnp.dot(
                    hb, whh_vmem[k], preferred_element_type=jnp.float32)

            i_g = _sigmoid_1eup(gate(0))
            f_g = _sigmoid_1eup(gate(1))
            g_g = jnp.tanh(gate(2))
            o_g = _sigmoid_1eup(gate(3))

            c_new = f_g * c_adj + i_g * g_g
            h_new = o_g * jnp.tanh(c_new)
            if needs_mask:
                # Padded tail timesteps (global step >= seq_len) are no-ops on
                # the carried state, so the final h/c stay exact.
                valid = (t * Ts + i) < seq_len
                c = jnp.where(valid, c_new, c)
                h = jnp.where(valid, h_new, h)
            else:
                c, h = c_new, h_new
            out_ref[:, i, :] = h.astype(out_ref.dtype)

        h_sc[...] = h
        c_sc[...] = c

        @pl.when(t == pl.num_programs(1) - 1)
        def _finalize():
            cn_ref[...] = c.astype(cn_ref.dtype)

    return kernel


def _pad_gate_axis(w, H, Hp):
    """Pad the trailing 4*H gate axis (PyTorch i,f,g,o blocks) to 4*Hp with zeros."""
    if Hp == H:
        return w
    lead = w.shape[:-1]
    w4 = w.reshape(lead + (4, H))
    w4 = jnp.pad(w4, [(0, 0)] * (len(lead) + 1) + [(0, Hp - H)])
    return w4.reshape(lead + (4 * Hp,))


def _vmem_bytes(Tb, Ts, Hp):
    G = 4 * Hp
    return (2 * Tb * Ts * G * 2        # gates_x blocks (bf16, double-buffered)
            + 2 * Tb * Ts * 4          # time-decay blocks (f32, double-buffered)
            + 2 * Tb * Ts * Hp * 4     # output blocks (f32, double-buffered)
            + 4 * Hp * Hp * 2          # resident W_hh (bf16, single scratch copy)
            + 2 * Tb * Hp * 4          # final-c output block
            + 2 * Tb * Hp * 4)         # carried h/c scratch


def _pick_tiles(B, S, Hp, batch_block=None):
    """Choose (Bp, Tb, Sp, Ts) against a VMEM budget that fits every TPU gen."""
    ceil_to = lambda v, m: -(-v // m) * m
    if batch_block is not None:
        Tb = ceil_to(max(batch_block, 1), _SUBLANE)
        Bp = ceil_to(B, Tb)
        tb_cands = [Tb]
    else:
        Bp = ceil_to(max(B, 1), _SUBLANE)
        m = Bp // _SUBLANE
        tb_cands = [_SUBLANE * k for k in range(m, 0, -1) if m % k == 0]
    # Time blocks are multiples of 16 (bf16 sublane tile); capped at 32 to
    # bound the statically unrolled live ranges / compile time.
    ts_cands = [ts for ts in (32, 16) if ts <= max(16, ceil_to(S, 16))]
    for Tb in tb_cands:
        fitting = [ts for ts in ts_cands if _vmem_bytes(Tb, ts, Hp) <= _VMEM_BUDGET]
        if not fitting:
            continue
        divisible = [ts for ts in fitting if S % ts == 0]
        if divisible:
            Ts = max(divisible)
        else:  # minimize padded tail, then prefer fewer grid steps
            Ts = min(fitting, key=lambda ts: (ceil_to(S, ts), -ts))
        return Bp, Tb, ceil_to(S, Ts), Ts
    # Nothing fits the budget (very large hidden): smallest tiles, let the
    # compiler try with the raised vmem limit.
    Tb, Ts = tb_cands[-1], ts_cands[-1]
    return Bp, Tb, ceil_to(S, Ts), Ts


def time_gru_forward(inputs, params, time_diff=None, batch_block=None):
    """inputs: (B, S, E) batch-first.  time_diff: optional (B, S).
    Returns (outputs (B, S, H), (h_n (1, B, H), c_n (1, B, H))).

    batch_block: optional batch tile.  Setting it below B (e.g. B // 2) splits
    the batch over the 'parallel' grid axis so v7x's two TensorCores each take
    part of the rows; leave None on single-core chips (v5e/v6e), where extra
    batch grid steps are pure serial overhead unless VMEM-bound.
    """
    B, S, E = inputs.shape
    H = params["w_hh_t"].shape[0]
    Hp = -(-H // _LANE) * _LANE
    G = 4 * Hp
    has_td = time_diff is not None

    Bp, Tb, Sp, Ts = _pick_tiles(B, S, Hp, batch_block)
    needs_mask = Sp != S

    x = inputs.astype(jnp.float32)

    # Hoisted input projection: one large batched matmul over all timesteps.
    # Stored bf16: gates_x is the dominant HBM stream; halving it is a large
    # bandwidth cut.  (Fusing x @ W_ih into the kernel would cut it further
    # for very long sequences; not done here.)
    wih_p = _pad_gate_axis(params["w_ih_t"].astype(jnp.float32), H, Hp)       # (E, G)
    bias_p = _pad_gate_axis(
        (params["b_ih"] + params["b_hh"]).astype(jnp.float32), H, Hp)         # (G,)
    gates_x = jnp.einsum("bse,eg->bsg", x, wih_p) + bias_p                    # (B, S, G)
    gates_x = jnp.pad(gates_x, ((0, Bp - B), (0, Sp - S), (0, 0)))
    gates_x = gates_x.astype(jnp.bfloat16)

    # Recurrent weight as (4, Hp, Hp) bf16, gate-major, zero-padded so padded
    # hidden lanes provably stay exactly 0 through the recurrence.
    whh = params["w_hh_t"].astype(jnp.float32).reshape(H, 4, H).transpose(1, 0, 2)
    whh = jnp.pad(whh, ((0, 0), (0, Hp - H), (0, Hp - H))).astype(jnp.bfloat16)

    operands = [gates_x]
    in_specs = [pl.BlockSpec((Tb, Ts, G), lambda b, t: (b, t, 0))]
    if has_td:
        td_w = 1.0 / jnp.log(jnp.exp(jnp.float32(1.0)) + time_diff.astype(jnp.float32))
        td_w = jnp.pad(td_w, ((0, Bp - B), (0, Sp - S)), constant_values=1.0)[..., None]
        operands.append(td_w)
        in_specs.append(pl.BlockSpec((Tb, Ts, 1), lambda b, t: (b, t, 0)))
    operands.append(whh)
    in_specs.append(pl.BlockSpec(memory_space=pl.ANY))   # raw HBM ref, DMA'd once

    out_shapes = (
        jax.ShapeDtypeStruct((Bp, Sp, Hp), jnp.float32),  # per-step hidden states
        jax.ShapeDtypeStruct((Bp, Hp), jnp.float32),      # final cell state
    )
    out_specs = [
        pl.BlockSpec((Tb, Ts, Hp), lambda b, t: (b, t, 0)),
        pl.BlockSpec((Tb, Hp), lambda b, t: (b, 0)),      # resident across t
    ]
    scratch = [
        pltpu.VMEM((4, Hp, Hp), jnp.bfloat16),            # resident W_hh copy
        pltpu.SemaphoreType.DMA,                          # its load semaphore
        pltpu.VMEM((Tb, Hp), jnp.float32),                # carried h
        pltpu.VMEM((Tb, Hp), jnp.float32),                # carried c
    ]

    vmem_limit = int(min(max(_vmem_bytes(Tb, Ts, Hp) + (8 << 20), 32 << 20), 112 << 20))

    kernel = _make_time_lstm_kernel(Ts, S, has_td, needs_mask)
    outs_p, cn_p = pl.pallas_call(
        kernel,
        out_shape=out_shapes,
        grid_spec=pltpu.PrefetchScalarGridSpec(
            num_scalar_prefetch=0,
            grid=(Bp // Tb, Sp // Ts),
            in_specs=in_specs,
            out_specs=out_specs,
            scratch_shapes=scratch),
        compiler_params=pltpu.CompilerParams(
            # batch blocks are independent (megacore-shardable on v7x); the
            # time axis carries the recurrence and must stay serial.
            dimension_semantics=("parallel", "arbitrary"),
            vmem_limit_bytes=vmem_limit),
    )(*operands)

    outputs = outs_p[:B, :S, :H]                          # un-pad batch/seq/hidden
    h_n = outputs[:, -1, :][None]                         # (1, B, H)
    c_n = cn_p[:B, :H][None]                              # (1, B, H)
    return outputs, (h_n, c_n)


def _reference_forward(inputs, params, time_diff=None):
    """Pure-JAX replica of the PyTorch forward for a correctness check."""
    B, S, E = inputs.shape
    H = params["w_hh_t"].shape[0]
    wih, whh = params["w_ih_t"], params["w_hh_t"]
    bias = params["b_ih"] + params["b_hh"]
    h = jnp.zeros((B, H), jnp.float32)
    c = jnp.zeros((B, H), jnp.float32)
    if time_diff is not None:
        td_w = 1.0 / jnp.log(jnp.exp(jnp.float32(1.0)) + time_diff)   # (B, S)
    outs = []
    for s in range(S):
        c_adj = c * td_w[:, s:s + 1] if time_diff is not None else c
        gates = inputs[:, s] @ wih + h @ whh + bias
        i = jax.nn.sigmoid(gates[:, 0 * H:1 * H])
        f = jax.nn.sigmoid(gates[:, 1 * H:2 * H])
        g = jnp.tanh(gates[:, 2 * H:3 * H])
        o = jax.nn.sigmoid(gates[:, 3 * H:4 * H])
        c = f * c_adj + i * g
        h = o * jnp.tanh(c)
        outs.append(h)
    return jnp.stack(outs, 1), (h[None], c[None])


def _init_params(key, input_size, hidden_size):
    """PyTorch LSTMCell shapes: W_ih (4H, E), W_hh (4H, H), b_ih/b_hh (4H,);
    uniform(-1/sqrt(H), 1/sqrt(H))."""
    k1, k2, k3, k4 = jax.random.split(key, 4)
    bound = 1.0 / (hidden_size ** 0.5)
    u = lambda k, shp: jax.random.uniform(k, shp, jnp.float32, -bound, bound)
    w_ih = u(k1, (4 * hidden_size, input_size))
    w_hh = u(k2, (4 * hidden_size, hidden_size))
    b_ih = u(k3, (4 * hidden_size,))
    b_hh = u(k4, (4 * hidden_size,))
    return {"w_ih_t": w_ih.T, "w_hh_t": w_hh.T, "b_ih": b_ih, "b_hh": b_hh}


if __name__ == "__main__":
    def _check(B, S, E, H, key, use_td):
        kp, kx, kt = jax.random.split(key, 3)
        params = _init_params(kp, input_size=E, hidden_size=H)
        inputs = jax.random.normal(kx, (B, S, E), jnp.float32)
        td = jax.random.uniform(kt, (B, S), jnp.float32, 0.0, 5.0) if use_td else None
        out, (h_n, c_n) = time_gru_forward(inputs, params, td)
        jax.block_until_ready((out, h_n, c_n))
        ref_out, (rh, rc) = _reference_forward(inputs, params, td)
        assert out.shape == (B, S, H) and h_n.shape == (1, B, H) and c_n.shape == (1, B, H)
        tol = dict(atol=3e-2, rtol=3e-2)   # bf16 MXU operands / bf16 gates_x
        assert jnp.allclose(out, ref_out, **tol)
        assert jnp.allclose(h_n, rh, **tol)
        assert jnp.allclose(c_n, rc, **tol)

    key = jax.random.PRNGKey(0)
    k1, k2, k3 = jax.random.split(key, 3)
    # Small shapes implied by the module: (batch, seq, embed), hidden=32.
    _check(B=2, S=8, E=4, H=32, key=k1, use_td=True)    # time-decay path
    _check(B=2, S=8, E=4, H=32, key=k2, use_td=False)   # specialized no-td kernel
    # Exercises batch/seq/hidden padding, masked tail steps and multi-grid-step
    # state carry (S=40 -> Ts=16, 3 time grid steps).
    _check(B=3, S=40, E=5, H=40, key=k3, use_td=True)
    print("KERNEL_OK")
</pallas_src>

<mosaic_0001>
module attributes {stable_mosaic.version = 11 : i64} {
  func.func @kernel(%arg0: i32, %arg1: i32, %arg2: memref<8x16x512xbf16, #tpu.memory_space<vmem>>, %arg3: memref<8x16x1xf32, #tpu.memory_space<vmem>>, %arg4: memref<4x128x128xbf16, #tpu.memory_space<any>>, %arg5: memref<8x16x128xf32, #tpu.memory_space<vmem>>, %arg6: memref<8x128xf32, #tpu.memory_space<vmem>>, %arg7: memref<4x128x128xbf16, #tpu.memory_space<vmem>>, %arg8: memref<!tpu.dma_semaphore, #tpu.memory_space<semaphore_mem>>, %arg9: memref<8x128xf32, #tpu.memory_space<vmem>>, %arg10: memref<8x128xf32, #tpu.memory_space<vmem>>) attributes {dimension_semantics = [#tpu.dimension_semantics<parallel>, #tpu.dimension_semantics<arbitrary>], iteration_bounds = array<i64: 1, 1>, scalar_prefetch = 0 : i64, scratch_operands = 4 : i64, tpu.core_type = #tpu.core_type<tc>, window_params = [{transform_indices = @transform_0, window_bounds = array<i64: 8, 16, 512>}, {transform_indices = @transform_1, window_bounds = array<i64: 8, 16, 1>}, {}, {transform_indices = @transform_3, window_bounds = array<i64: 8, 16, 128>}, {transform_indices = @transform_4, window_bounds = array<i64: 8, 128>}]} {
    %c0_i32 = arith.constant 0 : i32
    %0 = arith.cmpi eq, %arg1, %c0_i32 : i32
    %1 = arith.extui %0 : i1 to i32
    %c0_i32_0 = arith.constant 0 : i32
    %2 = arith.cmpi ne, %1, %c0_i32_0 : i32
    scf.if %2 {
      tpu.enqueue_dma source(%arg4 : memref<4x128x128xbf16, #tpu.memory_space<any>>) target(%arg7 : memref<4x128x128xbf16, #tpu.memory_space<vmem>>) target_semaphore(%arg8 : memref<!tpu.dma_semaphore, #tpu.memory_space<semaphore_mem>>)
      %cst_570 = arith.constant 0.000000e+00 : f32
      %1018 = vector.broadcast %cst_570 : f32 to vector<8x128xf32>
      %c0_571 = arith.constant 0 : index
      %c0_572 = arith.constant 0 : index
      %1019 = vector.load %arg9[%c0_571, %c0_572] : memref<8x128xf32, #tpu.memory_space<vmem>>, vector<8x128xf32>
      tpu.vector_store %arg9[%c0_571, %c0_572], %1018 {strides = array<i32>} : memref<8x128xf32, #tpu.memory_space<vmem>>, vector<8x128xf32>,
      %cst_573 = arith.constant 0.000000e+00 : f32
      %1020 = vector.broadcast %cst_573 : f32 to vector<8x128xf32>
      %c0_574 = arith.constant 0 : index
      %c0_575 = arith.constant 0 : index
      %1021 = vector.load %arg10[%c0_574, %c0_575] : memref<8x128xf32, #tpu.memory_space<vmem>>, vector<8x128xf32>
      tpu.vector_store %arg10[%c0_574, %c0_575], %1020 {strides = array<i32>} : memref<8x128xf32, #tpu.memory_space<vmem>>, vector<8x128xf32>,
      tpu.wait_dma2 semaphore(%arg8 : memref<!tpu.dma_semaphore, #tpu.memory_space<semaphore_mem>>) src(%arg4 : memref<4x128x128xbf16, #tpu.memory_space<any>>) dst(%arg7 : memref<4x128x128xbf16, #tpu.memory_space<vmem>>)
    } else {
    }
    %c0 = arith.constant 0 : index
    %c0_1 = arith.constant 0 : index
    %3 = vector.load %arg9[%c0, %c0_1] : memref<8x128xf32, #tpu.memory_space<vmem>>, vector<8x128xf32>
    %c0_2 = arith.constant 0 : index
    %c0_3 = arith.constant 0 : index
    %4 = vector.load %arg10[%c0_2, %c0_3] : memref<8x128xf32, #tpu.memory_space<vmem>>, vector<8x128xf32>
    %c0_4 = arith.constant 0 : index
    %c0_5 = arith.constant 0 : index
    %c0_6 = arith.constant 0 : index
    %5 = vector.load %arg3[%c0_4, %c0_5, %c0_6] : memref<8x16x1xf32, #tpu.memory_space<vmem>>, vector<8x1x1xf32>
    %6 = vector.shape_cast %5 : vector<8x1x1xf32> to vector<8x1xf32>
    %7 = vector.broadcast %6 : vector<8x1xf32> to vector<8x128xf32>
    %8 = arith.mulf %4, %7 : vector<8x128xf32>
    %c0_7 = arith.constant 0 : index
    %c0_8 = arith.constant 0 : index
    %c0_9 = arith.constant 0 : index
    %9 = vector.load %arg2[%c0_7, %c0_8, %c0_9] : memref<8x16x512xbf16, #tpu.memory_space<vmem>>, vector<8x1x512xbf16>
    %10 = vector.shape_cast %9 : vector<8x1x512xbf16> to vector<8x512xbf16>
    %11 = arith.extf %10 : vector<8x512xbf16> to vector<8x512xf32>
    %12 = arith.truncf %3 : vector<8x128xf32> to vector<8x128xbf16>
    %13 = vector.extract_strided_slice %11 {offsets = [0, 0], sizes = [8, 128], strides = [1, 1]} : vector<8x512xf32> to vector<8x128xf32>
    %c0_10 = arith.constant 0 : index
    %c0_11 = arith.constant 0 : index
    %c0_12 = arith.constant 0 : index
    %14 = vector.load %arg7[%c0_10, %c0_11, %c0_12] : memref<4x128x128xbf16, #tpu.memory_space<vmem>>, vector<1x128x128xbf16>
    %15 = vector.shape_cast %14 : vector<1x128x128xbf16> to vector<128x128xbf16>
    %cst = arith.constant dense<0.000000e+00> : vector<8x128xf32>
    %16 = tpu.matmul %12, %15, %cst {dimension_numbers = #tpu.dot_dimension_numbers<[1], [0], [0], [1], [0, 0, 1, 1], [], []>} : vector<8x128xbf16>, vector<128x128xbf16>, vector<8x128xf32> -> vector<8x128xf32>
    %17 = arith.addf %13, %16 : vector<8x128xf32>
    %cst_13 = arith.constant 5.000000e-01 : f32
    %18 = vector.broadcast %cst_13 : f32 to vector<8x128xf32>
    %19 = arith.mulf %18, %17 : vector<8x128xf32>
    %20 = math.tanh %19 : vector<8x128xf32>
    %cst_14 = arith.constant 1.000000e+00 : f32
    %21 = vector.broadcast %cst_14 : f32 to vector<8x128xf32>
    %22 = arith.addf %20, %21 : vector<8x128xf32>
    %cst_15 = arith.constant 5.000000e-01 : f32
    %23 = vector.broadcast %cst_15 : f32 to vector<8x128xf32>
    %24 = arith.mulf %23, %22 : vector<8x128xf32>
    %25 = vector.extract_strided_slice %11 {offsets = [0, 128], sizes = [8, 128], strides = [1, 1]} : vector<8x512xf32> to vector<8x128xf32>
    %c1 = arith.constant 1 : index
    %c0_16 = arith.constant 0 : index
    %c0_17 = arith.constant 0 : index
    %26 = vector.load %arg7[%c1, %c0_16, %c0_17] : memref<4x128x128xbf16, #tpu.memory_space<vmem>>, vector<1x128x128xbf16>
    %27 = vector.shape_cast %26 : vector<1x128x128xbf16> to vector<128x128xbf16>
    %cst_18 = arith.constant dense<0.000000e+00> : vector<8x128xf32>
    %28 = tpu.matmul %12, %27, %cst_18 {dimension_numbers = #tpu.dot_dimension_numbers<[1], [0], [0], [1], [0, 0, 1, 1], [], []>} : vector<8x128xbf16>, vector<128x128xbf16>, vector<8x128xf32> -> vector<8x128xf32>
    %29 = arith.addf %25, %28 : vector<8x128xf32>
    %cst_19 = arith.constant 5.000000e-01 : f32
    %30 = vector.broadcast %cst_19 : f32 to vector<8x128xf32>
    %31 = arith.mulf %30, %29 : vector<8x128xf32>
    %32 = math.tanh %31 : vector<8x128xf32>
    %cst_20 = arith.constant 1.000000e+00 : f32
    %33 = vector.broadcast %cst_20 : f32 to vector<8x128xf32>
    %34 = arith.addf %32, %33 : vector<8x128xf32>
    %cst_21 = arith.constant 5.000000e-01 : f32
    %35 = vector.broadcast %cst_21 : f32 to vector<8x128xf32>
    %36 = arith.mulf %35, %34 : vector<8x128xf32>
    %37 = vector.extract_strided_slice %11 {offsets = [0, 256], sizes = [8, 128], strides = [1, 1]} : vector<8x512xf32> to vector<8x128xf32>
    %c2 = arith.constant 2 : index
    %c0_22 = arith.constant 0 : index
    %c0_23 = arith.constant 0 : index
    %38 = vector.load %arg7[%c2, %c0_22, %c0_23] : memref<4x128x128xbf16, #tpu.memory_space<vmem>>, vector<1x128x128xbf16>
    %39 = vector.shape_cast %38 : vector<1x128x128xbf16> to vector<128x128xbf16>
    %cst_24 = arith.constant dense<0.000000e+00> : vector<8x128xf32>
    %40 = tpu.matmul %12, %39, %cst_24 {dimension_numbers = #tpu.dot_dimension_numbers<[1], [0], [0], [1], [0, 0, 1, 1], [], []>} : vector<8x128xbf16>, vector<128x128xbf16>, vector<8x128xf32> -> vector<8x128xf32>
    %41 = arith.addf %37, %40 : vector<8x128xf32>
    %42 = math.tanh %41 : vector<8x128xf32>
    %43 = vector.extract_strided_slice %11 {offsets = [0, 384], sizes = [8, 128], strides = [1, 1]} : vector<8x512xf32> to vector<8x128xf32>
    %c3 = arith.constant 3 : index
    %c0_25 = arith.constant 0 : index
    %c0_26 = arith.constant 0 : index
    %44 = vector.load %arg7[%c3, %c0_25, %c0_26] : memref<4x128x128xbf16, #tpu.memory_space<vmem>>, vector<1x128x128xbf16>
    %45 = vector.shape_cast %44 : vector<1x128x128xbf16> to vector<128x128xbf16>
    %cst_27 = arith.constant dense<0.000000e+00> : vector<8x128xf32>
    %46 = tpu.matmul %12, %45, %cst_27 {dimension_numbers = #tpu.dot_dimension_numbers<[1], [0], [0], [1], [0, 0, 1, 1], [], []>} : vector<8x128xbf16>, vector<128x128xbf16>, vector<8x128xf32> -> vector<8x128xf32>
    %47 = arith.addf %43, %46 : vector<8x128xf32>
    %cst_28 = arith.constant 5.000000e-01 : f32
    %48 = vector.broadcast %cst_28 : f32 to vector<8x128xf32>
    %49 = arith.mulf %48, %47 : vector<8x128xf32>
    %50 = math.tanh %49 : vector<8x128xf32>
    %cst_29 = arith.constant 1.000000e+00 : f32
    %51 = vector.broadcast %cst_29 : f32 to vector<8x128xf32>
    %52 = arith.addf %50, %51 : vector<8x128xf32>
    %cst_30 = arith.constant 5.000000e-01 : f32
    %53 = vector.broadcast %cst_30 : f32 to vector<8x128xf32>
    %54 = arith.mulf %53, %52 : vector<8x128xf32>
    %55 = arith.mulf %36, %8 : vector<8x128xf32>
    %56 = arith.mulf %24, %42 : vector<8x128xf32>
    %57 = arith.addf %55, %56 : vector<8x128xf32>
    %58 = math.tanh %57 : vector<8x128xf32>
    %59 = arith.mulf %54, %58 : vector<8x128xf32>
    %c16_i32 = arith.constant 16 : i32
    %60 = arith.muli %arg1, %c16_i32 : i32
    %c0_i32_31 = arith.constant 0 : i32
    %61 = arith.addi %60, %c0_i32_31 : i32
    %c8_i32 = arith.constant 8 : i32
    %62 = arith.cmpi slt, %61, %c8_i32 : i32
    %63 = arith.select %62, %57, %4 : vector<8x128xf32>
    %64 = arith.select %62, %59, %3 : vector<8x128xf32>
    %c0_32 = arith.constant 0 : index
    %c0_33 = arith.constant 0 : index
    %c0_34 = arith.constant 0 : index
    %65 = vector.load %arg5[%c0_32, %c0_33, %c0_34] : memref<8x16x128xf32, #tpu.memory_space<vmem>>, vector<8x1x128xf32>
    %66 = vector.shape_cast %65 : vector<8x1x128xf32> to vector<8x128xf32>
    %67 = vector.shape_cast %64 : vector<8x128xf32> to vector<8x1x128xf32>
    tpu.vector_store %arg5[%c0_32, %c0_33, %c0_34], %67 {strides = array<i32>} : memref<8x16x128xf32, #tpu.memory_space<vmem>>, vector<8x1x128xf32>,
    %c0_35 = arith.constant 0 : index
    %c1_36 = arith.constant 1 : index
    %c0_37 = arith.constant 0 : index
    %68 = vector.load %arg3[%c0_35, %c1_36, %c0_37] : memref<8x16x1xf32, #tpu.memory_space<vmem>>, vector<8x1x1xf32>
    %69 = vector.shape_cast %68 : vector<8x1x1xf32> to vector<8x1xf32>
    %70 = vector.broadcast %69 : vector<8x1xf32> to vector<8x128xf32>
    %71 = arith.mulf %63, %70 : vector<8x128xf32>
    %c0_38 = arith.constant 0 : index
    %c1_39 = arith.constant 1 : index
    %c0_40 = arith.constant 0 : index
    %72 = vector.load %arg2[%c0_38, %c1_39, %c0_40] : memref<8x16x512xbf16, #tpu.memory_space<vmem>>, vector<8x1x512xbf16>
    %73 = vector.shape_cast %72 : vector<8x1x512xbf16> to vector<8x512xbf16>
    %74 = arith.extf %73 : vector<8x512xbf16> to vector<8x512xf32>
    %75 = arith.truncf %64 : vector<8x128xf32> to vector<8x128xbf16>
    %76 = vector.extract_strided_slice %74 {offsets = [0, 0], sizes = [8, 128], strides = [1, 1]} : vector<8x512xf32> to vector<8x128xf32>
    %c0_41 = arith.constant 0 : index
    %c0_42 = arith.constant 0 : index
    %c0_43 = arith.constant 0 : index
    %77 = vector.load %arg7[%c0_41, %c0_42, %c0_43] : memref<4x128x128xbf16, #tpu.memory_space<vmem>>, vector<1x128x128xbf16>
    %78 = vector.shape_cast %77 : vector<1x128x128xbf16> to vector<128x128xbf16>
    %cst_44 = arith.constant dense<0.000000e+00> : vector<8x128xf32>
    %79 = tpu.matmul %75, %78, %cst_44 {dimension_numbers = #tpu.dot_dimension_numbers<[1], [0], [0], [1], [0, 0, 1, 1], [], []>} : vector<8x128xbf16>, vector<128x128xbf16>, vector<8x128xf32> -> vector<8x128xf32>
    %80 = arith.addf %76, %79 : vector<8x128xf32>
    %cst_45 = arith.constant 5.000000e-01 : f32
    %81 = vector.broadcast %cst_45 : f32 to vector<8x128xf32>
    %82 = arith.mulf %81, %80 : vector<8x128xf32>
    %83 = math.tanh %82 : vector<8x128xf32>
    %cst_46 = arith.constant 1.000000e+00 : f32
    %84 = vector.broadcast %cst_46 : f32 to vector<8x128xf32>
    %85 = arith.addf %83, %84 : vector<8x128xf32>
    %cst_47 = arith.constant 5.000000e-01 : f32
    %86 = vector.broadcast %cst_47 : f32 to vector<8x128xf32>
    %87 = arith.mulf %86, %85 : vector<8x128xf32>
    %88 = vector.extract_strided_slice %74 {offsets = [0, 128], sizes = [8, 128], strides = [1, 1]} : vector<8x512xf32> to vector<8x128xf32>
    %c1_48 = arith.constant 1 : index
    %c0_49 = arith.constant 0 : index
    %c0_50 = arith.constant 0 : index
    %89 = vector.load %arg7[%c1_48, %c0_49, %c0_50] : memref<4x128x128xbf16, #tpu.memory_space<vmem>>, vector<1x128x128xbf16>
    %90 = vector.shape_cast %89 : vector<1x128x128xbf16> to vector<128x128xbf16>
    %cst_51 = arith.constant dense<0.000000e+00> : vector<8x128xf32>
    %91 = tpu.matmul %75, %90, %cst_51 {dimension_numbers = #tpu.dot_dimension_numbers<[1], [0], [0], [1], [0, 0, 1, 1], [], []>} : vector<8x128xbf16>, vector<128x128xbf16>, vector<8x128xf32> -> vector<8x128xf32>
    %92 = arith.addf %88, %91 : vector<8x128xf32>
    %cst_52 = arith.constant 5.000000e-01 : f32
    %93 = vector.broadcast %cst_52 : f32 to vector<8x128xf32>
    %94 = arith.mulf %93, %92 : vector<8x128xf32>
    %95 = math.tanh %94 : vector<8x128xf32>
    %cst_53 = arith.constant 1.000000e+00 : f32
    %96 = vector.broadcast %cst_53 : f32 to vector<8x128xf32>
    %97 = arith.addf %95, %96 : vector<8x128xf32>
    %cst_54 = arith.constant 5.000000e-01 : f32
    %98 = vector.broadcast %cst_54 : f32 to vector<8x128xf32>
    %99 = arith.mulf %98, %97 : vector<8x128xf32>
    %100 = vector.extract_strided_slice %74 {offsets = [0, 256], sizes = [8, 128], strides = [1, 1]} : vector<8x512xf32> to vector<8x128xf32>
    %c2_55 = arith.constant 2 : index
    %c0_56 = arith.constant 0 : index
    %c0_57 = arith.constant 0 : index
    %101 = vector.load %arg7[%c2_55, %c0_56, %c0_57] : memref<4x128x128xbf16, #tpu.memory_space<vmem>>, vector<1x128x128xbf16>
    %102 = vector.shape_cast %101 : vector<1x128x128xbf16> to vector<128x128xbf16>
    %cst_58 = arith.constant dense<0.000000e+00> : vector<8x128xf32>
    %103 = tpu.matmul %75, %102, %cst_58 {dimension_numbers = #tpu.dot_dimension_numbers<[1], [0], [0], [1], [0, 0, 1, 1], [], []>} : vector<8x128xbf16>, vector<128x128xbf16>, vector<8x128xf32> -> vector<8x128xf32>
    %104 = arith.addf %100, %103 : vector<8x128xf32>
    %105 = math.tanh %104 : vector<8x128xf32>
    %106 = vector.extract_strided_slice %74 {offsets = [0, 384], sizes = [8, 128], strides = [1, 1]} : vector<8x512xf32> to vector<8x128xf32>
    %c3_59 = arith.constant 3 : index
    %c0_60 = arith.constant 0 : index
    %c0_61 = arith.constant 0 : index
    %107 = vector.load %arg7[%c3_59, %c0_60, %c0_61] : memref<4x128x128xbf16, #tpu.memory_space<vmem>>, vector<1x128x128xbf16>
    %108 = vector.shape_cast %107 : vector<1x128x128xbf16> to vector<128x128xbf16>
    %cst_62 = arith.constant dense<0.000000e+00> : vector<8x128xf32>
    %109 = tpu.matmul %75, %108, %cst_62 {dimension_numbers = #tpu.dot_dimension_numbers<[1], [0], [0], [1], [0, 0, 1, 1], [], []>} : vector<8x128xbf16>, vector<128x128xbf16>, vector<8x128xf32> -> vector<8x128xf32>
    %110 = arith.addf %106, %109 : vector<8x128xf32>
    %cst_63 = arith.constant 5.000000e-01 : f32
    %111 = vector.broadcast %cst_63 : f32 to vector<8x128xf32>
    %112 = arith.mulf %111, %110 : vector<8x128xf32>
    %113 = math.tanh %112 : vector<8x128xf32>
    %cst_64 = arith.constant 1.000000e+00 : f32
    %114 = vector.broadcast %cst_64 : f32 to vector<8x128xf32>
    %115 = arith.addf %113, %114 : vector<8x128xf32>
    %cst_65 = arith.constant 5.000000e-01 : f32
    %116 = vector.broadcast %cst_65 : f32 to vector<8x128xf32>
    %117 = arith.mulf %116, %115 : vector<8x128xf32>
    %118 = arith.mulf %99, %71 : vector<8x128xf32>
    %119 = arith.mulf %87, %105 : vector<8x128xf32>
    %120 = arith.addf %118, %119 : vector<8x128xf32>
    %121 = math.tanh %120 : vector<8x128xf32>
    %122 = arith.mulf %117, %121 : vector<8x128xf32>
    %c16_i32_66 = arith.constant 16 : i32
    %123 = arith.muli %arg1, %c16_i32_66 : i32
    %c1_i32 = arith.constant 1 : i32
    %124 = arith.addi %123, %c1_i32 : i32
    %c8_i32_67 = arith.constant 8 : i32
    %125 = arith.cmpi slt, %124, %c8_i32_67 : i32
    %126 = arith.select %125, %120, %63 : vector<8x128xf32>
    %127 = arith.select %125, %122, %64 : vector<8x128xf32>
    %c0_68 = arith.constant 0 : index
    %c1_69 = arith.constant 1 : index
    %c0_70 = arith.constant 0 : index
    %128 = vector.load %arg5[%c0_68, %c1_69, %c0_70] : memref<8x16x128xf32, #tpu.memory_space<vmem>>, vector<8x1x128xf32>
    %129 = vector.shape_cast %128 : vector<8x1x128xf32> to vector<8x128xf32>
    %130 = vector.shape_cast %127 : vector<8x128xf32> to vector<8x1x128xf32>
    tpu.vector_store %arg5[%c0_68, %c1_69, %c0_70], %130 {strides = array<i32>} : memref<8x16x128xf32, #tpu.memory_space<vmem>>, vector<8x1x128xf32>,
    %c0_71 = arith.constant 0 : index
    %c2_72 = arith.constant 2 : index
    %c0_73 = arith.constant 0 : index
    %131 = vector.load %arg3[%c0_71, %c2_72, %c0_73] : memref<8x16x1xf32, #tpu.memory_space<vmem>>, vector<8x1x1xf32>
    %132 = vector.shape_cast %131 : vector<8x1x1xf32> to vector<8x1xf32>
    %133 = vector.broadcast %132 : vector<8x1xf32> to vector<8x128xf32>
    %134 = arith.mulf %126, %133 : vector<8x128xf32>
    %c0_74 = arith.constant 0 : index
    %c2_75 = arith.constant 2 : index
    %c0_76 = arith.constant 0 : index
    %135 = vector.load %arg2[%c0_74, %c2_75, %c0_76] : memref<8x16x512xbf16, #tpu.memory_space<vmem>>, vector<8x1x512xbf16>
    %136 = vector.shape_cast %135 : vector<8x1x512xbf16> to vector<8x512xbf16>
    %137 = arith.extf %136 : vector<8x512xbf16> to vector<8x512xf32>
    %138 = arith.truncf %127 : vector<8x128xf32> to vector<8x128xbf16>
    %139 = vector.extract_strided_slice %137 {offsets = [0, 0], sizes = [8, 128], strides = [1, 1]} : vector<8x512xf32> to vector<8x128xf32>
    %c0_77 = arith.constant 0 : index
    %c0_78 = arith.constant 0 : index
    %c0_79 = arith.constant 0 : index
    %140 = vector.load %arg7[%c0_77, %c0_78, %c0_79] : memref<4x128x128xbf16, #tpu.memory_space<vmem>>, vector<1x128x128xbf16>
    %141 = vector.shape_cast %140 : vector<1x128x128xbf16> to vector<128x128xbf16>
    %cst_80 = arith.constant dense<0.000000e+00> : vector<8x128xf32>
    %142 = tpu.matmul %138, %141, %cst_80 {dimension_numbers = #tpu.dot_dimension_numbers<[1], [0], [0], [1], [0, 0, 1, 1], [], []>} : vector<8x128xbf16>, vector<128x128xbf16>, vector<8x128xf32> -> vector<8x128xf32>
    %143 = arith.addf %139, %142 : vector<8x128xf32>
    %cst_81 = arith.constant 5.000000e-01 : f32
    %144 = vector.broadcast %cst_81 : f32 to vector<8x128xf32>
    %145 = arith.mulf %144, %143 : vector<8x128xf32>
    %146 = math.tanh %145 : vector<8x128xf32>
    %cst_82 = arith.constant 1.000000e+00 : f32
    %147 = vector.broadcast %cst_82 : f32 to vector<8x128xf32>
    %148 = arith.addf %146, %147 : vector<8x128xf32>
    %cst_83 = arith.constant 5.000000e-01 : f32
    %149 = vector.broadcast %cst_83 : f32 to vector<8x128xf32>
    %150 = arith.mulf %149, %148 : vector<8x128xf32>
    %151 = vector.extract_strided_slice %137 {offsets = [0, 128], sizes = [8, 128], strides = [1, 1]} : vector<8x512xf32> to vector<8x128xf32>
    %c1_84 = arith.constant 1 : index
    %c0_85 = arith.constant 0 : index
    %c0_86 = arith.constant 0 : index
    %152 = vector.load %arg7[%c1_84, %c0_85, %c0_86] : memref<4x128x128xbf16, #tpu.memory_space<vmem>>, vector<1x128x128xbf16>
    %153 = vector.shape_cast %152 : vector<1x128x128xbf16> to vector<128x128xbf16>
    %cst_87 = arith.constant dense<0.000000e+00> : vector<8x128xf32>
    %154 = tpu.matmul %138, %153, %cst_87 {dimension_numbers = #tpu.dot_dimension_numbers<[1], [0], [0], [1], [0, 0, 1, 1], [], []>} : vector<8x128xbf16>, vector<128x128xbf16>, vector<8x128xf32> -> vector<8x128xf32>
    %155 = arith.addf %151, %154 : vector<8x128xf32>
    %cst_88 = arith.constant 5.000000e-01 : f32
    %156 = vector.broadcast %cst_88 : f32 to vector<8x128xf32>
    %157 = arith.mulf %156, %155 : vector<8x128xf32>
    %158 = math.tanh %157 : vector<8x128xf32>
    %cst_89 = arith.constant 1.000000e+00 : f32
    %159 = vector.broadcast %cst_89 : f32 to vector<8x128xf32>
    %160 = arith.addf %158, %159 : vector<8x128xf32>
    %cst_90 = arith.constant 5.000000e-01 : f32
    %161 = vector.broadcast %cst_90 : f32 to vector<8x128xf32>
    %162 = arith.mulf %161, %160 : vector<8x128xf32>
    %163 = vector.extract_strided_slice %137 {offsets = [0, 256], sizes = [8, 128], strides = [1, 1]} : vector<8x512xf32> to vector<8x128xf32>
    %c2_91 = arith.constant 2 : index
    %c0_92 = arith.constant 0 : index
    %c0_93 = arith.constant 0 : index
    %164 = vector.load %arg7[%c2_91, %c0_92, %c0_93] : memref<4x128x128xbf16, #tpu.memory_space<vmem>>, vector<1x128x128xbf16>
    %165 = vector.shape_cast %164 : vector<1x128x128xbf16> to vector<128x128xbf16>
    %cst_94 = arith.constant dense<0.000000e+00> : vector<8x128xf32>
    %166 = tpu.matmul %138, %165, %cst_94 {dimension_numbers = #tpu.dot_dimension_numbers<[1], [0], [0], [1], [0, 0, 1, 1], [], []>} : vector<8x128xbf16>, vector<128x128xbf16>, vector<8x128xf32> -> vector<8x128xf32>
    %167 = arith.addf %163, %166 : vector<8x128xf32>
    %168 = math.tanh %167 : vector<8x128xf32>
    %169 = vector.extract_strided_slice %137 {offsets = [0, 384], sizes = [8, 128], strides = [1, 1]} : vector<8x512xf32> to vector<8x128xf32>
    %c3_95 = arith.constant 3 : index
    %c0_96 = arith.constant 0 : index
    %c0_97 = arith.constant 0 : index
    %170 = vector.load %arg7[%c3_95, %c0_96, %c0_97] : memref<4x128x128xbf16, #tpu.memory_space<vmem>>, vector<1x128x128xbf16>
    %171 = vector.shape_cast %170 : vector<1x128x128xbf16> to vector<128x128xbf16>
    %cst_98 = arith.constant dense<0.000000e+00> : vector<8x128xf32>
    %172 = tpu.matmul %138, %171, %cst_98 {dimension_numbers = #tpu.dot_dimension_numbers<[1], [0], [0], [1], [0, 0, 1, 1], [], []>} : vector<8x128xbf16>, vector<128x128xbf16>, vector<8x128xf32> -> vector<8x128xf32>
    %173 = arith.addf %169, %172 : vector<8x128xf32>
    %cst_99 = arith.constant 5.000000e-01 : f32
    %174 = vector.broadcast %cst_99 : f32 to vector<8x128xf32>
    %175 = arith.mulf %174, %173 : vector<8x128xf32>
    %176 = math.tanh %175 : vector<8x128xf32>
    %cst_100 = arith.constant 1.000000e+00 : f32
    %177 = vector.broadcast %cst_100 : f32 to vector<8x128xf32>
    %178 = arith.addf %176, %177 : vector<8x128xf32>
    %cst_101 = arith.constant 5.000000e-01 : f32
    %179 = vector.broadcast %cst_101 : f32 to vector<8x128xf32>
    %180 = arith.mulf %179, %178 : vector<8x128xf32>
    %181 = arith.mulf %162, %134 : vector<8x128xf32>
    %182 = arith.mulf %150, %168 : vector<8x128xf32>
    %183 = arith.addf %181, %182 : vector<8x128xf32>
    %184 = math.tanh %183 : vector<8x128xf32>
    %185 = arith.mulf %180, %184 : vector<8x128xf32>
    %c16_i32_102 = arith.constant 16 : i32
    %186 = arith.muli %arg1, %c16_i32_102 : i32
    %c2_i32 = arith.constant 2 : i32
    %187 = arith.addi %186, %c2_i32 : i32
    %c8_i32_103 = arith.constant 8 : i32
    %188 = arith.cmpi slt, %187, %c8_i32_103 : i32
    %189 = arith.select %188, %183, %126 : vector<8x128xf32>
    %190 = arith.select %188, %185, %127 : vector<8x128xf32>
    %c0_104 = arith.constant 0 : index
    %c2_105 = arith.constant 2 : index
    %c0_106 = arith.constant 0 : index
    %191 = vector.load %arg5[%c0_104, %c2_105, %c0_106] : memref<8x16x128xf32, #tpu.memory_space<vmem>>, vector<8x1x128xf32>
    %192 = vector.shape_cast %191 : vector<8x1x128xf32> to vector<8x128xf32>
    %193 = vector.shape_cast %190 : vector<8x128xf32> to vector<8x1x128xf32>
    tpu.vector_store %arg5[%c0_104, %c2_105, %c0_106], %193 {strides = array<i32>} : memref<8x16x128xf32, #tpu.memory_space<vmem>>, vector<8x1x128xf32>,
    %c0_107 = arith.constant 0 : index
    %c3_108 = arith.constant 3 : index
    %c0_109 = arith.constant 0 : index
    %194 = vector.load %arg3[%c0_107, %c3_108, %c0_109] : memref<8x16x1xf32, #tpu.memory_space<vmem>>, vector<8x1x1xf32>
    %195 = vector.shape_cast %194 : vector<8x1x1xf32> to vector<8x1xf32>
    %196 = vector.broadcast %195 : vector<8x1xf32> to vector<8x128xf32>
    %197 = arith.mulf %189, %196 : vector<8x128xf32>
    %c0_110 = arith.constant 0 : index
    %c3_111 = arith.constant 3 : index
    %c0_112 = arith.constant 0 : index
    %198 = vector.load %arg2[%c0_110, %c3_111, %c0_112] : memref<8x16x512xbf16, #tpu.memory_space<vmem>>, vector<8x1x512xbf16>
    %199 = vector.shape_cast %198 : vector<8x1x512xbf16> to vector<8x512xbf16>
    %200 = arith.extf %199 : vector<8x512xbf16> to vector<8x512xf32>
    %201 = arith.truncf %190 : vector<8x128xf32> to vector<8x128xbf16>
    %202 = vector.extract_strided_slice %200 {offsets = [0, 0], sizes = [8, 128], strides = [1, 1]} : vector<8x512xf32> to vector<8x128xf32>
    %c0_113 = arith.constant 0 : index
    %c0_114 = arith.constant 0 : index
    %c0_115 = arith.constant 0 : index
    %203 = vector.load %arg7[%c0_113, %c0_114, %c0_115] : memref<4x128x128xbf16, #tpu.memory_space<vmem>>, vector<1x128x128xbf16>
    %204 = vector.shape_cast %203 : vector<1x128x128xbf16> to vector<128x128xbf16>
    %cst_116 = arith.constant dense<0.000000e+00> : vector<8x128xf32>
    %205 = tpu.matmul %201, %204, %cst_116 {dimension_numbers = #tpu.dot_dimension_numbers<[1], [0], [0], [1], [0, 0, 1, 1], [], []>} : vector<8x128xbf16>, vector<128x128xbf16>, vector<8x128xf32> -> vector<8x128xf32>
    %206 = arith.addf %202, %205 : vector<8x128xf32>
    %cst_117 = arith.constant 5.000000e-01 : f32
    %207 = vector.broadcast %cst_117 : f32 to vector<8x128xf32>
    %208 = arith.mulf %207, %206 : vector<8x128xf32>
    %209 = math.tanh %208 : vector<8x128xf32>
    %cst_118 = arith.constant 1.000000e+00 : f32
    %210 = vector.broadcast %cst_118 : f32 to vector<8x128xf32>
    %211 = arith.addf %209, %210 : vector<8x128xf32>
    %cst_119 = arith.constant 5.000000e-01 : f32
    %212 = vector.broadcast %cst_119 : f32 to vector<8x128xf32>
    %213 = arith.mulf %212, %211 : vector<8x128xf32>
    %214 = vector.extract_strided_slice %200 {offsets = [0, 128], sizes = [8, 128], strides = [1, 1]} : vector<8x512xf32> to vector<8x128xf32>
    %c1_120 = arith.constant 1 : index
    %c0_121 = arith.constant 0 : index
    %c0_122 = arith.constant 0 : index
    %215 = vector.load %arg7[%c1_120, %c0_121, %c0_122] : memref<4x128x128xbf16, #tpu.memory_space<vmem>>, vector<1x128x128xbf16>
    %216 = vector.shape_cast %215 : vector<1x128x128xbf16> to vector<128x128xbf16>
    %cst_123 = arith.constant dense<0.000000e+00> : vector<8x128xf32>
    %217 = tpu.matmul %201, %216, %cst_123 {dimension_numbers = #tpu.dot_dimension_numbers<[1], [0], [0], [1], [0, 0, 1, 1], [], []>} : vector<8x128xbf16>, vector<128x128xbf16>, vector<8x128xf32> -> vector<8x128xf32>
    %218 = arith.addf %214, %217 : vector<8x128xf32>
    %cst_124 = arith.constant 5.000000e-01 : f32
    %219 = vector.broadcast %cst_124 : f32 to vector<8x128xf32>
    %220 = arith.mulf %219, %218 : vector<8x128xf32>
    %221 = math.tanh %220 : vector<8x128xf32>
    %cst_125 = arith.constant 1.000000e+00 : f32
    %222 = vector.broadcast %cst_125 : f32 to vector<8x128xf32>
    %223 = arith.addf %221, %222 : vector<8x128xf32>
    %cst_126 = arith.constant 5.000000e-01 : f32
    %224 = vector.broadcast %cst_126 : f32 to vector<8x128xf32>
    %225 = arith.mulf %224, %223 : vector<8x128xf32>
    %226 = vector.extract_strided_slice %200 {offsets = [0, 256], sizes = [8, 128], strides = [1, 1]} : vector<8x512xf32> to vector<8x128xf32>
    %c2_127 = arith.constant 2 : index
    %c0_128 = arith.constant 0 : index
    %c0_129 = arith.constant 0 : index
    %227 = vector.load %arg7[%c2_127, %c0_128, %c0_129] : memref<4x128x128xbf16, #tpu.memory_space<vmem>>, vector<1x128x128xbf16>
    %228 = vector.shape_cast %227 : vector<1x128x128xbf16> to vector<128x128xbf16>
    %cst_130 = arith.constant dense<0.000000e+00> : vector<8x128xf32>
    %229 = tpu.matmul %201, %228, %cst_130 {dimension_numbers = #tpu.dot_dimension_numbers<[1], [0], [0], [1], [0, 0, 1, 1], [], []>} : vector<8x128xbf16>, vector<128x128xbf16>, vector<8x128xf32> -> vector<8x128xf32>
    %230 = arith.addf %226, %229 : vector<8x128xf32>
    %231 = math.tanh %230 : vector<8x128xf32>
    %232 = vector.extract_strided_slice %200 {offsets = [0, 384], sizes = [8, 128], strides = [1, 1]} : vector<8x512xf32> to vector<8x128xf32>
    %c3_131 = arith.constant 3 : index
    %c0_132 = arith.constant 0 : index
    %c0_133 = arith.constant 0 : index
    %233 = vector.load %arg7[%c3_131, %c0_132, %c0_133] : memref<4x128x128xbf16, #tpu.memory_space<vmem>>, vector<1x128x128xbf16>
    %234 = vector.shape_cast %233 : vector<1x128x128xbf16> to vector<128x128xbf16>
    %cst_134 = arith.constant dense<0.000000e+00> : vector<8x128xf32>
    %235 = tpu.matmul %201, %234, %cst_134 {dimension_numbers = #tpu.dot_dimension_numbers<[1], [0], [0], [1], [0, 0, 1, 1], [], []>} : vector<8x128xbf16>, vector<128x128xbf16>, vector<8x128xf32> -> vector<8x128xf32>
    %236 = arith.addf %232, %235 : vector<8x128xf32>
    %cst_135 = arith.constant 5.000000e-01 : f32
    %237 = vector.broadcast %cst_135 : f32 to vector<8x128xf32>
    %238 = arith.mulf %237, %236 : vector<8x128xf32>
    %239 = math.tanh %238 : vector<8x128xf32>
    %cst_136 = arith.constant 1.000000e+00 : f32
    %240 = vector.broadcast %cst_136 : f32 to vector<8x128xf32>
    %241 = arith.addf %239, %240 : vector<8x128xf32>
    %cst_137 = arith.constant 5.000000e-01 : f32
    %242 = vector.broadcast %cst_137 : f32 to vector<8x128xf32>
    %243 = arith.mulf %242, %241 : vector<8x128xf32>
    %244 = arith.mulf %225, %197 : vector<8x128xf32>
    %245 = arith.mulf %213, %231 : vector<8x128xf32>
    %246 = arith.addf %244, %245 : vector<8x128xf32>
    %247 = math.tanh %246 : vector<8x128xf32>
    %248 = arith.mulf %243, %247 : vector<8x128xf32>
    %c16_i32_138 = arith.constant 16 : i32
    %249 = arith.muli %arg1, %c16_i32_138 : i32
    %c3_i32 = arith.constant 3 : i32
    %250 = arith.addi %249, %c3_i32 : i32
    %c8_i32_139 = arith.constant 8 : i32
    %251 = arith.cmpi slt, %250, %c8_i32_139 : i32
    %252 = arith.select %251, %246, %189 : vector<8x128xf32>
    %253 = arith.select %251, %248, %190 : vector<8x128xf32>
    %c0_140 = arith.constant 0 : index
    %c3_141 = arith.constant 3 : index
    %c0_142 = arith.constant 0 : index
    %254 = vector.load %arg5[%c0_140, %c3_141, %c0_142] : memref<8x16x128xf32, #tpu.memory_space<vmem>>, vector<8x1x128xf32>
    %255 = vector.shape_cast %254 : vector<8x1x128xf32> to vector<8x128xf32>
    %256 = vector.shape_cast %253 : vector<8x128xf32> to vector<8x1x128xf32>
    tpu.vector_store %arg5[%c0_140, %c3_141, %c0_142], %256 {strides = array<i32>} : memref<8x16x128xf32, #tpu.memory_space<vmem>>, vector<8x1x128xf32>,
    %c0_143 = arith.constant 0 : index
    %c4 = arith.constant 4 : index
    %c0_144 = arith.constant 0 : index
    %257 = vector.load %arg3[%c0_143, %c4, %c0_144] : memref<8x16x1xf32, #tpu.memory_space<vmem>>, vector<8x1x1xf32>
    %258 = vector.shape_cast %257 : vector<8x1x1xf32> to vector<8x1xf32>
    %259 = vector.broadcast %258 : vector<8x1xf32> to vector<8x128xf32>
    %260 = arith.mulf %252, %259 : vector<8x128xf32>
    %c0_145 = arith.constant 0 : index
    %c4_146 = arith.constant 4 : index
    %c0_147 = arith.constant 0 : index
    %261 = vector.load %arg2[%c0_145, %c4_146, %c0_147] : memref<8x16x512xbf16, #tpu.memory_space<vmem>>, vector<8x1x512xbf16>
    %262 = vector.shape_cast %261 : vector<8x1x512xbf16> to vector<8x512xbf16>
    %263 = arith.extf %262 : vector<8x512xbf16> to vector<8x512xf32>
    %264 = arith.truncf %253 : vector<8x128xf32> to vector<8x128xbf16>
    %265 = vector.extract_strided_slice %263 {offsets = [0, 0], sizes = [8, 128], strides = [1, 1]} : vector<8x512xf32> to vector<8x128xf32>
    %c0_148 = arith.constant 0 : index
    %c0_149 = arith.constant 0 : index
    %c0_150 = arith.constant 0 : index
    %266 = vector.load %arg7[%c0_148, %c0_149, %c0_150] : memref<4x128x128xbf16, #tpu.memory_space<vmem>>, vector<1x128x128xbf16>
    %267 = vector.shape_cast %266 : vector<1x128x128xbf16> to vector<128x128xbf16>
    %cst_151 = arith.constant dense<0.000000e+00> : vector<8x128xf32>
    %268 = tpu.matmul %264, %267, %cst_151 {dimension_numbers = #tpu.dot_dimension_numbers<[1], [0], [0], [1], [0, 0, 1, 1], [], []>} : vector<8x128xbf16>, vector<128x128xbf16>, vector<8x128xf32> -> vector<8x128xf32>
    %269 = arith.addf %265, %268 : vector<8x128xf32>
    %cst_152 = arith.constant 5.000000e-01 : f32
    %270 = vector.broadcast %cst_152 : f32 to vector<8x128xf32>
    %271 = arith.mulf %270, %269 : vector<8x128xf32>
    %272 = math.tanh %271 : vector<8x128xf32>
    %cst_153 = arith.constant 1.000000e+00 : f32
    %273 = vector.broadcast %cst_153 : f32 to vector<8x128xf32>
    %274 = arith.addf %272, %273 : vector<8x128xf32>
    %cst_154 = arith.constant 5.000000e-01 : f32
    %275 = vector.broadcast %cst_154 : f32 to vector<8x128xf32>
    %276 = arith.mulf %275, %274 : vector<8x128xf32>
    %277 = vector.extract_strided_slice %263 {offsets = [0, 128], sizes = [8, 128], strides = [1, 1]} : vector<8x512xf32> to vector<8x128xf32>
    %c1_155 = arith.constant 1 : index
    %c0_156 = arith.constant 0 : index
    %c0_157 = arith.constant 0 : index
    %278 = vector.load %arg7[%c1_155, %c0_156, %c0_157] : memref<4x128x128xbf16, #tpu.memory_space<vmem>>, vector<1x128x128xbf16>
    %279 = vector.shape_cast %278 : vector<1x128x128xbf16> to vector<128x128xbf16>
    %cst_158 = arith.constant dense<0.000000e+00> : vector<8x128xf32>
    %280 = tpu.matmul %264, %279, %cst_158 {dimension_numbers = #tpu.dot_dimension_numbers<[1], [0], [0], [1], [0, 0, 1, 1], [], []>} : vector<8x128xbf16>, vector<128x128xbf16>, vector<8x128xf32> -> vector<8x128xf32>
    %281 = arith.addf %277, %280 : vector<8x128xf32>
    %cst_159 = arith.constant 5.000000e-01 : f32
    %282 = vector.broadcast %cst_159 : f32 to vector<8x128xf32>
    %283 = arith.mulf %282, %281 : vector<8x128xf32>
    %284 = math.tanh %283 : vector<8x128xf32>
    %cst_160 = arith.constant 1.000000e+00 : f32
    %285 = vector.broadcast %cst_160 : f32 to vector<8x128xf32>
    %286 = arith.addf %284, %285 : vector<8x128xf32>
    %cst_161 = arith.constant 5.000000e-01 : f32
    %287 = vector.broadcast %cst_161 : f32 to vector<8x128xf32>
    %288 = arith.mulf %287, %286 : vector<8x128xf32>
    %289 = vector.extract_strided_slice %263 {offsets = [0, 256], sizes = [8, 128], strides = [1, 1]} : vector<8x512xf32> to vector<8x128xf32>
    %c2_162 = arith.constant 2 : index
    %c0_163 = arith.constant 0 : index
    %c0_164 = arith.constant 0 : index
    %290 = vector.load %arg7[%c2_162, %c0_163, %c0_164] : memref<4x128x128xbf16, #tpu.memory_space<vmem>>, vector<1x128x128xbf16>
    %291 = vector.shape_cast %290 : vector<1x128x128xbf16> to vector<128x128xbf16>
    %cst_165 = arith.constant dense<0.000000e+00> : vector<8x128xf32>
    %292 = tpu.matmul %264, %291, %cst_165 {dimension_numbers = #tpu.dot_dimension_numbers<[1], [0], [0], [1], [0, 0, 1, 1], [], []>} : vector<8x128xbf16>, vector<128x128xbf16>, vector<8x128xf32> -> vector<8x128xf32>
    %293 = arith.addf %289, %292 : vector<8x128xf32>
    %294 = math.tanh %293 : vector<8x128xf32>
    %295 = vector.extract_strided_slice %263 {offsets = [0, 384], sizes = [8, 128], strides = [1, 1]} : vector<8x512xf32> to vector<8x128xf32>
    %c3_166 = arith.constant 3 : index
    %c0_167 = arith.constant 0 : index
    %c0_168 = arith.constant 0 : index
    %296 = vector.load %arg7[%c3_166, %c0_167, %c0_168] : memref<4x128x128xbf16, #tpu.memory_space<vmem>>, vector<1x128x128xbf16>
    %297 = vector.shape_cast %296 : vector<1x128x128xbf16> to vector<128x128xbf16>
    %cst_169 = arith.constant dense<0.000000e+00> : vector<8x128xf32>
    %298 = tpu.matmul %264, %297, %cst_169 {dimension_numbers = #tpu.dot_dimension_numbers<[1], [0], [0], [1], [0, 0, 1, 1], [], []>} : vector<8x128xbf16>, vector<128x128xbf16>, vector<8x128xf32> -> vector<8x128xf32>
    %299 = arith.addf %295, %298 : vector<8x128xf32>
    %cst_170 = arith.constant 5.000000e-01 : f32
    %300 = vector.broadcast %cst_170 : f32 to vector<8x128xf32>
    %301 = arith.mulf %300, %299 : vector<8x128xf32>
    %302 = math.tanh %301 : vector<8x128xf32>
    %cst_171 = arith.constant 1.000000e+00 : f32
    %303 = vector.broadcast %cst_171 : f32 to vector<8x128xf32>
    %304 = arith.addf %302, %303 : vector<8x128xf32>
    %cst_172 = arith.constant 5.000000e-01 : f32
    %305 = vector.broadcast %cst_172 : f32 to vector<8x128xf32>
    %306 = arith.mulf %305, %304 : vector<8x128xf32>
    %307 = arith.mulf %288, %260 : vector<8x128xf32>
    %308 = arith.mulf %276, %294 : vector<8x128xf32>
    %309 = arith.addf %307, %308 : vector<8x128xf32>
    %310 = math.tanh %309 : vector<8x128xf32>
    %311 = arith.mulf %306, %310 : vector<8x128xf32>
    %c16_i32_173 = arith.constant 16 : i32
    %312 = arith.muli %arg1, %c16_i32_173 : i32
    %c4_i32 = arith.constant 4 : i32
    %313 = arith.addi %312, %c4_i32 : i32
    %c8_i32_174 = arith.constant 8 : i32
    %314 = arith.cmpi slt, %313, %c8_i32_174 : i32
    %315 = arith.select %314, %309, %252 : vector<8x128xf32>
    %316 = arith.select %314, %311, %253 : vector<8x128xf32>
    %c0_175 = arith.constant 0 : index
    %c4_176 = arith.constant 4 : index
    %c0_177 = arith.constant 0 : index
    %317 = vector.load %arg5[%c0_175, %c4_176, %c0_177] : memref<8x16x128xf32, #tpu.memory_space<vmem>>, vector<8x1x128xf32>
    %318 = vector.shape_cast %317 : vector<8x1x128xf32> to vector<8x128xf32>
    %319 = vector.shape_cast %316 : vector<8x128xf32> to vector<8x1x128xf32>
    tpu.vector_store %arg5[%c0_175, %c4_176, %c0_177], %319 {strides = array<i32>} : memref<8x16x128xf32, #tpu.memory_space<vmem>>, vector<8x1x128xf32>,
    %c0_178 = arith.constant 0 : index
    %c5 = arith.constant 5 : index
    %c0_179 = arith.constant 0 : index
    %320 = vector.load %arg3[%c0_178, %c5, %c0_179] : memref<8x16x1xf32, #tpu.memory_space<vmem>>, vector<8x1x1xf32>
    %321 = vector.shape_cast %320 : vector<8x1x1xf32> to vector<8x1xf32>
    %322 = vector.broadcast %321 : vector<8x1xf32> to vector<8x128xf32>
    %323 = arith.mulf %315, %322 : vector<8x128xf32>
    %c0_180 = arith.constant 0 : index
    %c5_181 = arith.constant 5 : index
    %c0_182 = arith.constant 0 : index
    %324 = vector.load %arg2[%c0_180, %c5_181, %c0_182] : memref<8x16x512xbf16, #tpu.memory_space<vmem>>, vector<8x1x512xbf16>
    %325 = vector.shape_cast %324 : vector<8x1x512xbf16> to vector<8x512xbf16>
    %326 = arith.extf %325 : vector<8x512xbf16> to vector<8x512xf32>
    %327 = arith.truncf %316 : vector<8x128xf32> to vector<8x128xbf16>
    %328 = vector.extract_strided_slice %326 {offsets = [0, 0], sizes = [8, 128], strides = [1, 1]} : vector<8x512xf32> to vector<8x128xf32>
    %c0_183 = arith.constant 0 : index
    %c0_184 = arith.constant 0 : index
    %c0_185 = arith.constant 0 : index
    %329 = vector.load %arg7[%c0_183, %c0_184, %c0_185] : memref<4x128x128xbf16, #tpu.memory_space<vmem>>, vector<1x128x128xbf16>
    %330 = vector.shape_cast %329 : vector<1x128x128xbf16> to vector<128x128xbf16>
    %cst_186 = arith.constant dense<0.000000e+00> : vector<8x128xf32>
    %331 = tpu.matmul %327, %330, %cst_186 {dimension_numbers = #tpu.dot_dimension_numbers<[1], [0], [0], [1], [0, 0, 1, 1], [], []>} : vector<8x128xbf16>, vector<128x128xbf16>, vector<8x128xf32> -> vector<8x128xf32>
    %332 = arith.addf %328, %331 : vector<8x128xf32>
    %cst_187 = arith.constant 5.000000e-01 : f32
    %333 = vector.broadcast %cst_187 : f32 to vector<8x128xf32>
    %334 = arith.mulf %333, %332 : vector<8x128xf32>
    %335 = math.tanh %334 : vector<8x128xf32>
    %cst_188 = arith.constant 1.000000e+00 : f32
    %336 = vector.broadcast %cst_188 : f32 to vector<8x128xf32>
    %337 = arith.addf %335, %336 : vector<8x128xf32>
    %cst_189 = arith.constant 5.000000e-01 : f32
    %338 = vector.broadcast %cst_189 : f32 to vector<8x128xf32>
    %339 = arith.mulf %338, %337 : vector<8x128xf32>
    %340 = vector.extract_strided_slice %326 {offsets = [0, 128], sizes = [8, 128], strides = [1, 1]} : vector<8x512xf32> to vector<8x128xf32>
    %c1_190 = arith.constant 1 : index
    %c0_191 = arith.constant 0 : index
    %c0_192 = arith.constant 0 : index
    %341 = vector.load %arg7[%c1_190, %c0_191, %c0_192] : memref<4x128x128xbf16, #tpu.memory_space<vmem>>, vector<1x128x128xbf16>
    %342 = vector.shape_cast %341 : vector<1x128x128xbf16> to vector<128x128xbf16>
    %cst_193 = arith.constant dense<0.000000e+00> : vector<8x128xf32>
    %343 = tpu.matmul %327, %342, %cst_193 {dimension_numbers = #tpu.dot_dimension_numbers<[1], [0], [0], [1], [0, 0, 1, 1], [], []>} : vector<8x128xbf16>, vector<128x128xbf16>, vector<8x128xf32> -> vector<8x128xf32>
    %344 = arith.addf %340, %343 : vector<8x128xf32>
    %cst_194 = arith.constant 5.000000e-01 : f32
    %345 = vector.broadcast %cst_194 : f32 to vector<8x128xf32>
    %346 = arith.mulf %345, %344 : vector<8x128xf32>
    %347 = math.tanh %346 : vector<8x128xf32>
    %cst_195 = arith.constant 1.000000e+00 : f32
    %348 = vector.broadcast %cst_195 : f32 to vector<8x128xf32>
    %349 = arith.addf %347, %348 : vector<8x128xf32>
    %cst_196 = arith.constant 5.000000e-01 : f32
    %350 = vector.broadcast %cst_196 : f32 to vector<8x128xf32>
    %351 = arith.mulf %350, %349 : vector<8x128xf32>
    %352 = vector.extract_strided_slice %326 {offsets = [0, 256], sizes = [8, 128], strides = [1, 1]} : vector<8x512xf32> to vector<8x128xf32>
    %c2_197 = arith.constant 2 : index
    %c0_198 = arith.constant 0 : index
    %c0_199 = arith.constant 0 : index
    %353 = vector.load %arg7[%c2_197, %c0_198, %c0_199] : memref<4x128x128xbf16, #tpu.memory_space<vmem>>, vector<1x128x128xbf16>
    %354 = vector.shape_cast %353 : vector<1x128x128xbf16> to vector<128x128xbf16>
    %cst_200 = arith.constant dense<0.000000e+00> : vector<8x128xf32>
    %355 = tpu.matmul %327, %354, %cst_200 {dimension_numbers = #tpu.dot_dimension_numbers<[1], [0], [0], [1], [0, 0, 1, 1], [], []>} : vector<8x128xbf16>, vector<128x128xbf16>, vector<8x128xf32> -> vector<8x128xf32>
    %356 = arith.addf %352, %355 : vector<8x128xf32>
    %357 = math.tanh %356 : vector<8x128xf32>
    %358 = vector.extract_strided_slice %326 {offsets = [0, 384], sizes = [8, 128], strides = [1, 1]} : vector<8x512xf32> to vector<8x128xf32>
    %c3_201 = arith.constant 3 : index
    %c0_202 = arith.constant 0 : index
    %c0_203 = arith.constant 0 : index
    %359 = vector.load %arg7[%c3_201, %c0_202, %c0_203] : memref<4x128x128xbf16, #tpu.memory_space<vmem>>, vector<1x128x128xbf16>
    %360 = vector.shape_cast %359 : vector<1x128x128xbf16> to vector<128x128xbf16>
    %cst_204 = arith.constant dense<0.000000e+00> : vector<8x128xf32>
    %361 = tpu.matmul %327, %360, %cst_204 {dimension_numbers = #tpu.dot_dimension_numbers<[1], [0], [0], [1], [0, 0, 1, 1], [], []>} : vector<8x128xbf16>, vector<128x128xbf16>, vector<8x128xf32> -> vector<8x128xf32>
    %362 = arith.addf %358, %361 : vector<8x128xf32>
    %cst_205 = arith.constant 5.000000e-01 : f32
    %363 = vector.broadcast %cst_205 : f32 to vector<8x128xf32>
    %364 = arith.mulf %363, %362 : vector<8x128xf32>
    %365 = math.tanh %364 : vector<8x128xf32>
    %cst_206 = arith.constant 1.000000e+00 : f32
    %366 = vector.broadcast %cst_206 : f32 to vector<8x128xf32>
    %367 = arith.addf %365, %366 : vector<8x128xf32>
    %cst_207 = arith.constant 5.000000e-01 : f32
    %368 = vector.broadcast %cst_207 : f32 to vector<8x128xf32>
    %369 = arith.mulf %368, %367 : vector<8x128xf32>
    %370 = arith.mulf %351, %323 : vector<8x128xf32>
    %371 = arith.mulf %339, %357 : vector<8x128xf32>
    %372 = arith.addf %370, %371 : vector<8x128xf32>
    %373 = math.tanh %372 : vector<8x128xf32>
    %374 = arith.mulf %369, %373 : vector<8x128xf32>
    %c16_i32_208 = arith.constant 16 : i32
    %375 = arith.muli %arg1, %c16_i32_208 : i32
    %c5_i32 = arith.constant 5 : i32
    %376 = arith.addi %375, %c5_i32 : i32
    %c8_i32_209 = arith.constant 8 : i32
    %377 = arith.cmpi slt, %376, %c8_i32_209 : i32
    %378 = arith.select %377, %372, %315 : vector<8x128xf32>
    %379 = arith.select %377, %374, %316 : vector<8x128xf32>
    %c0_210 = arith.constant 0 : index
    %c5_211 = arith.constant 5 : index
    %c0_212 = arith.constant 0 : index
    %380 = vector.load %arg5[%c0_210, %c5_211, %c0_212] : memref<8x16x128xf32, #tpu.memory_space<vmem>>, vector<8x1x128xf32>
    %381 = vector.shape_cast %380 : vector<8x1x128xf32> to vector<8x128xf32>
    %382 = vector.shape_cast %379 : vector<8x128xf32> to vector<8x1x128xf32>
    tpu.vector_store %arg5[%c0_210, %c5_211, %c0_212], %382 {strides = array<i32>} : memref<8x16x128xf32, #tpu.memory_space<vmem>>, vector<8x1x128xf32>,
    %c0_213 = arith.constant 0 : index
    %c6 = arith.constant 6 : index
    %c0_214 = arith.constant 0 : index
    %383 = vector.load %arg3[%c0_213, %c6, %c0_214] : memref<8x16x1xf32, #tpu.memory_space<vmem>>, vector<8x1x1xf32>
    %384 = vector.shape_cast %383 : vector<8x1x1xf32> to vector<8x1xf32>
    %385 = vector.broadcast %384 : vector<8x1xf32> to vector<8x128xf32>
    %386 = arith.mulf %378, %385 : vector<8x128xf32>
    %c0_215 = arith.constant 0 : index
    %c6_216 = arith.constant 6 : index
    %c0_217 = arith.constant 0 : index
    %387 = vector.load %arg2[%c0_215, %c6_216, %c0_217] : memref<8x16x512xbf16, #tpu.memory_space<vmem>>, vector<8x1x512xbf16>
    %388 = vector.shape_cast %387 : vector<8x1x512xbf16> to vector<8x512xbf16>
    %389 = arith.extf %388 : vector<8x512xbf16> to vector<8x512xf32>
    %390 = arith.truncf %379 : vector<8x128xf32> to vector<8x128xbf16>
    %391 = vector.extract_strided_slice %389 {offsets = [0, 0], sizes = [8, 128], strides = [1, 1]} : vector<8x512xf32> to vector<8x128xf32>
    %c0_218 = arith.constant 0 : index
    %c0_219 = arith.constant 0 : index
    %c0_220 = arith.constant 0 : index
    %392 = vector.load %arg7[%c0_218, %c0_219, %c0_220] : memref<4x128x128xbf16, #tpu.memory_space<vmem>>, vector<1x128x128xbf16>
    %393 = vector.shape_cast %392 : vector<1x128x128xbf16> to vector<128x128xbf16>
    %cst_221 = arith.constant dense<0.000000e+00> : vector<8x128xf32>
    %394 = tpu.matmul %390, %393, %cst_221 {dimension_numbers = #tpu.dot_dimension_numbers<[1], [0], [0], [1], [0, 0, 1, 1], [], []>} : vector<8x128xbf16>, vector<128x128xbf16>, vector<8x128xf32> -> vector<8x128xf32>
    %395 = arith.addf %391, %394 : vector<8x128xf32>
    %cst_222 = arith.constant 5.000000e-01 : f32
    %396 = vector.broadcast %cst_222 : f32 to vector<8x128xf32>
    %397 = arith.mulf %396, %395 : vector<8x128xf32>
    %398 = math.tanh %397 : vector<8x128xf32>
    %cst_223 = arith.constant 1.000000e+00 : f32
    %399 = vector.broadcast %cst_223 : f32 to vector<8x128xf32>
    %400 = arith.addf %398, %399 : vector<8x128xf32>
    %cst_224 = arith.constant 5.000000e-01 : f32
    %401 = vector.broadcast %cst_224 : f32 to vector<8x128xf32>
    %402 = arith.mulf %401, %400 : vector<8x128xf32>
    %403 = vector.extract_strided_slice %389 {offsets = [0, 128], sizes = [8, 128], strides = [1, 1]} : vector<8x512xf32> to vector<8x128xf32>
    %c1_225 = arith.constant 1 : index
    %c0_226 = arith.constant 0 : index
    %c0_227 = arith.constant 0 : index
    %404 = vector.load %arg7[%c1_225, %c0_226, %c0_227] : memref<4x128x128xbf16, #tpu.memory_space<vmem>>, vector<1x128x128xbf16>
    %405 = vector.shape_cast %404 : vector<1x128x128xbf16> to vector<128x128xbf16>
    %cst_228 = arith.constant dense<0.000000e+00> : vector<8x128xf32>
    %406 = tpu.matmul %390, %405, %cst_228 {dimension_numbers = #tpu.dot_dimension_numbers<[1], [0], [0], [1], [0, 0, 1, 1], [], []>} : vector<8x128xbf16>, vector<128x128xbf16>, vector<8x128xf32> -> vector<8x128xf32>
    %407 = arith.addf %403, %406 : vector<8x128xf32>
    %cst_229 = arith.constant 5.000000e-01 : f32
    %408 = vector.broadcast %cst_229 : f32 to vector<8x128xf32>
    %409 = arith.mulf %408, %407 : vector<8x128xf32>
    %410 = math.tanh %409 : vector<8x128xf32>
    %cst_230 = arith.constant 1.000000e+00 : f32
    %411 = vector.broadcast %cst_230 : f32 to vector<8x128xf32>
    %412 = arith.addf %410, %411 : vector<8x128xf32>
    %cst_231 = arith.constant 5.000000e-01 : f32
    %413 = vector.broadcast %cst_231 : f32 to vector<8x128xf32>
    %414 = arith.mulf %413, %412 : vector<8x128xf32>
    %415 = vector.extract_strided_slice %389 {offsets = [0, 256], sizes = [8, 128], strides = [1, 1]} : vector<8x512xf32> to vector<8x128xf32>
    %c2_232 = arith.constant 2 : index
    %c0_233 = arith.constant 0 : index
    %c0_234 = arith.constant 0 : index
    %416 = vector.load %arg7[%c2_232, %c0_233, %c0_234] : memref<4x128x128xbf16, #tpu.memory_space<vmem>>, vector<1x128x128xbf16>
    %417 = vector.shape_cast %416 : vector<1x128x128xbf16> to vector<128x128xbf16>
    %cst_235 = arith.constant dense<0.000000e+00> : vector<8x128xf32>
    %418 = tpu.matmul %390, %417, %cst_235 {dimension_numbers = #tpu.dot_dimension_numbers<[1], [0], [0], [1], [0, 0, 1, 1], [], []>} : vector<8x128xbf16>, vector<128x128xbf16>, vector<8x128xf32> -> vector<8x128xf32>
    %419 = arith.addf %415, %418 : vector<8x128xf32>
    %420 = math.tanh %419 : vector<8x128xf32>
    %421 = vector.extract_strided_slice %389 {offsets = [0, 384], sizes = [8, 128], strides = [1, 1]} : vector<8x512xf32> to vector<8x128xf32>
    %c3_236 = arith.constant 3 : index
    %c0_237 = arith.constant 0 : index
    %c0_238 = arith.constant 0 : index
    %422 = vector.load %arg7[%c3_236, %c0_237, %c0_238] : memref<4x128x128xbf16, #tpu.memory_space<vmem>>, vector<1x128x128xbf16>
    %423 = vector.shape_cast %422 : vector<1x128x128xbf16> to vector<128x128xbf16>
    %cst_239 = arith.constant dense<0.000000e+00> : vector<8x128xf32>
    %424 = tpu.matmul %390, %423, %cst_239 {dimension_numbers = #tpu.dot_dimension_numbers<[1], [0], [0], [1], [0, 0, 1, 1], [], []>} : vector<8x128xbf16>, vector<128x128xbf16>, vector<8x128xf32> -> vector<8x128xf32>
    %425 = arith.addf %421, %424 : vector<8x128xf32>
    %cst_240 = arith.constant 5.000000e-01 : f32
    %426 = vector.broadcast %cst_240 : f32 to vector<8x128xf32>
    %427 = arith.mulf %426, %425 : vector<8x128xf32>
    %428 = math.tanh %427 : vector<8x128xf32>
    %cst_241 = arith.constant 1.000000e+00 : f32
    %429 = vector.broadcast %cst_241 : f32 to vector<8x128xf32>
    %430 = arith.addf %428, %429 : vector<8x128xf32>
    %cst_242 = arith.constant 5.000000e-01 : f32
    %431 = vector.broadcast %cst_242 : f32 to vector<8x128xf32>
    %432 = arith.mulf %431, %430 : vector<8x128xf32>
    %433 = arith.mulf %414, %386 : vector<8x128xf32>
    %434 = arith.mulf %402, %420 : vector<8x128xf32>
    %435 = arith.addf %433, %434 : vector<8x128xf32>
    %436 = math.tanh %435 : vector<8x128xf32>
    %437 = arith.mulf %432, %436 : vector<8x128xf32>
    %c16_i32_243 = arith.constant 16 : i32
    %438 = arith.muli %arg1, %c16_i32_243 : i32
    %c6_i32 = arith.constant 6 : i32
    %439 = arith.addi %438, %c6_i32 : i32
    %c8_i32_244 = arith.constant 8 : i32
    %440 = arith.cmpi slt, %439, %c8_i32_244 : i32
    %441 = arith.select %440, %435, %378 : vector<8x128xf32>
    %442 = arith.select %440, %437, %379 : vector<8x128xf32>
    %c0_245 = arith.constant 0 : index
    %c6_246 = arith.constant 6 : index
    %c0_247 = arith.constant 0 : index
    %443 = vector.load %arg5[%c0_245, %c6_246, %c0_247] : memref<8x16x128xf32, #tpu.memory_space<vmem>>, vector<8x1x128xf32>
    %444 = vector.shape_cast %443 : vector<8x1x128xf32> to vector<8x128xf32>
    %445 = vector.shape_cast %442 : vector<8x128xf32> to vector<8x1x128xf32>
    tpu.vector_store %arg5[%c0_245, %c6_246, %c0_247], %445 {strides = array<i32>} : memref<8x16x128xf32, #tpu.memory_space<vmem>>, vector<8x1x128xf32>,
    %c0_248 = arith.constant 0 : index
    %c7 = arith.constant 7 : index
    %c0_249 = arith.constant 0 : index
    %446 = vector.load %arg3[%c0_248, %c7, %c0_249] : memref<8x16x1xf32, #tpu.memory_space<vmem>>, vector<8x1x1xf32>
    %447 = vector.shape_cast %446 : vector<8x1x1xf32> to vector<8x1xf32>
    %448 = vector.broadcast %447 : vector<8x1xf32> to vector<8x128xf32>
    %449 = arith.mulf %441, %448 : vector<8x128xf32>
    %c0_250 = arith.constant 0 : index
    %c7_251 = arith.constant 7 : index
    %c0_252 = arith.constant 0 : index
    %450 = vector.load %arg2[%c0_250, %c7_251, %c0_252] : memref<8x16x512xbf16, #tpu.memory_space<vmem>>, vector<8x1x512xbf16>
    %451 = vector.shape_cast %450 : vector<8x1x512xbf16> to vector<8x512xbf16>
    %452 = arith.extf %451 : vector<8x512xbf16> to vector<8x512xf32>
    %453 = arith.truncf %442 : vector<8x128xf32> to vector<8x128xbf16>
    %454 = vector.extract_strided_slice %452 {offsets = [0, 0], sizes = [8, 128], strides = [1, 1]} : vector<8x512xf32> to vector<8x128xf32>
    %c0_253 = arith.constant 0 : index
    %c0_254 = arith.constant 0 : index
    %c0_255 = arith.constant 0 : index
    %455 = vector.load %arg7[%c0_253, %c0_254, %c0_255] : memref<4x128x128xbf16, #tpu.memory_space<vmem>>, vector<1x128x128xbf16>
    %456 = vector.shape_cast %455 : vector<1x128x128xbf16> to vector<128x128xbf16>
    %cst_256 = arith.constant dense<0.000000e+00> : vector<8x128xf32>
    %457 = tpu.matmul %453, %456, %cst_256 {dimension_numbers = #tpu.dot_dimension_numbers<[1], [0], [0], [1], [0, 0, 1, 1], [], []>} : vector<8x128xbf16>, vector<128x128xbf16>, vector<8x128xf32> -> vector<8x128xf32>
    %458 = arith.addf %454, %457 : vector<8x128xf32>
    %cst_257 = arith.constant 5.000000e-01 : f32
    %459 = vector.broadcast %cst_257 : f32 to vector<8x128xf32>
    %460 = arith.mulf %459, %458 : vector<8x128xf32>
    %461 = math.tanh %460 : vector<8x128xf32>
    %cst_258 = arith.constant 1.000000e+00 : f32
    %462 = vector.broadcast %cst_258 : f32 to vector<8x128xf32>
    %463 = arith.addf %461, %462 : vector<8x128xf32>
    %cst_259 = arith.constant 5.000000e-01 : f32
    %464 = vector.broadcast %cst_259 : f32 to vector<8x128xf32>
    %465 = arith.mulf %464, %463 : vector<8x128xf32>
    %466 = vector.extract_strided_slice %452 {offsets = [0, 128], sizes = [8, 128], strides = [1, 1]} : vector<8x512xf32> to vector<8x128xf32>
    %c1_260 = arith.constant 1 : index
    %c0_261 = arith.constant 0 : index
    %c0_262 = arith.constant 0 : index
    %467 = vector.load %arg7[%c1_260, %c0_261, %c0_262] : memref<4x128x128xbf16, #tpu.memory_space<vmem>>, vector<1x128x128xbf16>
    %468 = vector.shape_cast %467 : vector<1x128x128xbf16> to vector<128x128xbf16>
    %cst_263 = arith.constant dense<0.000000e+00> : vector<8x128xf32>
    %469 = tpu.matmul %453, %468, %cst_263 {dimension_numbers = #tpu.dot_dimension_numbers<[1], [0], [0], [1], [0, 0, 1, 1], [], []>} : vector<8x128xbf16>, vector<128x128xbf16>, vector<8x128xf32> -> vector<8x128xf32>
    %470 = arith.addf %466, %469 : vector<8x128xf32>
    %cst_264 = arith.constant 5.000000e-01 : f32
    %471 = vector.broadcast %cst_264 : f32 to vector<8x128xf32>
    %472 = arith.mulf %471, %470 : vector<8x128xf32>
    %473 = math.tanh %472 : vector<8x128xf32>
    %cst_265 = arith.constant 1.000000e+00 : f32
    %474 = vector.broadcast %cst_265 : f32 to vector<8x128xf32>
    %475 = arith.addf %473, %474 : vector<8x128xf32>
    %cst_266 = arith.constant 5.000000e-01 : f32
    %476 = vector.broadcast %cst_266 : f32 to vector<8x128xf32>
    %477 = arith.mulf %476, %475 : vector<8x128xf32>
    %478 = vector.extract_strided_slice %452 {offsets = [0, 256], sizes = [8, 128], strides = [1, 1]} : vector<8x512xf32> to vector<8x128xf32>
    %c2_267 = arith.constant 2 : index
    %c0_268 = arith.constant 0 : index
    %c0_269 = arith.constant 0 : index
    %479 = vector.load %arg7[%c2_267, %c0_268, %c0_269] : memref<4x128x128xbf16, #tpu.memory_space<vmem>>, vector<1x128x128xbf16>
    %480 = vector.shape_cast %479 : vector<1x128x128xbf16> to vector<128x128xbf16>
    %cst_270 = arith.constant dense<0.000000e+00> : vector<8x128xf32>
    %481 = tpu.matmul %453, %480, %cst_270 {dimension_numbers = #tpu.dot_dimension_numbers<[1], [0], [0], [1], [0, 0, 1, 1], [], []>} : vector<8x128xbf16>, vector<128x128xbf16>, vector<8x128xf32> -> vector<8x128xf32>
    %482 = arith.addf %478, %481 : vector<8x128xf32>
    %483 = math.tanh %482 : vector<8x128xf32>
    %484 = vector.extract_strided_slice %452 {offsets = [0, 384], sizes = [8, 128], strides = [1, 1]} : vector<8x512xf32> to vector<8x128xf32>
    %c3_271 = arith.constant 3 : index
    %c0_272 = arith.constant 0 : index
    %c0_273 = arith.constant 0 : index
    %485 = vector.load %arg7[%c3_271, %c0_272, %c0_273] : memref<4x128x128xbf16, #tpu.memory_space<vmem>>, vector<1x128x128xbf16>
    %486 = vector.shape_cast %485 : vector<1x128x128xbf16> to vector<128x128xbf16>
    %cst_274 = arith.constant dense<0.000000e+00> : vector<8x128xf32>
    %487 = tpu.matmul %453, %486, %cst_274 {dimension_numbers = #tpu.dot_dimension_numbers<[1], [0], [0], [1], [0, 0, 1, 1], [], []>} : vector<8x128xbf16>, vector<128x128xbf16>, vector<8x128xf32> -> vector<8x128xf32>
    %488 = arith.addf %484, %487 : vector<8x128xf32>
    %cst_275 = arith.constant 5.000000e-01 : f32
    %489 = vector.broadcast %cst_275 : f32 to vector<8x128xf32>
    %490 = arith.mulf %489, %488 : vector<8x128xf32>
    %491 = math.tanh %490 : vector<8x128xf32>
    %cst_276 = arith.constant 1.000000e+00 : f32
    %492 = vector.broadcast %cst_276 : f32 to vector<8x128xf32>
    %493 = arith.addf %491, %492 : vector<8x128xf32>
    %cst_277 = arith.constant 5.000000e-01 : f32
    %494 = vector.broadcast %cst_277 : f32 to vector<8x128xf32>
    %495 = arith.mulf %494, %493 : vector<8x128xf32>
    %496 = arith.mulf %477, %449 : vector<8x128xf32>
    %497 = arith.mulf %465, %483 : vector<8x128xf32>
    %498 = arith.addf %496, %497 : vector<8x128xf32>
    %499 = math.tanh %498 : vector<8x128xf32>
    %500 = arith.mulf %495, %499 : vector<8x128xf32>
    %c16_i32_278 = arith.constant 16 : i32
    %501 = arith.muli %arg1, %c16_i32_278 : i32
    %c7_i32 = arith.constant 7 : i32
    %502 = arith.addi %501, %c7_i32 : i32
    %c8_i32_279 = arith.constant 8 : i32
    %503 = arith.cmpi slt, %502, %c8_i32_279 : i32
    %504 = arith.select %503, %498, %441 : vector<8x128xf32>
    %505 = arith.select %503, %500, %442 : vector<8x128xf32>
    %c0_280 = arith.constant 0 : index
    %c7_281 = arith.constant 7 : index
    %c0_282 = arith.constant 0 : index
    %506 = vector.load %arg5[%c0_280, %c7_281, %c0_282] : memref<8x16x128xf32, #tpu.memory_space<vmem>>, vector<8x1x128xf32>
    %507 = vector.shape_cast %506 : vector<8x1x128xf32> to vector<8x128xf32>
    %508 = vector.shape_cast %505 : vector<8x128xf32> to vector<8x1x128xf32>
    tpu.vector_store %arg5[%c0_280, %c7_281, %c0_282], %508 {strides = array<i32>} : memref<8x16x128xf32, #tpu.memory_space<vmem>>, vector<8x1x128xf32>,
    %c0_283 = arith.constant 0 : index
    %c8 = arith.constant 8 : index
    %c0_284 = arith.constant 0 : index
    %509 = vector.load %arg3[%c0_283, %c8, %c0_284] : memref<8x16x1xf32, #tpu.memory_space<vmem>>, vector<8x1x1xf32>
    %510 = vector.shape_cast %509 : vector<8x1x1xf32> to vector<8x1xf32>
    %511 = vector.broadcast %510 : vector<8x1xf32> to vector<8x128xf32>
    %512 = arith.mulf %504, %511 : vector<8x128xf32>
    %c0_285 = arith.constant 0 : index
    %c8_286 = arith.constant 8 : index
    %c0_287 = arith.constant 0 : index
    %513 = vector.load %arg2[%c0_285, %c8_286, %c0_287] : memref<8x16x512xbf16, #tpu.memory_space<vmem>>, vector<8x1x512xbf16>
    %514 = vector.shape_cast %513 : vector<8x1x512xbf16> to vector<8x512xbf16>
    %515 = arith.extf %514 : vector<8x512xbf16> to vector<8x512xf32>
    %516 = arith.truncf %505 : vector<8x128xf32> to vector<8x128xbf16>
    %517 = vector.extract_strided_slice %515 {offsets = [0, 0], sizes = [8, 128], strides = [1, 1]} : vector<8x512xf32> to vector<8x128xf32>
    %c0_288 = arith.constant 0 : index
    %c0_289 = arith.constant 0 : index
    %c0_290 = arith.constant 0 : index
    %518 = vector.load %arg7[%c0_288, %c0_289, %c0_290] : memref<4x128x128xbf16, #tpu.memory_space<vmem>>, vector<1x128x128xbf16>
    %519 = vector.shape_cast %518 : vector<1x128x128xbf16> to vector<128x128xbf16>
    %cst_291 = arith.constant dense<0.000000e+00> : vector<8x128xf32>
    %520 = tpu.matmul %516, %519, %cst_291 {dimension_numbers = #tpu.dot_dimension_numbers<[1], [0], [0], [1], [0, 0, 1, 1], [], []>} : vector<8x128xbf16>, vector<128x128xbf16>, vector<8x128xf32> -> vector<8x128xf32>
    %521 = arith.addf %517, %520 : vector<8x128xf32>
    %cst_292 = arith.constant 5.000000e-01 : f32
    %522 = vector.broadcast %cst_292 : f32 to vector<8x128xf32>
    %523 = arith.mulf %522, %521 : vector<8x128xf32>
    %524 = math.tanh %523 : vector<8x128xf32>
    %cst_293 = arith.constant 1.000000e+00 : f32
    %525 = vector.broadcast %cst_293 : f32 to vector<8x128xf32>
    %526 = arith.addf %524, %525 : vector<8x128xf32>
    %cst_294 = arith.constant 5.000000e-01 : f32
    %527 = vector.broadcast %cst_294 : f32 to vector<8x128xf32>
    %528 = arith.mulf %527, %526 : vector<8x128xf32>
    %529 = vector.extract_strided_slice %515 {offsets = [0, 128], sizes = [8, 128], strides = [1, 1]} : vector<8x512xf32> to vector<8x128xf32>
    %c1_295 = arith.constant 1 : index
    %c0_296 = arith.constant 0 : index
    %c0_297 = arith.constant 0 : index
    %530 = vector.load %arg7[%c1_295, %c0_296, %c0_297] : memref<4x128x128xbf16, #tpu.memory_space<vmem>>, vector<1x128x128xbf16>
    %531 = vector.shape_cast %530 : vector<1x128x128xbf16> to vector<128x128xbf16>
    %cst_298 = arith.constant dense<0.000000e+00> : vector<8x128xf32>
    %532 = tpu.matmul %516, %531, %cst_298 {dimension_numbers = #tpu.dot_dimension_numbers<[1], [0], [0], [1], [0, 0, 1, 1], [], []>} : vector<8x128xbf16>, vector<128x128xbf16>, vector<8x128xf32> -> vector<8x128xf32>
    %533 = arith.addf %529, %532 : vector<8x128xf32>
    %cst_299 = arith.constant 5.000000e-01 : f32
    %534 = vector.broadcast %cst_299 : f32 to vector<8x128xf32>
    %535 = arith.mulf %534, %533 : vector<8x128xf32>
    %536 = math.tanh %535 : vector<8x128xf32>
    %cst_300 = arith.constant 1.000000e+00 : f32
    %537 = vector.broadcast %cst_300 : f32 to vector<8x128xf32>
    %538 = arith.addf %536, %537 : vector<8x128xf32>
    %cst_301 = arith.constant 5.000000e-01 : f32
    %539 = vector.broadcast %cst_301 : f32 to vector<8x128xf32>
    %540 = arith.mulf %539, %538 : vector<8x128xf32>
    %541 = vector.extract_strided_slice %515 {offsets = [0, 256], sizes = [8, 128], strides = [1, 1]} : vector<8x512xf32> to vector<8x128xf32>
    %c2_302 = arith.constant 2 : index
    %c0_303 = arith.constant 0 : index
    %c0_304 = arith.constant 0 : index
    %542 = vector.load %arg7[%c2_302, %c0_303, %c0_304] : memref<4x128x128xbf16, #tpu.memory_space<vmem>>, vector<1x128x128xbf16>
    %543 = vector.shape_cast %542 : vector<1x128x128xbf16> to vector<128x128xbf16>
    %cst_305 = arith.constant dense<0.000000e+00> : vector<8x128xf32>
    %544 = tpu.matmul %516, %543, %cst_305 {dimension_numbers = #tpu.dot_dimension_numbers<[1], [0], [0], [1], [0, 0, 1, 1], [], []>} : vector<8x128xbf16>, vector<128x128xbf16>, vector<8x128xf32> -> vector<8x128xf32>
    %545 = arith.addf %541, %544 : vector<8x128xf32>
    %546 = math.tanh %545 : vector<8x128xf32>
    %547 = vector.extract_strided_slice %515 {offsets = [0, 384], sizes = [8, 128], strides = [1, 1]} : vector<8x512xf32> to vector<8x128xf32>
    %c3_306 = arith.constant 3 : index
    %c0_307 = arith.constant 0 : index
    %c0_308 = arith.constant 0 : index
    %548 = vector.load %arg7[%c3_306, %c0_307, %c0_308] : memref<4x128x128xbf16, #tpu.memory_space<vmem>>, vector<1x128x128xbf16>
    %549 = vector.shape_cast %548 : vector<1x128x128xbf16> to vector<128x128xbf16>
    %cst_309 = arith.constant dense<0.000000e+00> : vector<8x128xf32>
    %550 = tpu.matmul %516, %549, %cst_309 {dimension_numbers = #tpu.dot_dimension_numbers<[1], [0], [0], [1], [0, 0, 1, 1], [], []>} : vector<8x128xbf16>, vector<128x128xbf16>, vector<8x128xf32> -> vector<8x128xf32>
    %551 = arith.addf %547, %550 : vector<8x128xf32>
    %cst_310 = arith.constant 5.000000e-01 : f32
    %552 = vector.broadcast %cst_310 : f32 to vector<8x128xf32>
    %553 = arith.mulf %552, %551 : vector<8x128xf32>
    %554 = math.tanh %553 : vector<8x128xf32>
    %cst_311 = arith.constant 1.000000e+00 : f32
    %555 = vector.broadcast %cst_311 : f32 to vector<8x128xf32>
    %556 = arith.addf %554, %555 : vector<8x128xf32>
    %cst_312 = arith.constant 5.000000e-01 : f32
    %557 = vector.broadcast %cst_312 : f32 to vector<8x128xf32>
    %558 = arith.mulf %557, %556 : vector<8x128xf32>
    %559 = arith.mulf %540, %512 : vector<8x128xf32>
    %560 = arith.mulf %528, %546 : vector<8x128xf32>
    %561 = arith.addf %559, %560 : vector<8x128xf32>
    %562 = math.tanh %561 : vector<8x128xf32>
    %563 = arith.mulf %558, %562 : vector<8x128xf32>
    %c16_i32_313 = arith.constant 16 : i32
    %564 = arith.muli %arg1, %c16_i32_313 : i32
    %c8_i32_314 = arith.constant 8 : i32
    %565 = arith.addi %564, %c8_i32_314 : i32
    %c8_i32_315 = arith.constant 8 : i32
    %566 = arith.cmpi slt, %565, %c8_i32_315 : i32
    %567 = arith.select %566, %561, %504 : vector<8x128xf32>
    %568 = arith.select %566, %563, %505 : vector<8x128xf32>
    %c0_316 = arith.constant 0 : index
    %c8_317 = arith.constant 8 : index
    %c0_318 = arith.constant 0 : index
    %569 = vector.load %arg5[%c0_316, %c8_317, %c0_318] : memref<8x16x128xf32, #tpu.memory_space<vmem>>, vector<8x1x128xf32>
    %570 = vector.shape_cast %569 : vector<8x1x128xf32> to vector<8x128xf32>
    %571 = vector.shape_cast %568 : vector<8x128xf32> to vector<8x1x128xf32>
    tpu.vector_store %arg5[%c0_316, %c8_317, %c0_318], %571 {strides = array<i32>} : memref<8x16x128xf32, #tpu.memory_space<vmem>>, vector<8x1x128xf32>,
    %c0_319 = arith.constant 0 : index
    %c9 = arith.constant 9 : index
    %c0_320 = arith.constant 0 : index
    %572 = vector.load %arg3[%c0_319, %c9, %c0_320] : memref<8x16x1xf32, #tpu.memory_space<vmem>>, vector<8x1x1xf32>
    %573 = vector.shape_cast %572 : vector<8x1x1xf32> to vector<8x1xf32>
    %574 = vector.broadcast %573 : vector<8x1xf32> to vector<8x128xf32>
    %575 = arith.mulf %567, %574 : vector<8x128xf32>
    %c0_321 = arith.constant 0 : index
    %c9_322 = arith.constant 9 : index
    %c0_323 = arith.constant 0 : index
    %576 = vector.load %arg2[%c0_321, %c9_322, %c0_323] : memref<8x16x512xbf16, #tpu.memory_space<vmem>>, vector<8x1x512xbf16>
    %577 = vector.shape_cast %576 : vector<8x1x512xbf16> to vector<8x512xbf16>
    %578 = arith.extf %577 : vector<8x512xbf16> to vector<8x512xf32>
    %579 = arith.truncf %568 : vector<8x128xf32> to vector<8x128xbf16>
    %580 = vector.extract_strided_slice %578 {offsets = [0, 0], sizes = [8, 128], strides = [1, 1]} : vector<8x512xf32> to vector<8x128xf32>
    %c0_324 = arith.constant 0 : index
    %c0_325 = arith.constant 0 : index
    %c0_326 = arith.constant 0 : index
    %581 = vector.load %arg7[%c0_324, %c0_325, %c0_326] : memref<4x128x128xbf16, #tpu.memory_space<vmem>>, vector<1x128x128xbf16>
    %582 = vector.shape_cast %581 : vector<1x128x128xbf16> to vector<128x128xbf16>
    %cst_327 = arith.constant dense<0.000000e+00> : vector<8x128xf32>
    %583 = tpu.matmul %579, %582, %cst_327 {dimension_numbers = #tpu.dot_dimension_numbers<[1], [0], [0], [1], [0, 0, 1, 1], [], []>} : vector<8x128xbf16>, vector<128x128xbf16>, vector<8x128xf32> -> vector<8x128xf32>
    %584 = arith.addf %580, %583 : vector<8x128xf32>
    %cst_328 = arith.constant 5.000000e-01 : f32
    %585 = vector.broadcast %cst_328 : f32 to vector<8x128xf32>
    %586 = arith.mulf %585, %584 : vector<8x128xf32>
    %587 = math.tanh %586 : vector<8x128xf32>
    %cst_329 = arith.constant 1.000000e+00 : f32
    %588 = vector.broadcast %cst_329 : f32 to vector<8x128xf32>
    %589 = arith.addf %587, %588 : vector<8x128xf32>
    %cst_330 = arith.constant 5.000000e-01 : f32
    %590 = vector.broadcast %cst_330 : f32 to vector<8x128xf32>
    %591 = arith.mulf %590, %589 : vector<8x128xf32>
    %592 = vector.extract_strided_slice %578 {offsets = [0, 128], sizes = [8, 128], strides = [1, 1]} : vector<8x512xf32> to vector<8x128xf32>
    %c1_331 = arith.constant 1 : index
    %c0_332 = arith.constant 0 : index
    %c0_333 = arith.constant 0 : index
    %593 = vector.load %arg7[%c1_331, %c0_332, %c0_333] : memref<4x128x128xbf16, #tpu.memory_space<vmem>>, vector<1x128x128xbf16>
    %594 = vector.shape_cast %593 : vector<1x128x128xbf16> to vector<128x128xbf16>
    %cst_334 = arith.constant dense<0.000000e+00> : vector<8x128xf32>
    %595 = tpu.matmul %579, %594, %cst_334 {dimension_numbers = #tpu.dot_dimension_numbers<[1], [0], [0], [1], [0, 0, 1, 1], [], []>} : vector<8x128xbf16>, vector<128x128xbf16>, vector<8x128xf32> -> vector<8x128xf32>
    %596 = arith.addf %592, %595 : vector<8x128xf32>
    %cst_335 = arith.constant 5.000000e-01 : f32
    %597 = vector.broadcast %cst_335 : f32 to vector<8x128xf32>
    %598 = arith.mulf %597, %596 : vector<8x128xf32>
    %599 = math.tanh %598 : vector<8x128xf32>
    %cst_336 = arith.constant 1.000000e+00 : f32
    %600 = vector.broadcast %cst_336 : f32 to vector<8x128xf32>
    %601 = arith.addf %599, %600 : vector<8x128xf32>
    %cst_337 = arith.constant 5.000000e-01 : f32
    %602 = vector.broadcast %cst_337 : f32 to vector<8x128xf32>
    %603 = arith.mulf %602, %601 : vector<8x128xf32>
    %604 = vector.extract_strided_slice %578 {offsets = [0, 256], sizes = [8, 128], strides = [1, 1]} : vector<8x512xf32> to vector<8x128xf32>
    %c2_338 = arith.constant 2 : index
    %c0_339 = arith.constant 0 : index
    %c0_340 = arith.constant 0 : index
    %605 = vector.load %arg7[%c2_338, %c0_339, %c0_340] : memref<4x128x128xbf16, #tpu.memory_space<vmem>>, vector<1x128x128xbf16>
    %606 = vector.shape_cast %605 : vector<1x128x128xbf16> to vector<128x128xbf16>
    %cst_341 = arith.constant dense<0.000000e+00> : vector<8x128xf32>
    %607 = tpu.matmul %579, %606, %cst_341 {dimension_numbers = #tpu.dot_dimension_numbers<[1], [0], [0], [1], [0, 0, 1, 1], [], []>} : vector<8x128xbf16>, vector<128x128xbf16>, vector<8x128xf32> -> vector<8x128xf32>
    %608 = arith.addf %604, %607 : vector<8x128xf32>
    %609 = math.tanh %608 : vector<8x128xf32>
    %610 = vector.extract_strided_slice %578 {offsets = [0, 384], sizes = [8, 128], strides = [1, 1]} : vector<8x512xf32> to vector<8x128xf32>
    %c3_342 = arith.constant 3 : index
    %c0_343 = arith.constant 0 : index
    %c0_344 = arith.constant 0 : index
    %611 = vector.load %arg7[%c3_342, %c0_343, %c0_344] : memref<4x128x128xbf16, #tpu.memory_space<vmem>>, vector<1x128x128xbf16>
    %612 = vector.shape_cast %611 : vector<1x128x128xbf16> to vector<128x128xbf16>
    %cst_345 = arith.constant dense<0.000000e+00> : vector<8x128xf32>
    %613 = tpu.matmul %579, %612, %cst_345 {dimension_numbers = #tpu.dot_dimension_numbers<[1], [0], [0], [1], [0, 0, 1, 1], [], []>} : vector<8x128xbf16>, vector<128x128xbf16>, vector<8x128xf32> -> vector<8x128xf32>
    %614 = arith.addf %610, %613 : vector<8x128xf32>
    %cst_346 = arith.constant 5.000000e-01 : f32
    %615 = vector.broadcast %cst_346 : f32 to vector<8x128xf32>
    %616 = arith.mulf %615, %614 : vector<8x128xf32>
    %617 = math.tanh %616 : vector<8x128xf32>
    %cst_347 = arith.constant 1.000000e+00 : f32
    %618 = vector.broadcast %cst_347 : f32 to vector<8x128xf32>
    %619 = arith.addf %617, %618 : vector<8x128xf32>
    %cst_348 = arith.constant 5.000000e-01 : f32
    %620 = vector.broadcast %cst_348 : f32 to vector<8x128xf32>
    %621 = arith.mulf %620, %619 : vector<8x128xf32>
    %622 = arith.mulf %603, %575 : vector<8x128xf32>
    %623 = arith.mulf %591, %609 : vector<8x128xf32>
    %624 = arith.addf %622, %623 : vector<8x128xf32>
    %625 = math.tanh %624 : vector<8x128xf32>
    %626 = arith.mulf %621, %625 : vector<8x128xf32>
    %c16_i32_349 = arith.constant 16 : i32
    %627 = arith.muli %arg1, %c16_i32_349 : i32
    %c9_i32 = arith.constant 9 : i32
    %628 = arith.addi %627, %c9_i32 : i32
    %c8_i32_350 = arith.constant 8 : i32
    %629 = arith.cmpi slt, %628, %c8_i32_350 : i32
    %630 = arith.select %629, %624, %567 : vector<8x128xf32>
    %631 = arith.select %629, %626, %568 : vector<8x128xf32>
    %c0_351 = arith.constant 0 : index
    %c9_352 = arith.constant 9 : index
    %c0_353 = arith.constant 0 : index
    %632 = vector.load %arg5[%c0_351, %c9_352, %c0_353] : memref<8x16x128xf32, #tpu.memory_space<vmem>>, vector<8x1x128xf32>
    %633 = vector.shape_cast %632 : vector<8x1x128xf32> to vector<8x128xf32>
    %634 = vector.shape_cast %631 : vector<8x128xf32> to vector<8x1x128xf32>
    tpu.vector_store %arg5[%c0_351, %c9_352, %c0_353], %634 {strides = array<i32>} : memref<8x16x128xf32, #tpu.memory_space<vmem>>, vector<8x1x128xf32>,
    %c0_354 = arith.constant 0 : index
    %c10 = arith.constant 10 : index
    %c0_355 = arith.constant 0 : index
    %635 = vector.load %arg3[%c0_354, %c10, %c0_355] : memref<8x16x1xf32, #tpu.memory_space<vmem>>, vector<8x1x1xf32>
    %636 = vector.shape_cast %635 : vector<8x1x1xf32> to vector<8x1xf32>
    %637 = vector.broadcast %636 : vector<8x1xf32> to vector<8x128xf32>
    %638 = arith.mulf %630, %637 : vector<8x128xf32>
    %c0_356 = arith.constant 0 : index
    %c10_357 = arith.constant 10 : index
    %c0_358 = arith.constant 0 : index
    %639 = vector.load %arg2[%c0_356, %c10_357, %c0_358] : memref<8x16x512xbf16, #tpu.memory_space<vmem>>, vector<8x1x512xbf16>
    %640 = vector.shape_cast %639 : vector<8x1x512xbf16> to vector<8x512xbf16>
    %641 = arith.extf %640 : vector<8x512xbf16> to vector<8x512xf32>
    %642 = arith.truncf %631 : vector<8x128xf32> to vector<8x128xbf16>
    %643 = vector.extract_strided_slice %641 {offsets = [0, 0], sizes = [8, 128], strides = [1, 1]} : vector<8x512xf32> to vector<8x128xf32>
    %c0_359 = arith.constant 0 : index
    %c0_360 = arith.constant 0 : index
    %c0_361 = arith.constant 0 : index
    %644 = vector.load %arg7[%c0_359, %c0_360, %c0_361] : memref<4x128x128xbf16, #tpu.memory_space<vmem>>, vector<1x128x128xbf16>
    %645 = vector.shape_cast %644 : vector<1x128x128xbf16> to vector<128x128xbf16>
    %cst_362 = arith.constant dense<0.000000e+00> : vector<8x128xf32>
    %646 = tpu.matmul %642, %645, %cst_362 {dimension_numbers = #tpu.dot_dimension_numbers<[1], [0], [0], [1], [0, 0, 1, 1], [], []>} : vector<8x128xbf16>, vector<128x128xbf16>, vector<8x128xf32> -> vector<8x128xf32>
    %647 = arith.addf %643, %646 : vector<8x128xf32>
    %cst_363 = arith.constant 5.000000e-01 : f32
    %648 = vector.broadcast %cst_363 : f32 to vector<8x128xf32>
    %649 = arith.mulf %648, %647 : vector<8x128xf32>
    %650 = math.tanh %649 : vector<8x128xf32>
    %cst_364 = arith.constant 1.000000e+00 : f32
    %651 = vector.broadcast %cst_364 : f32 to vector<8x128xf32>
    %652 = arith.addf %650, %651 : vector<8x128xf32>
    %cst_365 = arith.constant 5.000000e-01 : f32
    %653 = vector.broadcast %cst_365 : f32 to vector<8x128xf32>
    %654 = arith.mulf %653, %652 : vector<8x128xf32>
    %655 = vector.extract_strided_slice %641 {offsets = [0, 128], sizes = [8, 128], strides = [1, 1]} : vector<8x512xf32> to vector<8x128xf32>
    %c1_366 = arith.constant 1 : index
    %c0_367 = arith.constant 0 : index
    %c0_368 = arith.constant 0 : index
    %656 = vector.load %arg7[%c1_366, %c0_367, %c0_368] : memref<4x128x128xbf16, #tpu.memory_space<vmem>>, vector<1x128x128xbf16>
    %657 = vector.shape_cast %656 : vector<1x128x128xbf16> to vector<128x128xbf16>
    %cst_369 = arith.constant dense<0.000000e+00> : vector<8x128xf32>
    %658 = tpu.matmul %642, %657, %cst_369 {dimension_numbers = #tpu.dot_dimension_numbers<[1], [0], [0], [1], [0, 0, 1, 1], [], []>} : vector<8x128xbf16>, vector<128x128xbf16>, vector<8x128xf32> -> vector<8x128xf32>
    %659 = arith.addf %655, %658 : vector<8x128xf32>
    %cst_370 = arith.constant 5.000000e-01 : f32
    %660 = vector.broadcast %cst_370 : f32 to vector<8x128xf32>
    %661 = arith.mulf %660, %659 : vector<8x128xf32>
    %662 = math.tanh %661 : vector<8x128xf32>
    %cst_371 = arith.constant 1.000000e+00 : f32
    %663 = vector.broadcast %cst_371 : f32 to vector<8x128xf32>
    %664 = arith.addf %662, %663 : vector<8x128xf32>
    %cst_372 = arith.constant 5.000000e-01 : f32
    %665 = vector.broadcast %cst_372 : f32 to vector<8x128xf32>
    %666 = arith.mulf %665, %664 : vector<8x128xf32>
    %667 = vector.extract_strided_slice %641 {offsets = [0, 256], sizes = [8, 128], strides = [1, 1]} : vector<8x512xf32> to vector<8x128xf32>
    %c2_373 = arith.constant 2 : index
    %c0_374 = arith.constant 0 : index
    %c0_375 = arith.constant 0 : index
    %668 = vector.load %arg7[%c2_373, %c0_374, %c0_375] : memref<4x128x128xbf16, #tpu.memory_space<vmem>>, vector<1x128x128xbf16>
    %669 = vector.shape_cast %668 : vector<1x128x128xbf16> to vector<128x128xbf16>
    %cst_376 = arith.constant dense<0.000000e+00> : vector<8x128xf32>
    %670 = tpu.matmul %642, %669, %cst_376 {dimension_numbers = #tpu.dot_dimension_numbers<[1], [0], [0], [1], [0, 0, 1, 1], [], []>} : vector<8x128xbf16>, vector<128x128xbf16>, vector<8x128xf32> -> vector<8x128xf32>
    %671 = arith.addf %667, %670 : vector<8x128xf32>
    %672 = math.tanh %671 : vector<8x128xf32>
    %673 = vector.extract_strided_slice %641 {offsets = [0, 384], sizes = [8, 128], strides = [1, 1]} : vector<8x512xf32> to vector<8x128xf32>
    %c3_377 = arith.constant 3 : index
    %c0_378 = arith.constant 0 : index
    %c0_379 = arith.constant 0 : index
    %674 = vector.load %arg7[%c3_377, %c0_378, %c0_379] : memref<4x128x128xbf16, #tpu.memory_space<vmem>>, vector<1x128x128xbf16>
    %675 = vector.shape_cast %674 : vector<1x128x128xbf16> to vector<128x128xbf16>
    %cst_380 = arith.constant dense<0.000000e+00> : vector<8x128xf32>
    %676 = tpu.matmul %642, %675, %cst_380 {dimension_numbers = #tpu.dot_dimension_numbers<[1], [0], [0], [1], [0, 0, 1, 1], [], []>} : vector<8x128xbf16>, vector<128x128xbf16>, vector<8x128xf32> -> vector<8x128xf32>
    %677 = arith.addf %673, %676 : vector<8x128xf32>
    %cst_381 = arith.constant 5.000000e-01 : f32
    %678 = vector.broadcast %cst_381 : f32 to vector<8x128xf32>
    %679 = arith.mulf %678, %677 : vector<8x128xf32>
    %680 = math.tanh %679 : vector<8x128xf32>
    %cst_382 = arith.constant 1.000000e+00 : f32
    %681 = vector.broadcast %cst_382 : f32 to vector<8x128xf32>
    %682 = arith.addf %680, %681 : vector<8x128xf32>
    %cst_383 = arith.constant 5.000000e-01 : f32
    %683 = vector.broadcast %cst_383 : f32 to vector<8x128xf32>
    %684 = arith.mulf %683, %682 : vector<8x128xf32>
    %685 = arith.mulf %666, %638 : vector<8x128xf32>
    %686 = arith.mulf %654, %672 : vector<8x128xf32>
    %687 = arith.addf %685, %686 : vector<8x128xf32>
    %688 = math.tanh %687 : vector<8x128xf32>
    %689 = arith.mulf %684, %688 : vector<8x128xf32>
    %c16_i32_384 = arith.constant 16 : i32
    %690 = arith.muli %arg1, %c16_i32_384 : i32
    %c10_i32 = arith.constant 10 : i32
    %691 = arith.addi %690, %c10_i32 : i32
    %c8_i32_385 = arith.constant 8 : i32
    %692 = arith.cmpi slt, %691, %c8_i32_385 : i32
    %693 = arith.select %692, %687, %630 : vector<8x128xf32>
    %694 = arith.select %692, %689, %631 : vector<8x128xf32>
    %c0_386 = arith.constant 0 : index
    %c10_387 = arith.constant 10 : index
    %c0_388 = arith.constant 0 : index
    %695 = vector.load %arg5[%c0_386, %c10_387, %c0_388] : memref<8x16x128xf32, #tpu.memory_space<vmem>>, vector<8x1x128xf32>
    %696 = vector.shape_cast %695 : vector<8x1x128xf32> to vector<8x128xf32>
    %697 = vector.shape_cast %694 : vector<8x128xf32> to vector<8x1x128xf32>
    tpu.vector_store %arg5[%c0_386, %c10_387, %c0_388], %697 {strides = array<i32>} : memref<8x16x128xf32, #tpu.memory_space<vmem>>, vector<8x1x128xf32>,
    %c0_389 = arith.constant 0 : index
    %c11 = arith.constant 11 : index
    %c0_390 = arith.constant 0 : index
    %698 = vector.load %arg3[%c0_389, %c11, %c0_390] : memref<8x16x1xf32, #tpu.memory_space<vmem>>, vector<8x1x1xf32>
    %699 = vector.shape_cast %698 : vector<8x1x1xf32> to vector<8x1xf32>
    %700 = vector.broadcast %699 : vector<8x1xf32> to vector<8x128xf32>
    %701 = arith.mulf %693, %700 : vector<8x128xf32>
    %c0_391 = arith.constant 0 : index
    %c11_392 = arith.constant 11 : index
    %c0_393 = arith.constant 0 : index
    %702 = vector.load %arg2[%c0_391, %c11_392, %c0_393] : memref<8x16x512xbf16, #tpu.memory_space<vmem>>, vector<8x1x512xbf16>
    %703 = vector.shape_cast %702 : vector<8x1x512xbf16> to vector<8x512xbf16>
    %704 = arith.extf %703 : vector<8x512xbf16> to vector<8x512xf32>
    %705 = arith.truncf %694 : vector<8x128xf32> to vector<8x128xbf16>
    %706 = vector.extract_strided_slice %704 {offsets = [0, 0], sizes = [8, 128], strides = [1, 1]} : vector<8x512xf32> to vector<8x128xf32>
    %c0_394 = arith.constant 0 : index
    %c0_395 = arith.constant 0 : index
    %c0_396 = arith.constant 0 : index
    %707 = vector.load %arg7[%c0_394, %c0_395, %c0_396] : memref<4x128x128xbf16, #tpu.memory_space<vmem>>, vector<1x128x128xbf16>
    %708 = vector.shape_cast %707 : vector<1x128x128xbf16> to vector<128x128xbf16>
    %cst_397 = arith.constant dense<0.000000e+00> : vector<8x128xf32>
    %709 = tpu.matmul %705, %708, %cst_397 {dimension_numbers = #tpu.dot_dimension_numbers<[1], [0], [0], [1], [0, 0, 1, 1], [], []>} : vector<8x128xbf16>, vector<128x128xbf16>, vector<8x128xf32> -> vector<8x128xf32>
    %710 = arith.addf %706, %709 : vector<8x128xf32>
    %cst_398 = arith.constant 5.000000e-01 : f32
    %711 = vector.broadcast %cst_398 : f32 to vector<8x128xf32>
    %712 = arith.mulf %711, %710 : vector<8x128xf32>
    %713 = math.tanh %712 : vector<8x128xf32>
    %cst_399 = arith.constant 1.000000e+00 : f32
    %714 = vector.broadcast %cst_399 : f32 to vector<8x128xf32>
    %715 = arith.addf %713, %714 : vector<8x128xf32>
    %cst_400 = arith.constant 5.000000e-01 : f32
    %716 = vector.broadcast %cst_400 : f32 to vector<8x128xf32>
    %717 = arith.mulf %716, %715 : vector<8x128xf32>
    %718 = vector.extract_strided_slice %704 {offsets = [0, 128], sizes = [8, 128], strides = [1, 1]} : vector<8x512xf32> to vector<8x128xf32>
    %c1_401 = arith.constant 1 : index
    %c0_402 = arith.constant 0 : index
    %c0_403 = arith.constant 0 : index
    %719 = vector.load %arg7[%c1_401, %c0_402, %c0_403] : memref<4x128x128xbf16, #tpu.memory_space<vmem>>, vector<1x128x128xbf16>
    %720 = vector.shape_cast %719 : vector<1x128x128xbf16> to vector<128x128xbf16>
    %cst_404 = arith.constant dense<0.000000e+00> : vector<8x128xf32>
    %721 = tpu.matmul %705, %720, %cst_404 {dimension_numbers = #tpu.dot_dimension_numbers<[1], [0], [0], [1], [0, 0, 1, 1], [], []>} : vector<8x128xbf16>, vector<128x128xbf16>, vector<8x128xf32> -> vector<8x128xf32>
    %722 = arith.addf %718, %721 : vector<8x128xf32>
    %cst_405 = arith.constant 5.000000e-01 : f32
    %723 = vector.broadcast %cst_405 : f32 to vector<8x128xf32>
    %724 = arith.mulf %723, %722 : vector<8x128xf32>
    %725 = math.tanh %724 : vector<8x128xf32>
    %cst_406 = arith.constant 1.000000e+00 : f32
    %726 = vector.broadcast %cst_406 : f32 to vector<8x128xf32>
    %727 = arith.addf %725, %726 : vector<8x128xf32>
    %cst_407 = arith.constant 5.000000e-01 : f32
    %728 = vector.broadcast %cst_407 : f32 to vector<8x128xf32>
    %729 = arith.mulf %728, %727 : vector<8x128xf32>
    %730 = vector.extract_strided_slice %704 {offsets = [0, 256], sizes = [8, 128], strides = [1, 1]} : vector<8x512xf32> to vector<8x128xf32>
    %c2_408 = arith.constant 2 : index
    %c0_409 = arith.constant 0 : index
    %c0_410 = arith.constant 0 : index
    %731 = vector.load %arg7[%c2_408, %c0_409, %c0_410] : memref<4x128x128xbf16, #tpu.memory_space<vmem>>, vector<1x128x128xbf16>
    %732 = vector.shape_cast %731 : vector<1x128x128xbf16> to vector<128x128xbf16>
    %cst_411 = arith.constant dense<0.000000e+00> : vector<8x128xf32>
    %733 = tpu.matmul %705, %732, %cst_411 {dimension_numbers = #tpu.dot_dimension_numbers<[1], [0], [0], [1], [0, 0, 1, 1], [], []>} : vector<8x128xbf16>, vector<128x128xbf16>, vector<8x128xf32> -> vector<8x128xf32>
    %734 = arith.addf %730, %733 : vector<8x128xf32>
    %735 = math.tanh %734 : vector<8x128xf32>
    %736 = vector.extract_strided_slice %704 {offsets = [0, 384], sizes = [8, 128], strides = [1, 1]} : vector<8x512xf32> to vector<8x128xf32>
    %c3_412 = arith.constant 3 : index
    %c0_413 = arith.constant 0 : index
    %c0_414 = arith.constant 0 : index
    %737 = vector.load %arg7[%c3_412, %c0_413, %c0_414] : memref<4x128x128xbf16, #tpu.memory_space<vmem>>, vector<1x128x128xbf16>
    %738 = vector.shape_cast %737 : vector<1x128x128xbf16> to vector<128x128xbf16>
    %cst_415 = arith.constant dense<0.000000e+00> : vector<8x128xf32>
    %739 = tpu.matmul %705, %738, %cst_415 {dimension_numbers = #tpu.dot_dimension_numbers<[1], [0], [0], [1], [0, 0, 1, 1], [], []>} : vector<8x128xbf16>, vector<128x128xbf16>, vector<8x128xf32> -> vector<8x128xf32>
    %740 = arith.addf %736, %739 : vector<8x128xf32>
    %cst_416 = arith.constant 5.000000e-01 : f32
    %741 = vector.broadcast %cst_416 : f32 to vector<8x128xf32>
    %742 = arith.mulf %741, %740 : vector<8x128xf32>
    %743 = math.tanh %742 : vector<8x128xf32>
    %cst_417 = arith.constant 1.000000e+00 : f32
    %744 = vector.broadcast %cst_417 : f32 to vector<8x128xf32>
    %745 = arith.addf %743, %744 : vector<8x128xf32>
    %cst_418 = arith.constant 5.000000e-01 : f32
    %746 = vector.broadcast %cst_418 : f32 to vector<8x128xf32>
    %747 = arith.mulf %746, %745 : vector<8x128xf32>
    %748 = arith.mulf %729, %701 : vector<8x128xf32>
    %749 = arith.mulf %717, %735 : vector<8x128xf32>
    %750 = arith.addf %748, %749 : vector<8x128xf32>
    %751 = math.tanh %750 : vector<8x128xf32>
    %752 = arith.mulf %747, %751 : vector<8x128xf32>
    %c16_i32_419 = arith.constant 16 : i32
    %753 = arith.muli %arg1, %c16_i32_419 : i32
    %c11_i32 = arith.constant 11 : i32
    %754 = arith.addi %753, %c11_i32 : i32
    %c8_i32_420 = arith.constant 8 : i32
    %755 = arith.cmpi slt, %754, %c8_i32_420 : i32
    %756 = arith.select %755, %750, %693 : vector<8x128xf32>
    %757 = arith.select %755, %752, %694 : vector<8x128xf32>
    %c0_421 = arith.constant 0 : index
    %c11_422 = arith.constant 11 : index
    %c0_423 = arith.constant 0 : index
    %758 = vector.load %arg5[%c0_421, %c11_422, %c0_423] : memref<8x16x128xf32, #tpu.memory_space<vmem>>, vector<8x1x128xf32>
    %759 = vector.shape_cast %758 : vector<8x1x128xf32> to vector<8x128xf32>
    %760 = vector.shape_cast %757 : vector<8x128xf32> to vector<8x1x128xf32>
    tpu.vector_store %arg5[%c0_421, %c11_422, %c0_423], %760 {strides = array<i32>} : memref<8x16x128xf32, #tpu.memory_space<vmem>>, vector<8x1x128xf32>,
    %c0_424 = arith.constant 0 : index
    %c12 = arith.constant 12 : index
    %c0_425 = arith.constant 0 : index
    %761 = vector.load %arg3[%c0_424, %c12, %c0_425] : memref<8x16x1xf32, #tpu.memory_space<vmem>>, vector<8x1x1xf32>
    %762 = vector.shape_cast %761 : vector<8x1x1xf32> to vector<8x1xf32>
    %763 = vector.broadcast %762 : vector<8x1xf32> to vector<8x128xf32>
    %764 = arith.mulf %756, %763 : vector<8x128xf32>
    %c0_426 = arith.constant 0 : index
    %c12_427 = arith.constant 12 : index
    %c0_428 = arith.constant 0 : index
    %765 = vector.load %arg2[%c0_426, %c12_427, %c0_428] : memref<8x16x512xbf16, #tpu.memory_space<vmem>>, vector<8x1x512xbf16>
    %766 = vector.shape_cast %765 : vector<8x1x512xbf16> to vector<8x512xbf16>
    %767 = arith.extf %766 : vector<8x512xbf16> to vector<8x512xf32>
    %768 = arith.truncf %757 : vector<8x128xf32> to vector<8x128xbf16>
    %769 = vector.extract_strided_slice %767 {offsets = [0, 0], sizes = [8, 128], strides = [1, 1]} : vector<8x512xf32> to vector<8x128xf32>
    %c0_429 = arith.constant 0 : index
    %c0_430 = arith.constant 0 : index
    %c0_431 = arith.constant 0 : index
    %770 = vector.load %arg7[%c0_429, %c0_430, %c0_431] : memref<4x128x128xbf16, #tpu.memory_space<vmem>>, vector<1x128x128xbf16>
    %771 = vector.shape_cast %770 : vector<1x128x128xbf16> to vector<128x128xbf16>
    %cst_432 = arith.constant dense<0.000000e+00> : vector<8x128xf32>
    %772 = tpu.matmul %768, %771, %cst_432 {dimension_numbers = #tpu.dot_dimension_numbers<[1], [0], [0], [1], [0, 0, 1, 1], [], []>} : vector<8x128xbf16>, vector<128x128xbf16>, vector<8x128xf32> -> vector<8x128xf32>
    %773 = arith.addf %769, %772 : vector<8x128xf32>
    %cst_433 = arith.constant 5.000000e-01 : f32
    %774 = vector.broadcast %cst_433 : f32 to vector<8x128xf32>
    %775 = arith.mulf %774, %773 : vector<8x128xf32>
    %776 = math.tanh %775 : vector<8x128xf32>
    %cst_434 = arith.constant 1.000000e+00 : f32
    %777 = vector.broadcast %cst_434 : f32 to vector<8x128xf32>
    %778 = arith.addf %776, %777 : vector<8x128xf32>
    %cst_435 = arith.constant 5.000000e-01 : f32
    %779 = vector.broadcast %cst_435 : f32 to vector<8x128xf32>
    %780 = arith.mulf %779, %778 : vector<8x128xf32>
    %781 = vector.extract_strided_slice %767 {offsets = [0, 128], sizes = [8, 128], strides = [1, 1]} : vector<8x512xf32> to vector<8x128xf32>
    %c1_436 = arith.constant 1 : index
    %c0_437 = arith.constant 0 : index
    %c0_438 = arith.constant 0 : index
    %782 = vector.load %arg7[%c1_436, %c0_437, %c0_438] : memref<4x128x128xbf16, #tpu.memory_space<vmem>>, vector<1x128x128xbf16>
    %783 = vector.shape_cast %782 : vector<1x128x128xbf16> to vector<128x128xbf16>
    %cst_439 = arith.constant dense<0.000000e+00> : vector<8x128xf32>
    %784 = tpu.matmul %768, %783, %cst_439 {dimension_numbers = #tpu.dot_dimension_numbers<[1], [0], [0], [1], [0, 0, 1, 1], [], []>} : vector<8x128xbf16>, vector<128x128xbf16>, vector<8x128xf32> -> vector<8x128xf32>
    %785 = arith.addf %781, %784 : vector<8x128xf32>
    %cst_440 = arith.constant 5.000000e-01 : f32
    %786 = vector.broadcast %cst_440 : f32 to vector<8x128xf32>
    %787 = arith.mulf %786, %785 : vector<8x128xf32>
    %788 = math.tanh %787 : vector<8x128xf32>
    %cst_441 = arith.constant 1.000000e+00 : f32
    %789 = vector.broadcast %cst_441 : f32 to vector<8x128xf32>
    %790 = arith.addf %788, %789 : vector<8x128xf32>
    %cst_442 = arith.constant 5.000000e-01 : f32
    %791 = vector.broadcast %cst_442 : f32 to vector<8x128xf32>
    %792 = arith.mulf %791, %790 : vector<8x128xf32>
    %793 = vector.extract_strided_slice %767 {offsets = [0, 256], sizes = [8, 128], strides = [1, 1]} : vector<8x512xf32> to vector<8x128xf32>
    %c2_443 = arith.constant 2 : index
    %c0_444 = arith.constant 0 : index
    %c0_445 = arith.constant 0 : index
    %794 = vector.load %arg7[%c2_443, %c0_444, %c0_445] : memref<4x128x128xbf16, #tpu.memory_space<vmem>>, vector<1x128x128xbf16>
    %795 = vector.shape_cast %794 : vector<1x128x128xbf16> to vector<128x128xbf16>
    %cst_446 = arith.constant dense<0.000000e+00> : vector<8x128xf32>
    %796 = tpu.matmul %768, %795, %cst_446 {dimension_numbers = #tpu.dot_dimension_numbers<[1], [0], [0], [1], [0, 0, 1, 1], [], []>} : vector<8x128xbf16>, vector<128x128xbf16>, vector<8x128xf32> -> vector<8x128xf32>
    %797 = arith.addf %793, %796 : vector<8x128xf32>
    %798 = math.tanh %797 : vector<8x128xf32>
    %799 = vector.extract_strided_slice %767 {offsets = [0, 384], sizes = [8, 128], strides = [1, 1]} : vector<8x512xf32> to vector<8x128xf32>
    %c3_447 = arith.constant 3 : index
    %c0_448 = arith.constant 0 : index
    %c0_449 = arith.constant 0 : index
    %800 = vector.load %arg7[%c3_447, %c0_448, %c0_449] : memref<4x128x128xbf16, #tpu.memory_space<vmem>>, vector<1x128x128xbf16>
    %801 = vector.shape_cast %800 : vector<1x128x128xbf16> to vector<128x128xbf16>
    %cst_450 = arith.constant dense<0.000000e+00> : vector<8x128xf32>
    %802 = tpu.matmul %768, %801, %cst_450 {dimension_numbers = #tpu.dot_dimension_numbers<[1], [0], [0], [1], [0, 0, 1, 1], [], []>} : vector<8x128xbf16>, vector<128x128xbf16>, vector<8x128xf32> -> vector<8x128xf32>
    %803 = arith.addf %799, %802 : vector<8x128xf32>
    %cst_451 = arith.constant 5.000000e-01 : f32
    %804 = vector.broadcast %cst_451 : f32 to vector<8x128xf32>
    %805 = arith.mulf %804, %803 : vector<8x128xf32>
    %806 = math.tanh %805 : vector<8x128xf32>
    %cst_452 = arith.constant 1.000000e+00 : f32
    %807 = vector.broadcast %cst_452 : f32 to vector<8x128xf32>
    %808 = arith.addf %806, %807 : vector<8x128xf32>
    %cst_453 = arith.constant 5.000000e-01 : f32
    %809 = vector.broadcast %cst_453 : f32 to vector<8x128xf32>
    %810 = arith.mulf %809, %808 : vector<8x128xf32>
    %811 = arith.mulf %792, %764 : vector<8x128xf32>
    %812 = arith.mulf %780, %798 : vector<8x128xf32>
    %813 = arith.addf %811, %812 : vector<8x128xf32>
    %814 = math.tanh %813 : vector<8x128xf32>
    %815 = arith.mulf %810, %814 : vector<8x128xf32>
    %c16_i32_454 = arith.constant 16 : i32
    %816 = arith.muli %arg1, %c16_i32_454 : i32
    %c12_i32 = arith.constant 12 : i32
    %817 = arith.addi %816, %c12_i32 : i32
    %c8_i32_455 = arith.constant 8 : i32
    %818 = arith.cmpi slt, %817, %c8_i32_455 : i32
    %819 = arith.select %818, %813, %756 : vector<8x128xf32>
    %820 = arith.select %818, %815, %757 : vector<8x128xf32>
    %c0_456 = arith.constant 0 : index
    %c12_457 = arith.constant 12 : index
    %c0_458 = arith.constant 0 : index
    %821 = vector.load %arg5[%c0_456, %c12_457, %c0_458] : memref<8x16x128xf32, #tpu.memory_space<vmem>>, vector<8x1x128xf32>
    %822 = vector.shape_cast %821 : vector<8x1x128xf32> to vector<8x128xf32>
    %823 = vector.shape_cast %820 : vector<8x128xf32> to vector<8x1x128xf32>
    tpu.vector_store %arg5[%c0_456, %c12_457, %c0_458], %823 {strides = array<i32>} : memref<8x16x128xf32, #tpu.memory_space<vmem>>, vector<8x1x128xf32>,
    %c0_459 = arith.constant 0 : index
    %c13 = arith.constant 13 : index
    %c0_460 = arith.constant 0 : index
    %824 = vector.load %arg3[%c0_459, %c13, %c0_460] : memref<8x16x1xf32, #tpu.memory_space<vmem>>, vector<8x1x1xf32>
    %825 = vector.shape_cast %824 : vector<8x1x1xf32> to vector<8x1xf32>
    %826 = vector.broadcast %825 : vector<8x1xf32> to vector<8x128xf32>
    %827 = arith.mulf %819, %826 : vector<8x128xf32>
    %c0_461 = arith.constant 0 : index
    %c13_462 = arith.constant 13 : index
    %c0_463 = arith.constant 0 : index
    %828 = vector.load %arg2[%c0_461, %c13_462, %c0_463] : memref<8x16x512xbf16, #tpu.memory_space<vmem>>, vector<8x1x512xbf16>
    %829 = vector.shape_cast %828 : vector<8x1x512xbf16> to vector<8x512xbf16>
    %830 = arith.extf %829 : vector<8x512xbf16> to vector<8x512xf32>
    %831 = arith.truncf %820 : vector<8x128xf32> to vector<8x128xbf16>
    %832 = vector.extract_strided_slice %830 {offsets = [0, 0], sizes = [8, 128], strides = [1, 1]} : vector<8x512xf32> to vector<8x128xf32>
    %c0_464 = arith.constant 0 : index
    %c0_465 = arith.constant 0 : index
    %c0_466 = arith.constant 0 : index
    %833 = vector.load %arg7[%c0_464, %c0_465, %c0_466] : memref<4x128x128xbf16, #tpu.memory_space<vmem>>, vector<1x128x128xbf16>
    %834 = vector.shape_cast %833 : vector<1x128x128xbf16> to vector<128x128xbf16>
    %cst_467 = arith.constant dense<0.000000e+00> : vector<8x128xf32>
    %835 = tpu.matmul %831, %834, %cst_467 {dimension_numbers = #tpu.dot_dimension_numbers<[1], [0], [0], [1], [0, 0, 1, 1], [], []>} : vector<8x128xbf16>, vector<128x128xbf16>, vector<8x128xf32> -> vector<8x128xf32>
    %836 = arith.addf %832, %835 : vector<8x128xf32>
    %cst_468 = arith.constant 5.000000e-01 : f32
    %837 = vector.broadcast %cst_468 : f32 to vector<8x128xf32>
    %838 = arith.mulf %837, %836 : vector<8x128xf32>
    %839 = math.tanh %838 : vector<8x128xf32>
    %cst_469 = arith.constant 1.000000e+00 : f32
    %840 = vector.broadcast %cst_469 : f32 to vector<8x128xf32>
    %841 = arith.addf %839, %840 : vector<8x128xf32>
    %cst_470 = arith.constant 5.000000e-01 : f32
    %842 = vector.broadcast %cst_470 : f32 to vector<8x128xf32>
    %843 = arith.mulf %842, %841 : vector<8x128xf32>
    %844 = vector.extract_strided_slice %830 {offsets = [0, 128], sizes = [8, 128], strides = [1, 1]} : vector<8x512xf32> to vector<8x128xf32>
    %c1_471 = arith.constant 1 : index
    %c0_472 = arith.constant 0 : index
    %c0_473 = arith.constant 0 : index
    %845 = vector.load %arg7[%c1_471, %c0_472, %c0_473] : memref<4x128x128xbf16, #tpu.memory_space<vmem>>, vector<1x128x128xbf16>
    %846 = vector.shape_cast %845 : vector<1x128x128xbf16> to vector<128x128xbf16>
    %cst_474 = arith.constant dense<0.000000e+00> : vector<8x128xf32>
    %847 = tpu.matmul %831, %846, %cst_474 {dimension_numbers = #tpu.dot_dimension_numbers<[1], [0], [0], [1], [0, 0, 1, 1], [], []>} : vector<8x128xbf16>, vector<128x128xbf16>, vector<8x128xf32> -> vector<8x128xf32>
    %848 = arith.addf %844, %847 : vector<8x128xf32>
    %cst_475 = arith.constant 5.000000e-01 : f32
    %849 = vector.broadcast %cst_475 : f32 to vector<8x128xf32>
    %850 = arith.mulf %849, %848 : vector<8x128xf32>
    %851 = math.tanh %850 : vector<8x128xf32>
    %cst_476 = arith.constant 1.000000e+00 : f32
    %852 = vector.broadcast %cst_476 : f32 to vector<8x128xf32>
    %853 = arith.addf %851, %852 : vector<8x128xf32>
    %cst_477 = arith.constant 5.000000e-01 : f32
    %854 = vector.broadcast %cst_477 : f32 to vector<8x128xf32>
    %855 = arith.mulf %854, %853 : vector<8x128xf32>
    %856 = vector.extract_strided_slice %830 {offsets = [0, 256], sizes = [8, 128], strides = [1, 1]} : vector<8x512xf32> to vector<8x128xf32>
    %c2_478 = arith.constant 2 : index
    %c0_479 = arith.constant 0 : index
    %c0_480 = arith.constant 0 : index
    %857 = vector.load %arg7[%c2_478, %c0_479, %c0_480] : memref<4x128x128xbf16, #tpu.memory_space<vmem>>, vector<1x128x128xbf16>
    %858 = vector.shape_cast %857 : vector<1x128x128xbf16> to vector<128x128xbf16>
    %cst_481 = arith.constant dense<0.000000e+00> : vector<8x128xf32>
    %859 = tpu.matmul %831, %858, %cst_481 {dimension_numbers = #tpu.dot_dimension_numbers<[1], [0], [0], [1], [0, 0, 1, 1], [], []>} : vector<8x128xbf16>, vector<128x128xbf16>, vector<8x128xf32> -> vector<8x128xf32>
    %860 = arith.addf %856, %859 : vector<8x128xf32>
    %861 = math.tanh %860 : vector<8x128xf32>
    %862 = vector.extract_strided_slice %830 {offsets = [0, 384], sizes = [8, 128], strides = [1, 1]} : vector<8x512xf32> to vector<8x128xf32>
    %c3_482 = arith.constant 3 : index
    %c0_483 = arith.constant 0 : index
    %c0_484 = arith.constant 0 : index
    %863 = vector.load %arg7[%c3_482, %c0_483, %c0_484] : memref<4x128x128xbf16, #tpu.memory_space<vmem>>, vector<1x128x128xbf16>
    %864 = vector.shape_cast %863 : vector<1x128x128xbf16> to vector<128x128xbf16>
    %cst_485 = arith.constant dense<0.000000e+00> : vector<8x128xf32>
    %865 = tpu.matmul %831, %864, %cst_485 {dimension_numbers = #tpu.dot_dimension_numbers<[1], [0], [0], [1], [0, 0, 1, 1], [], []>} : vector<8x128xbf16>, vector<128x128xbf16>, vector<8x128xf32> -> vector<8x128xf32>
    %866 = arith.addf %862, %865 : vector<8x128xf32>
    %cst_486 = arith.constant 5.000000e-01 : f32
    %867 = vector.broadcast %cst_486 : f32 to vector<8x128xf32>
    %868 = arith.mulf %867, %866 : vector<8x128xf32>
    %869 = math.tanh %868 : vector<8x128xf32>
    %cst_487 = arith.constant 1.000000e+00 : f32
    %870 = vector.broadcast %cst_487 : f32 to vector<8x128xf32>
    %871 = arith.addf %869, %870 : vector<8x128xf32>
    %cst_488 = arith.constant 5.000000e-01 : f32
    %872 = vector.broadcast %cst_488 : f32 to vector<8x128xf32>
    %873 = arith.mulf %872, %871 : vector<8x128xf32>
    %874 = arith.mulf %855, %827 : vector<8x128xf32>
    %875 = arith.mulf %843, %861 : vector<8x128xf32>
    %876 = arith.addf %874, %875 : vector<8x128xf32>
    %877 = math.tanh %876 : vector<8x128xf32>
    %878 = arith.mulf %873, %877 : vector<8x128xf32>
    %c16_i32_489 = arith.constant 16 : i32
    %879 = arith.muli %arg1, %c16_i32_489 : i32
    %c13_i32 = arith.constant 13 : i32
    %880 = arith.addi %879, %c13_i32 : i32
    %c8_i32_490 = arith.constant 8 : i32
    %881 = arith.cmpi slt, %880, %c8_i32_490 : i32
    %882 = arith.select %881, %876, %819 : vector<8x128xf32>
    %883 = arith.select %881, %878, %820 : vector<8x128xf32>
    %c0_491 = arith.constant 0 : index
    %c13_492 = arith.constant 13 : index
    %c0_493 = arith.constant 0 : index
    %884 = vector.load %arg5[%c0_491, %c13_492, %c0_493] : memref<8x16x128xf32, #tpu.memory_space<vmem>>, vector<8x1x128xf32>
    %885 = vector.shape_cast %884 : vector<8x1x128xf32> to vector<8x128xf32>
    %886 = vector.shape_cast %883 : vector<8x128xf32> to vector<8x1x128xf32>
    tpu.vector_store %arg5[%c0_491, %c13_492, %c0_493], %886 {strides = array<i32>} : memref<8x16x128xf32, #tpu.memory_space<vmem>>, vector<8x1x128xf32>,
    %c0_494 = arith.constant 0 : index
    %c14 = arith.constant 14 : index
    %c0_495 = arith.constant 0 : index
    %887 = vector.load %arg3[%c0_494, %c14, %c0_495] : memref<8x16x1xf32, #tpu.memory_space<vmem>>, vector<8x1x1xf32>
    %888 = vector.shape_cast %887 : vector<8x1x1xf32> to vector<8x1xf32>
    %889 = vector.broadcast %888 : vector<8x1xf32> to vector<8x128xf32>
    %890 = arith.mulf %882, %889 : vector<8x128xf32>
    %c0_496 = arith.constant 0 : index
    %c14_497 = arith.constant 14 : index
    %c0_498 = arith.constant 0 : index
    %891 = vector.load %arg2[%c0_496, %c14_497, %c0_498] : memref<8x16x512xbf16, #tpu.memory_space<vmem>>, vector<8x1x512xbf16>
    %892 = vector.shape_cast %891 : vector<8x1x512xbf16> to vector<8x512xbf16>
    %893 = arith.extf %892 : vector<8x512xbf16> to vector<8x512xf32>
    %894 = arith.truncf %883 : vector<8x128xf32> to vector<8x128xbf16>
    %895 = vector.extract_strided_slice %893 {offsets = [0, 0], sizes = [8, 128], strides = [1, 1]} : vector<8x512xf32> to vector<8x128xf32>
    %c0_499 = arith.constant 0 : index
    %c0_500 = arith.constant 0 : index
    %c0_501 = arith.constant 0 : index
    %896 = vector.load %arg7[%c0_499, %c0_500, %c0_501] : memref<4x128x128xbf16, #tpu.memory_space<vmem>>, vector<1x128x128xbf16>
    %897 = vector.shape_cast %896 : vector<1x128x128xbf16> to vector<128x128xbf16>
    %cst_502 = arith.constant dense<0.000000e+00> : vector<8x128xf32>
    %898 = tpu.matmul %894, %897, %cst_502 {dimension_numbers = #tpu.dot_dimension_numbers<[1], [0], [0], [1], [0, 0, 1, 1], [], []>} : vector<8x128xbf16>, vector<128x128xbf16>, vector<8x128xf32> -> vector<8x128xf32>
    %899 = arith.addf %895, %898 : vector<8x128xf32>
    %cst_503 = arith.constant 5.000000e-01 : f32
    %900 = vector.broadcast %cst_503 : f32 to vector<8x128xf32>
    %901 = arith.mulf %900, %899 : vector<8x128xf32>
    %902 = math.tanh %901 : vector<8x128xf32>
    %cst_504 = arith.constant 1.000000e+00 : f32
    %903 = vector.broadcast %cst_504 : f32 to vector<8x128xf32>
    %904 = arith.addf %902, %903 : vector<8x128xf32>
    %cst_505 = arith.constant 5.000000e-01 : f32
    %905 = vector.broadcast %cst_505 : f32 to vector<8x128xf32>
    %906 = arith.mulf %905, %904 : vector<8x128xf32>
    %907 = vector.extract_strided_slice %893 {offsets = [0, 128], sizes = [8, 128], strides = [1, 1]} : vector<8x512xf32> to vector<8x128xf32>
    %c1_506 = arith.constant 1 : index
    %c0_507 = arith.constant 0 : index
    %c0_508 = arith.constant 0 : index
    %908 = vector.load %arg7[%c1_506, %c0_507, %c0_508] : memref<4x128x128xbf16, #tpu.memory_space<vmem>>, vector<1x128x128xbf16>
    %909 = vector.shape_cast %908 : vector<1x128x128xbf16> to vector<128x128xbf16>
    %cst_509 = arith.constant dense<0.000000e+00> : vector<8x128xf32>
    %910 = tpu.matmul %894, %909, %cst_509 {dimension_numbers = #tpu.dot_dimension_numbers<[1], [0], [0], [1], [0, 0, 1, 1], [], []>} : vector<8x128xbf16>, vector<128x128xbf16>, vector<8x128xf32> -> vector<8x128xf32>
    %911 = arith.addf %907, %910 : vector<8x128xf32>
    %cst_510 = arith.constant 5.000000e-01 : f32
    %912 = vector.broadcast %cst_510 : f32 to vector<8x128xf32>
    %913 = arith.mulf %912, %911 : vector<8x128xf32>
    %914 = math.tanh %913 : vector<8x128xf32>
    %cst_511 = arith.constant 1.000000e+00 : f32
    %915 = vector.broadcast %cst_511 : f32 to vector<8x128xf32>
    %916 = arith.addf %914, %915 : vector<8x128xf32>
    %cst_512 = arith.constant 5.000000e-01 : f32
    %917 = vector.broadcast %cst_512 : f32 to vector<8x128xf32>
    %918 = arith.mulf %917, %916 : vector<8x128xf32>
    %919 = vector.extract_strided_slice %893 {offsets = [0, 256], sizes = [8, 128], strides = [1, 1]} : vector<8x512xf32> to vector<8x128xf32>
    %c2_513 = arith.constant 2 : index
    %c0_514 = arith.constant 0 : index
    %c0_515 = arith.constant 0 : index
    %920 = vector.load %arg7[%c2_513, %c0_514, %c0_515] : memref<4x128x128xbf16, #tpu.memory_space<vmem>>, vector<1x128x128xbf16>
    %921 = vector.shape_cast %920 : vector<1x128x128xbf16> to vector<128x128xbf16>
    %cst_516 = arith.constant dense<0.000000e+00> : vector<8x128xf32>
    %922 = tpu.matmul %894, %921, %cst_516 {dimension_numbers = #tpu.dot_dimension_numbers<[1], [0], [0], [1], [0, 0, 1, 1], [], []>} : vector<8x128xbf16>, vector<128x128xbf16>, vector<8x128xf32> -> vector<8x128xf32>
    %923 = arith.addf %919, %922 : vector<8x128xf32>
    %924 = math.tanh %923 : vector<8x128xf32>
    %925 = vector.extract_strided_slice %893 {offsets = [0, 384], sizes = [8, 128], strides = [1, 1]} : vector<8x512xf32> to vector<8x128xf32>
    %c3_517 = arith.constant 3 : index
    %c0_518 = arith.constant 0 : index
    %c0_519 = arith.constant 0 : index
    %926 = vector.load %arg7[%c3_517, %c0_518, %c0_519] : memref<4x128x128xbf16, #tpu.memory_space<vmem>>, vector<1x128x128xbf16>
    %927 = vector.shape_cast %926 : vector<1x128x128xbf16> to vector<128x128xbf16>
    %cst_520 = arith.constant dense<0.000000e+00> : vector<8x128xf32>
    %928 = tpu.matmul %894, %927, %cst_520 {dimension_numbers = #tpu.dot_dimension_numbers<[1], [0], [0], [1], [0, 0, 1, 1], [], []>} : vector<8x128xbf16>, vector<128x128xbf16>, vector<8x128xf32> -> vector<8x128xf32>
    %929 = arith.addf %925, %928 : vector<8x128xf32>
    %cst_521 = arith.constant 5.000000e-01 : f32
    %930 = vector.broadcast %cst_521 : f32 to vector<8x128xf32>
    %931 = arith.mulf %930, %929 : vector<8x128xf32>
    %932 = math.tanh %931 : vector<8x128xf32>
    %cst_522 = arith.constant 1.000000e+00 : f32
    %933 = vector.broadcast %cst_522 : f32 to vector<8x128xf32>
    %934 = arith.addf %932, %933 : vector<8x128xf32>
    %cst_523 = arith.constant 5.000000e-01 : f32
    %935 = vector.broadcast %cst_523 : f32 to vector<8x128xf32>
    %936 = arith.mulf %935, %934 : vector<8x128xf32>
    %937 = arith.mulf %918, %890 : vector<8x128xf32>
    %938 = arith.mulf %906, %924 : vector<8x128xf32>
    %939 = arith.addf %937, %938 : vector<8x128xf32>
    %940 = math.tanh %939 : vector<8x128xf32>
    %941 = arith.mulf %936, %940 : vector<8x128xf32>
    %c16_i32_524 = arith.constant 16 : i32
    %942 = arith.muli %arg1, %c16_i32_524 : i32
    %c14_i32 = arith.constant 14 : i32
    %943 = arith.addi %942, %c14_i32 : i32
    %c8_i32_525 = arith.constant 8 : i32
    %944 = arith.cmpi slt, %943, %c8_i32_525 : i32
    %945 = arith.select %944, %939, %882 : vector<8x128xf32>
    %946 = arith.select %944, %941, %883 : vector<8x128xf32>
    %c0_526 = arith.constant 0 : index
    %c14_527 = arith.constant 14 : index
    %c0_528 = arith.constant 0 : index
    %947 = vector.load %arg5[%c0_526, %c14_527, %c0_528] : memref<8x16x128xf32, #tpu.memory_space<vmem>>, vector<8x1x128xf32>
    %948 = vector.shape_cast %947 : vector<8x1x128xf32> to vector<8x128xf32>
    %949 = vector.shape_cast %946 : vector<8x128xf32> to vector<8x1x128xf32>
    tpu.vector_store %arg5[%c0_526, %c14_527, %c0_528], %949 {strides = array<i32>} : memref<8x16x128xf32, #tpu.memory_space<vmem>>, vector<8x1x128xf32>,
    %c0_529 = arith.constant 0 : index
    %c15 = arith.constant 15 : index
    %c0_530 = arith.constant 0 : index
    %950 = vector.load %arg3[%c0_529, %c15, %c0_530] : memref<8x16x1xf32, #tpu.memory_space<vmem>>, vector<8x1x1xf32>
    %951 = vector.shape_cast %950 : vector<8x1x1xf32> to vector<8x1xf32>
    %952 = vector.broadcast %951 : vector<8x1xf32> to vector<8x128xf32>
    %953 = arith.mulf %945, %952 : vector<8x128xf32>
    %c0_531 = arith.constant 0 : index
    %c15_532 = arith.constant 15 : index
    %c0_533 = arith.constant 0 : index
    %954 = vector.load %arg2[%c0_531, %c15_532, %c0_533] : memref<8x16x512xbf16, #tpu.memory_space<vmem>>, vector<8x1x512xbf16>
    %955 = vector.shape_cast %954 : vector<8x1x512xbf16> to vector<8x512xbf16>
    %956 = arith.extf %955 : vector<8x512xbf16> to vector<8x512xf32>
    %957 = arith.truncf %946 : vector<8x128xf32> to vector<8x128xbf16>
    %958 = vector.extract_strided_slice %956 {offsets = [0, 0], sizes = [8, 128], strides = [1, 1]} : vector<8x512xf32> to vector<8x128xf32>
    %c0_534 = arith.constant 0 : index
    %c0_535 = arith.constant 0 : index
    %c0_536 = arith.constant 0 : index
    %959 = vector.load %arg7[%c0_534, %c0_535, %c0_536] : memref<4x128x128xbf16, #tpu.memory_space<vmem>>, vector<1x128x128xbf16>
    %960 = vector.shape_cast %959 : vector<1x128x128xbf16> to vector<128x128xbf16>
    %cst_537 = arith.constant dense<0.000000e+00> : vector<8x128xf32>
    %961 = tpu.matmul %957, %960, %cst_537 {dimension_numbers = #tpu.dot_dimension_numbers<[1], [0], [0], [1], [0, 0, 1, 1], [], []>} : vector<8x128xbf16>, vector<128x128xbf16>, vector<8x128xf32> -> vector<8x128xf32>
    %962 = arith.addf %958, %961 : vector<8x128xf32>
    %cst_538 = arith.constant 5.000000e-01 : f32
    %963 = vector.broadcast %cst_538 : f32 to vector<8x128xf32>
    %964 = arith.mulf %963, %962 : vector<8x128xf32>
    %965 = math.tanh %964 : vector<8x128xf32>
    %cst_539 = arith.constant 1.000000e+00 : f32
    %966 = vector.broadcast %cst_539 : f32 to vector<8x128xf32>
    %967 = arith.addf %965, %966 : vector<8x128xf32>
    %cst_540 = arith.constant 5.000000e-01 : f32
    %968 = vector.broadcast %cst_540 : f32 to vector<8x128xf32>
    %969 = arith.mulf %968, %967 : vector<8x128xf32>
    %970 = vector.extract_strided_slice %956 {offsets = [0, 128], sizes = [8, 128], strides = [1, 1]} : vector<8x512xf32> to vector<8x128xf32>
    %c1_541 = arith.constant 1 : index
    %c0_542 = arith.constant 0 : index
    %c0_543 = arith.constant 0 : index
    %971 = vector.load %arg7[%c1_541, %c0_542, %c0_543] : memref<4x128x128xbf16, #tpu.memory_space<vmem>>, vector<1x128x128xbf16>
    %972 = vector.shape_cast %971 : vector<1x128x128xbf16> to vector<128x128xbf16>
    %cst_544 = arith.constant dense<0.000000e+00> : vector<8x128xf32>
    %973 = tpu.matmul %957, %972, %cst_544 {dimension_numbers = #tpu.dot_dimension_numbers<[1], [0], [0], [1], [0, 0, 1, 1], [], []>} : vector<8x128xbf16>, vector<128x128xbf16>, vector<8x128xf32> -> vector<8x128xf32>
    %974 = arith.addf %970, %973 : vector<8x128xf32>
    %cst_545 = arith.constant 5.000000e-01 : f32
    %975 = vector.broadcast %cst_545 : f32 to vector<8x128xf32>
    %976 = arith.mulf %975, %974 : vector<8x128xf32>
    %977 = math.tanh %976 : vector<8x128xf32>
    %cst_546 = arith.constant 1.000000e+00 : f32
    %978 = vector.broadcast %cst_546 : f32 to vector<8x128xf32>
    %979 = arith.addf %977, %978 : vector<8x128xf32>
    %cst_547 = arith.constant 5.000000e-01 : f32
    %980 = vector.broadcast %cst_547 : f32 to vector<8x128xf32>
    %981 = arith.mulf %980, %979 : vector<8x128xf32>
    %982 = vector.extract_strided_slice %956 {offsets = [0, 256], sizes = [8, 128], strides = [1, 1]} : vector<8x512xf32> to vector<8x128xf32>
    %c2_548 = arith.constant 2 : index
    %c0_549 = arith.constant 0 : index
    %c0_550 = arith.constant 0 : index
    %983 = vector.load %arg7[%c2_548, %c0_549, %c0_550] : memref<4x128x128xbf16, #tpu.memory_space<vmem>>, vector<1x128x128xbf16>
    %984 = vector.shape_cast %983 : vector<1x128x128xbf16> to vector<128x128xbf16>
    %cst_551 = arith.constant dense<0.000000e+00> : vector<8x128xf32>
    %985 = tpu.matmul %957, %984, %cst_551 {dimension_numbers = #tpu.dot_dimension_numbers<[1], [0], [0], [1], [0, 0, 1, 1], [], []>} : vector<8x128xbf16>, vector<128x128xbf16>, vector<8x128xf32> -> vector<8x128xf32>
    %986 = arith.addf %982, %985 : vector<8x128xf32>
    %987 = math.tanh %986 : vector<8x128xf32>
    %988 = vector.extract_strided_slice %956 {offsets = [0, 384], sizes = [8, 128], strides = [1, 1]} : vector<8x512xf32> to vector<8x128xf32>
    %c3_552 = arith.constant 3 : index
    %c0_553 = arith.constant 0 : index
    %c0_554 = arith.constant 0 : index
    %989 = vector.load %arg7[%c3_552, %c0_553, %c0_554] : memref<4x128x128xbf16, #tpu.memory_space<vmem>>, vector<1x128x128xbf16>
    %990 = vector.shape_cast %989 : vector<1x128x128xbf16> to vector<128x128xbf16>
    %cst_555 = arith.constant dense<0.000000e+00> : vector<8x128xf32>
    %991 = tpu.matmul %957, %990, %cst_555 {dimension_numbers = #tpu.dot_dimension_numbers<[1], [0], [0], [1], [0, 0, 1, 1], [], []>} : vector<8x128xbf16>, vector<128x128xbf16>, vector<8x128xf32> -> vector<8x128xf32>
    %992 = arith.addf %988, %991 : vector<8x128xf32>
    %cst_556 = arith.constant 5.000000e-01 : f32
    %993 = vector.broadcast %cst_556 : f32 to vector<8x128xf32>
    %994 = arith.mulf %993, %992 : vector<8x128xf32>
    %995 = math.tanh %994 : vector<8x128xf32>
    %cst_557 = arith.constant 1.000000e+00 : f32
    %996 = vector.broadcast %cst_557 : f32 to vector<8x128xf32>
    %997 = arith.addf %995, %996 : vector<8x128xf32>
    %cst_558 = arith.constant 5.000000e-01 : f32
    %998 = vector.broadcast %cst_558 : f32 to vector<8x128xf32>
    %999 = arith.mulf %998, %997 : vector<8x128xf32>
    %1000 = arith.mulf %981, %953 : vector<8x128xf32>
    %1001 = arith.mulf %969, %987 : vector<8x128xf32>
    %1002 = arith.addf %1000, %1001 : vector<8x128xf32>
    %1003 = math.tanh %1002 : vector<8x128xf32>
    %1004 = arith.mulf %999, %1003 : vector<8x128xf32>
    %c16_i32_559 = arith.constant 16 : i32
    %1005 = arith.muli %arg1, %c16_i32_559 : i32
    %c15_i32 = arith.constant 15 : i32
    %1006 = arith.addi %1005, %c15_i32 : i32
    %c8_i32_560 = arith.constant 8 : i32
    %1007 = arith.cmpi slt, %1006, %c8_i32_560 : i32
    %1008 = arith.select %1007, %1002, %945 : vector<8x128xf32>
    %1009 = arith.select %1007, %1004, %946 : vector<8x128xf32>
    %c0_561 = arith.constant 0 : index
    %c15_562 = arith.constant 15 : index
    %c0_563 = arith.constant 0 : index
    %1010 = vector.load %arg5[%c0_561, %c15_562, %c0_563] : memref<8x16x128xf32, #tpu.memory_space<vmem>>, vector<8x1x128xf32>
    %1011 = vector.shape_cast %1010 : vector<8x1x128xf32> to vector<8x128xf32>
    %1012 = vector.shape_cast %1009 : vector<8x128xf32> to vector<8x1x128xf32>
    tpu.vector_store %arg5[%c0_561, %c15_562, %c0_563], %1012 {strides = array<i32>} : memref<8x16x128xf32, #tpu.memory_space<vmem>>, vector<8x1x128xf32>,
    %c0_564 = arith.constant 0 : index
    %c0_565 = arith.constant 0 : index
    %1013 = vector.load %arg9[%c0_564, %c0_565] : memref<8x128xf32, #tpu.memory_space<vmem>>, vector<8x128xf32>
    tpu.vector_store %arg9[%c0_564, %c0_565], %1009 {strides = array<i32>} : memref<8x128xf32, #tpu.memory_space<vmem>>, vector<8x128xf32>,
    %c0_566 = arith.constant 0 : index
    %c0_567 = arith.constant 0 : index
    %1014 = vector.load %arg10[%c0_566, %c0_567] : memref<8x128xf32, #tpu.memory_space<vmem>>, vector<8x128xf32>
    tpu.vector_store %arg10[%c0_566, %c0_567], %1008 {strides = array<i32>} : memref<8x128xf32, #tpu.memory_space<vmem>>, vector<8x128xf32>,
    %c0_i32_568 = arith.constant 0 : i32
    %1015 = arith.cmpi eq, %arg1, %c0_i32_568 : i32
    %1016 = arith.extui %1015 : i1 to i32
    %c0_i32_569 = arith.constant 0 : i32
    %1017 = arith.cmpi ne, %1016, %c0_i32_569 : i32
    scf.if %1017 {
      %c0_570 = arith.constant 0 : index
      %c0_571 = arith.constant 0 : index
      %1018 = vector.load %arg6[%c0_570, %c0_571] : memref<8x128xf32, #tpu.memory_space<vmem>>, vector<8x128xf32>
      tpu.vector_store %arg6[%c0_570, %c0_571], %1008 {strides = array<i32>} : memref<8x128xf32, #tpu.memory_space<vmem>>, vector<8x128xf32>,
    } else {
    }
    return
  }
  func.func @transform_0(%arg0: i32, %arg1: i32) -> (i32, i32, i32) {
    %c0_i32 = arith.constant 0 : i32
    %c0_i32_0 = arith.constant 0 : i32
    return %arg0, %arg1, %c0_i32 : i32, i32, i32
  }
  func.func @transform_1(%arg0: i32, %arg1: i32) -> (i32, i32, i32) {
    %c0_i32 = arith.constant 0 : i32
    %c0_i32_0 = arith.constant 0 : i32
    return %arg0, %arg1, %c0_i32 : i32, i32, i32
  }
  func.func @transform_3(%arg0: i32, %arg1: i32) -> (i32, i32, i32) {
    %c0_i32 = arith.constant 0 : i32
    %c0_i32_0 = arith.constant 0 : i32
    return %arg0, %arg1, %c0_i32 : i32, i32, i32
  }
  func.func @transform_4(%arg0: i32, %arg1: i32) -> (i32, i32) {
    %c0_i32 = arith.constant 0 : i32
    %c0_i32_0 = arith.constant 0 : i32
    return %arg0, %c0_i32 : i32, i32
  }
}

</mosaic_0001>

<bundles_post_ra>
// kernel: tpu_custom_call.1
= control target key start
LH: loop header
LB: loop body
LE: loop exit
PB: predicated region body
PF: predicated region fallthrough
CT: control target
= control target key end

     0   :  { %10 = vsyncpa [#allocation7], 0  ;;  %s18747_s0 = inlined_call_operand.hbm [shape: bf16[8,16,512], index: 0, kind: input, shape index: {}]   ;;  %s18748_s1 = inlined_call_operand.vmem [shape: f32[8,16,1], index: 1, kind: input, shape index: {}]   ;;  %s18749_s2 = inlined_call_operand.hbm [shape: bf16[4,128,128], index: 2, kind: input, shape index: {}]   ;;  %s18750_s3 = inlined_call_operand.hbm [shape: f32[8,16,128], index: 3, kind: output, shape index: {0}]   ;;  %s18751_s4 = inlined_call_operand.hbm [shape: f32[8,128], index: 4, kind: output, shape index: {1}]  }
   0x1   :  { %11 = vsyncpa [#allocation8], 0 }
   0x2   :  { %12 = vsyncpa [#allocation11], 0  ;;  %s17_s17 = sshll.u32 %s18747_s0, 4  ;;  %s16272_s18 = smov [#allocation6]   ;;  %s18_s17 = int_to_ptr.hbm [resolvable:$true] %s17_s17 }
   0x3   :  { %s19_s19 = sshll.u32 %s16272_s18, 4  ;;  %s16273_s20 = smov 256   ;;  %s20_s19 = int_to_ptr.vmem [resolvable:$true] %s19_s19 }
   0x4   :  { %s16274_s21 = smov 16  }
   0x5   :  { %25 = dma.hbm_to_vmem [thread:$0]  %s18_s17, 4096, %s20_s19, [#allocation7], %s16273_s20, %s16273_s20, %s16274_s21  }
   0x6   :  { %16264 = dma.done.wait [#allocation7], 4096  }
   0x7   :  { %16265 = vsyncadd [#allocation7], 4294963200  ;;  %s43_s24 = sshll.u32 %s18749_s2, 4  ;;  %s16275_s25 = smov [#allocation2]   ;;  %v16276_v0 = vmov 0.0   ;;  %s44_s24 = int_to_ptr.hbm [resolvable:$true] %s43_s24 }
   0x8   :  { %s45_s26 = sshll.u32 %s16275_s25, 4  ;;  %49 = vst [vmem:[#allocation4] sm:$0xff] %v16276_v0  ;;  %s46_s26 = int_to_ptr.vmem [resolvable:$true] %s45_s26 }
   0x9   :  { %50 = vst [vmem:[#allocation5] sm:$0xff] %v16276_v0  ;;  %48 = dma.hbm_to_vmem [thread:$0]  %s44_s24, 4096, %s46_s26, [#allocation3] }
   0xa   :  { %16266 = dma.done.wait [#allocation3], 4096 }
   0xb   :  { %16267 = vsyncadd [#allocation3], 4294963200  ;;  %v16277_v1 = vmov 0   ;;  %v62_v2 = vld [vmem:[%s18748_s1 + $0x40] sm:$0x1]  ;;  %v14956_v5 = vld [vmem:[#allocation2 + $0x38] sm:$0xff] }
   0xc   :  { %15527 = vset.pattern.permute.xlu2 %v16277_v1  ;;  %15526 = vset.pattern.permute.xlu1 %v16277_v1  ;;  %v59_v3 = vld [vmem:[%s18748_s1 + $0x10] sm:$0x1]  ;;  %v58_v4 = vld [vmem:[%s18748_s1] sm:$0x1]  ;;  %v14964_v6 = vld [vmem:[#allocation2 + $0x78] sm:$0xff]  ;;  %vm99_vm0 = vcmask 1041409  }
   0xd   :  { %15525 = vset.pattern.permute.xlu0 %v16277_v1  ;;  %84 = vperm.xlu2 %15527, %v62_v2   ;;  %v14972_v7 = vld [vmem:[#allocation2 + $0xb8] sm:$0xff]  ;;  %v14955_v9 = vld [vmem:[#allocation2 + $0x30] sm:$0xff]  ;;  %v60_v14 = vld [vmem:[%s18748_s1 + $0x20] sm:$0x1]  ;;  %vm102_vm1 = vcmask 1042434   ;;  %vm105_vm2 = vcmask 1043459  }
   0xe   :  { %72 = vperm.xlu0 %15525, %v59_v3   ;;  %68 = vperm.xlu1 %15526, %v58_v4   ;;  %v14980_v8 = vld [vmem:[#allocation2 + $0xf8] sm:$0xff]  ;;  %v14963_v10 = vld [vmem:[#allocation2 + $0x70] sm:$0xff]  ;;  %v14954_v16 = vld [vmem:[#allocation2 + $0x28] sm:$0xff]  ;;  %vm108_vm3 = vcmask 1044484   ;;  %vm111_vm4 = vcmask 1045509   ;;  %vm114_vm5 = vcmask 1046534  }
   0xf   :  { %234 = vmatpush.bf16.msra.mxu0 %v14956_v5  ;;  %368 = vmatpush.bf16.msra.mxu1 %v14964_v6  ;;  %v14971_v11 = vld [vmem:[#allocation2 + $0xb0] sm:$0xff]  ;;  %v14962_v17 = vld [vmem:[#allocation2 + $0x68] sm:$0xff]  ;;  %v14953_v20 = vld [vmem:[#allocation2 + $0x20] sm:$0xff]  ;;  %vm117_vm6 = vcmask 1047559   ;;  %s12858_s16 = sshll.u32 %s18750_s3, 4  ;;  %s16278_s17 = smov [#allocation9]   ;;  %s12859_s16 = int_to_ptr.hbm [resolvable:$true] %s12858_s16 }
  0x10   :  { %502 = vmatpush.bf16.msra.mxu2 %v14972_v7  ;;  %612 = vmatpush.bf16.msra.mxu3 %v14980_v8  ;;  %v14979_v12 = vld [vmem:[#allocation2 + $0xf0] sm:$0xff]  ;;  %v14970_v18 = vld [vmem:[#allocation2 + $0xa8] sm:$0xff]  ;;  %v14961_v21 = vld [vmem:[#allocation2 + $0x60] sm:$0xff]  ;;  %s12856_s18 = sshll.u32 %s16278_s17, 4  ;;  %s16279_s19 = smov 128   ;;  %s12857_s18 = int_to_ptr.vmem [resolvable:$true] %s12856_s18 }
  0x11   :  { %v63_v13 = vld [vmem:[%s18748_s1 + $0x50] sm:$0x1]  ;;  %v14978_v19 = vld [vmem:[#allocation2 + $0xe8] sm:$0xff]  ;;  %v14969_v22 = vld [vmem:[#allocation2 + $0xa0] sm:$0xff]  ;;  %s16280_s20 = smov 8   ;;  %s16281_s21 = smov [#allocation10]  }
  0x12   :  { %v61_v15 = vld [vmem:[%s18748_s1 + $0x30] sm:$0x1]  ;;  %v14977_v23 = vld [vmem:[#allocation2 + $0xe0] sm:$0xff]  ;;  %v14952_v27 = vld [vmem:[#allocation2 + $0x18] sm:$0xff]  ;;  %s12870_s22 = sshll.u32 %s16281_s21, 4  ;;  %s12872_s25 = sshll.u32 %s18751_s4, 4  ;;  %s12871_s22 = int_to_ptr.vmem [resolvable:$true] %s12870_s22  ;;  %s12873_s25 = int_to_ptr.hbm [resolvable:$true] %s12872_s25 }
  0x13   :  { %235 = vmatpush.bf16.msra.mxu0 %v14955_v9  ;;  %369 = vmatpush.bf16.msra.mxu1 %v14963_v10  ;;  %v798_v24 = vld [vmem:[%s18748_s1 + $0x1] sm:$0x1]  ;;  %v64_v25 = vld [vmem:[%s18748_s1 + $0x60] sm:$0x1]  ;;  %v65_v26 = vld [vmem:[%s18748_s1 + $0x70] sm:$0x1] }
  0x14   :  { %503 = vmatpush.bf16.msra.mxu2 %v14971_v11  ;;  %613 = vmatpush.bf16.msra.mxu3 %v14979_v12  ;;  %v14960_v28 = vld [vmem:[#allocation2 + $0x58] sm:$0xff]  ;;  %v14951_v31 = vld [vmem:[#allocation2 + $0x10] sm:$0xff]  ;;  %v800_v36 = vld [vmem:[%s18748_s1 + $0x21] sm:$0x1] }
  0x15   :  { %88 = vperm.xlu2 %15527, %v63_v13   ;;  %v14968_v29 = vld [vmem:[#allocation2 + $0x98] sm:$0xff]  ;;  %v14959_v32 = vld [vmem:[#allocation2 + $0x50] sm:$0xff]  ;;  %v14950_v38 = vld [vmem:[#allocation2 + $0x8] sm:$0xff] }
  0x16   :  { %76 = vperm.xlu0 %15525, %v60_v14   ;;  %80 = vperm.xlu1 %15526, %v61_v15   ;;  %v14976_v30 = vld [vmem:[#allocation2 + $0xd8] sm:$0xff]  ;;  %v14967_v33 = vld [vmem:[#allocation2 + $0x90] sm:$0xff]  ;;  %v14958_v39 = vld [vmem:[#allocation2 + $0x48] sm:$0xff] }
  0x17   :  { %236 = vmatpush.bf16.msra.mxu0 %v14954_v16  ;;  %370 = vmatpush.bf16.msra.mxu1 %v14962_v17  ;;  %v14975_v34 = vld [vmem:[#allocation2 + $0xd0] sm:$0xff]  ;;  %v14966_v40 = vld [vmem:[#allocation2 + $0x88] sm:$0xff]  ;;  %v14949_v42 = vld [vmem:[#allocation2] sm:$0xff] }
  0x18   :  { %504 = vmatpush.bf16.msra.mxu2 %v14970_v18  ;;  %614 = vmatpush.bf16.msra.mxu3 %v14978_v19  ;;  %v801_v35 = vld [vmem:[%s18748_s1 + $0x31] sm:$0x1]  ;;  %v14974_v41 = vld [vmem:[#allocation2 + $0xc8] sm:$0xff]  ;;  %v14957_v43 = vld [vmem:[#allocation2 + $0x40] sm:$0xff] }
  0x19   :  { %v799_v37 = vld [vmem:[%s18748_s1 + $0x11] sm:$0x1]  ;;  %v56_v44 = vld [vmem:[#allocation4] sm:$0xff]  ;;  %v1592_v51 = vld [vmem:[%s18748_s1 + $0x12] sm:$0x1] }
  0x1a   :  { %v14965_v45 = vld [vmem:[#allocation2 + $0x80] sm:$0xff]  ;;  %v169_v49 = vpack.c.bf16 %v56_v44, %v56_v44  ;;  %v803_v50 = vld [vmem:[%s18748_s1 + $0x51] sm:$0x1]  ;;  %v1594_v55 = vld [vmem:[%s18748_s1 + $0x32] sm:$0x1] }
  0x1b   :  { %237 = vmatpush.bf16.msra.mxu0 %v14953_v20  ;;  %371 = vmatpush.bf16.msra.mxu1 %v14961_v21  ;;  %v14973_v46 = vld [vmem:[#allocation2 + $0xc0] sm:$0xff]  ;;  %v805_v52 = vld [vmem:[%s18748_s1 + $0x71] sm:$0x1]  ;;  %v1598_v57 = vld [vmem:[%s18748_s1 + $0x72] sm:$0x1] }
  0x1c   :  { %505 = vmatpush.bf16.msra.mxu2 %v14969_v22  ;;  %615 = vmatpush.bf16.msra.mxu3 %v14977_v23  ;;  %v804_v47 = vld [vmem:[%s18748_s1 + $0x61] sm:$0x1]  ;;  %v1591_v53 = vld [vmem:[%s18748_s1 + $0x2] sm:$0x1]  ;;  %v1596_v58 = vld [vmem:[%s18748_s1 + $0x52] sm:$0x1] }
  0x1d   :  { %808 = vperm.xlu2 %15527, %v798_v24   ;;  %v802_v48 = vld [vmem:[%s18748_s1 + $0x41] sm:$0x1]  ;;  %v1595_v54 = vld [vmem:[%s18748_s1 + $0x42] sm:$0x1]  ;;  %v2394_v60 = vld [vmem:[%s18748_s1 + $0x23] sm:$0x1] }
  0x1e   :  { %92 = vperm.xlu0 %15525, %v64_v25   ;;  %96 = vperm.xlu1 %15526, %v65_v26   ;;  %v1593_v56 = vld [vmem:[%s18748_s1 + $0x22] sm:$0x1]  ;;  %v2392_v61 = vld [vmem:[%s18748_s1 + $0x3] sm:$0x1]  ;;  %v2393_v62 = vld [vmem:[%s18748_s1 + $0x13] sm:$0x1] }
  0x1f   :  { %238 = vmatpush.bf16.msra.mxu0 %v14952_v27  ;;  %372 = vmatpush.bf16.msra.mxu1 %v14960_v28  ;;  %v1597_v59 = vld [vmem:[%s18748_s1 + $0x62] sm:$0x1]  ;;  %v2397_v63 = vld [vmem:[%s18748_s1 + $0x53] sm:$0x1]  ;;  %v2396_v0 = vld [vmem:[%s18748_s1 + $0x43] sm:$0x1] }
  0x20   :  { %506 = vmatpush.bf16.msra.mxu2 %v14968_v29  ;;  %616 = vmatpush.bf16.msra.mxu3 %v14976_v30  ;;  %v2395_v1 = vld [vmem:[%s18748_s1 + $0x33] sm:$0x1]  ;;  %v3193_v2 = vld [vmem:[%s18748_s1 + $0x4] sm:$0x1]  ;;  %v2398_v3 = vld [vmem:[%s18748_s1 + $0x63] sm:$0x1] }
  0x21   :  { %v2399_v4 = vld [vmem:[%s18748_s1 + $0x73] sm:$0x1]  ;;  %v3196_v5 = vld [vmem:[%s18748_s1 + $0x34] sm:$0x1]  ;;  %v3195_v7 = vld [vmem:[%s18748_s1 + $0x24] sm:$0x1] }
  0x22   :  { %v3194_v6 = vld [vmem:[%s18748_s1 + $0x14] sm:$0x1]  ;;  %v3199_v8 = vld [vmem:[%s18748_s1 + $0x64] sm:$0x1]  ;;  %v3995_v11 = vld [vmem:[%s18748_s1 + $0x15] sm:$0x1] }
  0x23   :  { %239 = vmatpush.bf16.msra.mxu0 %v14951_v31  ;;  %373 = vmatpush.bf16.msra.mxu1 %v14959_v32  ;;  %v3198_v9 = vld [vmem:[%s18748_s1 + $0x54] sm:$0x1]  ;;  %v3197_v10 = vld [vmem:[%s18748_s1 + $0x44] sm:$0x1]  ;;  %v3994_v13 = vld [vmem:[%s18748_s1 + $0x5] sm:$0x1] }
  0x24   :  { %507 = vmatpush.bf16.msra.mxu2 %v14967_v33  ;;  %617 = vmatpush.bf16.msra.mxu3 %v14975_v34  ;;  %v3200_v12 = vld [vmem:[%s18748_s1 + $0x74] sm:$0x1]  ;;  %v3998_v14 = vld [vmem:[%s18748_s1 + $0x45] sm:$0x1]  ;;  %v3997_v16 = vld [vmem:[%s18748_s1 + $0x35] sm:$0x1] }
  0x25   :  { %823 = vperm.xlu2 %15527, %v801_v35   ;;  %v3996_v15 = vld [vmem:[%s18748_s1 + $0x25] sm:$0x1]  ;;  %v4001_v17 = vld [vmem:[%s18748_s1 + $0x75] sm:$0x1]  ;;  %v4797_v20 = vld [vmem:[%s18748_s1 + $0x26] sm:$0x1] }
  0x26   :  { %818 = vperm.xlu0 %15525, %v800_v36   ;;  %813 = vperm.xlu1 %15526, %v799_v37   ;;  %v4000_v18 = vld [vmem:[%s18748_s1 + $0x65] sm:$0x1]  ;;  %v3999_v19 = vld [vmem:[%s18748_s1 + $0x55] sm:$0x1]  ;;  %v4795_v21 = vld [vmem:[%s18748_s1 + $0x6] sm:$0x1] }
  0x27   :  { %240 = vmatpush.bf16.msra.mxu0 %v14950_v38  ;;  %374 = vmatpush.bf16.msra.mxu1 %v14958_v39  ;;  %v4796_v22 = vld [vmem:[%s18748_s1 + $0x16] sm:$0x1]  ;;  %v4799_v27 = vld [vmem:[%s18748_s1 + $0x46] sm:$0x1]  ;;  %v5596_v34 = vld [vmem:[%s18748_s1 + $0x7] sm:$0x1] }
  0x28   :  { %508 = vmatpush.bf16.msra.mxu2 %v14966_v40  ;;  %618 = vmatpush.bf16.msra.mxu3 %v14974_v41  ;;  %v4800_v25 = vld [vmem:[%s18748_s1 + $0x56] sm:$0x1]  ;;  %v4801_v37 = vld [vmem:[%s18748_s1 + $0x66] sm:$0x1]  ;;  %v5599_v44 = vld [vmem:[%s18748_s1 + $0x37] sm:$0x1] }
  0x29   :  { %v4798_v26 = vld [vmem:[%s18748_s1 + $0x36] sm:$0x1] }
  0x2a   :  { %v4802_v35 = vld [vmem:[%s18748_s1 + $0x76] sm:$0x1] }
  0x2b   :  { %241 = vmatpush.bf16.msra.mxu0 %v14949_v42  ;;  %375 = vmatpush.bf16.msra.mxu1 %v14957_v43 }
  0x2c   :  { %509 = vmatpush.bf16.msra.mxu2 %v14965_v45  ;;  %619 = vmatpush.bf16.msra.mxu3 %v14973_v46  ;;  %v5597_v45 = vld [vmem:[%s18748_s1 + $0x17] sm:$0x1] }
  0x2d   :  { %838 = vperm.xlu2 %15527, %v804_v47   ;;  %v5598_v47 = vld [vmem:[%s18748_s1 + $0x27] sm:$0x1] }
  0x2e   :  { %828 = vperm.xlu0 %15525, %v802_v48   ;;  %833 = vperm.xlu1 %15526, %v803_v50   ;;  %v16498_v50 = vld [vmem:[#allocation6] sm:$0x11] }
  0x2f   :  { %242 = vmatmul.bf16.vlgmr.msra.gmra.mxu0 %v169_v49  ;;  %376 = vmatmul.bf16.vlgmr.msra.gmra.mxu1 %v169_v49 }
  0x30   :  { %510 = vmatmul.bf16.vlgmr.msra.gmra.mxu2 %v169_v49  ;;  %620 = vmatmul.bf16.vlgmr.msra.gmra.mxu3 %v169_v49 }
  0x35   :  { %1605 = vperm.xlu2 %15527, %v1592_v51   ;;  %v16500_v51 = vld [vmem:[#allocation6 + $0x20] sm:$0x11] }
  0x36   :  { %843 = vperm.xlu0 %15525, %v805_v52   ;;  %1601 = vperm.xlu1 %15526, %v1591_v53   ;;  %v16502_v52 = vld [vmem:[#allocation6 + $0x40] sm:$0x11] }
  0x3d   :  { %1617 = vperm.xlu2 %15527, %v1595_v54   ;;  %v16504_v54 = vld [vmem:[#allocation6 + $0x60] sm:$0x11] }
  0x3e   :  { %1613 = vperm.xlu0 %15525, %v1594_v55   ;;  %1609 = vperm.xlu1 %15526, %v1593_v56   ;;  %v16506_v55 = vld [vmem:[#allocation6 + $0x80] sm:$0x11] }
  0x3f   :  { %v16508_v56 = vld [vmem:[#allocation6 + $0xa0] sm:$0x11] }
  0x45   :  { %1629 = vperm.xlu2 %15527, %v1598_v57  }
  0x46   :  { %1621 = vperm.xlu0 %15525, %v1596_v58   ;;  %1625 = vperm.xlu1 %15526, %v1597_v59   ;;  %v16510_v58 = vld [vmem:[#allocation6 + $0xc0] sm:$0x11] }
  0x47   :  { %v16512_v59 = vld [vmem:[#allocation6 + $0xe0] sm:$0x11] }
  0x4d   :  { %2410 = vperm.xlu2 %15527, %v2394_v60  }
  0x4e   :  { %2402 = vperm.xlu0 %15525, %v2392_v61   ;;  %2406 = vperm.xlu1 %15526, %v2393_v62   ;;  %v137_v61 = vunpack.c.l.bf16 %v16498_v50  ;;  %v141_v62 = vunpack.c.l.bf16 %v16500_v51 }
  0x55   :  { %2422 = vperm.xlu2 %15527, %v2397_v63   ;;  %v145_v63 = vunpack.c.l.bf16 %v16502_v52 }
  0x56   :  { %2418 = vperm.xlu0 %15525, %v2396_v0   ;;  %2414 = vperm.xlu1 %15526, %v2395_v1   ;;  %v149_v0 = vunpack.c.l.bf16 %v16504_v54  ;;  %v153_v1 = vunpack.c.l.bf16 %v16506_v55 }
  0x5d   :  { %3203 = vperm.xlu2 %15527, %v3193_v2   ;;  %v157_v2 = vunpack.c.l.bf16 %v16508_v56 }
  0x5e   :  { %2426 = vperm.xlu0 %15525, %v2398_v3   ;;  %2430 = vperm.xlu1 %15526, %v2399_v4   ;;  %v161_v3 = vunpack.c.l.bf16 %v16510_v58  ;;  %v165_v4 = vunpack.c.l.bf16 %v16512_v59 }
  0x65   :  { %3215 = vperm.xlu2 %15527, %v3196_v5   ;;  %v138_v5 = vunpack.c.h.bf16 %v16498_v50  ;;  %v5603_v50 = vld [vmem:[%s18748_s1 + $0x77] sm:$0x1] }
  0x66   :  { %3207 = vperm.xlu0 %15525, %v3194_v6   ;;  %3211 = vperm.xlu1 %15526, %v3195_v7   ;;  %v142_v6 = vunpack.c.h.bf16 %v16500_v51  ;;  %v5602_v7 = vld [vmem:[%s18748_s1 + $0x67] sm:$0x1] }
  0x67   :  { %v85_v29 = vpop.permute.xlu2 %84 }
  0x68   :  { %v107_v39 = vrot.slane %v85_v29, 4 }
  0x6d   :  { %3227 = vperm.xlu2 %15527, %v3199_v8   ;;  %v5600_v8 = vld [vmem:[%s18748_s1 + $0x47] sm:$0x1] }
  0x6e   :  { %3223 = vperm.xlu0 %15525, %v3198_v9   ;;  %3219 = vperm.xlu1 %15526, %v3197_v10  }
  0x6f   :  { %v89_v41 = vpop.permute.xlu2 %88 }
  0x70   :  { %v110_v42 = vrot.slane %v89_v41, 3 }
  0x75   :  { %4008 = vperm.xlu2 %15527, %v3995_v11   ;;  %v146_v11 = vunpack.c.h.bf16 %v16502_v52 }
  0x76   :  { %3231 = vperm.xlu0 %15525, %v3200_v12   ;;  %4004 = vperm.xlu1 %15526, %v3994_v13   ;;  %v150_v12 = vunpack.c.h.bf16 %v16504_v54  ;;  %v154_v13 = vunpack.c.h.bf16 %v16506_v55 }
  0x7d   :  { %4020 = vperm.xlu2 %15527, %v3998_v14   ;;  %v5601_v14 = vld [vmem:[%s18748_s1 + $0x57] sm:$0x1] }
  0x7e   :  { %4012 = vperm.xlu0 %15525, %v3996_v15   ;;  %4016 = vperm.xlu1 %15526, %v3997_v16  }
  0x80   :  { %v73_v23 = vpop.permute.xlu0 %72  ;;  %v69_v24 = vpop.permute.xlu1 %68 }
  0x81   :  { %v98_v28 = vrot.slane %v73_v23, 7 }
  0x83   :  { %v100_v32 = vsel %vm99_vm0, %v98_v28, %v69_v24  ;;  %v57_v24 = vld [vmem:[#allocation5] sm:$0xff] }
  0x85   :  { %4032 = vperm.xlu2 %15527, %v4001_v17  }
  0x86   :  { %4028 = vperm.xlu0 %15525, %v4000_v18   ;;  %4024 = vperm.xlu1 %15526, %v3999_v19  }
  0x88   :  { %v77_v30 = vpop.permute.xlu0 %76  ;;  %v81_v33 = vpop.permute.xlu1 %80 }
  0x89   :  { %v101_v31 = vrot.slane %v77_v30, 6  ;;  %v104_v36 = vrot.slane %v81_v33, 5 }
  0x8b   :  { %v103_v38 = vsel %vm102_vm1, %v101_v31, %v100_v32 }
  0x8c   :  { %v106_v40 = vsel %vm105_vm2, %v104_v36, %v103_v38  ;;  %v162_v36 = vunpack.c.h.bf16 %v16510_v58 }
  0x8d   :  { %4813 = vperm.xlu2 %15527, %v4797_v20   ;;  %v109_v43 = vsel %vm108_vm3, %v107_v39, %v106_v40  ;;  %v166_v40 = vunpack.c.h.bf16 %v16512_v59 }
  0x8e   :  { %4805 = vperm.xlu0 %15525, %v4795_v21   ;;  %4809 = vperm.xlu1 %15526, %v4796_v22   ;;  %v112_v49 = vsel %vm111_vm4, %v110_v42, %v109_v43 }
  0x90   :  { %v93_v46 = vpop.permute.xlu0 %92  ;;  %v97_v53 = vpop.permute.xlu1 %96 }
  0x91   :  { %v113_v48 = vrot.slane %v93_v46, 2  ;;  %v116_v57 = vrot.slane %v97_v53, 1 }
  0x93   :  { %v115_v60 = vsel %vm114_vm5, %v113_v48, %v112_v49 }
  0x94   :  { %v118_v9 = vsel %vm117_vm6, %v116_v57, %v115_v60 }
  0x95   :  { %4825 = vperm.xlu2 %15527, %v4800_v25  }
  0x96   :  { %4817 = vperm.xlu0 %15525, %v4798_v26   ;;  %4821 = vperm.xlu1 %15526, %v4799_v27  }
  0x9d   :  { %5606 = vperm.xlu2 %15527, %v5596_v34  }
  0x9e   :  { %4833 = vperm.xlu0 %15525, %v4802_v35   ;;  %4829 = vperm.xlu1 %15526, %v4801_v37   ;;  %v158_v35 = vunpack.c.h.bf16 %v16508_v56  ;;  %v16542_v37 = vmul.f32 %v118_v9, %v57_v24  ;;  %v15003_v24 = vld [vmem:[#allocation2 + $0xb0] sm:$0xff] }
  0xa0   :  { %v684_v9 = vrot.slane %v16542_v37, 3 }
  0xa5   :  { %5618 = vperm.xlu2 %15527, %v5599_v44  }
  0xa6   :  { %5610 = vperm.xlu0 %15525, %v5597_v45   ;;  %5614 = vperm.xlu1 %15526, %v5598_v47  }
  0xac   :  { %v243_v10 = vpop.f32.mrf.mxu0  ;;  %v16538_v19 = vpop.f32.mrf.mxu1 }
  0xad   :  { %v248_v15 = vrot.slane %v243_v10, 1  ;;  %v249_v16 = vrot.slane %v243_v10, 2  ;;  %v250_v17 = vrot.slane %v243_v10, 3  ;;  %v251_v18 = vrot.slane %v243_v10, 4  ;;  %5630 = vperm.xlu2 %15527, %v5602_v7  }
  0xae   :  { %v252_v20 = vrot.slane %v243_v10, 5  ;;  %v253_v21 = vrot.slane %v243_v10, 6  ;;  %v254_v22 = vrot.slane %v243_v10, 7  ;;  %v263_v23 = vadd.f32 %v243_v10, %v137_v61  ;;  %5622 = vperm.xlu0 %15525, %v5600_v8   ;;  %5626 = vperm.xlu1 %15526, %v5601_v14   ;;  %v16565_v10 = vld [vmem:[#allocation6 + $0x8] sm:$0x11] }
  0xaf   :  { %v264_v25 = vadd.f32 %v248_v15, %v141_v62  ;;  %v265_v26 = vadd.f32 %v249_v16, %v145_v63  ;;  %v266_v27 = vadd.f32 %v250_v17, %v149_v0  ;;  %v267_v28 = vadd.f32 %v251_v18, %v153_v1  ;;  %v14988_v63 = vld [vmem:[#allocation2 + $0x38] sm:$0xff] }
  0xb0   :  { %v268_v29 = vadd.f32 %v252_v20, %v157_v2  ;;  %v269_v30 = vadd.f32 %v253_v21, %v161_v3  ;;  %v270_v31 = vadd.f32 %v254_v22, %v165_v4  ;;  %v271_v32 = vmul.f32 0.5, %v263_v23  ;;  %v14996_v0 = vld [vmem:[#allocation2 + $0x78] sm:$0xff]  ;;  %1006 = vmatpush.bf16.msrb.mxu0 %v14988_v63  ;;  %v14987_v22 = vld [vmem:[#allocation2 + $0x30] sm:$0xff] }
  0xb1   :  { %v272_v33 = vmul.f32 0.5, %v264_v25  ;;  %v273_v34 = vmul.f32 0.5, %v265_v26  ;;  %v274_v38 = vmul.f32 0.5, %v266_v27  ;;  %v275_v39 = vmul.f32 0.5, %v267_v28  ;;  %v15004_v1 = vld [vmem:[#allocation2 + $0xb8] sm:$0xff]  ;;  %1139 = vmatpush.bf16.msrb.mxu1 %v14996_v0  ;;  %v14995_v23 = vld [vmem:[#allocation2 + $0x70] sm:$0xff] }
  0xb2   :  { %15528 = vtanh.f32 %v271_v32  ;;  %v382_v41 = vrot.slane %v16538_v19, 1  ;;  %v383_v42 = vrot.slane %v16538_v19, 2  ;;  %v384_v43 = vrot.slane %v16538_v19, 3  ;;  %v16570_v17 = vld [vmem:[#allocation6 + $0x48] sm:$0x11]  ;;  %1272 = vmatpush.bf16.msrb.mxu2 %v15004_v1  ;;  %v15011_v32 = vld [vmem:[#allocation2 + $0xf0] sm:$0xff] }
  0xb3   :  { %v16548_v44 = vpop.f32.mrf.mxu2  ;;  %v276_v45 = vmul.f32 0.5, %v268_v29  ;;  %v277_v46 = vmul.f32 0.5, %v269_v30  ;;  %v278_v47 = vmul.f32 0.5, %v270_v31  ;;  %15530 = vtanh.f32 %v272_v33  ;;  %v16550_v48 = vpop.f32.mrf.mxu3  ;;  %v16572_v18 = vld [vmem:[#allocation6 + $0x68] sm:$0x11] }
  0xb4   :  { %v245_v49 = vpop.f32.mrf.mxu0  ;;  %15532 = vtanh.f32 %v273_v34  ;;  %v385_v51 = vrot.slane %v16538_v19, 4  ;;  %v397_v52 = vadd.f32 %v16538_v19, %v138_v5  ;;  %v398_v53 = vadd.f32 %v382_v41, %v142_v6  ;;  %v379_v54 = vpop.f32.mrf.mxu1  ;;  %v15012_v5 = vld [vmem:[#allocation2 + $0xf8] sm:$0xff]  ;;  %1007 = vmatpush.bf16.msrb.mxu0 %v14987_v22 }
  0xb5   :  { %15534 = vtanh.f32 %v274_v38  ;;  %v386_v56 = vrot.slane %v16538_v19, 5  ;;  %v399_v57 = vadd.f32 %v383_v42, %v146_v11  ;;  %v400_v58 = vadd.f32 %v384_v43, %v150_v12  ;;  %v16567_v11 = vld [vmem:[#allocation6 + $0x28] sm:$0x11]  ;;  %1381 = vmatpush.bf16.msrb.mxu3 %v15012_v5  ;;  %1140 = vmatpush.bf16.msrb.mxu1 %v14995_v23 }
  0xb6   :  { %5634 = vperm.xlu0 %15525, %v5603_v50   ;;  %15536 = vtanh.f32 %v275_v39  ;;  %v387_v60 = vrot.slane %v16538_v19, 6  ;;  %v682_v61 = vrot.slane %v16542_v37, 1  ;;  %v683_v62 = vrot.slane %v16542_v37, 2  ;;  %v16578_v27 = vld [vmem:[#allocation6 + $0x88] sm:$0x11]  ;;  %1273 = vmatpush.bf16.msrb.mxu2 %v15003_v24  ;;  %v14986_v50 = vld [vmem:[#allocation2 + $0x28] sm:$0xff] }
  0xb7   :  { %15538 = vtanh.f32 %v276_v45  ;;  %v388_v2 = vrot.slane %v16538_v19, 7  ;;  %v405_v3 = vmul.f32 0.5, %v397_v52  ;;  %v406_v4 = vmul.f32 0.5, %v398_v53  ;;  %v16580_v28 = vld [vmem:[#allocation6 + $0xa8] sm:$0x11]  ;;  %v15002_v52 = vld [vmem:[#allocation2 + $0xa8] sm:$0xff] }
  0xb8   :  { %v15529_v6 = vpop.eup %15528  ;;  %15540 = vtanh.f32 %v277_v46  ;;  %v401_v7 = vadd.f32 %v385_v51, %v154_v13  ;;  %v407_v8 = vmul.f32 0.5, %v399_v57  ;;  %v402_v14 = vadd.f32 %v386_v56, %v158_v35  ;;  %v16586_v38 = vld [vmem:[#allocation6 + $0xe8] sm:$0x11]  ;;  %v14994_v51 = vld [vmem:[#allocation2 + $0x68] sm:$0xff]  ;;  %1008 = vmatpush.bf16.msrb.mxu0 %v14986_v50 }
  0xb9   :  { %v15531_v12 = vpop.eup %15530  ;;  %15542 = vtanh.f32 %v278_v47  ;;  %v408_v15 = vmul.f32 0.5, %v400_v58  ;;  %v685_v16 = vrot.slane %v16542_v37, 4  ;;  %v403_v13 = vadd.f32 %v387_v60, %v162_v36  ;;  %v16584_v36 = vld [vmem:[#allocation6 + $0xc8] sm:$0x11]  ;;  %1382 = vmatpush.bf16.msrb.mxu3 %v15011_v32  ;;  %v15010_v60 = vld [vmem:[#allocation2 + $0xe8] sm:$0xff]  ;;  %1141 = vmatpush.bf16.msrb.mxu1 %v14994_v51 }
  0xba   :  { %v15533_v55 = vpop.eup %15532  ;;  %15544 = vtanh.f32 %v405_v3  ;;  %v686_v19 = vrot.slane %v16542_v37, 5  ;;  %v687_v20 = vrot.slane %v16542_v37, 6  ;;  %v404_v26 = vadd.f32 %v388_v2, %v166_v40  ;;  %1274 = vmatpush.bf16.msrb.mxu2 %v15002_v52 }
  0xbb   :  { %v513_v21 = vpop.f32.mrf.mxu2  ;;  %v15535_v25 = vpop.eup %15534  ;;  %15546 = vtanh.f32 %v406_v4  ;;  %v139_v29 = vunpack.c.l.bf16 %v16565_v10  ;;  %v143_v30 = vunpack.c.l.bf16 %v16567_v11  ;;  %v287_v34 = vadd.f32 1.0, %v15529_v6 }
  0xbc   :  { %v623_v31 = vpop.f32.mrf.mxu3  ;;  %v15537_v33 = vpop.eup %15536  ;;  %v409_v35 = vmul.f32 0.5, %v401_v7  ;;  %15548 = vtanh.f32 %v407_v8  ;;  %v147_v59 = vunpack.c.l.bf16 %v16570_v17  ;;  %v288_v40 = vadd.f32 1.0, %v15531_v12 }
  0xbd   :  { %v15539_v39 = vpop.eup %15538  ;;  %v410_v41 = vmul.f32 0.5, %v402_v14  ;;  %15550 = vtanh.f32 %v408_v15  ;;  %v151_v42 = vunpack.c.l.bf16 %v16572_v18  ;;  %v289_v45 = vadd.f32 1.0, %v15533_v55  ;;  %1383 = vmatpush.bf16.msrb.mxu3 %v15010_v60  ;;  %v14985_v15 = vld [vmem:[#allocation2 + $0x20] sm:$0xff] }
  0xbe   :  { %v15541_v43 = vpop.eup %15540  ;;  %v411_v46 = vmul.f32 0.5, %v403_v13  ;;  %v155_v47 = vunpack.c.l.bf16 %v16578_v27  ;;  %v159_v49 = vunpack.c.l.bf16 %v16580_v28  ;;  %v290_v54 = vadd.f32 1.0, %v15535_v25  ;;  %v14993_v55 = vld [vmem:[#allocation2 + $0x60] sm:$0xff]  ;;  %1009 = vmatpush.bf16.msrb.mxu0 %v14985_v15 }
  0xbf   :  { %v15543_v53 = vpop.eup %15542  ;;  %v412_v56 = vmul.f32 0.5, %v404_v26  ;;  %v163_v57 = vunpack.c.l.bf16 %v16584_v36  ;;  %v167_v58 = vunpack.c.l.bf16 %v16586_v38  ;;  %v291_v0 = vadd.f32 1.0, %v15537_v33  ;;  %v15001_v13 = vld [vmem:[#allocation2 + $0xa0] sm:$0xff]  ;;  %1142 = vmatpush.bf16.msrb.mxu1 %v14993_v55 }
  0xc0   :  { %v15545_v63 = vpop.eup %15544  ;;  %v16594_v1 = vmul.f32 0.5, %v287_v34  ;;  %15552 = vtanh.f32 %v409_v35  ;;  %v516_v2 = vrot.slane %v16548_v44, 1  ;;  %v16597_v4 = vmul.f32 0.5, %v288_v40  ;;  %v15009_v26 = vld [vmem:[#allocation2 + $0xe0] sm:$0xff]  ;;  %v14984_v35 = vld [vmem:[#allocation2 + $0x18] sm:$0xff]  ;;  %1275 = vmatpush.bf16.msrb.mxu2 %v15001_v13 }
  0xc1   :  { %v15547_v3 = vpop.eup %15546  ;;  %15554 = vtanh.f32 %v410_v41  ;;  %v421_v5 = vadd.f32 1.0, %v15545_v63  ;;  %v517_v6 = vrot.slane %v16548_v44, 2  ;;  %v292_v8 = vadd.f32 1.0, %v15539_v39  ;;  %v14992_v39 = vld [vmem:[#allocation2 + $0x58] sm:$0xff]  ;;  %1384 = vmatpush.bf16.msrb.mxu3 %v15009_v26 }
  0xc2   :  { %v15549_v7 = vpop.eup %15548  ;;  %v16600_v12 = vmul.f32 0.5, %v289_v45  ;;  %15556 = vtanh.f32 %v411_v46  ;;  %v422_v14 = vadd.f32 1.0, %v15547_v3  ;;  %v293_v22 = vadd.f32 1.0, %v15541_v43  ;;  %v15000_v45 = vld [vmem:[#allocation2 + $0x98] sm:$0xff]  ;;  %1010 = vmatpush.bf16.msrb.mxu0 %v14984_v35  ;;  %v14983_v3 = vld [vmem:[#allocation2 + $0x10] sm:$0xff] }
  0xc3   :  { %v15551_v21 = vpop.eup %15550  ;;  %v16602_v23 = vmul.f32 0.5, %v290_v54  ;;  %v518_v24 = vrot.slane %v16548_v44, 3  ;;  %v531_v25 = vadd.f32 %v16548_v44, %v139_v29  ;;  %v16606_v31 = vmul.f32 0.5, %v291_v0  ;;  %v15008_v46 = vld [vmem:[#allocation2 + $0xd8] sm:$0xff]  ;;  %1143 = vmatpush.bf16.msrb.mxu1 %v14992_v39  ;;  %v14998_v39 = vld [vmem:[#allocation2 + $0x88] sm:$0xff] }
  0xc4   :  { %v423_v32 = vadd.f32 1.0, %v15549_v7  ;;  %v519_v33 = vrot.slane %v16548_v44, 4  ;;  %v532_v34 = vadd.f32 %v516_v2, %v143_v30  ;;  %v16611_v40 = vadd.f32 1.0, %v15543_v53  ;;  %1276 = vmatpush.bf16.msrb.mxu2 %v15000_v45 }
  0xc5   :  { %v429_v41 = vmul.f32 0.5, %v421_v5  ;;  %v520_v43 = vrot.slane %v16548_v44, 5  ;;  %v533_v29 = vadd.f32 %v517_v6, %v147_v59  ;;  %15558 = vtanh.f32 %v412_v56  ;;  %v14991_v5 = vld [vmem:[#allocation2 + $0x50] sm:$0xff]  ;;  %1385 = vmatpush.bf16.msrb.mxu3 %v15008_v46 }
  0xc6   :  { %v15553_v50 = vpop.eup %15552  ;;  %v424_v51 = vadd.f32 1.0, %v15551_v21  ;;  %v430_v30 = vmul.f32 0.5, %v422_v14  ;;  %v521_v52 = vrot.slane %v16548_v44, 6  ;;  %v16617_v60 = vmul.f32 0.5, %v292_v8  ;;  %v15007_v8 = vld [vmem:[#allocation2 + $0xd0] sm:$0xff]  ;;  %1011 = vmatpush.bf16.msrb.mxu0 %v14983_v3  ;;  %v15005_v3 = vld [vmem:[#allocation2 + $0xc0] sm:$0xff] }
  0xc7   :  { %v15555_v54 = vpop.eup %15554  ;;  %v522_v53 = vrot.slane %v16548_v44, 7  ;;  %v534_v63 = vadd.f32 %v518_v24, %v151_v42  ;;  %15560 = vtanh.f32 %v531_v25  ;;  %v16622_v0 = vmul.f32 0.5, %v293_v22  ;;  %v14999_v42 = vld [vmem:[#allocation2 + $0x90] sm:$0xff]  ;;  %1144 = vmatpush.bf16.msrb.mxu1 %v14991_v5 }
  0xc8   :  { %v15557_v59 = vpop.eup %15556  ;;  %v431_v2 = vmul.f32 0.5, %v423_v32  ;;  %v535_v56 = vadd.f32 %v519_v33, %v155_v47  ;;  %15562 = vtanh.f32 %v532_v34  ;;  %v425_v6 = vadd.f32 1.0, %v15553_v50  ;;  %1277 = vmatpush.bf16.msrb.mxu2 %v14999_v42 }
  0xc9   :  { %v697_v7 = vmul.f32 %v429_v41, %v16542_v37  ;;  %v536_v44 = vadd.f32 %v520_v43, %v159_v49  ;;  %15564 = vtanh.f32 %v533_v29  ;;  %v16629_v14 = vadd.f32 1.0, %v15555_v54  ;;  %1386 = vmatpush.bf16.msrb.mxu3 %v15007_v8  ;;  %v15006_v41 = vld [vmem:[#allocation2 + $0xc8] sm:$0xff] }
  0xca   :  { %v16631_v15 = vmul.f32 0.5, %v424_v51  ;;  %v698_v47 = vmul.f32 %v682_v61, %v430_v30  ;;  %v537_v55 = vadd.f32 %v521_v52, %v163_v57  ;;  %v16637_v13 = vadd.f32 1.0, %v15557_v59  ;;  %v14982_v57 = vld [vmem:[#allocation2 + $0x8] sm:$0xff] }
  0xcb   :  { %v538_v49 = vadd.f32 %v522_v53, %v167_v58  ;;  %15566 = vtanh.f32 %v534_v63  ;;  %v140_v21 = vunpack.c.h.bf16 %v16565_v10  ;;  %v15559_v22 = vpop.eup %15558  ;;  %v699_v24 = vmul.f32 %v683_v62, %v431_v2  ;;  %v14990_v62 = vld [vmem:[#allocation2 + $0x48] sm:$0xff]  ;;  %1012 = vmatpush.bf16.msrb.mxu0 %v14982_v57 }
  0xcc   :  { %15568 = vtanh.f32 %v535_v56  ;;  %v144_v25 = vunpack.c.h.bf16 %v16567_v11  ;;  %v148_v61 = vunpack.c.h.bf16 %v16570_v17  ;;  %v152_v32 = vunpack.c.h.bf16 %v16572_v18  ;;  %1145 = vmatpush.bf16.msrb.mxu1 %v14990_v62  ;;  %1278 = vmatpush.bf16.msrb.mxu2 %v14998_v39  ;;  %v14997_v56 = vld [vmem:[#allocation2 + $0x80] sm:$0xff] }
  0xcd   :  { %v15561_v26 = vpop.eup %15560  ;;  %v626_v58 = vrot.slane %v16550_v48, 1  ;;  %v627_v33 = vrot.slane %v16550_v48, 2  ;;  %v628_v10 = vrot.slane %v16550_v48, 3  ;;  %15570 = vtanh.f32 %v536_v44  ;;  %1387 = vmatpush.bf16.msrb.mxu3 %v15006_v41 }
  0xce   :  { %v15563_v34 = vpop.eup %15562  ;;  %v705_v11 = vmul.f32 %v15561_v26, %v16594_v1  ;;  %v156_v17 = vunpack.c.h.bf16 %v16578_v27  ;;  %v629_v35 = vrot.slane %v16550_v48, 4  ;;  %v160_v29 = vunpack.c.h.bf16 %v16580_v28  ;;  %v14981_v27 = vld [vmem:[#allocation2] sm:$0xff] }
  0xcf   :  { %v15565_v18 = vpop.eup %15564  ;;  %v706_v43 = vmul.f32 %v15563_v34, %v16597_v4  ;;  %v630_v45 = vrot.slane %v16550_v48, 5  ;;  %v641_v46 = vadd.f32 %v16550_v48, %v140_v21  ;;  %v642_v1 = vadd.f32 %v626_v58, %v144_v25  ;;  %v14989_v28 = vld [vmem:[#allocation2 + $0x40] sm:$0xff]  ;;  %1013 = vmatpush.bf16.msrb.mxu0 %v14981_v27 }
  0xd0   :  { %v707_v50 = vmul.f32 %v15565_v18, %v16600_v12  ;;  %v16658_v51 = vadd.f32 %v705_v11, %v697_v7  ;;  %v643_v30 = vadd.f32 %v627_v33, %v148_v61  ;;  %v433_v54 = vmul.f32 0.5, %v425_v6  ;;  %1146 = vmatpush.bf16.msrb.mxu1 %v14989_v28  ;;  %1279 = vmatpush.bf16.msrb.mxu2 %v14997_v56 }
  0xd1   :  { %v15567_v52 = vpop.eup %15566  ;;  %15572 = vtanh.f32 %v537_v55  ;;  %v16660_v53 = vadd.f32 %v706_v43, %v698_v47  ;;  %v644_v4 = vadd.f32 %v628_v10, %v152_v32  ;;  %v428_v59 = vadd.f32 1.0, %v15559_v22  ;;  %1388 = vmatpush.bf16.msrb.mxu3 %v15005_v3 }
  0xd2   :  { %v15569_v63 = vpop.eup %15568  ;;  %15574 = vtanh.f32 %v538_v49  ;;  %v16662_v2 = vadd.f32 %v707_v50, %v699_v24  ;;  %v645_v12 = vadd.f32 %v629_v35, %v156_v17  ;;  %v164_v5 = vunpack.c.h.bf16 %v16584_v36 }
  0xd3   :  { %15576 = vtanh.f32 %v16658_v51  ;;  %v631_v6 = vrot.slane %v16550_v48, 6  ;;  %v646_v7 = vadd.f32 %v630_v45, %v160_v29  ;;  %v15571_v44 = vpop.eup %15570  ;;  %v649_v42 = vmul.f32 0.5, %v641_v46 }
  0xd4   :  { %15578 = vtanh.f32 %v16660_v53  ;;  %v650_v8 = vmul.f32 0.5, %v642_v1  ;;  %v651_v47 = vmul.f32 0.5, %v643_v30  ;;  %v434_v55 = vmul.f32 0.5, %v16629_v14 }
  0xd5   :  { %v700_v49 = vmul.f32 %v684_v9, %v16631_v15  ;;  %15580 = vtanh.f32 %v16662_v2  ;;  %v652_v21 = vmul.f32 0.5, %v644_v4  ;;  %v435_v36 = vmul.f32 0.5, %v16637_v13 }
  0xd6   :  { %v708_v22 = vmul.f32 %v15567_v52, %v16602_v23  ;;  %v653_v24 = vmul.f32 0.5, %v645_v12  ;;  %15582 = vtanh.f32 %v649_v42  ;;  %v302_v61 = vmul.f32 0.5, %v16611_v40 }
  0xd7   :  { %v15573_v25 = vpop.eup %15572  ;;  %v647_v14 = vadd.f32 %v631_v6, %v164_v5  ;;  %v654_v57 = vmul.f32 0.5, %v646_v7  ;;  %15584 = vtanh.f32 %v650_v8  ;;  %v701_v9 = vmul.f32 %v685_v16, %v433_v54 }
  0xd8   :  { %v15575_v26 = vpop.eup %15574  ;;  %v709_v15 = vmul.f32 %v15569_v63, %v16606_v31  ;;  %v632_v13 = vrot.slane %v16550_v48, 7  ;;  %15586 = vtanh.f32 %v651_v47  ;;  %v436_v32 = vmul.f32 0.5, %v428_v59 }
  0xd9   :  { %v15577_v23 = vpop.eup %15576  ;;  %v702_v58 = vmul.f32 %v686_v19, %v434_v55  ;;  %v710_v33 = vmul.f32 %v15571_v44, %v16617_v60  ;;  %15588 = vtanh.f32 %v652_v21  ;;  %v703_v10 = vmul.f32 %v687_v20, %v435_v36 }
  0xda   :  { %v15579_v40 = vpop.eup %15578  ;;  %v16685_v62 = vadd.f32 %v708_v22, %v700_v49  ;;  %15590 = vtanh.f32 %v653_v24  ;;  %v168_v16 = vunpack.c.h.bf16 %v16586_v38  ;;  %v655_v48 = vmul.f32 0.5, %v647_v14 }
  0xdb   :  { %v15581_v31 = vpop.eup %15580  ;;  %15592 = vtanh.f32 %v654_v57  ;;  %v688_v34 = vrot.slane %v16542_v37, 7  ;;  %v711_v11 = vmul.f32 %v15573_v25, %v16622_v0  ;;  %v712_v60 = vmul.f32 %v15575_v26, %v302_v61 }
  0xdc   :  { %v15583_v19 = vpop.eup %15582  ;;  %v648_v17 = vadd.f32 %v632_v13, %v168_v16  ;;  %v16690_v35 = vadd.f32 %v709_v15, %v701_v9  ;;  %15594 = vtanh.f32 %v655_v48  ;;  %v16692_v18 = vadd.f32 %v710_v33, %v702_v58 }
  0xdd   :  { %v15585_v39 = vpop.eup %15584  ;;  %v665_v41 = vadd.f32 1.0, %v15583_v19  ;;  %v704_v20 = vmul.f32 %v688_v34, %v436_v32  ;;  %v16694_v45 = vadd.f32 %v711_v11, %v703_v10  ;;  %15596 = vtanh.f32 %v16685_v62 }
  0xde   :  { %v15587_v43 = vpop.eup %15586  ;;  %v666_v38 = vadd.f32 1.0, %v15585_v39  ;;  %v656_v29 = vmul.f32 0.5, %v648_v17  ;;  %15598 = vtanh.f32 %v16690_v35 }
  0xdf   :  { %v15589_v37 = vpop.eup %15588  ;;  %v667_v0 = vadd.f32 1.0, %v15587_v43  ;;  %v673_v46 = vmul.f32 0.5, %v665_v41  ;;  %v16697_v50 = vadd.f32 %v712_v60, %v704_v20 }
  0xe0   :  { %v15591_v1 = vpop.eup %15590  ;;  %v668_v30 = vadd.f32 1.0, %v15589_v37  ;;  %v674_v27 = vmul.f32 0.5, %v666_v38  ;;  %15600 = vtanh.f32 %v656_v29 }
  0xe1   :  { %v15593_v52 = vpop.eup %15592  ;;  %v675_v54 = vmul.f32 0.5, %v667_v0  ;;  %v729_v4 = vmul.f32 %v15577_v23, %v673_v46  ;;  %v669_v28 = vadd.f32 1.0, %v15591_v1  ;;  %15602 = vtanh.f32 %v16692_v18 }
  0xe2   :  { %v676_v63 = vmul.f32 0.5, %v668_v30  ;;  %v730_v59 = vmul.f32 %v15579_v40, %v674_v27  ;;  %v670_v12 = vadd.f32 1.0, %v15593_v52  ;;  %15604 = vtanh.f32 %v16694_v45  ;;  %v15595_v56 = vpop.eup %15594 }
  0xe3   :  { %790 = vst [vmem:[#allocation9] sm:$0x1] %v729_v4  ;;  %v677_v3 = vmul.f32 0.5, %v669_v28  ;;  %15606 = vtanh.f32 %v16697_v50  ;;  %v731_v5 = vmul.f32 %v15581_v31, %v675_v54  ;;  %v15597_v6 = vpop.eup %15596  ;;  %v671_v7 = vadd.f32 1.0, %v15595_v56  ;;  %v819_v54 = vpop.permute.xlu0 %818 }
  0xe4   :  { %791 = vst [vmem:[#allocation9 + $0x10] sm:$0x1] %v730_v59  ;;  %v678_v44 = vmul.f32 0.5, %v670_v12  ;;  %v902_v42 = vpack.c.bf16 %v729_v4, %v729_v4  ;;  %v903_v8 = vpack.c.bf16 %v730_v59, %v730_v59  ;;  %v15599_v47 = vpop.eup %15598  ;;  %v732_v55 = vmul.f32 %v15597_v6, %v676_v63  ;;  %v809_v4 = vpop.permute.xlu2 %808 }
  0xe5   :  { %792 = vst [vmem:[#allocation9 + $0x20] sm:$0x1] %v731_v5  ;;  %v904_v49 = vpack.c.bf16 %v731_v5, %v731_v5  ;;  %v679_v36 = vmul.f32 0.5, %v671_v7  ;;  %v733_v22 = vmul.f32 %v15599_v47, %v677_v3  ;;  %v814_v59 = vpop.permute.xlu1 %813  ;;  %v16714_v3 = vmul.f32 %v809_v4, %v16658_v51 }
  0xe6   :  { %v15601_v21 = vpop.eup %15600  ;;  %v935_v24 = vunpack.c.l.b16 %v903_v8  ;;  %793 = vst [vmem:[#allocation9 + $0x30] sm:$0x1] %v732_v55  ;;  %v905_v14 = vpack.c.bf16 %v732_v55, %v732_v55  ;;  %v934_v13 = vunpack.c.l.b16 %v902_v42  ;;  %v16717_v5 = vmul.f32 %v814_v59, %v16660_v53  ;;  %v16738_v55 = vld [vmem:[#allocation6 + $0x20] sm:$0x11] }
  0xe7   :  { %v15603_v25 = vpop.eup %15602  ;;  %v672_v61 = vadd.f32 1.0, %v15601_v21  ;;  %v936_v57 = vunpack.c.l.b16 %v904_v49  ;;  %794 = vst [vmem:[#allocation9 + $0x40] sm:$0x1] %v733_v22  ;;  %v906_v15 = vpack.c.bf16 %v733_v22, %v733_v22  ;;  %v16720_v6 = vmul.f32 %v819_v54, %v16662_v2  ;;  %v16736_v2 = vld [vmem:[#allocation6] sm:$0x11] }
  0xe8   :  { %v15605_v26 = vpop.eup %15604  ;;  %v734_v9 = vmul.f32 %v15603_v25, %v678_v44  ;;  %v942_v23 = vrot.slane %v935_v24, 7  ;;  %v937_v40 = vunpack.c.l.b16 %v905_v14  ;;  %v16742_v21 = vld [vmem:[#allocation6 + $0x40] sm:$0x11] }
  0xe9   :  { %v15607_v32 = vpop.eup %15606  ;;  %v680_v58 = vmul.f32 0.5, %v672_v61  ;;  %v735_v33 = vmul.f32 %v15605_v26, %v679_v36  ;;  %v944_v10 = vrot.slane %v936_v57, 6  ;;  %v938_v31 = vunpack.c.l.b16 %v906_v15  ;;  %v16746_v36 = vld [vmem:[#allocation6 + $0x80] sm:$0x11] }
  0xea   :  { %795 = vst [vmem:[#allocation9 + $0x50] sm:$0x1] %v734_v9  ;;  %v907_v16 = vpack.c.bf16 %v734_v9, %v734_v9  ;;  %v943_v48 = vsel %vm99_vm0, %v942_v23, %v934_v13  ;;  %v946_v17 = vrot.slane %v937_v40, 5  ;;  %v16752_v22 = vld [vmem:[#allocation6 + $0xe0] sm:$0x11]  ;;  %v870_v57 = vunpack.c.l.bf16 %v16736_v2 }
  0xeb   :  { %v736_v34 = vmul.f32 %v15607_v32, %v680_v58  ;;  %796 = vst [vmem:[#allocation9 + $0x60] sm:$0x1] %v735_v33  ;;  %v908_v11 = vpack.c.bf16 %v735_v33, %v735_v33  ;;  %v945_v19 = vsel %vm102_vm1, %v944_v10, %v943_v48  ;;  %v948_v39 = vrot.slane %v938_v31, 4  ;;  %v829_v28 = vpop.permute.xlu0 %828  ;;  %v16762_v13 = vld [vmem:[#allocation6 + $0x28] sm:$0x11] }
  0xec   :  { %v939_v60 = vunpack.c.l.b16 %v907_v16  ;;  %v947_v43 = vsel %vm105_vm2, %v946_v17, %v945_v19  ;;  %v824_v63 = vpop.permute.xlu2 %823  ;;  %v874_v26 = vunpack.c.l.bf16 %v16738_v55  ;;  %v878_v9 = vunpack.c.l.bf16 %v16742_v21  ;;  %v16768_v40 = vld [vmem:[#allocation6 + $0x8] sm:$0x11] }
  0xed   :  { %797 = vst [vmem:[#allocation9 + $0x70] sm:$0x1] %v736_v34  ;;  %v909_v41 = vpack.c.bf16 %v736_v34, %v736_v34  ;;  %v940_v20 = vunpack.c.l.b16 %v908_v11  ;;  %v949_v38 = vsel %vm108_vm3, %v948_v39, %v947_v43  ;;  %v834_v44 = vpop.permute.xlu1 %833  ;;  %v16727_v47 = vmul.f32 %v824_v63, %v16685_v62  ;;  %v16744_v62 = vld [vmem:[#allocation6 + $0x60] sm:$0x11]  ;;  %v16770_v10 = vld [vmem:[#allocation6 + $0x48] sm:$0x11] }
  0xee   :  { %v950_v29 = vrot.slane %v939_v60, 3  ;;  %v16733_v51 = vmul.f32 %v834_v44, %v16692_v18  ;;  %v16750_v18 = vld [vmem:[#allocation6 + $0xc0] sm:$0x11]  ;;  %v882_v15 = vunpack.c.l.bf16 %v16744_v62  ;;  %v886_v23 = vunpack.c.l.bf16 %v16746_v36  ;;  %v16772_v16 = vld [vmem:[#allocation6 + $0x68] sm:$0x11] }
  0xef   :  { %v941_v37 = vunpack.c.l.b16 %v909_v41  ;;  %v952_v0 = vrot.slane %v940_v20, 2  ;;  %v894_v58 = vunpack.c.l.bf16 %v16750_v18  ;;  %v898_v33 = vunpack.c.l.bf16 %v16752_v22  ;;  %v16778_v19 = vld [vmem:[#allocation6 + $0x88] sm:$0x11] }
  0xf0   :  { %v951_v46 = vsel %vm111_vm4, %v950_v29, %v949_v38  ;;  %v871_v31 = vunpack.c.h.bf16 %v16736_v2  ;;  %v875_v48 = vunpack.c.h.bf16 %v16738_v55  ;;  %v879_v34 = vunpack.c.h.bf16 %v16742_v21  ;;  %v16780_v17 = vld [vmem:[#allocation6 + $0xa8] sm:$0x11] }
  0xf1   :  { %v953_v1 = vsel %vm114_vm5, %v952_v0, %v951_v46  ;;  %v954_v30 = vrot.slane %v941_v37, 1  ;;  %v883_v11 = vunpack.c.h.bf16 %v16744_v62  ;;  %v16782_v60 = vld [vmem:[#allocation6 + $0xc8] sm:$0x11]  ;;  %v887_v39 = vunpack.c.h.bf16 %v16746_v36 }
  0xf2   :  { %v895_v20 = vunpack.c.h.bf16 %v16750_v18  ;;  %v899_v43 = vunpack.c.h.bf16 %v16752_v22  ;;  %v872_v38 = vunpack.c.l.bf16 %v16768_v40  ;;  %v876_v29 = vunpack.c.l.bf16 %v16762_v13  ;;  %v16798_v55 = vld [vmem:[#allocation6 + $0xe8] sm:$0x11] }
  0xf3   :  { %v955_v27 = vsel %vm117_vm6, %v954_v30, %v953_v1  ;;  %v844_v12 = vpop.permute.xlu0 %843  ;;  %v880_v37 = vunpack.c.l.bf16 %v16770_v10  ;;  %v884_v0 = vunpack.c.l.bf16 %v16772_v16 }
  0xf4   :  { %v956_v52 = vpack.c.b16 %v955_v27, %v955_v27  ;;  %v16711_v56 = vmul.f32 %v844_v12, %v16697_v50  ;;  %v839_v7 = vpop.permute.xlu2 %838  ;;  %v16730_v50 = vmul.f32 %v829_v28, %v16690_v35  ;;  %v16748_v35 = vld [vmem:[#allocation6 + $0xa0] sm:$0x11] }
  0xf5   :  { %v16723_v42 = vmul.f32 %v839_v7, %v16694_v45  ;;  %v890_v32 = vunpack.c.l.bf16 %v16748_v35  ;;  %v891_v41 = vunpack.c.h.bf16 %v16748_v35  ;;  %v900_v45 = vunpack.c.l.bf16 %v16798_v55 }
  0xf6   :  { %1014 = vmatmul.bf16.vlgmr.msrb.gmra.mxu0 %v956_v52  ;;  %1147 = vmatmul.bf16.vlgmr.msrb.gmra.mxu1 %v956_v52 }
  0xf7   :  { %1280 = vmatmul.bf16.vlgmr.msrb.gmra.mxu2 %v956_v52  ;;  %1389 = vmatmul.bf16.vlgmr.msrb.gmra.mxu3 %v956_v52 }
 0x173   :  { %v1015_v46 = vpop.f32.mrf.mxu0  ;;  %v16792_v1 = vpop.f32.mrf.mxu1 }
 0x174   :  { %v1020_v4 = vrot.slane %v1015_v46, 7  ;;  %v1021_v28 = vrot.slane %v1015_v46, 1  ;;  %v1022_v63 = vrot.slane %v1015_v46, 2  ;;  %v1023_v59 = vrot.slane %v1015_v46, 3 }
 0x175   :  { %v1024_v12 = vrot.slane %v1015_v46, 4  ;;  %v1025_v7 = vrot.slane %v1015_v46, 5  ;;  %v1026_v44 = vrot.slane %v1015_v46, 6  ;;  %v1036_v2 = vadd.f32 %v1015_v46, %v874_v26 }
 0x176   :  { %v1035_v21 = vadd.f32 %v1020_v4, %v870_v57  ;;  %v1037_v62 = vadd.f32 %v1021_v28, %v878_v9  ;;  %v1038_v36 = vadd.f32 %v1022_v63, %v882_v15  ;;  %v1039_v8 = vadd.f32 %v1023_v59, %v886_v23 }
 0x177   :  { %v1040_v14 = vadd.f32 %v1024_v12, %v890_v32  ;;  %v1041_v61 = vadd.f32 %v1025_v7, %v894_v58  ;;  %v1042_v25 = vadd.f32 %v1026_v44, %v898_v33  ;;  %v1044_v24 = vmul.f32 0.5, %v1036_v2  ;;  %v15044_v2 = vld [vmem:[#allocation2 + $0xf8] sm:$0xff] }
 0x178   :  { %v1043_v49 = vmul.f32 0.5, %v1035_v21  ;;  %v1045_v54 = vmul.f32 0.5, %v1037_v62  ;;  %v1046_v52 = vmul.f32 0.5, %v1038_v36  ;;  %v1047_v53 = vmul.f32 0.5, %v1039_v8  ;;  %2182 = vmatpush.bf16.msra.mxu3 %v15044_v2 }
 0x179   :  { %v1048_v27 = vmul.f32 0.5, %v1040_v14  ;;  %v1049_v30 = vmul.f32 0.5, %v1041_v61  ;;  %15608 = vtanh.f32 %v1044_v24  ;;  %v1153_v26 = vrot.slane %v16792_v1, 7 }
 0x17a   :  { %15610 = vtanh.f32 %v1043_v49  ;;  %v1154_v57 = vrot.slane %v16792_v1, 1  ;;  %v1155_v9 = vrot.slane %v16792_v1, 2  ;;  %v16804_v15 = vpop.f32.mrf.mxu2  ;;  %v16806_v23 = vpop.f32.mrf.mxu3  ;;  %v1050_v32 = vmul.f32 0.5, %v1042_v25 }
 0x17b   :  { %15612 = vtanh.f32 %v1045_v54  ;;  %v1156_v58 = vrot.slane %v16792_v1, 3  ;;  %v1157_v8 = vrot.slane %v16792_v1, 4  ;;  %v1017_v14 = vpop.f32.mrf.mxu0  ;;  %v1150_v61 = vpop.f32.mrf.mxu1  ;;  %v1158_v49 = vrot.slane %v16792_v1, 5 }
 0x17c   :  { %15614 = vtanh.f32 %v1046_v52  ;;  %v1168_v24 = vadd.f32 %v1153_v26, %v871_v31  ;;  %v1169_v33 = vadd.f32 %v16792_v1, %v875_v48  ;;  %v1159_v46 = vrot.slane %v16792_v1, 6  ;;  %v15028_v1 = vld [vmem:[#allocation2 + $0x78] sm:$0xff]  ;;  %v15019_v61 = vld [vmem:[#allocation2 + $0x30] sm:$0xff] }
 0x17d   :  { %15616 = vtanh.f32 %v1047_v53  ;;  %v1170_v4 = vadd.f32 %v1154_v57, %v879_v34  ;;  %v1171_v28 = vadd.f32 %v1155_v9, %v883_v11  ;;  %v1172_v25 = vadd.f32 %v1156_v58, %v887_v39  ;;  %v15020_v39 = vld [vmem:[#allocation2 + $0x38] sm:$0xff]  ;;  %1940 = vmatpush.bf16.msra.mxu1 %v15028_v1 }
 0x17e   :  { %15618 = vtanh.f32 %v1048_v27  ;;  %v873_v54 = vunpack.c.h.bf16 %v16768_v40  ;;  %v881_v63 = vunpack.c.h.bf16 %v16770_v10  ;;  %v1173_v52 = vadd.f32 %v1157_v8, %v891_v41  ;;  %v15036_v27 = vld [vmem:[#allocation2 + $0xb8] sm:$0xff]  ;;  %1807 = vmatpush.bf16.msra.mxu0 %v15020_v39 }
 0x17f   :  { %v15609_v59 = vpop.eup %15608  ;;  %15620 = vtanh.f32 %v1049_v30  ;;  %v1176_v12 = vmul.f32 0.5, %v1168_v24  ;;  %v1177_v31 = vmul.f32 0.5, %v1169_v33  ;;  %v1174_v53 = vadd.f32 %v1158_v49, %v895_v20  ;;  %2073 = vmatpush.bf16.msra.mxu2 %v15036_v27  ;;  %v15027_v49 = vld [vmem:[#allocation2 + $0x70] sm:$0xff] }
 0x180   :  { %v15611_v7 = vpop.eup %15610  ;;  %v1178_v48 = vmul.f32 0.5, %v1170_v4  ;;  %v885_v34 = vunpack.c.h.bf16 %v16772_v16  ;;  %v889_v11 = vunpack.c.h.bf16 %v16778_v19  ;;  %15622 = vtanh.f32 %v1050_v32  ;;  %v15035_v24 = vld [vmem:[#allocation2 + $0xb0] sm:$0xff] }
 0x181   :  { %v15613_v44 = vpop.eup %15612  ;;  %v1060_v30 = vadd.f32 1.0, %v15609_v59  ;;  %v1175_v35 = vadd.f32 %v1159_v46, %v899_v43  ;;  %v1179_v41 = vmul.f32 0.5, %v1171_v28  ;;  %v1059_v62 = vadd.f32 1.0, %v15611_v7  ;;  %1941 = vmatpush.bf16.msra.mxu1 %v15027_v49 }
 0x182   :  { %v15615_v21 = vpop.eup %15614  ;;  %v1061_v18 = vadd.f32 1.0, %v15613_v44  ;;  %v1180_v20 = vmul.f32 0.5, %v1172_v25  ;;  %15624 = vtanh.f32 %v1176_v12  ;;  %v1283_v36 = vpop.f32.mrf.mxu2  ;;  %v1181_v58 = vmul.f32 0.5, %v1173_v52  ;;  %v15043_v25 = vld [vmem:[#allocation2 + $0xf0] sm:$0xff]  ;;  %1808 = vmatpush.bf16.msra.mxu0 %v15019_v61 }
 0x183   :  { %v1392_v26 = vpop.f32.mrf.mxu3  ;;  %v15617_v57 = vpop.eup %15616  ;;  %v1062_v9 = vadd.f32 1.0, %v15615_v21  ;;  %15626 = vtanh.f32 %v1177_v31  ;;  %v893_v32 = vunpack.c.h.bf16 %v16780_v17  ;;  %v1182_v43 = vmul.f32 0.5, %v1174_v53  ;;  %2074 = vmatpush.bf16.msra.mxu2 %v15035_v24  ;;  %2183 = vmatpush.bf16.msra.mxu3 %v15043_v25  ;;  %v15033_v24 = vld [vmem:[#allocation2 + $0xa0] sm:$0xff] }
 0x184   :  { %v15619_v22 = vpop.eup %15618  ;;  %15628 = vtanh.f32 %v1178_v48  ;;  %v1286_v8 = vrot.slane %v16804_v15, 7  ;;  %v897_v14 = vunpack.c.h.bf16 %v16782_v60  ;;  %v1063_v46 = vadd.f32 1.0, %v15617_v57 }
 0x185   :  { %v15621_v33 = vpop.eup %15620  ;;  %v16826_v4 = vmul.f32 0.5, %v1060_v30  ;;  %v1183_v28 = vmul.f32 0.5, %v1175_v35  ;;  %15630 = vtanh.f32 %v1179_v41  ;;  %v16828_v59 = vmul.f32 0.5, %v1059_v62  ;;  %v15018_v30 = vld [vmem:[#allocation2 + $0x28] sm:$0xff] }
 0x186   :  { %v16830_v52 = vmul.f32 0.5, %v1061_v18  ;;  %15632 = vtanh.f32 %v1180_v20  ;;  %v1287_v12 = vrot.slane %v16804_v15, 1  ;;  %v15623_v31 = vpop.eup %15622  ;;  %v1064_v7 = vadd.f32 1.0, %v15619_v22  ;;  %v15026_v35 = vld [vmem:[#allocation2 + $0x68] sm:$0xff]  ;;  %1809 = vmatpush.bf16.msra.mxu0 %v15018_v30  ;;  %v15025_v22 = vld [vmem:[#allocation2 + $0x60] sm:$0xff] }
 0x187   :  { %v16833_v53 = vmul.f32 0.5, %v1062_v9  ;;  %15634 = vtanh.f32 %v1181_v58  ;;  %v1288_v48 = vrot.slane %v16804_v15, 2  ;;  %v1065_v1 = vadd.f32 1.0, %v15621_v33  ;;  %v15034_v41 = vld [vmem:[#allocation2 + $0xa8] sm:$0xff]  ;;  %1942 = vmatpush.bf16.msra.mxu1 %v15026_v35  ;;  %v15017_v58 = vld [vmem:[#allocation2 + $0x20] sm:$0xff] }
 0x188   :  { %v15625_v39 = vpop.eup %15624  ;;  %15636 = vtanh.f32 %v1182_v43  ;;  %v1289_v27 = vrot.slane %v16804_v15, 3  ;;  %v1301_v44 = vadd.f32 %v1286_v8, %v872_v38  ;;  %v16839_v21 = vmul.f32 0.5, %v1063_v46  ;;  %v15042_v20 = vld [vmem:[#allocation2 + $0xe8] sm:$0xff]  ;;  %2075 = vmatpush.bf16.msra.mxu2 %v15034_v41  ;;  %v15041_v33 = vld [vmem:[#allocation2 + $0xe0] sm:$0xff]  ;;  %v15016_v41 = vld [vmem:[#allocation2 + $0x18] sm:$0xff] }
 0x189   :  { %v15627_v2 = vpop.eup %15626  ;;  %15638 = vtanh.f32 %v1183_v28  ;;  %v1192_v62 = vadd.f32 1.0, %v15625_v39  ;;  %v1302_v18 = vadd.f32 %v16804_v15, %v876_v29  ;;  %v1066_v26 = vadd.f32 1.0, %v15623_v31  ;;  %2184 = vmatpush.bf16.msra.mxu3 %v15042_v20 }
 0x18a   :  { %v15629_v36 = vpop.eup %15628  ;;  %v1193_v57 = vadd.f32 1.0, %v15627_v2  ;;  %v1290_v9 = vrot.slane %v16804_v15, 4  ;;  %v1303_v38 = vadd.f32 %v1287_v12, %v880_v37  ;;  %v1291_v61 = vrot.slane %v16804_v15, 5  ;;  %1810 = vmatpush.bf16.msra.mxu0 %v15017_v58 }
 0x18b   :  { %v15631_v43 = vpop.eup %15630  ;;  %v1194_v8 = vadd.f32 1.0, %v15629_v36  ;;  %v1292_v49 = vrot.slane %v16804_v15, 6  ;;  %v1304_v29 = vadd.f32 %v1288_v48, %v884_v0  ;;  %v1200_v37 = vmul.f32 0.5, %v1192_v62  ;;  %1943 = vmatpush.bf16.msra.mxu1 %v15025_v22  ;;  %v15024_v62 = vld [vmem:[#allocation2 + $0x58] sm:$0xff] }
 0x18c   :  { %v15633_v46 = vpop.eup %15632  ;;  %v1195_v28 = vadd.f32 1.0, %v15631_v43  ;;  %v1201_v25 = vmul.f32 0.5, %v1193_v57  ;;  %15640 = vtanh.f32 %v1301_v44  ;;  %v16851_v31 = vmul.f32 0.5, %v1064_v7  ;;  %2076 = vmatpush.bf16.msra.mxu2 %v15033_v24 }
 0x18d   :  { %v15635_v12 = vpop.eup %15634  ;;  %v1196_v39 = vadd.f32 1.0, %v15633_v46  ;;  %v1202_v30 = vmul.f32 0.5, %v1194_v8  ;;  %15642 = vtanh.f32 %v1302_v18  ;;  %v16853_v15 = vmul.f32 0.5, %v1065_v1  ;;  %2185 = vmatpush.bf16.msra.mxu3 %v15041_v33  ;;  %v15032_v1 = vld [vmem:[#allocation2 + $0x98] sm:$0xff] }
 0x18e   :  { %v15637_v35 = vpop.eup %15636  ;;  %v1197_v2 = vadd.f32 1.0, %v15635_v12  ;;  %v18752_v0 = vunpack.c.l.bf16 %v16778_v19  ;;  %15644 = vtanh.f32 %v1303_v38  ;;  %v16857_v44 = vmul.f32 0.5, %v1066_v26  ;;  %v15040_v18 = vld [vmem:[#allocation2 + $0xd8] sm:$0xff]  ;;  %1811 = vmatpush.bf16.msra.mxu0 %v15016_v41  ;;  %v15013_v19 = vld [vmem:[#allocation2] sm:$0xff] }
 0x18f   :  { %v15639_v20 = vpop.eup %15638  ;;  %v1203_v7 = vmul.f32 0.5, %v1195_v28  ;;  %v18753_v36 = vunpack.c.l.bf16 %v16780_v17  ;;  %15646 = vtanh.f32 %v1304_v29  ;;  %v18754_v43 = vrot.slane %v16714_v3, 7  ;;  %1944 = vmatpush.bf16.msra.mxu1 %v15024_v62  ;;  %v15029_v17 = vld [vmem:[#allocation2 + $0x80] sm:$0xff] }
 0x190   :  { %v1305_v48 = vadd.f32 %v1289_v27, %v18752_v0  ;;  %v18755_v38 = vrot.slane %v16717_v5, 7  ;;  %v18756_v22 = vunpack.c.l.bf16 %v16782_v60  ;;  %v1308_v26 = vadd.f32 %v1292_v49, %v900_v45  ;;  %2077 = vmatpush.bf16.msra.mxu2 %v15032_v1 }
 0x191   :  { %v1306_v57 = vadd.f32 %v1290_v9, %v18753_v36  ;;  %v1474_v27 = vmul.f32 %v18754_v43, %v1200_v37  ;;  %v1198_v46 = vadd.f32 1.0, %v15637_v35  ;;  %v1204_v28 = vmul.f32 0.5, %v1196_v39  ;;  %2186 = vmatpush.bf16.msra.mxu3 %v15040_v18  ;;  %v15023_v39 = vld [vmem:[#allocation2 + $0x50] sm:$0xff]  ;;  %v15014_v18 = vld [vmem:[#allocation2 + $0x8] sm:$0xff] }
 0x192   :  { %v1475_v58 = vmul.f32 %v18755_v38, %v1201_v25  ;;  %v1307_v8 = vadd.f32 %v1291_v61, %v18756_v22  ;;  %v18757_v9 = vrot.slane %v16720_v6, 7  ;;  %v1395_v24 = vrot.slane %v16806_v23, 7  ;;  %v15641_v33 = vpop.eup %15640  ;;  %v15015_v61 = vld [vmem:[#allocation2 + $0x10] sm:$0xff] }
 0x193   :  { %v1199_v12 = vadd.f32 1.0, %v15639_v20  ;;  %v16872_v3 = vmul.f32 0.5, %v1197_v2  ;;  %15648 = vtanh.f32 %v1305_v48  ;;  %v1396_v5 = vrot.slane %v16806_v23, 1  ;;  %v15643_v37 = vpop.eup %15642  ;;  %1812 = vmatpush.bf16.msra.mxu0 %v15015_v61  ;;  %1945 = vmatpush.bf16.msra.mxu1 %v15023_v39  ;;  %v15037_v61 = vld [vmem:[#allocation2 + $0xc0] sm:$0xff] }
 0x194   :  { %v1476_v29 = vmul.f32 %v18757_v9, %v1202_v30  ;;  %v18758_v45 = vrot.slane %v16727_v47, 7  ;;  %15650 = vtanh.f32 %v1306_v57  ;;  %v1482_v6 = vmul.f32 %v15641_v33, %v16828_v59  ;;  %v15031_v30 = vld [vmem:[#allocation2 + $0x90] sm:$0xff]  ;;  %v15645_v35 = vpop.eup %15644 }
 0x195   :  { %v1397_v25 = vrot.slane %v16806_v23, 2  ;;  %15652 = vtanh.f32 %v1307_v8  ;;  %v1483_v2 = vmul.f32 %v15643_v37, %v16826_v4  ;;  %v1398_v0 = vrot.slane %v16806_v23, 3  ;;  %v15039_v47 = vld [vmem:[#allocation2 + $0xd0] sm:$0xff]  ;;  %v15647_v41 = vpop.eup %15646  ;;  %2078 = vmatpush.bf16.msra.mxu2 %v15031_v30 }
 0x196   :  { %v16877_v49 = vmul.f32 %v18758_v45, %v1203_v7  ;;  %v1399_v48 = vrot.slane %v16806_v23, 4  ;;  %v1484_v62 = vmul.f32 %v15645_v35, %v16830_v52  ;;  %v16885_v20 = vadd.f32 %v1482_v6, %v1474_v27  ;;  %2187 = vmatpush.bf16.msra.mxu3 %v15039_v47 }
 0x197   :  { %v1400_v59 = vrot.slane %v16806_v23, 5  ;;  %v1410_v7 = vadd.f32 %v1395_v24, %v873_v54  ;;  %15654 = vtanh.f32 %v1308_v26  ;;  %v16890_v36 = vadd.f32 %v1483_v2, %v1475_v58  ;;  %v15022_v54 = vld [vmem:[#allocation2 + $0x48] sm:$0xff]  ;;  %1813 = vmatpush.bf16.msra.mxu0 %v15014_v18 }
 0x198   :  { %v18759_v4 = vunpack.c.h.bf16 %v16762_v13  ;;  %v1412_v1 = vadd.f32 %v1396_v5, %v881_v63  ;;  %v1206_v52 = vmul.f32 0.5, %v1198_v46  ;;  %v18760_v43 = vrot.slane %v16730_v50, 7  ;;  %v15030_v13 = vld [vmem:[#allocation2 + $0x88] sm:$0xff]  ;;  %1946 = vmatpush.bf16.msra.mxu1 %v15022_v54 }
 0x199   :  { %v16899_v38 = vadd.f32 %v1484_v62, %v1476_v29  ;;  %v1413_v40 = vadd.f32 %v1397_v25, %v885_v34  ;;  %v15649_v58 = vpop.eup %15648  ;;  %v1485_v22 = vmul.f32 %v15647_v41, %v16833_v53  ;;  %15656 = vtanh.f32 %v16885_v20  ;;  %v15038_v63 = vld [vmem:[#allocation2 + $0xc8] sm:$0xff]  ;;  %2079 = vmatpush.bf16.msra.mxu2 %v15030_v13  ;;  %v15021_v29 = vld [vmem:[#allocation2 + $0x40] sm:$0xff] }
 0x19a   :  { %v1411_v57 = vadd.f32 %v16806_v23, %v18759_v4  ;;  %v1478_v27 = vmul.f32 %v18760_v43, %v1204_v28  ;;  %v1401_v10 = vrot.slane %v16806_v23, 6  ;;  %v1414_v50 = vadd.f32 %v1398_v0, %v889_v11  ;;  %v15651_v8 = vpop.eup %15650  ;;  %2188 = vmatpush.bf16.msra.mxu3 %v15038_v63 }
 0x19b   :  { %15658 = vtanh.f32 %v16890_v36  ;;  %v1415_v16 = vadd.f32 %v1399_v48, %v893_v32  ;;  %v1416_v34 = vadd.f32 %v1400_v59, %v897_v14  ;;  %v1418_v26 = vmul.f32 0.5, %v1410_v7  ;;  %v15653_v53 = vpop.eup %15652  ;;  %1814 = vmatpush.bf16.msra.mxu0 %v15013_v19 }
 0x19c   :  { %15660 = vtanh.f32 %v16899_v38  ;;  %v1419_v46 = vmul.f32 0.5, %v1411_v57  ;;  %v1420_v23 = vmul.f32 0.5, %v1412_v1  ;;  %v1421_v28 = vmul.f32 0.5, %v1413_v40  ;;  %1947 = vmatpush.bf16.msra.mxu1 %v15021_v29 }
 0x19d   :  { %v1207_v11 = vmul.f32 0.5, %v1199_v12  ;;  %v1422_v9 = vmul.f32 0.5, %v1414_v50  ;;  %15662 = vtanh.f32 %v1418_v26  ;;  %v901_v32 = vunpack.c.h.bf16 %v16798_v55  ;;  %v15655_v60 = vpop.eup %15654  ;;  %2080 = vmatpush.bf16.msra.mxu2 %v15029_v17 }
 0x19e   :  { %v18761_v14 = vrot.slane %v16733_v51, 7  ;;  %v1486_v33 = vmul.f32 %v15649_v58, %v16839_v21  ;;  %v1423_v5 = vmul.f32 0.5, %v1415_v16  ;;  %15664 = vtanh.f32 %v1419_v46  ;;  %2189 = vmatpush.bf16.msra.mxu3 %v15037_v61 }
 0x19f   :  { %v1487_v12 = vmul.f32 %v15651_v8, %v16851_v31  ;;  %15666 = vtanh.f32 %v1420_v23  ;;  %v1417_v37 = vadd.f32 %v1401_v10, %v901_v32  ;;  %v1424_v45 = vmul.f32 0.5, %v1416_v34  ;;  %v15657_v6 = vpop.eup %15656 }
 0x1a0   :  { %v1479_v24 = vmul.f32 %v18761_v14, %v16872_v3  ;;  %v18762_v25 = vrot.slane %v16723_v42, 7  ;;  %v16923_v39 = vadd.f32 %v1485_v22, %v16877_v49  ;;  %15668 = vtanh.f32 %v1421_v28 }
 0x1a1   :  { %v1488_v51 = vmul.f32 %v15653_v53, %v16853_v15  ;;  %v15659_v21 = vpop.eup %15658  ;;  %15670 = vtanh.f32 %v1422_v9  ;;  %v1425_v3 = vmul.f32 0.5, %v1417_v37  ;;  %v18763_v31 = vrot.slane %v16711_v56, 7 }
 0x1a2   :  { %v1480_v55 = vmul.f32 %v18762_v25, %v1206_v52  ;;  %v1489_v35 = vmul.f32 %v15655_v60, %v16857_v44  ;;  %v15661_v2 = vpop.eup %15660  ;;  %15672 = vtanh.f32 %v1423_v5  ;;  %v16929_v42 = vadd.f32 %v1486_v33, %v1478_v27 }
 0x1a3   :  { %v1481_v30 = vmul.f32 %v18763_v31, %v1207_v11  ;;  %v15663_v49 = vpop.eup %15662  ;;  %15674 = vtanh.f32 %v1424_v45  ;;  %v16931_v0 = vadd.f32 %v1487_v12, %v1479_v24 }
 0x1a4   :  { %v15665_v15 = vpop.eup %15664  ;;  %v1434_v48 = vadd.f32 1.0, %v15663_v49  ;;  %15676 = vtanh.f32 %v1425_v3  ;;  %v16933_v47 = vadd.f32 %v1488_v51, %v1480_v55 }
 0x1a5   :  { %v15667_v41 = vpop.eup %15666  ;;  %v1435_v62 = vadd.f32 1.0, %v15665_v15  ;;  %v16935_v56 = vadd.f32 %v1489_v35, %v1481_v30  ;;  %15678 = vtanh.f32 %v16923_v39 }
 0x1a6   :  { %v15669_v44 = vpop.eup %15668  ;;  %v1436_v59 = vadd.f32 1.0, %v15667_v41  ;;  %v1442_v7 = vmul.f32 0.5, %v1434_v48  ;;  %15680 = vtanh.f32 %v16929_v42 }
 0x1a7   :  { %v15671_v4 = vpop.eup %15670  ;;  %v1437_v57 = vadd.f32 1.0, %v15669_v44  ;;  %v1443_v1 = vmul.f32 0.5, %v1435_v62  ;;  %15682 = vtanh.f32 %v16931_v0 }
 0x1a8   :  { %v15673_v18 = vpop.eup %15672  ;;  %v1444_v52 = vmul.f32 0.5, %v1436_v59  ;;  %v1506_v43 = vmul.f32 %v15657_v6, %v1442_v7  ;;  %v1438_v27 = vadd.f32 1.0, %v15671_v4  ;;  %15684 = vtanh.f32 %v16933_v47 }
 0x1a9   :  { %v15675_v40 = vpop.eup %15674  ;;  %v1507_v54 = vmul.f32 %v15659_v21, %v1443_v1  ;;  %v1439_v13 = vadd.f32 1.0, %v15673_v18  ;;  %15686 = vtanh.f32 %v16935_v56  ;;  %v1445_v22 = vmul.f32 0.5, %v1437_v57 }
 0x1aa   :  { %v15677_v58 = vpop.eup %15676  ;;  %1583 = vst [vmem:[#allocation9] sm:$0x2] %v1506_v43  ;;  %v1440_v10 = vadd.f32 1.0, %v15675_v40  ;;  %v1508_v50 = vmul.f32 %v15661_v2, %v1444_v52  ;;  %v1703_v63 = vpack.c.bf16 %v1506_v43, %v1506_v43  ;;  %v1446_v34 = vmul.f32 0.5, %v1438_v27  ;;  %v1606_v52 = vpop.permute.xlu2 %1605 }
 0x1ab   :  { %v15679_v8 = vpop.eup %15678  ;;  %1584 = vst [vmem:[#allocation9 + $0x10] sm:$0x2] %v1507_v54  ;;  %v1441_v16 = vadd.f32 1.0, %v15677_v58  ;;  %v1704_v26 = vpack.c.bf16 %v1507_v54, %v1507_v54  ;;  %v1447_v46 = vmul.f32 0.5, %v1439_v13  ;;  %v1602_v43 = vpop.permute.xlu1 %1601 }
 0x1ac   :  { %v15681_v53 = vpop.eup %15680  ;;  %v1509_v23 = vmul.f32 %v15679_v8, %v1445_v22  ;;  %1585 = vst [vmem:[#allocation9 + $0x20] sm:$0x2] %v1508_v50  ;;  %v1705_v28 = vpack.c.bf16 %v1508_v50, %v1508_v50  ;;  %v1735_v19 = vunpack.c.l.b16 %v1703_v63  ;;  %v1448_v9 = vmul.f32 0.5, %v1440_v10  ;;  %v1614_v40 = vpop.permute.xlu0 %1613 }
 0x1ad   :  { %v15683_v11 = vpop.eup %15682  ;;  %v1449_v29 = vmul.f32 0.5, %v1441_v16  ;;  %v1510_v17 = vmul.f32 %v15681_v53, %v1446_v34  ;;  %v1736_v32 = vunpack.c.l.b16 %v1704_v26  ;;  %v1631_v50 = vrot.slane %v1602_v43, 7 }
 0x1ae   :  { %v15685_v60 = vpop.eup %15684  ;;  %v1511_v14 = vmul.f32 %v15683_v11, %v1447_v46  ;;  %1586 = vst [vmem:[#allocation9 + $0x30] sm:$0x2] %v1509_v23  ;;  %v1706_v24 = vpack.c.bf16 %v1509_v23, %v1509_v23  ;;  %v1737_v33 = vunpack.c.l.b16 %v1705_v28  ;;  %v1743_v5 = vrot.slane %v1735_v19, 1  ;;  %v16955_v28 = vld [vmem:[#allocation6] sm:$0x22] }
 0x1af   :  { %v15687_v61 = vpop.eup %15686  ;;  %v1512_v12 = vmul.f32 %v15685_v60, %v1448_v9  ;;  %1587 = vst [vmem:[#allocation9 + $0x40] sm:$0x2] %v1510_v17  ;;  %v1707_v37 = vpack.c.bf16 %v1510_v17, %v1510_v17  ;;  %v1632_v63 = vrot.slane %v1606_v52, 7  ;;  %v1634_v16 = vrot.slane %v1614_v40, 7  ;;  %v16957_v19 = vld [vmem:[#allocation6 + $0x20] sm:$0x22] }
 0x1b0   :  { %v1513_v45 = vmul.f32 %v15687_v61, %v1449_v29  ;;  %1588 = vst [vmem:[#allocation9 + $0x50] sm:$0x2] %v1511_v14  ;;  %v1708_v6 = vpack.c.bf16 %v1511_v14, %v1511_v14  ;;  %v1738_v25 = vunpack.c.l.b16 %v1706_v24  ;;  %v1744_v55 = vsel %vm99_vm0, %v1736_v32, %v1743_v5  ;;  %v16979_v60 = vld [vmem:[#allocation6 + $0x60] sm:$0x22] }
 0x1b1   :  { %1589 = vst [vmem:[#allocation9 + $0x60] sm:$0x2] %v1512_v12  ;;  %v1709_v51 = vpack.c.bf16 %v1512_v12, %v1512_v12  ;;  %v1739_v21 = vunpack.c.l.b16 %v1707_v37  ;;  %v1745_v3 = vrot.slane %v1737_v33, 7  ;;  %v16953_v23 = vmul.f32 %v1631_v50, %v16885_v20  ;;  %v16974_v20 = vld [vmem:[#allocation6 + $0x40] sm:$0x22] }
 0x1b2   :  { %1590 = vst [vmem:[#allocation9 + $0x70] sm:$0x2] %v1513_v45  ;;  %v1710_v31 = vpack.c.bf16 %v1513_v45, %v1513_v45  ;;  %v1740_v30 = vunpack.c.l.b16 %v1708_v6  ;;  %v1747_v35 = vrot.slane %v1738_v25, 6  ;;  %v1618_v27 = vpop.permute.xlu2 %1617  ;;  %v16960_v11 = vmul.f32 %v1632_v63, %v16890_v36  ;;  %v16981_v36 = vld [vmem:[#allocation6 + $0x80] sm:$0x22] }
 0x1b3   :  { %v1741_v2 = vunpack.c.l.b16 %v1709_v51  ;;  %v1746_v49 = vsel %vm102_vm1, %v1745_v3, %v1744_v55  ;;  %v1749_v15 = vrot.slane %v1739_v21, 5  ;;  %v1610_v54 = vpop.permute.xlu1 %1609  ;;  %v1635_v8 = vrot.slane %v1618_v27, 7  ;;  %v16986_v14 = vld [vmem:[#allocation6 + $0xc0] sm:$0x22]  ;;  %v17001_v55 = vld [vmem:[#allocation6 + $0x8] sm:$0x22] }
 0x1b4   :  { %v1742_v48 = vunpack.c.l.b16 %v1710_v31  ;;  %v1748_v41 = vsel %vm105_vm2, %v1747_v35, %v1746_v49  ;;  %v1751_v62 = vrot.slane %v1740_v30, 4  ;;  %v1622_v58 = vpop.permute.xlu0 %1621  ;;  %v1633_v34 = vrot.slane %v1610_v54, 7  ;;  %v17003_v51 = vld [vmem:[#allocation6 + $0x48] sm:$0x22] }
 0x1b5   :  { %v1750_v44 = vsel %vm108_vm3, %v1749_v15, %v1748_v41  ;;  %v1753_v59 = vrot.slane %v1741_v2, 3  ;;  %v1636_v26 = vrot.slane %v1622_v58, 7  ;;  %v16966_v29 = vmul.f32 %v1634_v16, %v16923_v39  ;;  %v17009_v35 = vld [vmem:[#allocation6 + $0x28] sm:$0x22] }
 0x1b6   :  { %v1752_v7 = vsel %vm111_vm4, %v1751_v62, %v1750_v44  ;;  %v1755_v4 = vrot.slane %v1742_v48, 2  ;;  %v16963_v9 = vmul.f32 %v1633_v34, %v16899_v38  ;;  %v16969_v17 = vmul.f32 %v1635_v8, %v16929_v42  ;;  %v16983_v38 = vld [vmem:[#allocation6 + $0xa0] sm:$0x22]  ;;  %v17011_v2 = vld [vmem:[#allocation6 + $0x68] sm:$0x22] }
 0x1b7   :  { %v1754_v57 = vsel %vm114_vm5, %v1753_v59, %v1752_v7  ;;  %v16977_v32 = vmul.f32 %v1636_v26, %v16931_v0  ;;  %v16988_v42 = vld [vmem:[#allocation6 + $0xe0] sm:$0x22]  ;;  %v1675_v24 = vunpack.c.l.bf16 %v16957_v19  ;;  %v1679_v37 = vunpack.c.l.bf16 %v16974_v20  ;;  %v17013_v49 = vld [vmem:[#allocation6 + $0x88] sm:$0x22] }
 0x1b8   :  { %v1756_v1 = vsel %vm117_vm6, %v1755_v4, %v1754_v57  ;;  %v1683_v45 = vunpack.c.l.bf16 %v16979_v60  ;;  %v1687_v21 = vunpack.c.l.bf16 %v16981_v36  ;;  %v1691_v3 = vunpack.c.l.bf16 %v16983_v38  ;;  %v17019_v44 = vld [vmem:[#allocation6 + $0xa8] sm:$0x22] }
 0x1b9   :  { %v1757_v18 = vpack.c.b16 %v1756_v1, %v1756_v1  ;;  %v1695_v31 = vunpack.c.l.bf16 %v16986_v14  ;;  %v1699_v30 = vunpack.c.l.bf16 %v16988_v42  ;;  %v1672_v15 = vunpack.c.h.bf16 %v16955_v28  ;;  %v17021_v59 = vld [vmem:[#allocation6 + $0xc8] sm:$0x22] }
 0x1ba   :  { %v1630_v13 = vpop.permute.xlu2 %1629  ;;  %v1676_v48 = vunpack.c.h.bf16 %v16957_v19  ;;  %v1680_v41 = vunpack.c.h.bf16 %v16974_v20  ;;  %v1684_v62 = vunpack.c.h.bf16 %v16979_v60  ;;  %v17023_v7 = vld [vmem:[#allocation6 + $0xe8] sm:$0x22]  ;;  %v1688_v4 = vunpack.c.h.bf16 %v16981_v36 }
 0x1bb   :  { %1815 = vmatmul.bf16.vlgmr.msra.gmra.mxu0 %v1757_v18  ;;  %1948 = vmatmul.bf16.vlgmr.msra.gmra.mxu1 %v1757_v18  ;;  %v1626_v22 = vpop.permute.xlu1 %1625  ;;  %v1638_v10 = vrot.slane %v1630_v13, 7  ;;  %v1692_v57 = vunpack.c.h.bf16 %v16983_v38  ;;  %v1696_v1 = vunpack.c.h.bf16 %v16986_v14  ;;  %v1673_v52 = vunpack.c.l.bf16 %v17001_v55 }
 0x1bc   :  { %2081 = vmatmul.bf16.vlgmr.msra.gmra.mxu2 %v1757_v18  ;;  %2190 = vmatmul.bf16.vlgmr.msra.gmra.mxu3 %v1757_v18  ;;  %v1637_v53 = vrot.slane %v1626_v22, 7  ;;  %v1700_v18 = vunpack.c.h.bf16 %v16988_v42  ;;  %v1677_v43 = vunpack.c.l.bf16 %v17009_v35  ;;  %v1681_v27 = vunpack.c.l.bf16 %v17003_v51 }
 0x1bd   :  { %v16950_v46 = vmul.f32 %v1638_v10, %v16935_v56  ;;  %v1685_v40 = vunpack.c.l.bf16 %v17011_v2  ;;  %v1682_v50 = vunpack.c.h.bf16 %v17003_v51 }
 0x1be   :  { %v16972_v56 = vmul.f32 %v1637_v53, %v16933_v47  ;;  %v1671_v47 = vunpack.c.l.bf16 %v16955_v28 }
 0x238   :  { %v1816_v54 = vpop.f32.mrf.mxu0  ;;  %v17033_v13 = vpop.f32.mrf.mxu1 }
 0x239   :  { %v1821_v63 = vrot.slane %v1816_v54, 6  ;;  %v1822_v8 = vrot.slane %v1816_v54, 7  ;;  %v1823_v16 = vrot.slane %v1816_v54, 1  ;;  %v1824_v34 = vrot.slane %v1816_v54, 2 }
 0x23a   :  { %v1825_v26 = vrot.slane %v1816_v54, 3  ;;  %v1826_v53 = vrot.slane %v1816_v54, 4  ;;  %v1827_v28 = vrot.slane %v1816_v54, 5  ;;  %v1838_v19 = vadd.f32 %v1816_v54, %v1679_v37 }
 0x23b   :  { %v1836_v20 = vadd.f32 %v1821_v63, %v1671_v47  ;;  %v1837_v60 = vadd.f32 %v1822_v8, %v1675_v24  ;;  %v1839_v36 = vadd.f32 %v1823_v16, %v1683_v45  ;;  %v1840_v39 = vadd.f32 %v1824_v34, %v1687_v21 }
 0x23c   :  { %v1841_v25 = vadd.f32 %v1825_v26, %v1691_v3  ;;  %v1842_v6 = vadd.f32 %v1826_v53, %v1695_v31  ;;  %v1843_v12 = vadd.f32 %v1827_v28, %v1699_v30  ;;  %v1846_v61 = vmul.f32 0.5, %v1838_v19  ;;  %v15076_v19 = vld [vmem:[#allocation2 + $0xf8] sm:$0xff] }
 0x23d   :  { %v1844_v5 = vmul.f32 0.5, %v1836_v20  ;;  %v1845_v10 = vmul.f32 0.5, %v1837_v60  ;;  %v1847_v0 = vmul.f32 0.5, %v1839_v36  ;;  %v1848_v33 = vmul.f32 0.5, %v1840_v39  ;;  %2983 = vmatpush.bf16.msrb.mxu3 %v15076_v19 }
 0x23e   :  { %v1849_v22 = vmul.f32 0.5, %v1841_v25  ;;  %v1850_v58 = vmul.f32 0.5, %v1842_v6  ;;  %15688 = vtanh.f32 %v1846_v61  ;;  %v1954_v37 = vrot.slane %v17033_v13, 6 }
 0x23f   :  { %15690 = vtanh.f32 %v1844_v5  ;;  %v1955_v47 = vrot.slane %v17033_v13, 7  ;;  %v1956_v24 = vrot.slane %v17033_v13, 1  ;;  %v17043_v45 = vpop.f32.mrf.mxu2  ;;  %v17045_v21 = vpop.f32.mrf.mxu3  ;;  %v1851_v3 = vmul.f32 0.5, %v1843_v12 }
 0x240   :  { %15692 = vtanh.f32 %v1845_v10  ;;  %v1957_v31 = vrot.slane %v17033_v13, 2  ;;  %v1958_v39 = vrot.slane %v17033_v13, 3  ;;  %v1818_v25 = vpop.f32.mrf.mxu0  ;;  %v1951_v6 = vpop.f32.mrf.mxu1  ;;  %v1959_v5 = vrot.slane %v17033_v13, 4 }
 0x241   :  { %15694 = vtanh.f32 %v1847_v0  ;;  %v1969_v61 = vadd.f32 %v1954_v37, %v1672_v15  ;;  %v1970_v30 = vadd.f32 %v1955_v47, %v1676_v48  ;;  %v1960_v54 = vrot.slane %v17033_v13, 5  ;;  %v15051_v6 = vld [vmem:[#allocation2 + $0x30] sm:$0xff] }
 0x242   :  { %15696 = vtanh.f32 %v1848_v33  ;;  %v1971_v63 = vadd.f32 %v17033_v13, %v1680_v41  ;;  %v1972_v8 = vadd.f32 %v1956_v24, %v1684_v62  ;;  %v1973_v12 = vadd.f32 %v1957_v31, %v1688_v4  ;;  %v15052_v4 = vld [vmem:[#allocation2 + $0x38] sm:$0xff] }
 0x243   :  { %15698 = vtanh.f32 %v1849_v22  ;;  %v1674_v10 = vunpack.c.h.bf16 %v17001_v55  ;;  %v1678_v16 = vunpack.c.h.bf16 %v17009_v35  ;;  %v1974_v0 = vadd.f32 %v1958_v39, %v1692_v57  ;;  %v15060_v13 = vld [vmem:[#allocation2 + $0x78] sm:$0xff]  ;;  %2608 = vmatpush.bf16.msrb.mxu0 %v15052_v4  ;;  %v15062_v35 = vld [vmem:[#allocation2 + $0x88] sm:$0xff] }
 0x244   :  { %v15689_v34 = vpop.eup %15688  ;;  %15700 = vtanh.f32 %v1850_v58  ;;  %v1977_v26 = vmul.f32 0.5, %v1969_v61  ;;  %v1978_v15 = vmul.f32 0.5, %v1970_v30  ;;  %v1975_v33 = vadd.f32 %v1959_v5, %v1696_v1  ;;  %v15068_v22 = vld [vmem:[#allocation2 + $0xb8] sm:$0xff]  ;;  %2741 = vmatpush.bf16.msrb.mxu1 %v15060_v13  ;;  %v15059_v5 = vld [vmem:[#allocation2 + $0x70] sm:$0xff] }
 0x245   :  { %v15691_v48 = vpop.eup %15690  ;;  %v1979_v53 = vmul.f32 0.5, %v1971_v63  ;;  %v1686_v41 = vunpack.c.h.bf16 %v17011_v2  ;;  %v1690_v62 = vunpack.c.h.bf16 %v17013_v49  ;;  %15702 = vtanh.f32 %v1851_v3  ;;  %2874 = vmatpush.bf16.msrb.mxu2 %v15068_v22  ;;  %v15067_v61 = vld [vmem:[#allocation2 + $0xb0] sm:$0xff] }
 0x246   :  { %v15693_v28 = vpop.eup %15692  ;;  %v1862_v58 = vadd.f32 1.0, %v15689_v34  ;;  %v1976_v38 = vadd.f32 %v1960_v54, %v1700_v18  ;;  %v1980_v57 = vmul.f32 0.5, %v1972_v8  ;;  %v1860_v60 = vadd.f32 1.0, %v15691_v48 }
 0x247   :  { %v15695_v20 = vpop.eup %15694  ;;  %v1861_v14 = vadd.f32 1.0, %v15693_v28  ;;  %v1981_v1 = vmul.f32 0.5, %v1973_v12  ;;  %15704 = vtanh.f32 %v1977_v26  ;;  %v2084_v36 = vpop.f32.mrf.mxu2  ;;  %v1982_v31 = vmul.f32 0.5, %v1974_v0  ;;  %v15075_v12 = vld [vmem:[#allocation2 + $0xf0] sm:$0xff]  ;;  %2609 = vmatpush.bf16.msrb.mxu0 %v15051_v6 }
 0x248   :  { %v2193_v37 = vpop.f32.mrf.mxu3  ;;  %v15697_v47 = vpop.eup %15696  ;;  %v1863_v24 = vadd.f32 1.0, %v15695_v20  ;;  %15706 = vtanh.f32 %v1978_v15  ;;  %v1694_v3 = vunpack.c.h.bf16 %v17019_v44  ;;  %v1983_v18 = vmul.f32 0.5, %v1975_v33  ;;  %2742 = vmatpush.bf16.msrb.mxu1 %v15059_v5  ;;  %2984 = vmatpush.bf16.msrb.mxu3 %v15075_v12 }
 0x249   :  { %v15699_v42 = vpop.eup %15698  ;;  %15708 = vtanh.f32 %v1979_v53  ;;  %v2087_v39 = vrot.slane %v17043_v45, 6  ;;  %v1698_v25 = vunpack.c.h.bf16 %v17021_v59  ;;  %v1864_v54 = vadd.f32 1.0, %v15697_v47  ;;  %2875 = vmatpush.bf16.msrb.mxu2 %v15067_v61  ;;  %v15065_v61 = vld [vmem:[#allocation2 + $0xa0] sm:$0xff] }
 0x24a   :  { %v15701_v30 = vpop.eup %15700  ;;  %v1984_v63 = vmul.f32 0.5, %v1976_v38  ;;  %15710 = vtanh.f32 %v1980_v57  ;;  %v2088_v8 = vrot.slane %v17043_v45, 7  ;;  %v17066_v34 = vmul.f32 0.5, %v1860_v60  ;;  %v15058_v38 = vld [vmem:[#allocation2 + $0x68] sm:$0xff] }
 0x24b   :  { %v17068_v0 = vmul.f32 0.5, %v1861_v14  ;;  %v17070_v26 = vmul.f32 0.5, %v1862_v58  ;;  %15712 = vtanh.f32 %v1981_v1  ;;  %v15703_v15 = vpop.eup %15702  ;;  %v1865_v48 = vadd.f32 1.0, %v15699_v42  ;;  %v15050_v58 = vld [vmem:[#allocation2 + $0x28] sm:$0xff]  ;;  %v15057_v42 = vld [vmem:[#allocation2 + $0x60] sm:$0xff] }
 0x24c   :  { %v17072_v33 = vmul.f32 0.5, %v1863_v24  ;;  %15714 = vtanh.f32 %v1982_v31  ;;  %v2089_v53 = vrot.slane %v17043_v45, 1  ;;  %v1866_v13 = vadd.f32 1.0, %v15701_v30  ;;  %v15066_v57 = vld [vmem:[#allocation2 + $0xa8] sm:$0xff]  ;;  %2610 = vmatpush.bf16.msrb.mxu0 %v15050_v58  ;;  %2743 = vmatpush.bf16.msrb.mxu1 %v15058_v38  ;;  %v15049_v31 = vld [vmem:[#allocation2 + $0x20] sm:$0xff] }
 0x24d   :  { %v15705_v4 = vpop.eup %15704  ;;  %15716 = vtanh.f32 %v1983_v18  ;;  %v2090_v22 = vrot.slane %v17043_v45, 2  ;;  %v2102_v28 = vadd.f32 %v2087_v39, %v1673_v52  ;;  %v17078_v20 = vmul.f32 0.5, %v1864_v54  ;;  %v15074_v1 = vld [vmem:[#allocation2 + $0xe8] sm:$0xff]  ;;  %2876 = vmatpush.bf16.msrb.mxu2 %v15066_v57  ;;  %v15073_v30 = vld [vmem:[#allocation2 + $0xe0] sm:$0xff]  ;;  %v15048_v57 = vld [vmem:[#allocation2 + $0x18] sm:$0xff] }
 0x24e   :  { %v15707_v19 = vpop.eup %15706  ;;  %15718 = vtanh.f32 %v1984_v63  ;;  %v1993_v60 = vadd.f32 1.0, %v15705_v4  ;;  %v2103_v14 = vadd.f32 %v2088_v8, %v1677_v43  ;;  %v1867_v37 = vadd.f32 1.0, %v15703_v15  ;;  %2985 = vmatpush.bf16.msrb.mxu3 %v15074_v1 }
 0x24f   :  { %v15709_v36 = vpop.eup %15708  ;;  %v1994_v47 = vadd.f32 1.0, %v15707_v19  ;;  %v2091_v24 = vrot.slane %v17043_v45, 3  ;;  %v2104_v52 = vadd.f32 %v17043_v45, %v1681_v27  ;;  %v2092_v6 = vrot.slane %v17043_v45, 4 }
 0x250   :  { %v15711_v18 = vpop.eup %15710  ;;  %v1995_v39 = vadd.f32 1.0, %v15709_v36  ;;  %v2093_v43 = vrot.slane %v17043_v45, 5  ;;  %v2105_v5 = vadd.f32 %v2089_v53, %v1685_v40  ;;  %v2001_v27 = vmul.f32 0.5, %v1993_v60  ;;  %2611 = vmatpush.bf16.msrb.mxu0 %v15049_v31  ;;  %2744 = vmatpush.bf16.msrb.mxu1 %v15057_v42  ;;  %v15056_v60 = vld [vmem:[#allocation2 + $0x58] sm:$0xff] }
 0x251   :  { %v15713_v54 = vpop.eup %15712  ;;  %v1996_v63 = vadd.f32 1.0, %v15711_v18  ;;  %v2002_v8 = vmul.f32 0.5, %v1994_v47  ;;  %15720 = vtanh.f32 %v2102_v28  ;;  %v17090_v15 = vmul.f32 0.5, %v1865_v48  ;;  %2877 = vmatpush.bf16.msrb.mxu2 %v15065_v61 }
 0x252   :  { %v15715_v12 = vpop.eup %15714  ;;  %v1997_v4 = vadd.f32 1.0, %v15713_v54  ;;  %v2003_v58 = vmul.f32 0.5, %v1995_v39  ;;  %15722 = vtanh.f32 %v2103_v14  ;;  %v17092_v45 = vmul.f32 0.5, %v1866_v13  ;;  %2986 = vmatpush.bf16.msrb.mxu3 %v15073_v30  ;;  %v15064_v13 = vld [vmem:[#allocation2 + $0x98] sm:$0xff] }
 0x253   :  { %v15717_v38 = vpop.eup %15716  ;;  %v1998_v19 = vadd.f32 1.0, %v15715_v12  ;;  %v18764_v40 = vunpack.c.l.bf16 %v17013_v49  ;;  %15724 = vtanh.f32 %v2104_v52  ;;  %v17096_v28 = vmul.f32 0.5, %v1867_v37  ;;  %v15072_v14 = vld [vmem:[#allocation2 + $0xd8] sm:$0xff]  ;;  %v15045_v49 = vld [vmem:[#allocation2] sm:$0xff] }
 0x254   :  { %v15719_v1 = vpop.eup %15718  ;;  %v2004_v48 = vmul.f32 0.5, %v1996_v63  ;;  %v18765_v36 = vunpack.c.l.bf16 %v17019_v44  ;;  %15726 = vtanh.f32 %v2105_v5  ;;  %v18766_v18 = vrot.slane %v16953_v23, 7  ;;  %2612 = vmatpush.bf16.msrb.mxu0 %v15048_v57  ;;  %2745 = vmatpush.bf16.msrb.mxu1 %v15056_v60  ;;  %v15061_v44 = vld [vmem:[#allocation2 + $0x80] sm:$0xff] }
 0x255   :  { %v2106_v53 = vadd.f32 %v2090_v22, %v18764_v40  ;;  %v18767_v52 = vrot.slane %v16960_v11, 7  ;;  %v18768_v42 = vunpack.c.l.bf16 %v17021_v59  ;;  %v18769_v37 = vunpack.c.l.bf16 %v17023_v7  ;;  %2878 = vmatpush.bf16.msrb.mxu2 %v15064_v13 }
 0x256   :  { %v2107_v47 = vadd.f32 %v2091_v24, %v18765_v36  ;;  %v2275_v22 = vmul.f32 %v18766_v18, %v2001_v27  ;;  %v1999_v63 = vadd.f32 1.0, %v15717_v38  ;;  %v2005_v12 = vmul.f32 0.5, %v1997_v4  ;;  %2987 = vmatpush.bf16.msrb.mxu3 %v15072_v14  ;;  %v15063_v38 = vld [vmem:[#allocation2 + $0x90] sm:$0xff]  ;;  %v15046_v18 = vld [vmem:[#allocation2 + $0x8] sm:$0xff] }
 0x257   :  { %v2276_v31 = vmul.f32 %v18767_v52, %v2002_v8  ;;  %v2108_v39 = vadd.f32 %v2092_v6, %v18768_v42  ;;  %v2109_v54 = vadd.f32 %v2093_v43, %v18769_v37  ;;  %v18770_v24 = vrot.slane %v16963_v9, 7  ;;  %v15721_v30 = vpop.eup %15720  ;;  %v15047_v6 = vld [vmem:[#allocation2 + $0x10] sm:$0xff] }
 0x258   :  { %v2196_v61 = vrot.slane %v17045_v21, 6  ;;  %v2000_v40 = vadd.f32 1.0, %v15719_v1  ;;  %v17111_v23 = vmul.f32 0.5, %v1998_v19  ;;  %15728 = vtanh.f32 %v2106_v53  ;;  %v15723_v27 = vpop.eup %15722  ;;  %2613 = vmatpush.bf16.msrb.mxu0 %v15047_v6 }
 0x259   :  { %v2277_v5 = vmul.f32 %v18770_v24, %v2003_v58  ;;  %v2197_v11 = vrot.slane %v17045_v21, 7  ;;  %v18771_v43 = vrot.slane %v16966_v29, 7  ;;  %15730 = vtanh.f32 %v2107_v47  ;;  %v15055_v58 = vld [vmem:[#allocation2 + $0x50] sm:$0xff]  ;;  %v15725_v19 = vpop.eup %15724  ;;  %2879 = vmatpush.bf16.msrb.mxu2 %v15063_v38  ;;  %v15053_v24 = vld [vmem:[#allocation2 + $0x40] sm:$0xff] }
 0x25a   :  { %v2283_v9 = vmul.f32 %v15721_v30, %v17066_v34  ;;  %v2198_v4 = vrot.slane %v17045_v21, 1  ;;  %15732 = vtanh.f32 %v2108_v39  ;;  %v2284_v53 = vmul.f32 %v15723_v27, %v17068_v0  ;;  %v15071_v29 = vld [vmem:[#allocation2 + $0xd0] sm:$0xff]  ;;  %v15727_v1 = vpop.eup %15726  ;;  %2746 = vmatpush.bf16.msrb.mxu1 %v15055_v58 }
 0x25b   :  { %v17116_v8 = vmul.f32 %v18771_v43, %v2004_v48  ;;  %v2199_v57 = vrot.slane %v17045_v21, 2  ;;  %v2200_v60 = vrot.slane %v17045_v21, 3  ;;  %v2285_v48 = vmul.f32 %v15725_v19, %v17070_v26  ;;  %2988 = vmatpush.bf16.msrb.mxu3 %v15071_v29 }
 0x25c   :  { %v17124_v36 = vadd.f32 %v2283_v9, %v2275_v22  ;;  %v2201_v34 = vrot.slane %v17045_v21, 4  ;;  %v2211_v47 = vadd.f32 %v2196_v61, %v1674_v10  ;;  %15734 = vtanh.f32 %v2109_v54  ;;  %v15054_v10 = vld [vmem:[#allocation2 + $0x48] sm:$0xff]  ;;  %2614 = vmatpush.bf16.msrb.mxu0 %v15046_v18 }
 0x25d   :  { %v17129_v13 = vadd.f32 %v2284_v53, %v2276_v31  ;;  %v2212_v0 = vadd.f32 %v2197_v11, %v1678_v16  ;;  %v2213_v14 = vadd.f32 %v17045_v21, %v1682_v50  ;;  %v2007_v26 = vmul.f32 0.5, %v1999_v63  ;;  %v15070_v31 = vld [vmem:[#allocation2 + $0xc8] sm:$0xff]  ;;  %2880 = vmatpush.bf16.msrb.mxu2 %v15062_v35  ;;  %v15069_v11 = vld [vmem:[#allocation2 + $0xc0] sm:$0xff] }
 0x25e   :  { %v18772_v22 = vrot.slane %v16969_v17, 7  ;;  %v17138_v42 = vadd.f32 %v2285_v48, %v2277_v5  ;;  %v2214_v55 = vadd.f32 %v2198_v4, %v1686_v41  ;;  %v15729_v16 = vpop.eup %15728  ;;  %v2286_v51 = vmul.f32 %v15727_v1, %v17072_v33  ;;  %2747 = vmatpush.bf16.msrb.mxu1 %v15054_v10 }
 0x25f   :  { %15736 = vtanh.f32 %v17124_v36  ;;  %v2202_v50 = vrot.slane %v17045_v21, 5  ;;  %v2215_v17 = vadd.f32 %v2199_v57, %v1690_v62  ;;  %v15731_v39 = vpop.eup %15730  ;;  %v2216_v2 = vadd.f32 %v2200_v60, %v1694_v3  ;;  %2989 = vmatpush.bf16.msrb.mxu3 %v15070_v31 }
 0x260   :  { %v2279_v52 = vmul.f32 %v18772_v22, %v2005_v12  ;;  %15738 = vtanh.f32 %v17129_v13  ;;  %v2217_v41 = vadd.f32 %v2201_v34, %v1698_v25  ;;  %v2219_v37 = vmul.f32 0.5, %v2211_v47  ;;  %v15733_v33 = vpop.eup %15732  ;;  %2615 = vmatpush.bf16.msrb.mxu0 %v15045_v49 }
 0x261   :  { %15740 = vtanh.f32 %v17138_v42  ;;  %v2220_v54 = vmul.f32 0.5, %v2212_v0  ;;  %v2221_v21 = vmul.f32 0.5, %v2213_v14  ;;  %v2222_v63 = vmul.f32 0.5, %v2214_v55  ;;  %2881 = vmatpush.bf16.msrb.mxu2 %v15061_v44 }
 0x262   :  { %v2008_v62 = vmul.f32 0.5, %v2000_v40  ;;  %v2223_v12 = vmul.f32 0.5, %v2215_v17  ;;  %15742 = vtanh.f32 %v2219_v37  ;;  %v1702_v3 = vunpack.c.h.bf16 %v17023_v7  ;;  %v15735_v59 = vpop.eup %15734  ;;  %2748 = vmatpush.bf16.msrb.mxu1 %v15053_v24 }
 0x263   :  { %v18773_v25 = vrot.slane %v16977_v32, 7  ;;  %v2287_v61 = vmul.f32 %v15729_v16, %v17078_v20  ;;  %v2224_v30 = vmul.f32 0.5, %v2216_v2  ;;  %15744 = vtanh.f32 %v2220_v54  ;;  %2990 = vmatpush.bf16.msrb.mxu3 %v15069_v11 }
 0x264   :  { %v2288_v40 = vmul.f32 %v15731_v39, %v17090_v15  ;;  %15746 = vtanh.f32 %v2221_v21  ;;  %v2218_v6 = vadd.f32 %v2202_v50, %v1702_v3  ;;  %v2225_v27 = vmul.f32 0.5, %v2217_v41 }
 0x265   :  { %v2280_v5 = vmul.f32 %v18773_v25, %v17111_v23  ;;  %v15737_v43 = vpop.eup %15736  ;;  %v18774_v9 = vrot.slane %v16972_v56, 7  ;;  %v17162_v4 = vadd.f32 %v2286_v51, %v17116_v8  ;;  %15748 = vtanh.f32 %v2222_v63 }
 0x266   :  { %v2289_v32 = vmul.f32 %v15733_v33, %v17092_v45  ;;  %v15739_v20 = vpop.eup %15738  ;;  %15750 = vtanh.f32 %v2223_v12  ;;  %v2226_v23 = vmul.f32 0.5, %v2218_v6  ;;  %v18775_v15 = vrot.slane %v16950_v46, 7 }
 0x267   :  { %v2281_v7 = vmul.f32 %v18774_v9, %v2007_v26  ;;  %v2290_v38 = vmul.f32 %v15735_v59, %v17096_v28  ;;  %v15741_v19 = vpop.eup %15740  ;;  %15752 = vtanh.f32 %v2224_v30  ;;  %v17168_v56 = vadd.f32 %v2287_v61, %v2279_v52 }
 0x268   :  { %v2282_v58 = vmul.f32 %v18775_v15, %v2008_v62  ;;  %v15743_v8 = vpop.eup %15742  ;;  %15754 = vtanh.f32 %v2225_v27  ;;  %v17170_v53 = vadd.f32 %v2288_v40, %v2280_v5 }
 0x269   :  { %v15745_v45 = vpop.eup %15744  ;;  %v2235_v57 = vadd.f32 1.0, %v15743_v8  ;;  %15756 = vtanh.f32 %v2226_v23  ;;  %v17172_v60 = vadd.f32 %v2289_v32, %v2281_v7 }
 0x26a   :  { %v15747_v29 = vpop.eup %15746  ;;  %v2236_v1 = vadd.f32 1.0, %v15745_v45  ;;  %v17174_v46 = vadd.f32 %v2290_v38, %v2282_v58  ;;  %15758 = vtanh.f32 %v17162_v4 }
 0x26b   :  { %v15749_v28 = vpop.eup %15748  ;;  %v2237_v48 = vadd.f32 1.0, %v15747_v29  ;;  %v2243_v34 = vmul.f32 0.5, %v2235_v57  ;;  %15760 = vtanh.f32 %v17168_v56 }
 0x26c   :  { %v15751_v47 = vpop.eup %15750  ;;  %v2238_v0 = vadd.f32 1.0, %v15749_v28  ;;  %v2244_v14 = vmul.f32 0.5, %v2236_v1  ;;  %15762 = vtanh.f32 %v17170_v53 }
 0x26d   :  { %v15753_v18 = vpop.eup %15752  ;;  %v2245_v26 = vmul.f32 0.5, %v2237_v48  ;;  %v2307_v22 = vmul.f32 %v15737_v43, %v2243_v34  ;;  %v2239_v52 = vadd.f32 1.0, %v15751_v47  ;;  %15764 = vtanh.f32 %v17172_v60 }
 0x26e   :  { %v15755_v55 = vpop.eup %15754  ;;  %v2308_v10 = vmul.f32 %v15739_v20, %v2244_v14  ;;  %v2240_v35 = vadd.f32 1.0, %v15753_v18  ;;  %15766 = vtanh.f32 %v17174_v46  ;;  %v2246_v51 = vmul.f32 0.5, %v2238_v0 }
 0x26f   :  { %v15757_v16 = vpop.eup %15756  ;;  %v2309_v50 = vmul.f32 %v15741_v19, %v2245_v26  ;;  %2384 = vst [vmem:[#allocation9] sm:$0x4] %v2307_v22  ;;  %v2241_v17 = vadd.f32 1.0, %v15755_v55  ;;  %v2504_v31 = vpack.c.bf16 %v2307_v22, %v2307_v22  ;;  %v2247_v41 = vmul.f32 0.5, %v2239_v52  ;;  %v2407_v26 = vpop.permute.xlu1 %2406 }
 0x270   :  { %v15759_v39 = vpop.eup %15758  ;;  %2385 = vst [vmem:[#allocation9 + $0x10] sm:$0x4] %v2308_v10  ;;  %v2242_v2 = vadd.f32 1.0, %v15757_v16  ;;  %v2505_v37 = vpack.c.bf16 %v2308_v10, %v2308_v10  ;;  %v2248_v54 = vmul.f32 0.5, %v2240_v35  ;;  %v2403_v22 = vpop.permute.xlu0 %2402 }
 0x271   :  { %v15761_v33 = vpop.eup %15760  ;;  %2386 = vst [vmem:[#allocation9 + $0x20] sm:$0x4] %v2309_v50  ;;  %v2310_v21 = vmul.f32 %v15759_v39, %v2246_v51  ;;  %v2506_v63 = vpack.c.bf16 %v2309_v50, %v2309_v50  ;;  %v2536_v49 = vunpack.c.l.b16 %v2504_v31  ;;  %v2249_v12 = vmul.f32 0.5, %v2241_v17  ;;  %v2411_v55 = vpop.permute.xlu2 %2410 }
 0x272   :  { %v15763_v62 = vpop.eup %15762  ;;  %v2311_v24 = vmul.f32 %v15761_v33, %v2247_v41  ;;  %v2537_v44 = vunpack.c.l.b16 %v2505_v37  ;;  %v2250_v59 = vmul.f32 0.5, %v2242_v2  ;;  %v2432_v50 = vrot.slane %v2403_v22, 6 }
 0x273   :  { %v15765_v3 = vpop.eup %15764  ;;  %v2312_v25 = vmul.f32 %v15763_v62, %v2248_v54  ;;  %2387 = vst [vmem:[#allocation9 + $0x30] sm:$0x4] %v2310_v21  ;;  %v2507_v5 = vpack.c.bf16 %v2310_v21, %v2310_v21  ;;  %v2544_v61 = vrot.slane %v2536_v49, 2  ;;  %v2538_v9 = vunpack.c.l.b16 %v2506_v63  ;;  %v17194_v63 = vld [vmem:[#allocation6] sm:$0x22] }
 0x274   :  { %v15767_v30 = vpop.eup %15766  ;;  %v2313_v11 = vmul.f32 %v15765_v3, %v2249_v12  ;;  %2388 = vst [vmem:[#allocation9 + $0x40] sm:$0x4] %v2311_v24  ;;  %v2508_v40 = vpack.c.bf16 %v2311_v24, %v2311_v24  ;;  %v2545_v6 = vrot.slane %v2537_v44, 1  ;;  %v2434_v31 = vrot.slane %v2411_v55, 6  ;;  %v17196_v49 = vld [vmem:[#allocation6 + $0x20] sm:$0x22] }
 0x275   :  { %v2314_v27 = vmul.f32 %v15767_v30, %v2250_v59  ;;  %2389 = vst [vmem:[#allocation9 + $0x50] sm:$0x4] %v2312_v25  ;;  %v2509_v43 = vpack.c.bf16 %v2312_v25, %v2312_v25  ;;  %v2539_v7 = vunpack.c.l.b16 %v2507_v5  ;;  %v2433_v39 = vrot.slane %v2407_v26, 6  ;;  %v17218_v59 = vld [vmem:[#allocation6 + $0x60] sm:$0x22] }
 0x276   :  { %2390 = vst [vmem:[#allocation9 + $0x60] sm:$0x4] %v2313_v11  ;;  %v2510_v32 = vpack.c.bf16 %v2313_v11, %v2313_v11  ;;  %v2540_v20 = vunpack.c.l.b16 %v2508_v40  ;;  %v2546_v23 = vsel %vm99_vm0, %v2545_v6, %v2544_v61  ;;  %v17192_v21 = vmul.f32 %v2432_v50, %v17124_v36  ;;  %v17213_v36 = vld [vmem:[#allocation6 + $0x40] sm:$0x22] }
 0x277   :  { %2391 = vst [vmem:[#allocation9 + $0x70] sm:$0x4] %v2314_v27  ;;  %v2511_v15 = vpack.c.bf16 %v2314_v27, %v2314_v27  ;;  %v2541_v58 = vunpack.c.l.b16 %v2509_v43  ;;  %v2547_v38 = vsel %vm102_vm1, %v2538_v9, %v2546_v23  ;;  %v2548_v19 = vrot.slane %v2539_v7, 7  ;;  %v2415_v52 = vpop.permute.xlu1 %2414  ;;  %v17225_v25 = vld [vmem:[#allocation6 + $0xc0] sm:$0x22] }
 0x278   :  { %v2542_v8 = vunpack.c.l.b16 %v2510_v32  ;;  %v2550_v45 = vrot.slane %v2540_v20, 6  ;;  %v2419_v10 = vpop.permute.xlu0 %2418  ;;  %v2435_v41 = vrot.slane %v2415_v52, 6  ;;  %v17199_v62 = vmul.f32 %v2433_v39, %v17129_v13  ;;  %v17220_v13 = vld [vmem:[#allocation6 + $0x80] sm:$0x22]  ;;  %v17240_v7 = vld [vmem:[#allocation6 + $0x8] sm:$0x22] }
 0x279   :  { %v2543_v57 = vunpack.c.l.b16 %v2511_v15  ;;  %v2549_v29 = vsel %vm105_vm2, %v2548_v19, %v2547_v38  ;;  %v2552_v1 = vrot.slane %v2541_v58, 5  ;;  %v2423_v16 = vpop.permute.xlu2 %2422  ;;  %v2436_v2 = vrot.slane %v2419_v10, 6  ;;  %v17242_v32 = vld [vmem:[#allocation6 + $0x68] sm:$0x22] }
 0x27a   :  { %v2551_v28 = vsel %vm108_vm3, %v2550_v45, %v2549_v29  ;;  %v2554_v48 = vrot.slane %v2542_v8, 4  ;;  %v2437_v37 = vrot.slane %v2423_v16, 6  ;;  %v17202_v12 = vmul.f32 %v2434_v31, %v17138_v42  ;;  %v17222_v42 = vld [vmem:[#allocation6 + $0xa0] sm:$0x22]  ;;  %v17248_v38 = vld [vmem:[#allocation6 + $0x28] sm:$0x22] }
 0x27b   :  { %v2553_v34 = vsel %vm111_vm4, %v2552_v1, %v2551_v28  ;;  %v2556_v47 = vrot.slane %v2543_v57, 3  ;;  %v17205_v24 = vmul.f32 %v2435_v41, %v17162_v4  ;;  %v17208_v44 = vmul.f32 %v2436_v2, %v17168_v56  ;;  %v17227_v56 = vld [vmem:[#allocation6 + $0xe0] sm:$0x22]  ;;  %v17250_v19 = vld [vmem:[#allocation6 + $0x48] sm:$0x22] }
 0x27c   :  { %v2555_v0 = vsel %vm114_vm5, %v2554_v48, %v2553_v34  ;;  %v17216_v3 = vmul.f32 %v2437_v37, %v17170_v53  ;;  %v2476_v5 = vunpack.c.l.bf16 %v17196_v49  ;;  %v2480_v6 = vunpack.c.l.bf16 %v17213_v36  ;;  %v17252_v8 = vld [vmem:[#allocation6 + $0x88] sm:$0x22] }
 0x27d   :  { %v2557_v14 = vsel %vm117_vm6, %v2556_v47, %v2555_v0  ;;  %v2484_v27 = vunpack.c.l.bf16 %v17218_v59  ;;  %v2488_v20 = vunpack.c.l.bf16 %v17220_v13  ;;  %v2492_v23 = vunpack.c.l.bf16 %v17222_v42  ;;  %v17258_v28 = vld [vmem:[#allocation6 + $0xa8] sm:$0x22] }
 0x27e   :  { %v2558_v18 = vpack.c.b16 %v2557_v14, %v2557_v14  ;;  %v2496_v15 = vunpack.c.l.bf16 %v17225_v25  ;;  %v2500_v58 = vunpack.c.l.bf16 %v17227_v56  ;;  %v2473_v45 = vunpack.c.h.bf16 %v17194_v63  ;;  %v17260_v48 = vld [vmem:[#allocation6 + $0xc8] sm:$0x22] }
 0x27f   :  { %v2431_v35 = vpop.permute.xlu1 %2430  ;;  %v2477_v57 = vunpack.c.h.bf16 %v17196_v49  ;;  %v2481_v29 = vunpack.c.h.bf16 %v17213_v36  ;;  %v2485_v1 = vunpack.c.h.bf16 %v17218_v59  ;;  %v17262_v34 = vld [vmem:[#allocation6 + $0xe8] sm:$0x22]  ;;  %v2489_v47 = vunpack.c.h.bf16 %v17220_v13 }
 0x280   :  { %2616 = vmatmul.bf16.vlgmr.msrb.gmra.mxu0 %v2558_v18  ;;  %2749 = vmatmul.bf16.vlgmr.msrb.gmra.mxu1 %v2558_v18  ;;  %v2427_v51 = vpop.permute.xlu0 %2426  ;;  %v2439_v17 = vrot.slane %v2431_v35, 6  ;;  %v2493_v0 = vunpack.c.h.bf16 %v17222_v42  ;;  %v2497_v14 = vunpack.c.h.bf16 %v17225_v25  ;;  %v2474_v26 = vunpack.c.l.bf16 %v17240_v7 }
 0x281   :  { %2882 = vmatmul.bf16.vlgmr.msrb.gmra.mxu2 %v2558_v18  ;;  %2991 = vmatmul.bf16.vlgmr.msrb.gmra.mxu3 %v2558_v18  ;;  %v2438_v33 = vrot.slane %v2427_v51, 6  ;;  %v2501_v18 = vunpack.c.h.bf16 %v17227_v56  ;;  %v2478_v22 = vunpack.c.l.bf16 %v17248_v38  ;;  %v2482_v52 = vunpack.c.l.bf16 %v17250_v19 }
 0x282   :  { %v17189_v54 = vmul.f32 %v2439_v17, %v17174_v46  ;;  %v2486_v55 = vunpack.c.l.bf16 %v17242_v32  ;;  %v2487_v17 = vunpack.c.h.bf16 %v17242_v32 }
 0x283   :  { %v17211_v46 = vmul.f32 %v2438_v33, %v17172_v60  ;;  %v2472_v60 = vunpack.c.l.bf16 %v17194_v63 }
 0x2fd   :  { %v2617_v10 = vpop.f32.mrf.mxu0  ;;  %v17272_v35 = vpop.f32.mrf.mxu1 }
 0x2fe   :  { %v2622_v31 = vrot.slane %v2617_v10, 5  ;;  %v2623_v39 = vrot.slane %v2617_v10, 6  ;;  %v2624_v2 = vrot.slane %v2617_v10, 7  ;;  %v2625_v41 = vrot.slane %v2617_v10, 1 }
 0x2ff   :  { %v2626_v37 = vrot.slane %v2617_v10, 2  ;;  %v2627_v33 = vrot.slane %v2617_v10, 3  ;;  %v2628_v63 = vrot.slane %v2617_v10, 4  ;;  %v2640_v49 = vadd.f32 %v2617_v10, %v2484_v27 }
 0x300   :  { %v2637_v36 = vadd.f32 %v2622_v31, %v2472_v60  ;;  %v2638_v59 = vadd.f32 %v2623_v39, %v2476_v5  ;;  %v2639_v13 = vadd.f32 %v2624_v2, %v2480_v6  ;;  %v2641_v4 = vadd.f32 %v2625_v41, %v2488_v20 }
 0x301   :  { %v2642_v9 = vadd.f32 %v2626_v37, %v2492_v23  ;;  %v2643_v43 = vadd.f32 %v2627_v33, %v2496_v15  ;;  %v2644_v40 = vadd.f32 %v2628_v63, %v2500_v58  ;;  %v2648_v11 = vmul.f32 0.5, %v2640_v49  ;;  %v15100_v33 = vld [vmem:[#allocation2 + $0xb8] sm:$0xff] }
 0x302   :  { %v2645_v30 = vmul.f32 0.5, %v2637_v36  ;;  %v2646_v50 = vmul.f32 0.5, %v2638_v59  ;;  %v2647_v53 = vmul.f32 0.5, %v2639_v13  ;;  %v2649_v61 = vmul.f32 0.5, %v2641_v4  ;;  %v15108_v49 = vld [vmem:[#allocation2 + $0xf8] sm:$0xff]  ;;  %3675 = vmatpush.bf16.msra.mxu2 %v15100_v33 }
 0x303   :  { %v2650_v51 = vmul.f32 0.5, %v2642_v9  ;;  %v2651_v16 = vmul.f32 0.5, %v2643_v43  ;;  %15768 = vtanh.f32 %v2648_v11  ;;  %v2755_v27 = vrot.slane %v17272_v35, 5  ;;  %3784 = vmatpush.bf16.msra.mxu3 %v15108_v49  ;;  %v15098_v49 = vld [vmem:[#allocation2 + $0xa8] sm:$0xff] }
 0x304   :  { %15770 = vtanh.f32 %v2645_v30  ;;  %v2756_v60 = vrot.slane %v17272_v35, 6  ;;  %v2757_v5 = vrot.slane %v17272_v35, 7  ;;  %v17282_v6 = vpop.f32.mrf.mxu2  ;;  %v17284_v20 = vpop.f32.mrf.mxu3  ;;  %v2652_v23 = vmul.f32 0.5, %v2644_v40 }
 0x305   :  { %15772 = vtanh.f32 %v2646_v50  ;;  %v2758_v15 = vrot.slane %v17272_v35, 1  ;;  %v2759_v4 = vrot.slane %v17272_v35, 2  ;;  %v2619_v9 = vpop.f32.mrf.mxu0  ;;  %v2752_v43 = vpop.f32.mrf.mxu1  ;;  %v2760_v30 = vrot.slane %v17272_v35, 3 }
 0x306   :  { %15774 = vtanh.f32 %v2647_v53  ;;  %v2770_v11 = vadd.f32 %v2755_v27, %v2473_v45  ;;  %v2771_v58 = vadd.f32 %v2756_v60, %v2477_v57  ;;  %v2761_v10 = vrot.slane %v17272_v35, 4  ;;  %v15083_v43 = vld [vmem:[#allocation2 + $0x30] sm:$0xff] }
 0x307   :  { %15776 = vtanh.f32 %v2649_v61  ;;  %v2772_v31 = vadd.f32 %v2757_v5, %v2481_v29  ;;  %v2773_v39 = vadd.f32 %v17272_v35, %v2485_v1  ;;  %v2774_v40 = vadd.f32 %v2758_v15, %v2489_v47  ;;  %v15084_v35 = vld [vmem:[#allocation2 + $0x38] sm:$0xff] }
 0x308   :  { %15778 = vtanh.f32 %v2650_v51  ;;  %v2475_v50 = vunpack.c.h.bf16 %v17240_v7  ;;  %v2479_v2 = vunpack.c.h.bf16 %v17248_v38  ;;  %v2775_v53 = vadd.f32 %v2759_v4, %v2493_v0  ;;  %v15092_v51 = vld [vmem:[#allocation2 + $0x78] sm:$0xff]  ;;  %3409 = vmatpush.bf16.msra.mxu0 %v15084_v35  ;;  %v15094_v38 = vld [vmem:[#allocation2 + $0x88] sm:$0xff] }
 0x309   :  { %v15769_v41 = vpop.eup %15768  ;;  %15780 = vtanh.f32 %v2651_v16  ;;  %v2778_v37 = vmul.f32 0.5, %v2770_v11  ;;  %v2779_v45 = vmul.f32 0.5, %v2771_v58  ;;  %v2776_v61 = vadd.f32 %v2760_v30, %v2497_v14  ;;  %3542 = vmatpush.bf16.msra.mxu1 %v15092_v51  ;;  %v15091_v30 = vld [vmem:[#allocation2 + $0x70] sm:$0xff] }
 0x30a   :  { %v15771_v57 = vpop.eup %15770  ;;  %v2780_v29 = vmul.f32 0.5, %v2772_v31  ;;  %v2483_v1 = vunpack.c.h.bf16 %v17250_v19  ;;  %v2491_v47 = vunpack.c.h.bf16 %v17252_v8  ;;  %15782 = vtanh.f32 %v2652_v23  ;;  %v15099_v11 = vld [vmem:[#allocation2 + $0xb0] sm:$0xff] }
 0x30b   :  { %v15773_v63 = vpop.eup %15772  ;;  %v2777_v42 = vadd.f32 %v2761_v10, %v2501_v18  ;;  %v2781_v0 = vmul.f32 0.5, %v2773_v39  ;;  %v2495_v16 = vunpack.c.h.bf16 %v17258_v28  ;;  %v2661_v25 = vadd.f32 1.0, %v15771_v57  ;;  %3676 = vmatpush.bf16.msra.mxu2 %v15099_v11  ;;  %v15097_v11 = vld [vmem:[#allocation2 + $0xa0] sm:$0xff] }
 0x30c   :  { %v15775_v36 = vpop.eup %15774  ;;  %v2664_v14 = vadd.f32 1.0, %v15769_v41  ;;  %v2782_v59 = vmul.f32 0.5, %v2774_v40  ;;  %15784 = vtanh.f32 %v2778_v37  ;;  %v2885_v13 = vpop.f32.mrf.mxu2  ;;  %v2662_v5 = vadd.f32 1.0, %v15773_v63  ;;  %v15107_v40 = vld [vmem:[#allocation2 + $0xf0] sm:$0xff]  ;;  %3410 = vmatpush.bf16.msra.mxu0 %v15083_v43 }
 0x30d   :  { %v2994_v27 = vpop.f32.mrf.mxu3  ;;  %v15777_v60 = vpop.eup %15776  ;;  %v2663_v15 = vadd.f32 1.0, %v15775_v36  ;;  %v2783_v23 = vmul.f32 0.5, %v2775_v53  ;;  %15786 = vtanh.f32 %v2779_v45  ;;  %v2784_v18 = vmul.f32 0.5, %v2776_v61  ;;  %3543 = vmatpush.bf16.msra.mxu1 %v15091_v30  ;;  %3785 = vmatpush.bf16.msra.mxu3 %v15107_v40  ;;  %v15106_v13 = vld [vmem:[#allocation2 + $0xe8] sm:$0xff] }
 0x30e   :  { %v15779_v56 = vpop.eup %15778  ;;  %15788 = vtanh.f32 %v2780_v29  ;;  %v2888_v4 = vrot.slane %v17282_v6, 5  ;;  %v2499_v9 = vunpack.c.h.bf16 %v17260_v48  ;;  %v2665_v10 = vadd.f32 1.0, %v15777_v60 }
 0x30f   :  { %v15781_v58 = vpop.eup %15780  ;;  %v2785_v31 = vmul.f32 0.5, %v2777_v42  ;;  %15790 = vtanh.f32 %v2781_v0  ;;  %v2889_v39 = vrot.slane %v17282_v6, 6  ;;  %v17305_v41 = vmul.f32 0.5, %v2661_v25  ;;  %v15082_v42 = vld [vmem:[#allocation2 + $0x28] sm:$0xff]  ;;  %3677 = vmatpush.bf16.msra.mxu2 %v15098_v49  ;;  %v15080_v49 = vld [vmem:[#allocation2 + $0x18] sm:$0xff] }
 0x310   :  { %v17307_v53 = vmul.f32 0.5, %v2664_v14  ;;  %15792 = vtanh.f32 %v2782_v59  ;;  %v2890_v37 = vrot.slane %v17282_v6, 7  ;;  %v15783_v45 = vpop.eup %15782  ;;  %v2666_v57 = vadd.f32 1.0, %v15779_v56  ;;  %v15090_v0 = vld [vmem:[#allocation2 + $0x68] sm:$0xff]  ;;  %3411 = vmatpush.bf16.msra.mxu0 %v15082_v42  ;;  %v15089_v56 = vld [vmem:[#allocation2 + $0x60] sm:$0xff] }
 0x311   :  { %v17310_v61 = vmul.f32 0.5, %v2662_v5  ;;  %v17312_v29 = vmul.f32 0.5, %v2663_v15  ;;  %15794 = vtanh.f32 %v2783_v23  ;;  %v2667_v51 = vadd.f32 1.0, %v15781_v58  ;;  %3544 = vmatpush.bf16.msra.mxu1 %v15090_v0  ;;  %v15081_v23 = vld [vmem:[#allocation2 + $0x20] sm:$0xff]  ;;  %3786 = vmatpush.bf16.msra.mxu3 %v15106_v13 }
 0x312   :  { %v15785_v35 = vpop.eup %15784  ;;  %15796 = vtanh.f32 %v2784_v18  ;;  %v2891_v33 = vrot.slane %v17282_v6, 1  ;;  %v2903_v63 = vadd.f32 %v2888_v4, %v2474_v26  ;;  %v17317_v25 = vmul.f32 0.5, %v2665_v10  ;;  %v15105_v58 = vld [vmem:[#allocation2 + $0xe0] sm:$0xff] }
 0x313   :  { %v15787_v36 = vpop.eup %15786  ;;  %15798 = vtanh.f32 %v2785_v31  ;;  %v2794_v14 = vadd.f32 1.0, %v15785_v35  ;;  %v2904_v59 = vadd.f32 %v2889_v39, %v2478_v22  ;;  %v2668_v60 = vadd.f32 1.0, %v15783_v45  ;;  %3678 = vmatpush.bf16.msra.mxu2 %v15097_v11 }
 0x314   :  { %v15789_v27 = vpop.eup %15788  ;;  %v2795_v5 = vadd.f32 1.0, %v15787_v36  ;;  %v2892_v15 = vrot.slane %v17282_v6, 2  ;;  %v2905_v26 = vadd.f32 %v2890_v37, %v2482_v52  ;;  %v2893_v43 = vrot.slane %v17282_v6, 3  ;;  %3412 = vmatpush.bf16.msra.mxu0 %v15081_v23 }
 0x315   :  { %v15791_v18 = vpop.eup %15790  ;;  %v2796_v4 = vadd.f32 1.0, %v15789_v27  ;;  %v2894_v30 = vrot.slane %v17282_v6, 4  ;;  %v2906_v22 = vadd.f32 %v17282_v6, %v2486_v55  ;;  %v2802_v31 = vmul.f32 0.5, %v2794_v14  ;;  %3545 = vmatpush.bf16.msra.mxu1 %v15089_v56  ;;  %v15088_v14 = vld [vmem:[#allocation2 + $0x58] sm:$0xff]  ;;  %3787 = vmatpush.bf16.msra.mxu3 %v15105_v58 }
 0x316   :  { %v15793_v10 = vpop.eup %15792  ;;  %v2797_v52 = vadd.f32 1.0, %v15791_v18  ;;  %v2803_v39 = vmul.f32 0.5, %v2795_v5  ;;  %15800 = vtanh.f32 %v2903_v63  ;;  %v17329_v37 = vmul.f32 0.5, %v2666_v57 }
 0x317   :  { %v15795_v40 = vpop.eup %15794  ;;  %v2798_v45 = vadd.f32 1.0, %v15793_v10  ;;  %v2804_v35 = vmul.f32 0.5, %v2796_v4  ;;  %15802 = vtanh.f32 %v2904_v59  ;;  %v17331_v0 = vmul.f32 0.5, %v2667_v51  ;;  %v15096_v51 = vld [vmem:[#allocation2 + $0x98] sm:$0xff] }
 0x318   :  { %v15797_v42 = vpop.eup %15796  ;;  %v2799_v36 = vadd.f32 1.0, %v15795_v40  ;;  %v18776_v55 = vunpack.c.l.bf16 %v17252_v8  ;;  %15804 = vtanh.f32 %v2905_v26  ;;  %v17335_v63 = vmul.f32 0.5, %v2668_v60  ;;  %v15104_v59 = vld [vmem:[#allocation2 + $0xd8] sm:$0xff]  ;;  %3413 = vmatpush.bf16.msra.mxu0 %v15080_v49  ;;  %3679 = vmatpush.bf16.msra.mxu2 %v15096_v51  ;;  %v15077_v8 = vld [vmem:[#allocation2] sm:$0xff] }
 0x319   :  { %v15799_v13 = vpop.eup %15798  ;;  %v2805_v57 = vmul.f32 0.5, %v2797_v52  ;;  %v18777_v27 = vunpack.c.l.bf16 %v17258_v28  ;;  %15806 = vtanh.f32 %v2906_v22  ;;  %v18778_v18 = vrot.slane %v17192_v21, 7  ;;  %3546 = vmatpush.bf16.msra.mxu1 %v15088_v14  ;;  %3788 = vmatpush.bf16.msra.mxu3 %v15104_v59  ;;  %v15093_v28 = vld [vmem:[#allocation2 + $0x80] sm:$0xff] }
 0x31a   :  { %v2907_v6 = vadd.f32 %v2891_v33, %v18776_v55  ;;  %v18779_v26 = vrot.slane %v17199_v62, 7  ;;  %v18780_v56 = vunpack.c.l.bf16 %v17260_v48  ;;  %v18781_v60 = vunpack.c.l.bf16 %v17262_v34 }
 0x31b   :  { %v2908_v5 = vadd.f32 %v2892_v15, %v18777_v27  ;;  %v3076_v33 = vmul.f32 %v18778_v18, %v2802_v31  ;;  %v2800_v52 = vadd.f32 1.0, %v15797_v42  ;;  %v2806_v40 = vmul.f32 0.5, %v2798_v45  ;;  %v15095_v42 = vld [vmem:[#allocation2 + $0x90] sm:$0xff]  ;;  %v15078_v18 = vld [vmem:[#allocation2 + $0x8] sm:$0xff] }
 0x31c   :  { %v3077_v23 = vmul.f32 %v18779_v26, %v2803_v39  ;;  %v2909_v4 = vadd.f32 %v2893_v43, %v18780_v56  ;;  %v2910_v10 = vadd.f32 %v2894_v30, %v18781_v60  ;;  %v18782_v15 = vrot.slane %v17202_v12, 7  ;;  %v15801_v58 = vpop.eup %15800  ;;  %v15079_v43 = vld [vmem:[#allocation2 + $0x10] sm:$0xff]  ;;  %3680 = vmatpush.bf16.msra.mxu2 %v15095_v42 }
 0x31d   :  { %v2997_v11 = vrot.slane %v17284_v20, 5  ;;  %v2801_v55 = vadd.f32 1.0, %v15799_v13  ;;  %v17350_v21 = vmul.f32 0.5, %v2799_v36  ;;  %15808 = vtanh.f32 %v2907_v6  ;;  %v15803_v31 = vpop.eup %15802  ;;  %3414 = vmatpush.bf16.msra.mxu0 %v15079_v43 }
 0x31e   :  { %v3078_v22 = vmul.f32 %v18782_v15, %v2804_v35  ;;  %v2998_v62 = vrot.slane %v17284_v20, 6  ;;  %v18783_v30 = vrot.slane %v17205_v24, 7  ;;  %15810 = vtanh.f32 %v2908_v5  ;;  %v15087_v35 = vld [vmem:[#allocation2 + $0x50] sm:$0xff]  ;;  %v15805_v36 = vpop.eup %15804  ;;  %v15085_v15 = vld [vmem:[#allocation2 + $0x40] sm:$0xff] }
 0x31f   :  { %v3084_v12 = vmul.f32 %v15801_v58, %v17305_v41  ;;  %v2999_v45 = vrot.slane %v17284_v20, 7  ;;  %15812 = vtanh.f32 %v2909_v4  ;;  %v3085_v6 = vmul.f32 %v15803_v31, %v17310_v61  ;;  %v15103_v24 = vld [vmem:[#allocation2 + $0xd0] sm:$0xff]  ;;  %v15807_v13 = vpop.eup %15806  ;;  %3547 = vmatpush.bf16.msra.mxu1 %v15087_v35 }
 0x320   :  { %v17355_v39 = vmul.f32 %v18783_v30, %v2805_v57  ;;  %v3000_v49 = vrot.slane %v17284_v20, 1  ;;  %v3001_v14 = vrot.slane %v17284_v20, 2  ;;  %v3086_v57 = vmul.f32 %v15805_v36, %v17312_v29  ;;  %3789 = vmatpush.bf16.msra.mxu3 %v15103_v24  ;;  %3681 = vmatpush.bf16.msra.mxu2 %v15094_v38 }
 0x321   :  { %v17363_v27 = vadd.f32 %v3084_v12, %v3076_v33  ;;  %v3002_v41 = vrot.slane %v17284_v20, 3  ;;  %v3012_v5 = vadd.f32 %v2997_v11, %v2475_v50  ;;  %15814 = vtanh.f32 %v2910_v10  ;;  %v15086_v50 = vld [vmem:[#allocation2 + $0x48] sm:$0xff]  ;;  %3415 = vmatpush.bf16.msra.mxu0 %v15078_v18 }
 0x322   :  { %v17368_v51 = vadd.f32 %v3085_v6, %v3077_v23  ;;  %v3013_v61 = vadd.f32 %v2998_v62, %v2479_v2  ;;  %v3014_v59 = vadd.f32 %v2999_v45, %v2483_v1  ;;  %v2808_v26 = vmul.f32 0.5, %v2800_v52  ;;  %v15102_v23 = vld [vmem:[#allocation2 + $0xc8] sm:$0xff]  ;;  %v15101_v62 = vld [vmem:[#allocation2 + $0xc0] sm:$0xff] }
 0x323   :  { %v18784_v29 = vrot.slane %v17208_v44, 7  ;;  %v17376_v56 = vadd.f32 %v3086_v57, %v3078_v22  ;;  %v3015_v7 = vadd.f32 %v17284_v20, %v2487_v17  ;;  %v15809_v2 = vpop.eup %15808  ;;  %v3087_v19 = vmul.f32 %v15807_v13, %v17307_v53  ;;  %3548 = vmatpush.bf16.msra.mxu1 %v15086_v50 }
 0x324   :  { %15816 = vtanh.f32 %v17363_v27  ;;  %v3003_v1 = vrot.slane %v17284_v20, 4  ;;  %v3016_v44 = vadd.f32 %v3000_v49, %v2491_v47  ;;  %v15811_v4 = vpop.eup %15810  ;;  %v3017_v32 = vadd.f32 %v3001_v14, %v2495_v16  ;;  %3790 = vmatpush.bf16.msra.mxu3 %v15102_v23  ;;  %3682 = vmatpush.bf16.msra.mxu2 %v15093_v28 }
 0x325   :  { %v3080_v33 = vmul.f32 %v18784_v29, %v2806_v40  ;;  %15818 = vtanh.f32 %v17368_v51  ;;  %v3018_v17 = vadd.f32 %v3002_v41, %v2499_v9  ;;  %v3020_v60 = vmul.f32 0.5, %v3012_v5  ;;  %v15813_v53 = vpop.eup %15812  ;;  %3416 = vmatpush.bf16.msra.mxu0 %v15077_v8 }
 0x326   :  { %15820 = vtanh.f32 %v17376_v56  ;;  %v3021_v10 = vmul.f32 0.5, %v3013_v61  ;;  %v3022_v20 = vmul.f32 0.5, %v3014_v59  ;;  %v3023_v52 = vmul.f32 0.5, %v3015_v7 }
 0x327   :  { %v2809_v47 = vmul.f32 0.5, %v2801_v55  ;;  %v3024_v40 = vmul.f32 0.5, %v3016_v44  ;;  %15822 = vtanh.f32 %v3020_v60  ;;  %v2503_v16 = vunpack.c.h.bf16 %v17262_v34  ;;  %v15815_v48 = vpop.eup %15814  ;;  %3549 = vmatpush.bf16.msra.mxu1 %v15085_v15 }
 0x328   :  { %v18785_v9 = vrot.slane %v17216_v3, 7  ;;  %v3088_v11 = vmul.f32 %v15809_v2, %v17317_v25  ;;  %v3025_v58 = vmul.f32 0.5, %v3017_v32  ;;  %15824 = vtanh.f32 %v3021_v10  ;;  %3791 = vmatpush.bf16.msra.mxu3 %v15101_v62 }
 0x329   :  { %v3089_v55 = vmul.f32 %v15811_v4, %v17329_v37  ;;  %15826 = vtanh.f32 %v3022_v20  ;;  %v3019_v43 = vadd.f32 %v3003_v1, %v2503_v16  ;;  %v3026_v31 = vmul.f32 0.5, %v3018_v17 }
 0x32a   :  { %v3081_v22 = vmul.f32 %v18785_v9, %v17350_v21  ;;  %v15817_v30 = vpop.eup %15816  ;;  %v18786_v12 = vrot.slane %v17211_v46, 7  ;;  %v17401_v45 = vadd.f32 %v3087_v19, %v17355_v39  ;;  %15828 = vtanh.f32 %v3023_v52 }
 0x32b   :  { %v3090_v3 = vmul.f32 %v15813_v53, %v17331_v0  ;;  %v15819_v25 = vpop.eup %15818  ;;  %15830 = vtanh.f32 %v3024_v40  ;;  %v3027_v21 = vmul.f32 0.5, %v3019_v43  ;;  %v18787_v37 = vrot.slane %v17189_v54, 7 }
 0x32c   :  { %v3082_v34 = vmul.f32 %v18786_v12, %v2808_v26  ;;  %v3091_v42 = vmul.f32 %v15815_v48, %v17335_v63  ;;  %v15821_v36 = vpop.eup %15820  ;;  %15832 = vtanh.f32 %v3025_v58  ;;  %v17407_v46 = vadd.f32 %v3088_v11, %v3080_v33 }
 0x32d   :  { %v3083_v35 = vmul.f32 %v18787_v37, %v2809_v47  ;;  %v15823_v39 = vpop.eup %15822  ;;  %15834 = vtanh.f32 %v3026_v31  ;;  %v17409_v6 = vadd.f32 %v3089_v55, %v3081_v22 }
 0x32e   :  { %v15825_v0 = vpop.eup %15824  ;;  %v3036_v49 = vadd.f32 1.0, %v15823_v39  ;;  %15836 = vtanh.f32 %v3027_v21  ;;  %v17411_v14 = vadd.f32 %v3090_v3, %v3082_v34 }
 0x32f   :  { %v15827_v24 = vpop.eup %15826  ;;  %v3037_v13 = vadd.f32 1.0, %v15825_v0  ;;  %v17413_v54 = vadd.f32 %v3091_v42, %v3083_v35  ;;  %15838 = vtanh.f32 %v17401_v45 }
 0x330   :  { %v15829_v63 = vpop.eup %15828  ;;  %v3038_v57 = vadd.f32 1.0, %v15827_v24  ;;  %v3044_v41 = vmul.f32 0.5, %v3036_v49  ;;  %15840 = vtanh.f32 %v17407_v46 }
 0x331   :  { %v15831_v5 = vpop.eup %15830  ;;  %v3039_v61 = vadd.f32 1.0, %v15829_v63  ;;  %v3045_v59 = vmul.f32 0.5, %v3037_v13  ;;  %15842 = vtanh.f32 %v17409_v6 }
 0x332   :  { %v15833_v18 = vpop.eup %15832  ;;  %v3046_v26 = vmul.f32 0.5, %v3038_v57  ;;  %v3108_v29 = vmul.f32 %v15817_v30, %v3044_v41  ;;  %v3040_v33 = vadd.f32 1.0, %v15831_v5  ;;  %15844 = vtanh.f32 %v17411_v14 }
 0x333   :  { %v15835_v7 = vpop.eup %15834  ;;  %v3109_v50 = vmul.f32 %v15819_v25, %v3045_v59  ;;  %v3041_v38 = vadd.f32 1.0, %v15833_v18  ;;  %15846 = vtanh.f32 %v17413_v54  ;;  %v3047_v19 = vmul.f32 0.5, %v3039_v61 }
 0x334   :  { %v15837_v2 = vpop.eup %15836  ;;  %3185 = vst [vmem:[#allocation9] sm:$0x8] %v3108_v29  ;;  %v3042_v1 = vadd.f32 1.0, %v15835_v7  ;;  %v3110_v44 = vmul.f32 %v15821_v36, %v3046_v26  ;;  %v3305_v23 = vpack.c.bf16 %v3108_v29, %v3108_v29  ;;  %v3048_v17 = vmul.f32 0.5, %v3040_v33  ;;  %v3208_v26 = vpop.permute.xlu0 %3207 }
 0x335   :  { %v15839_v4 = vpop.eup %15838  ;;  %3186 = vst [vmem:[#allocation9 + $0x10] sm:$0x8] %v3109_v50  ;;  %v3043_v32 = vadd.f32 1.0, %v15837_v2  ;;  %v3306_v60 = vpack.c.bf16 %v3109_v50, %v3109_v50  ;;  %v3049_v10 = vmul.f32 0.5, %v3041_v38  ;;  %v3204_v29 = vpop.permute.xlu2 %3203 }
 0x336   :  { %v15841_v53 = vpop.eup %15840  ;;  %v3111_v20 = vmul.f32 %v15839_v4, %v3047_v19  ;;  %3187 = vst [vmem:[#allocation9 + $0x20] sm:$0x8] %v3110_v44  ;;  %v3307_v52 = vpack.c.bf16 %v3110_v44, %v3110_v44  ;;  %v3337_v8 = vunpack.c.l.b16 %v3305_v23  ;;  %v3050_v40 = vmul.f32 0.5, %v3042_v1  ;;  %v3212_v50 = vpop.permute.xlu1 %3211 }
 0x337   :  { %v15843_v47 = vpop.eup %15842  ;;  %v3051_v15 = vmul.f32 0.5, %v3043_v32  ;;  %v3112_v28 = vmul.f32 %v15841_v53, %v3048_v17  ;;  %v3338_v16 = vunpack.c.l.b16 %v3306_v60  ;;  %v3233_v1 = vrot.slane %v3204_v29, 5 }
 0x338   :  { %v15845_v48 = vpop.eup %15844  ;;  %v3113_v9 = vmul.f32 %v15843_v47, %v3049_v10  ;;  %3188 = vst [vmem:[#allocation9 + $0x30] sm:$0x8] %v3111_v20  ;;  %v3308_v22 = vpack.c.bf16 %v3111_v20, %v3111_v20  ;;  %v3339_v11 = vunpack.c.l.b16 %v3307_v52  ;;  %v3345_v58 = vrot.slane %v3337_v8, 3  ;;  %v17427_v10 = vld [vmem:[#allocation6] sm:$0x44] }
 0x339   :  { %v15847_v62 = vpop.eup %15846  ;;  %v3114_v55 = vmul.f32 %v15845_v48, %v3050_v40  ;;  %3189 = vst [vmem:[#allocation9 + $0x40] sm:$0x8] %v3112_v28  ;;  %v3309_v43 = vpack.c.bf16 %v3112_v28, %v3112_v28  ;;  %v3346_v31 = vrot.slane %v3338_v16, 2  ;;  %v3234_v44 = vrot.slane %v3208_v26, 5  ;;  %v17432_v52 = vld [vmem:[#allocation6 + $0x20] sm:$0x44] }
 0x33a   :  { %v3115_v30 = vmul.f32 %v15847_v62, %v3051_v15  ;;  %3190 = vst [vmem:[#allocation9 + $0x50] sm:$0x8] %v3113_v9  ;;  %v3310_v12 = vpack.c.bf16 %v3113_v9, %v3113_v9  ;;  %v3348_v34 = vrot.slane %v3339_v11, 1  ;;  %v3340_v25 = vunpack.c.l.b16 %v3308_v22  ;;  %v17434_v8 = vld [vmem:[#allocation6 + $0x40] sm:$0x44] }
 0x33b   :  { %3191 = vst [vmem:[#allocation9 + $0x60] sm:$0x8] %v3114_v55  ;;  %v3311_v3 = vpack.c.bf16 %v3114_v55, %v3114_v55  ;;  %v3341_v21 = vunpack.c.l.b16 %v3309_v43  ;;  %v3347_v37 = vsel %vm99_vm0, %v3346_v31, %v3345_v58  ;;  %v3235_v23 = vrot.slane %v3212_v50, 5  ;;  %v17436_v47 = vld [vmem:[#allocation6 + $0x60] sm:$0x44] }
 0x33c   :  { %3192 = vst [vmem:[#allocation9 + $0x70] sm:$0x8] %v3115_v30  ;;  %v3312_v35 = vpack.c.bf16 %v3115_v30, %v3115_v30  ;;  %v3342_v42 = vunpack.c.l.b16 %v3310_v12  ;;  %v3349_v36 = vsel %vm102_vm1, %v3348_v34, %v3347_v37  ;;  %v3224_v33 = vpop.permute.xlu0 %3223  ;;  %v17439_v40 = vmul.f32 %v3233_v1, %v17363_v27  ;;  %v17459_v27 = vld [vmem:[#allocation6 + $0x80] sm:$0x44]  ;;  %v17479_v34 = vld [vmem:[#allocation6 + $0x88] sm:$0x44] }
 0x33d   :  { %v3343_v39 = vunpack.c.l.b16 %v3311_v3  ;;  %v3350_v0 = vsel %vm105_vm2, %v3340_v25, %v3349_v36  ;;  %v3351_v49 = vrot.slane %v3341_v21, 7  ;;  %v3216_v7 = vpop.permute.xlu2 %3215  ;;  %v3238_v60 = vrot.slane %v3224_v33, 5  ;;  %v17461_v22 = vld [vmem:[#allocation6 + $0xa0] sm:$0x44]  ;;  %v17489_v36 = vld [vmem:[#allocation6 + $0x48] sm:$0x44] }
 0x33e   :  { %v3344_v24 = vunpack.c.l.b16 %v3312_v35  ;;  %v3353_v13 = vrot.slane %v3342_v42, 6  ;;  %v3220_v19 = vpop.permute.xlu1 %3219  ;;  %v3236_v32 = vrot.slane %v3216_v7, 5  ;;  %v17442_v15 = vmul.f32 %v3234_v44, %v17368_v51  ;;  %v17463_v51 = vld [vmem:[#allocation6 + $0xc0] sm:$0x44]  ;;  %v17485_v35 = vld [vmem:[#allocation6 + $0x8] sm:$0x44] }
 0x33f   :  { %v3352_v63 = vsel %vm108_vm3, %v3351_v49, %v3350_v0  ;;  %v3355_v57 = vrot.slane %v3343_v39, 5  ;;  %v3237_v53 = vrot.slane %v3220_v19, 5  ;;  %v17445_v28 = vmul.f32 %v3235_v23, %v17376_v56  ;;  %v17465_v56 = vld [vmem:[#allocation6 + $0xe0] sm:$0x44]  ;;  %v17487_v42 = vld [vmem:[#allocation6 + $0x28] sm:$0x44] }
 0x340   :  { %v3354_v41 = vsel %vm111_vm4, %v3353_v13, %v3352_v63  ;;  %v3357_v5 = vrot.slane %v3344_v24, 4  ;;  %v17457_v9 = vmul.f32 %v3238_v60, %v17409_v6  ;;  %v3277_v11 = vunpack.c.l.bf16 %v17432_v52 }
 0x341   :  { %v3356_v61 = vsel %vm114_vm5, %v3355_v57, %v3354_v41  ;;  %v17454_v48 = vmul.f32 %v3237_v53, %v17407_v46  ;;  %v3285_v46 = vunpack.c.l.bf16 %v17436_v47  ;;  %v3861_v6 = vrot.slane %v17439_v40, 7  ;;  %v15128_v40 = vld [vmem:[#allocation2 + $0x98] sm:$0xff] }
 0x342   :  { %v3358_v59 = vsel %vm117_vm6, %v3357_v5, %v3356_v61  ;;  %v3862_v62 = vrot.slane %v17442_v15, 7  ;;  %v3289_v3 = vunpack.c.l.bf16 %v17459_v27  ;;  %v3293_v25 = vunpack.c.l.bf16 %v17461_v22 }
 0x343   :  { %v3359_v18 = vpack.c.b16 %v3358_v59, %v3358_v59  ;;  %v3297_v21 = vunpack.c.l.bf16 %v17463_v51  ;;  %v3301_v37 = vunpack.c.l.bf16 %v17465_v56  ;;  %v3274_v39 = vunpack.c.h.bf16 %v17427_v10 }
 0x344   :  { %v3232_v38 = vpop.permute.xlu0 %3231  ;;  %v3278_v0 = vunpack.c.h.bf16 %v17432_v52  ;;  %v3282_v49 = vunpack.c.h.bf16 %v17434_v8  ;;  %v3290_v24 = vunpack.c.h.bf16 %v17459_v27  ;;  %v3286_v13 = vunpack.c.h.bf16 %v17436_v47 }
 0x345   :  { %3417 = vmatmul.bf16.vlgmr.msra.gmra.mxu0 %v3359_v18  ;;  %3550 = vmatmul.bf16.vlgmr.msra.gmra.mxu1 %v3359_v18  ;;  %v3228_v2 = vpop.permute.xlu2 %3227  ;;  %v3240_v4 = vrot.slane %v3232_v38, 5  ;;  %v3294_v63 = vunpack.c.h.bf16 %v17461_v22  ;;  %v3298_v57 = vunpack.c.h.bf16 %v17463_v51  ;;  %v3302_v41 = vunpack.c.h.bf16 %v17465_v56 }
 0x346   :  { %3683 = vmatmul.bf16.vlgmr.msra.gmra.mxu2 %v3359_v18  ;;  %3792 = vmatmul.bf16.vlgmr.msra.gmra.mxu3 %v3359_v18  ;;  %v3239_v17 = vrot.slane %v3228_v2, 5  ;;  %v3275_v59 = vunpack.c.l.bf16 %v17485_v35  ;;  %v3279_v18 = vunpack.c.l.bf16 %v17487_v42  ;;  %v3283_v26 = vunpack.c.l.bf16 %v17489_v36  ;;  %v17505_v2 = vld [vmem:[#allocation6 + $0x68] sm:$0x44] }
 0x347   :  { %v17430_v20 = vmul.f32 %v3240_v4, %v17413_v54  ;;  %v17451_v54 = vmul.f32 %v3236_v32, %v17401_v45  ;;  %v3281_v45 = vunpack.c.l.bf16 %v17434_v8  ;;  %v3291_v29 = vunpack.c.l.bf16 %v17479_v34  ;;  %v17507_v4 = vld [vmem:[#allocation6 + $0xa8] sm:$0x44] }
 0x348   :  { %v17448_v16 = vmul.f32 %v3239_v17, %v17411_v14  ;;  %v3273_v14 = vunpack.c.l.bf16 %v17427_v10  ;;  %v17509_v10 = vld [vmem:[#allocation6 + $0xc8] sm:$0x44]  ;;  %v3287_v58 = vunpack.c.l.bf16 %v17505_v2  ;;  %v3295_v43 = vunpack.c.l.bf16 %v17507_v4 }
 0x349   :  { %v3280_v27 = vunpack.c.h.bf16 %v17487_v42  ;;  %v3288_v22 = vunpack.c.h.bf16 %v17505_v2 }
 0x3c2   :  { %v3418_v5 = vpop.f32.mrf.mxu0  ;;  %v17499_v61 = vpop.f32.mrf.mxu1 }
 0x3c3   :  { %v3423_v33 = vrot.slane %v3418_v5, 4  ;;  %v3424_v7 = vrot.slane %v3418_v5, 5  ;;  %v3425_v50 = vrot.slane %v3418_v5, 6  ;;  %v3426_v38 = vrot.slane %v3418_v5, 7 }
 0x3c4   :  { %v3427_v19 = vrot.slane %v3418_v5, 1  ;;  %v3428_v1 = vrot.slane %v3418_v5, 2  ;;  %v3429_v44 = vrot.slane %v3418_v5, 3  ;;  %v3442_v23 = vadd.f32 %v3418_v5, %v3289_v3 }
 0x3c5   :  { %v3438_v32 = vadd.f32 %v3423_v33, %v3273_v14  ;;  %v3439_v17 = vadd.f32 %v3424_v7, %v3277_v11  ;;  %v3440_v60 = vadd.f32 %v3425_v50, %v3281_v45  ;;  %v3441_v53 = vadd.f32 %v3426_v38, %v3285_v46  ;;  %v17522_v7 = vld [vmem:[#allocation6 + $0xe8] sm:$0x44] }
 0x3c6   :  { %v3443_v52 = vadd.f32 %v3427_v19, %v3293_v25  ;;  %v3444_v8 = vadd.f32 %v3428_v1, %v3297_v21  ;;  %v3450_v47 = vmul.f32 0.5, %v3442_v23  ;;  %v3445_v12 = vadd.f32 %v3429_v44, %v3301_v37 }
 0x3c7   :  { %v3446_v30 = vmul.f32 0.5, %v3438_v32  ;;  %v3447_v31 = vmul.f32 0.5, %v3439_v17  ;;  %v3448_v55 = vmul.f32 0.5, %v3440_v60  ;;  %v3449_v3 = vmul.f32 0.5, %v3441_v53 }
 0x3c8   :  { %15848 = vtanh.f32 %v3450_v47  ;;  %v3299_v14 = vunpack.c.l.bf16 %v17509_v10  ;;  %v3556_v11 = vrot.slane %v17499_v61, 4  ;;  %v3557_v45 = vrot.slane %v17499_v61, 5 }
 0x3c9   :  { %15850 = vtanh.f32 %v3446_v30  ;;  %v3558_v46 = vrot.slane %v17499_v61, 6  ;;  %v17517_v25 = vpop.f32.mrf.mxu2  ;;  %v17519_v21 = vpop.f32.mrf.mxu3  ;;  %v3451_v37 = vmul.f32 0.5, %v3443_v52  ;;  %v3452_v5 = vmul.f32 0.5, %v3444_v8 }
 0x3ca   :  { %15852 = vtanh.f32 %v3447_v31  ;;  %v3559_v33 = vrot.slane %v17499_v61, 7  ;;  %v3420_v50 = vpop.f32.mrf.mxu0  ;;  %v3553_v38 = vpop.f32.mrf.mxu1  ;;  %v3453_v30 = vmul.f32 0.5, %v3445_v12  ;;  %v3560_v19 = vrot.slane %v17499_v61, 1 }
 0x3cb   :  { %v3571_v1 = vadd.f32 %v3556_v11, %v3274_v39  ;;  %v3572_v44 = vadd.f32 %v3557_v45, %v3278_v0  ;;  %15854 = vtanh.f32 %v3448_v55  ;;  %v3561_v23 = vrot.slane %v17499_v61, 2  ;;  %v15140_v38 = vld [vmem:[#allocation2 + $0xf8] sm:$0xff] }
 0x3cc   :  { %v3573_v32 = vadd.f32 %v3558_v46, %v3282_v49  ;;  %v3574_v17 = vadd.f32 %v3559_v33, %v3286_v13  ;;  %15856 = vtanh.f32 %v3449_v3  ;;  %v3562_v60 = vrot.slane %v17499_v61, 3  ;;  %v15116_v46 = vld [vmem:[#allocation2 + $0x38] sm:$0xff]  ;;  %4585 = vmatpush.bf16.msrb.mxu3 %v15140_v38 }
 0x3cd   :  { %v3303_v31 = vunpack.c.l.bf16 %v17522_v7  ;;  %v3292_v53 = vunpack.c.h.bf16 %v17479_v34  ;;  %15858 = vtanh.f32 %v3451_v37  ;;  %v3575_v12 = vadd.f32 %v17499_v61, %v3290_v24  ;;  %v15124_v37 = vld [vmem:[#allocation2 + $0x78] sm:$0xff]  ;;  %4210 = vmatpush.bf16.msrb.mxu0 %v15116_v46 }
 0x3ce   :  { %v15849_v52 = vpop.eup %15848  ;;  %v3579_v39 = vmul.f32 0.5, %v3571_v1  ;;  %v3580_v0 = vmul.f32 0.5, %v3572_v44  ;;  %15860 = vtanh.f32 %v3452_v5  ;;  %v3576_v49 = vadd.f32 %v3560_v19, %v3294_v63  ;;  %v15132_v5 = vld [vmem:[#allocation2 + $0xb8] sm:$0xff]  ;;  %4343 = vmatpush.bf16.msrb.mxu1 %v15124_v37 }
 0x3cf   :  { %v15851_v55 = vpop.eup %15850  ;;  %v3581_v13 = vmul.f32 0.5, %v3573_v32  ;;  %v3276_v8 = vunpack.c.h.bf16 %v17485_v35  ;;  %15862 = vtanh.f32 %v3453_v30  ;;  %v3577_v3 = vadd.f32 %v3561_v23, %v3298_v57  ;;  %4476 = vmatpush.bf16.msrb.mxu2 %v15132_v5 }
 0x3d0   :  { %v15853_v47 = vpop.eup %15852  ;;  %v3582_v11 = vmul.f32 0.5, %v3574_v17  ;;  %v3578_v24 = vadd.f32 %v3562_v60, %v3302_v41  ;;  %15864 = vtanh.f32 %v3579_v39  ;;  %v3284_v61 = vunpack.c.h.bf16 %v17489_v36  ;;  %v15110_v36 = vld [vmem:[#allocation2 + $0x8] sm:$0xff] }
 0x3d1   :  { %v3686_v63 = vpop.f32.mrf.mxu2  ;;  %v3795_v45 = vpop.f32.mrf.mxu3  ;;  %v3462_v50 = vadd.f32 1.0, %v15851_v55  ;;  %v3466_v51 = vadd.f32 1.0, %v15849_v52  ;;  %v3583_v57 = vmul.f32 0.5, %v3575_v12  ;;  %15866 = vtanh.f32 %v3580_v0  ;;  %v15115_v0 = vld [vmem:[#allocation2 + $0x30] sm:$0xff] }
 0x3d2   :  { %v15855_v33 = vpop.eup %15854  ;;  %v3463_v19 = vadd.f32 1.0, %v15853_v47  ;;  %v3584_v56 = vmul.f32 0.5, %v3576_v49  ;;  %15868 = vtanh.f32 %v3581_v13  ;;  %v3689_v41 = vrot.slane %v17517_v25, 4  ;;  %v15123_v55 = vld [vmem:[#allocation2 + $0x70] sm:$0xff]  ;;  %4211 = vmatpush.bf16.msrb.mxu0 %v15115_v0 }
 0x3d3   :  { %v15857_v30 = vpop.eup %15856  ;;  %v3585_v44 = vmul.f32 0.5, %v3577_v3  ;;  %15870 = vtanh.f32 %v3582_v11  ;;  %v3690_v23 = vrot.slane %v17517_v25, 5  ;;  %v3464_v60 = vadd.f32 1.0, %v15855_v33  ;;  %v15131_v49 = vld [vmem:[#allocation2 + $0xb0] sm:$0xff]  ;;  %4344 = vmatpush.bf16.msrb.mxu1 %v15123_v55 }
 0x3d4   :  { %v15859_v1 = vpop.eup %15858  ;;  %v3586_v52 = vmul.f32 0.5, %v3578_v24  ;;  %v3691_v12 = vrot.slane %v17517_v25, 6  ;;  %v3465_v47 = vadd.f32 1.0, %v15857_v30  ;;  %v17547_v3 = vmul.f32 0.5, %v3462_v50  ;;  %v15139_v63 = vld [vmem:[#allocation2 + $0xf0] sm:$0xff]  ;;  %4477 = vmatpush.bf16.msrb.mxu2 %v15131_v49 }
 0x3d5   :  { %v15861_v17 = vpop.eup %15860  ;;  %v17549_v11 = vmul.f32 0.5, %v3466_v51  ;;  %15872 = vtanh.f32 %v3583_v57  ;;  %v3467_v46 = vadd.f32 1.0, %v15859_v1  ;;  %v17551_v37 = vmul.f32 0.5, %v3463_v19  ;;  %4586 = vmatpush.bf16.msrb.mxu3 %v15139_v63  ;;  %v15130_v1 = vld [vmem:[#allocation2 + $0xa8] sm:$0xff] }
 0x3d6   :  { %v15863_v13 = vpop.eup %15862  ;;  %15874 = vtanh.f32 %v3584_v56  ;;  %v3704_v24 = vadd.f32 %v3689_v41, %v3275_v59  ;;  %v3692_v50 = vrot.slane %v17517_v25, 7  ;;  %v3705_v51 = vadd.f32 %v3690_v23, %v3279_v18  ;;  %v15114_v56 = vld [vmem:[#allocation2 + $0x28] sm:$0xff] }
 0x3d7   :  { %v15865_v45 = vpop.eup %15864  ;;  %15876 = vtanh.f32 %v3585_v44  ;;  %v3468_v38 = vadd.f32 1.0, %v15861_v17  ;;  %v17558_v30 = vmul.f32 0.5, %v3464_v60  ;;  %v3706_v59 = vadd.f32 %v3691_v12, %v3283_v26  ;;  %v15122_v41 = vld [vmem:[#allocation2 + $0x68] sm:$0xff]  ;;  %4212 = vmatpush.bf16.msrb.mxu0 %v15114_v56  ;;  %v15113_v60 = vld [vmem:[#allocation2 + $0x20] sm:$0xff] }
 0x3d8   :  { %v15867_v5 = vpop.eup %15866  ;;  %v3595_v33 = vadd.f32 1.0, %v15865_v45  ;;  %v3469_v0 = vadd.f32 1.0, %v15863_v13  ;;  %15878 = vtanh.f32 %v3586_v52  ;;  %v3693_v45 = vrot.slane %v17517_v25, 1  ;;  %v15138_v18 = vld [vmem:[#allocation2 + $0xe8] sm:$0xff]  ;;  %4345 = vmatpush.bf16.msrb.mxu1 %v15122_v41  ;;  %v15121_v26 = vld [vmem:[#allocation2 + $0x60] sm:$0xff]  ;;  %4478 = vmatpush.bf16.msrb.mxu2 %v15130_v1 }
 0x3d9   :  { %v15869_v57 = vpop.eup %15868  ;;  %v3596_v19 = vadd.f32 1.0, %v15867_v5  ;;  %v3694_v49 = vrot.slane %v17517_v25, 2  ;;  %v3695_v17 = vrot.slane %v17517_v25, 3  ;;  %15880 = vtanh.f32 %v3704_v24  ;;  %4587 = vmatpush.bf16.msrb.mxu3 %v15138_v18  ;;  %v15129_v13 = vld [vmem:[#allocation2 + $0xa0] sm:$0xff] }
 0x3da   :  { %v15871_v44 = vpop.eup %15870  ;;  %v3597_v55 = vadd.f32 1.0, %v15869_v57  ;;  %v3603_v23 = vmul.f32 0.5, %v3595_v33  ;;  %v3707_v52 = vadd.f32 %v3692_v50, %v3287_v58  ;;  %15882 = vtanh.f32 %v3705_v51  ;;  %v15137_v33 = vld [vmem:[#allocation2 + $0xe0] sm:$0xff] }
 0x3db   :  { %v15873_v12 = vpop.eup %15872  ;;  %v3598_v63 = vadd.f32 1.0, %v15871_v44  ;;  %v3604_v5 = vmul.f32 0.5, %v3596_v19  ;;  %v17567_v39 = vmul.f32 0.5, %v3465_v47  ;;  %v17569_v32 = vmul.f32 0.5, %v3467_v46  ;;  %4213 = vmatpush.bf16.msrb.mxu0 %v15113_v60 }
 0x3dc   :  { %v15875_v57 = vpop.eup %15874  ;;  %v3708_v24 = vadd.f32 %v17517_v25, %v3291_v29  ;;  %15884 = vtanh.f32 %v3706_v59  ;;  %v17574_v19 = vmul.f32 0.5, %v3468_v38  ;;  %v17576_v41 = vmul.f32 0.5, %v3469_v0  ;;  %4346 = vmatpush.bf16.msrb.mxu1 %v15121_v26  ;;  %v15112_v25 = vld [vmem:[#allocation2 + $0x18] sm:$0xff]  ;;  %4479 = vmatpush.bf16.msrb.mxu2 %v15129_v13  ;;  %v15127_v13 = vld [vmem:[#allocation2 + $0x90] sm:$0xff] }
 0x3dd   :  { %v15877_v56 = vpop.eup %15876  ;;  %v3605_v58 = vmul.f32 0.5, %v3597_v55  ;;  %v3709_v50 = vadd.f32 %v3693_v45, %v3295_v43  ;;  %v3599_v51 = vadd.f32 1.0, %v15873_v12  ;;  %v3877_v47 = vmul.f32 %v3861_v6, %v3603_v23  ;;  %v15120_v38 = vld [vmem:[#allocation2 + $0x58] sm:$0xff]  ;;  %4588 = vmatpush.bf16.msrb.mxu3 %v15137_v33  ;;  %v15111_v12 = vld [vmem:[#allocation2 + $0x10] sm:$0xff] }
 0x3de   :  { %v3710_v46 = vadd.f32 %v3694_v49, %v3299_v14  ;;  %v3711_v29 = vadd.f32 %v3695_v17, %v3303_v31  ;;  %v15879_v59 = vpop.eup %15878  ;;  %v3600_v1 = vadd.f32 1.0, %v15875_v57  ;;  %v3606_v44 = vmul.f32 0.5, %v3598_v63  ;;  %v15136_v6 = vld [vmem:[#allocation2 + $0xd8] sm:$0xff]  ;;  %v15119_v63 = vld [vmem:[#allocation2 + $0x50] sm:$0xff] }
 0x3df   :  { %v3878_v43 = vmul.f32 %v3862_v62, %v3604_v5  ;;  %15886 = vtanh.f32 %v3707_v52  ;;  %v15881_v0 = vpop.eup %15880  ;;  %v3601_v14 = vadd.f32 1.0, %v15877_v56  ;;  %v3798_v31 = vrot.slane %v17519_v21, 4  ;;  %4214 = vmatpush.bf16.msrb.mxu0 %v15112_v25  ;;  %v15135_v33 = vld [vmem:[#allocation2 + $0xd0] sm:$0xff] }
 0x3e0   :  { %15888 = vtanh.f32 %v3708_v24  ;;  %v3799_v55 = vrot.slane %v17519_v21, 5  ;;  %v15883_v45 = vpop.eup %15882  ;;  %v18788_v18 = vrot.slane %v17445_v28, 7  ;;  %v3885_v15 = vmul.f32 %v15881_v0, %v17547_v3  ;;  %4347 = vmatpush.bf16.msrb.mxu1 %v15120_v38  ;;  %4480 = vmatpush.bf16.msrb.mxu2 %v15128_v40  ;;  %v15134_v38 = vld [vmem:[#allocation2 + $0xc8] sm:$0xff] }
 0x3e1   :  { %15890 = vtanh.f32 %v3709_v50  ;;  %v3800_v62 = vrot.slane %v17519_v21, 6  ;;  %v3607_v17 = vmul.f32 0.5, %v3599_v51  ;;  %v3886_v60 = vmul.f32 %v15883_v45, %v17551_v37  ;;  %4589 = vmatpush.bf16.msrb.mxu3 %v15136_v6 }
 0x3e2   :  { %v3879_v23 = vmul.f32 %v18788_v18, %v3605_v58  ;;  %v15885_v49 = vpop.eup %15884  ;;  %15892 = vtanh.f32 %v3710_v46  ;;  %v3801_v26 = vrot.slane %v17519_v21, 7  ;;  %v17597_v28 = vadd.f32 %v3885_v15, %v3877_v47  ;;  %v15133_v15 = vld [vmem:[#allocation2 + $0xc0] sm:$0xff] }
 0x3e3   :  { %v3887_v5 = vmul.f32 %v15885_v49, %v17558_v30  ;;  %v3802_v52 = vrot.slane %v17519_v21, 1  ;;  %v3803_v3 = vrot.slane %v17519_v21, 2  ;;  %v17601_v57 = vadd.f32 %v3886_v60, %v3878_v43  ;;  %4215 = vmatpush.bf16.msrb.mxu0 %v15111_v12 }
 0x3e4   :  { %v3813_v37 = vadd.f32 %v3798_v31, %v3276_v8  ;;  %v3814_v24 = vadd.f32 %v3799_v55, %v3280_v27  ;;  %v3815_v30 = vadd.f32 %v3800_v62, %v3284_v61  ;;  %v3602_v58 = vadd.f32 1.0, %v15879_v59  ;;  %4348 = vmatpush.bf16.msrb.mxu1 %v15119_v63  ;;  %v15118_v8 = vld [vmem:[#allocation2 + $0x48] sm:$0xff]  ;;  %4481 = vmatpush.bf16.msrb.mxu2 %v15127_v13  ;;  %v15117_v55 = vld [vmem:[#allocation2 + $0x40] sm:$0xff] }
 0x3e5   :  { %v15887_v56 = vpop.eup %15886  ;;  %15894 = vtanh.f32 %v3711_v29  ;;  %v17609_v50 = vadd.f32 %v3887_v5, %v3879_v23  ;;  %v3816_v51 = vadd.f32 %v3801_v26, %v3288_v22  ;;  %v3608_v46 = vmul.f32 0.5, %v3600_v1  ;;  %4590 = vmatpush.bf16.msrb.mxu3 %v15135_v33  ;;  %v15126_v29 = vld [vmem:[#allocation2 + $0x88] sm:$0xff] }
 0x3e6   :  { %v15889_v47 = vpop.eup %15888  ;;  %v18789_v25 = vrot.slane %v17451_v54, 7  ;;  %15896 = vtanh.f32 %v17597_v28  ;;  %v3817_v42 = vadd.f32 %v17519_v21, %v3292_v53  ;;  %v3609_v61 = vmul.f32 0.5, %v3601_v14 }
 0x3e7   :  { %v15891_v27 = vpop.eup %15890  ;;  %15898 = vtanh.f32 %v17601_v57  ;;  %v3804_v2 = vrot.slane %v17519_v21, 3  ;;  %v18790_v22 = vunpack.c.h.bf16 %v17507_v4  ;;  %v18791_v53 = vunpack.c.h.bf16 %v17509_v10  ;;  %4216 = vmatpush.bf16.msrb.mxu0 %v15110_v36  ;;  %v15109_v10 = vld [vmem:[#allocation2] sm:$0xff] }
 0x3e8   :  { %v3880_v35 = vmul.f32 %v18789_v25, %v3606_v44  ;;  %v15893_v34 = vpop.eup %15892  ;;  %v3821_v1 = vmul.f32 0.5, %v3813_v37  ;;  %v3822_v44 = vmul.f32 0.5, %v3814_v24  ;;  %v3823_v43 = vmul.f32 0.5, %v3815_v30  ;;  %4349 = vmatpush.bf16.msrb.mxu1 %v15118_v8  ;;  %4482 = vmatpush.bf16.msrb.mxu2 %v15126_v29 }
 0x3e9   :  { %v3818_v54 = vadd.f32 %v3802_v52, %v18790_v22  ;;  %v3819_v59 = vadd.f32 %v3803_v3, %v18791_v53  ;;  %v18792_v40 = vrot.slane %v17454_v48, 7  ;;  %15900 = vtanh.f32 %v17609_v50  ;;  %4591 = vmatpush.bf16.msrb.mxu3 %v15134_v38  ;;  %v15125_v48 = vld [vmem:[#allocation2 + $0x80] sm:$0xff] }
 0x3ea   :  { %v3824_v21 = vmul.f32 0.5, %v3816_v51  ;;  %v3304_v4 = vunpack.c.h.bf16 %v17522_v7  ;;  %v3610_v0 = vmul.f32 0.5, %v3602_v58  ;;  %v3888_v14 = vmul.f32 %v15887_v56, %v17567_v39 }
 0x3eb   :  { %v3881_v6 = vmul.f32 %v18792_v40, %v3607_v17  ;;  %v3825_v31 = vmul.f32 0.5, %v3817_v42  ;;  %15902 = vtanh.f32 %v3821_v1  ;;  %v15895_v45 = vpop.eup %15894  ;;  %v3889_v18 = vmul.f32 %v15889_v47, %v17549_v11  ;;  %4217 = vmatpush.bf16.msrb.mxu0 %v15109_v10 }
 0x3ec   :  { %v3826_v23 = vmul.f32 0.5, %v3818_v54  ;;  %15904 = vtanh.f32 %v3822_v44  ;;  %v3820_v62 = vadd.f32 %v3804_v2, %v3304_v4  ;;  %v15897_v7 = vpop.eup %15896  ;;  %v18793_v49 = vrot.slane %v17457_v9, 7  ;;  %4350 = vmatpush.bf16.msrb.mxu1 %v15117_v55  ;;  %4483 = vmatpush.bf16.msrb.mxu2 %v15125_v48 }
 0x3ed   :  { %v3890_v17 = vmul.f32 %v15891_v27, %v17569_v32  ;;  %15906 = vtanh.f32 %v3823_v43  ;;  %v3827_v60 = vmul.f32 0.5, %v3819_v59  ;;  %v15899_v26 = vpop.eup %15898  ;;  %v18794_v12 = vrot.slane %v17448_v16, 7  ;;  %4592 = vmatpush.bf16.msrb.mxu3 %v15133_v15 }
 0x3ee   :  { %v3882_v39 = vmul.f32 %v18793_v49, %v3608_v46  ;;  %15908 = vtanh.f32 %v3824_v21  ;;  %v3828_v11 = vmul.f32 0.5, %v3820_v62  ;;  %v3891_v5 = vmul.f32 %v15893_v34, %v17574_v19 }
 0x3ef   :  { %v3883_v63 = vmul.f32 %v18794_v12, %v3609_v61  ;;  %v17637_v52 = vadd.f32 %v3888_v14, %v3880_v35  ;;  %15910 = vtanh.f32 %v3825_v31  ;;  %v18795_v9 = vrot.slane %v17430_v20, 7  ;;  %v15901_v13 = vpop.eup %15900 }
 0x3f0   :  { %v3892_v32 = vmul.f32 %v15895_v45, %v17576_v41  ;;  %v17642_v33 = vadd.f32 %v3889_v18, %v3881_v6  ;;  %15912 = vtanh.f32 %v3826_v23  ;;  %v17644_v37 = vadd.f32 %v3890_v17, %v3882_v39 }
 0x3f1   :  { %v3884_v3 = vmul.f32 %v18795_v9, %v3610_v0  ;;  %v15903_v16 = vpop.eup %15902  ;;  %15914 = vtanh.f32 %v3827_v60  ;;  %v17646_v30 = vadd.f32 %v3891_v5, %v3883_v63 }
 0x3f2   :  { %v15905_v19 = vpop.eup %15904  ;;  %v3837_v24 = vadd.f32 1.0, %v15903_v16  ;;  %15916 = vtanh.f32 %v3828_v11 }
 0x3f3   :  { %v15907_v56 = vpop.eup %15906  ;;  %v3838_v20 = vadd.f32 1.0, %v15905_v19  ;;  %v17648_v58 = vadd.f32 %v3892_v32, %v3884_v3  ;;  %15918 = vtanh.f32 %v17637_v52 }
 0x3f4   :  { %v15909_v41 = vpop.eup %15908  ;;  %v3839_v51 = vadd.f32 1.0, %v15907_v56  ;;  %v3845_v47 = vmul.f32 0.5, %v3837_v24  ;;  %15920 = vtanh.f32 %v17642_v33 }
 0x3f5   :  { %v15911_v46 = vpop.eup %15910  ;;  %v3840_v25 = vadd.f32 1.0, %v15909_v41  ;;  %v3846_v35 = vmul.f32 0.5, %v3838_v20  ;;  %15922 = vtanh.f32 %v17644_v37 }
 0x3f6   :  { %v15913_v42 = vpop.eup %15912  ;;  %v3841_v36 = vadd.f32 1.0, %v15911_v46  ;;  %v3847_v8 = vmul.f32 0.5, %v3839_v51  ;;  %v3909_v27 = vmul.f32 %v15897_v7, %v3845_v47  ;;  %15924 = vtanh.f32 %v17646_v30 }
 0x3f7   :  { %v15915_v61 = vpop.eup %15914  ;;  %v3910_v2 = vmul.f32 %v15899_v26, %v3846_v35  ;;  %v3842_v22 = vadd.f32 1.0, %v15913_v42  ;;  %15926 = vtanh.f32 %v17648_v58  ;;  %v3848_v29 = vmul.f32 0.5, %v3840_v25 }
 0x3f8   :  { %v15917_v54 = vpop.eup %15916  ;;  %3986 = vst [vmem:[#allocation9] sm:$0x10] %v3909_v27  ;;  %v3843_v38 = vadd.f32 1.0, %v15915_v61  ;;  %v3911_v34 = vmul.f32 %v15901_v13, %v3847_v8  ;;  %v4106_v53 = vpack.c.bf16 %v3909_v27, %v3909_v27  ;;  %v3849_v1 = vmul.f32 0.5, %v3841_v36  ;;  %v4009_v36 = vpop.permute.xlu2 %4008 }
 0x3f9   :  { %v15919_v59 = vpop.eup %15918  ;;  %3987 = vst [vmem:[#allocation9 + $0x10] sm:$0x10] %v3910_v2  ;;  %v3844_v44 = vadd.f32 1.0, %v15917_v54  ;;  %v4107_v43 = vpack.c.bf16 %v3910_v2, %v3910_v2  ;;  %v3850_v6 = vmul.f32 0.5, %v3842_v22  ;;  %v4005_v8 = vpop.permute.xlu1 %4004 }
 0x3fa   :  { %v15921_v40 = vpop.eup %15920  ;;  %v3912_v21 = vmul.f32 %v15919_v59, %v3848_v29  ;;  %3988 = vst [vmem:[#allocation9 + $0x20] sm:$0x10] %v3911_v34  ;;  %v4108_v4 = vpack.c.bf16 %v3911_v34, %v3911_v34  ;;  %v4138_v0 = vunpack.c.l.b16 %v4106_v53  ;;  %v3851_v31 = vmul.f32 0.5, %v3843_v38  ;;  %v4013_v61 = vpop.permute.xlu0 %4012 }
 0x3fb   :  { %v15923_v14 = vpop.eup %15922  ;;  %v3852_v10 = vmul.f32 0.5, %v3844_v44  ;;  %v3913_v55 = vmul.f32 %v15921_v40, %v3849_v1  ;;  %v4139_v45 = vunpack.c.l.b16 %v4107_v43  ;;  %v4034_v34 = vrot.slane %v4005_v8, 4 }
 0x3fc   :  { %v15925_v18 = vpop.eup %15924  ;;  %v3914_v23 = vmul.f32 %v15923_v14, %v3850_v6  ;;  %3989 = vst [vmem:[#allocation9 + $0x30] sm:$0x10] %v3912_v21  ;;  %v4109_v48 = vpack.c.bf16 %v3912_v21, %v3912_v21  ;;  %v4140_v15 = vunpack.c.l.b16 %v4108_v4  ;;  %v4146_v62 = vrot.slane %v4138_v0, 4  ;;  %v17668_v4 = vld [vmem:[#allocation6] sm:$0x44] }
 0x3fd   :  { %v15927_v7 = vpop.eup %15926  ;;  %v3915_v49 = vmul.f32 %v15925_v18, %v3851_v31  ;;  %3990 = vst [vmem:[#allocation9 + $0x40] sm:$0x10] %v3913_v55  ;;  %v4110_v39 = vpack.c.bf16 %v3913_v55, %v3913_v55  ;;  %v4147_v17 = vrot.slane %v4139_v45, 3  ;;  %v4035_v53 = vrot.slane %v4009_v36, 4  ;;  %v17670_v0 = vld [vmem:[#allocation6 + $0x20] sm:$0x44] }
 0x3fe   :  { %v3916_v60 = vmul.f32 %v15927_v7, %v3852_v10  ;;  %3991 = vst [vmem:[#allocation9 + $0x50] sm:$0x10] %v3914_v23  ;;  %v4111_v26 = vpack.c.bf16 %v3914_v23, %v3914_v23  ;;  %v4141_v12 = vunpack.c.l.b16 %v4109_v48  ;;  %v4149_v63 = vrot.slane %v4140_v15, 2  ;;  %v17692_v18 = vld [vmem:[#allocation6 + $0x60] sm:$0x44] }
 0x3ff   :  { %3992 = vst [vmem:[#allocation9 + $0x60] sm:$0x10] %v3915_v49  ;;  %v4112_v11 = vpack.c.bf16 %v3915_v49, %v3915_v49  ;;  %v4148_v5 = vsel %vm99_vm0, %v4147_v17, %v4146_v62  ;;  %v4142_v16 = vunpack.c.l.b16 %v4110_v39  ;;  %v4036_v1 = vrot.slane %v4013_v61, 4  ;;  %v17699_v23 = vld [vmem:[#allocation6 + $0xc0] sm:$0x44] }
 0x400   :  { %3993 = vst [vmem:[#allocation9 + $0x70] sm:$0x10] %v3916_v60  ;;  %v4113_v9 = vpack.c.bf16 %v3916_v60, %v3916_v60  ;;  %v4143_v3 = vunpack.c.l.b16 %v4111_v26  ;;  %v4150_v32 = vsel %vm102_vm1, %v4149_v63, %v4148_v5  ;;  %v4151_v13 = vrot.slane %v4141_v12, 1  ;;  %v4021_v27 = vpop.permute.xlu2 %4020  ;;  %v17714_v12 = vld [vmem:[#allocation6 + $0x8] sm:$0x44] }
 0x401   :  { %v4144_v19 = vunpack.c.l.b16 %v4112_v11  ;;  %v4017_v2 = vpop.permute.xlu1 %4016  ;;  %v4038_v59 = vrot.slane %v4021_v27, 4  ;;  %v17666_v21 = vmul.f32 %v4034_v34, %v17597_v28  ;;  %v17673_v14 = vmul.f32 %v4035_v53, %v17601_v57  ;;  %v17687_v28 = vld [vmem:[#allocation6 + $0x40] sm:$0x44]  ;;  %v17716_v63 = vld [vmem:[#allocation6 + $0xa8] sm:$0x44] }
 0x402   :  { %v4145_v24 = vunpack.c.l.b16 %v4113_v9  ;;  %v4152_v56 = vsel %vm105_vm2, %v4151_v13, %v4150_v32  ;;  %v4154_v20 = vrot.slane %v4143_v3, 7  ;;  %v4029_v54 = vpop.permute.xlu0 %4028  ;;  %v4037_v44 = vrot.slane %v4017_v2, 4  ;;  %v17694_v57 = vld [vmem:[#allocation6 + $0x80] sm:$0x44]  ;;  %v17722_v32 = vld [vmem:[#allocation6 + $0x28] sm:$0x44] }
 0x403   :  { %v4153_v41 = vsel %vm108_vm3, %v4142_v16, %v4152_v56  ;;  %v4156_v51 = vrot.slane %v4144_v19, 6  ;;  %v4040_v43 = vrot.slane %v4029_v54, 4  ;;  %v17676_v31 = vmul.f32 %v4036_v1, %v17609_v50  ;;  %v17696_v50 = vld [vmem:[#allocation6 + $0xa0] sm:$0x44]  ;;  %v17724_v13 = vld [vmem:[#allocation6 + $0x48] sm:$0x44] }
 0x404   :  { %v4155_v47 = vsel %vm111_vm4, %v4154_v20, %v4153_v41  ;;  %v4158_v46 = vrot.slane %v4145_v24, 5  ;;  %v17679_v10 = vmul.f32 %v4037_v44, %v17637_v52  ;;  %v17682_v55 = vmul.f32 %v4038_v59, %v17642_v33  ;;  %v17701_v33 = vld [vmem:[#allocation6 + $0xe0] sm:$0x44]  ;;  %v17726_v16 = vld [vmem:[#allocation6 + $0x68] sm:$0x44] }
 0x405   :  { %v4157_v25 = vsel %vm114_vm5, %v4156_v51, %v4155_v47  ;;  %v4078_v48 = vunpack.c.l.bf16 %v17670_v0  ;;  %v4082_v39 = vunpack.c.l.bf16 %v17687_v28  ;;  %v4086_v17 = vunpack.c.l.bf16 %v17692_v18  ;;  %v17732_v41 = vld [vmem:[#allocation6 + $0x88] sm:$0x44] }
 0x406   :  { %v4159_v35 = vsel %vm117_vm6, %v4158_v46, %v4157_v25  ;;  %v4090_v11 = vunpack.c.l.bf16 %v17694_v57  ;;  %v4094_v5 = vunpack.c.l.bf16 %v17696_v50  ;;  %v4098_v9 = vunpack.c.l.bf16 %v17699_v23  ;;  %v17734_v51 = vld [vmem:[#allocation6 + $0xc8] sm:$0x44] }
 0x407   :  { %v4160_v42 = vpack.c.b16 %v4159_v35, %v4159_v35  ;;  %v4102_v3 = vunpack.c.l.bf16 %v17701_v33  ;;  %v4075_v19 = vunpack.c.h.bf16 %v17668_v4  ;;  %v4079_v24 = vunpack.c.h.bf16 %v17670_v0  ;;  %v17736_v47 = vld [vmem:[#allocation6 + $0xe8] sm:$0x44] }
 0x408   :  { %v4033_v22 = vpop.permute.xlu2 %4032  ;;  %v4083_v56 = vunpack.c.h.bf16 %v17687_v28  ;;  %v4095_v20 = vunpack.c.h.bf16 %v17696_v50  ;;  %v4087_v46 = vunpack.c.h.bf16 %v17692_v18  ;;  %v4091_v25 = vunpack.c.h.bf16 %v17694_v57 }
 0x409   :  { %4218 = vmatmul.bf16.vlgmr.msrb.gmra.mxu0 %v4160_v42  ;;  %4351 = vmatmul.bf16.vlgmr.msrb.gmra.mxu1 %v4160_v42  ;;  %v4025_v29 = vpop.permute.xlu1 %4024  ;;  %v4041_v38 = vrot.slane %v4033_v22, 4  ;;  %v4099_v35 = vunpack.c.h.bf16 %v17699_v23  ;;  %v4076_v36 = vunpack.c.l.bf16 %v17714_v12  ;;  %v4080_v8 = vunpack.c.l.bf16 %v17722_v32 }
 0x40a   :  { %4484 = vmatmul.bf16.vlgmr.msrb.gmra.mxu2 %v4160_v42  ;;  %4593 = vmatmul.bf16.vlgmr.msrb.gmra.mxu3 %v4160_v42  ;;  %v4039_v40 = vrot.slane %v4025_v29, 4  ;;  %v4103_v42 = vunpack.c.h.bf16 %v17701_v33  ;;  %v4084_v27 = vunpack.c.l.bf16 %v17724_v13  ;;  %v4088_v54 = vunpack.c.l.bf16 %v17726_v16 }
 0x40b   :  { %v17663_v6 = vmul.f32 %v4041_v38, %v17648_v58  ;;  %v17685_v58 = vmul.f32 %v4040_v43, %v17646_v30  ;;  %v4074_v30 = vunpack.c.l.bf16 %v17668_v4  ;;  %v4097_v34 = vunpack.c.h.bf16 %v17716_v63 }
 0x40c   :  { %v17690_v45 = vmul.f32 %v4039_v40, %v17644_v37  ;;  %v4093_v50 = vunpack.c.h.bf16 %v17732_v41  ;;  %v4101_v33 = vunpack.c.h.bf16 %v17734_v51 }
 0x486   :  { %v4219_v2 = vpop.f32.mrf.mxu0  ;;  %v17746_v22 = vpop.f32.mrf.mxu1 }
 0x487   :  { %v4224_v53 = vrot.slane %v4219_v2, 3  ;;  %v4225_v59 = vrot.slane %v4219_v2, 4  ;;  %v4226_v1 = vrot.slane %v4219_v2, 5  ;;  %v4227_v44 = vrot.slane %v4219_v2, 6 }
 0x488   :  { %v4228_v43 = vrot.slane %v4219_v2, 7  ;;  %v4229_v40 = vrot.slane %v4219_v2, 1  ;;  %v4230_v4 = vrot.slane %v4219_v2, 2  ;;  %v4244_v0 = vadd.f32 %v4219_v2, %v4094_v5 }
 0x489   :  { %v4239_v28 = vadd.f32 %v4224_v53, %v4074_v30  ;;  %v4240_v18 = vadd.f32 %v4225_v59, %v4078_v48  ;;  %v4241_v57 = vadd.f32 %v4226_v1, %v4082_v39  ;;  %v4242_v52 = vadd.f32 %v4227_v44, %v4086_v17 }
 0x48a   :  { %v4243_v26 = vadd.f32 %v4228_v43, %v4090_v11  ;;  %v4245_v60 = vadd.f32 %v4229_v40, %v4098_v9  ;;  %v4246_v49 = vadd.f32 %v4230_v4, %v4102_v3  ;;  %v4252_v7 = vmul.f32 0.5, %v4244_v0 }
 0x48b   :  { %v4247_v62 = vmul.f32 0.5, %v4239_v28  ;;  %v4248_v37 = vmul.f32 0.5, %v4240_v18  ;;  %v4249_v15 = vmul.f32 0.5, %v4241_v57  ;;  %v4250_v38 = vmul.f32 0.5, %v4242_v52  ;;  %v15148_v28 = vld [vmem:[#allocation2 + $0x38] sm:$0xff] }
 0x48c   :  { %v4251_v61 = vmul.f32 0.5, %v4243_v26  ;;  %v4253_v29 = vmul.f32 0.5, %v4245_v60  ;;  %15928 = vtanh.f32 %v4252_v7  ;;  %v4357_v5 = vrot.slane %v17746_v22, 3  ;;  %v15156_v18 = vld [vmem:[#allocation2 + $0x78] sm:$0xff]  ;;  %5011 = vmatpush.bf16.msra.mxu0 %v15148_v28  ;;  %v15154_v28 = vld [vmem:[#allocation2 + $0x68] sm:$0xff] }
 0x48d   :  { %15930 = vtanh.f32 %v4247_v62  ;;  %v4358_v30 = vrot.slane %v17746_v22, 4  ;;  %v4359_v48 = vrot.slane %v17746_v22, 5  ;;  %v17756_v39 = vpop.f32.mrf.mxu2  ;;  %v17758_v17 = vpop.f32.mrf.mxu3  ;;  %v4254_v11 = vmul.f32 0.5, %v4246_v49  ;;  %v15164_v57 = vld [vmem:[#allocation2 + $0xb8] sm:$0xff]  ;;  %5144 = vmatpush.bf16.msra.mxu1 %v15156_v18  ;;  %v15162_v18 = vld [vmem:[#allocation2 + $0xa8] sm:$0xff] }
 0x48e   :  { %15932 = vtanh.f32 %v4248_v37  ;;  %v4360_v9 = vrot.slane %v17746_v22, 6  ;;  %v4361_v52 = vrot.slane %v17746_v22, 7  ;;  %v4221_v26 = vpop.f32.mrf.mxu0  ;;  %v4354_v60 = vpop.f32.mrf.mxu1  ;;  %v4362_v62 = vrot.slane %v17746_v22, 1  ;;  %5277 = vmatpush.bf16.msra.mxu2 %v15164_v57 }
 0x48f   :  { %15934 = vtanh.f32 %v4249_v15  ;;  %v4372_v7 = vadd.f32 %v4357_v5, %v4075_v19  ;;  %v4373_v3 = vadd.f32 %v4358_v30, %v4079_v24  ;;  %v4363_v2 = vrot.slane %v17746_v22, 2 }
 0x490   :  { %15936 = vtanh.f32 %v4250_v38  ;;  %v4374_v53 = vadd.f32 %v4359_v48, %v4083_v56  ;;  %v4375_v59 = vadd.f32 %v4360_v9, %v4087_v46  ;;  %v4376_v1 = vadd.f32 %v4361_v52, %v4091_v25 }
 0x491   :  { %15938 = vtanh.f32 %v4251_v61  ;;  %v4077_v37 = vunpack.c.h.bf16 %v17714_v12  ;;  %v4081_v49 = vunpack.c.h.bf16 %v17722_v32  ;;  %v4377_v15 = vadd.f32 %v17746_v22, %v4095_v20 }
 0x492   :  { %v15929_v44 = vpop.eup %15928  ;;  %15940 = vtanh.f32 %v4253_v29  ;;  %v4380_v43 = vmul.f32 0.5, %v4372_v7  ;;  %v4381_v19 = vmul.f32 0.5, %v4373_v3  ;;  %v4378_v38 = vadd.f32 %v4362_v62, %v4099_v35 }
 0x493   :  { %v15931_v24 = vpop.eup %15930  ;;  %v4382_v56 = vmul.f32 0.5, %v4374_v53  ;;  %v4085_v46 = vunpack.c.h.bf16 %v17724_v13  ;;  %v4089_v25 = vunpack.c.h.bf16 %v17726_v16  ;;  %15942 = vtanh.f32 %v4254_v11 }
 0x494   :  { %v15933_v61 = vpop.eup %15932  ;;  %v4379_v29 = vadd.f32 %v4363_v2, %v4103_v42  ;;  %v4383_v40 = vmul.f32 0.5, %v4375_v59  ;;  %v4263_v22 = vadd.f32 1.0, %v15931_v24  ;;  %v4268_v4 = vadd.f32 1.0, %v15929_v44  ;;  %v15172_v42 = vld [vmem:[#allocation2 + $0xf8] sm:$0xff]  ;;  %v15155_v44 = vld [vmem:[#allocation2 + $0x70] sm:$0xff] }
 0x495   :  { %v15935_v20 = vpop.eup %15934  ;;  %v4384_v0 = vmul.f32 0.5, %v4376_v1  ;;  %15944 = vtanh.f32 %v4380_v43  ;;  %v4487_v23 = vpop.f32.mrf.mxu2  ;;  %v4264_v30 = vadd.f32 1.0, %v15933_v61  ;;  %v4385_v48 = vmul.f32 0.5, %v4377_v15  ;;  %5386 = vmatpush.bf16.msra.mxu3 %v15172_v42  ;;  %v15147_v1 = vld [vmem:[#allocation2 + $0x30] sm:$0xff]  ;;  %5145 = vmatpush.bf16.msra.mxu1 %v15155_v44  ;;  %v15170_v42 = vld [vmem:[#allocation2 + $0xe8] sm:$0xff]  ;;  %v15153_v44 = vld [vmem:[#allocation2 + $0x60] sm:$0xff] }
 0x496   :  { %v4596_v35 = vpop.f32.mrf.mxu3  ;;  %v15937_v5 = vpop.eup %15936  ;;  %15946 = vtanh.f32 %v4381_v19  ;;  %v4265_v9 = vadd.f32 1.0, %v15935_v20  ;;  %v4386_v52 = vmul.f32 0.5, %v4378_v38  ;;  %v4490_v26 = vrot.slane %v17756_v39, 3  ;;  %v15163_v15 = vld [vmem:[#allocation2 + $0xb0] sm:$0xff]  ;;  %5012 = vmatpush.bf16.msra.mxu0 %v15147_v1  ;;  %v15145_v1 = vld [vmem:[#allocation2 + $0x20] sm:$0xff] }
 0x497   :  { %v15939_v11 = vpop.eup %15938  ;;  %15948 = vtanh.f32 %v4382_v56  ;;  %v4266_v62 = vadd.f32 1.0, %v15937_v5  ;;  %v4387_v7 = vmul.f32 0.5, %v4379_v29  ;;  %v4491_v3 = vrot.slane %v17756_v39, 4  ;;  %v15171_v56 = vld [vmem:[#allocation2 + $0xf0] sm:$0xff]  ;;  %5278 = vmatpush.bf16.msra.mxu2 %v15163_v15  ;;  %v15146_v35 = vld [vmem:[#allocation2 + $0x28] sm:$0xff] }
 0x498   :  { %v15941_v60 = vpop.eup %15940  ;;  %15950 = vtanh.f32 %v4383_v40  ;;  %v17779_v2 = vmul.f32 0.5, %v4263_v22  ;;  %v17781_v53 = vmul.f32 0.5, %v4268_v4  ;;  %v4492_v59 = vrot.slane %v17756_v39, 5 }
 0x499   :  { %15952 = vtanh.f32 %v4384_v0  ;;  %v15943_v43 = vpop.eup %15942  ;;  %v4267_v19 = vadd.f32 1.0, %v15939_v11  ;;  %v17784_v24 = vmul.f32 0.5, %v4264_v30  ;;  %v4493_v38 = vrot.slane %v17756_v39, 6  ;;  %5387 = vmatpush.bf16.msra.mxu3 %v15171_v56  ;;  %5146 = vmatpush.bf16.msra.mxu1 %v15154_v28  ;;  %v15161_v56 = vld [vmem:[#allocation2 + $0xa0] sm:$0xff] }
 0x49a   :  { %15954 = vtanh.f32 %v4385_v48  ;;  %v4269_v29 = vadd.f32 1.0, %v15941_v60  ;;  %v17787_v40 = vmul.f32 0.5, %v4265_v9  ;;  %v4505_v20 = vadd.f32 %v4490_v26, %v4076_v36  ;;  %5013 = vmatpush.bf16.msra.mxu0 %v15146_v35 }
 0x49b   :  { %v15945_v61 = vpop.eup %15944  ;;  %15956 = vtanh.f32 %v4386_v52  ;;  %v17791_v4 = vmul.f32 0.5, %v4266_v62  ;;  %v4506_v23 = vadd.f32 %v4491_v3, %v4080_v8  ;;  %v4270_v5 = vadd.f32 1.0, %v15943_v43  ;;  %5279 = vmatpush.bf16.msra.mxu2 %v15162_v18 }
 0x49c   :  { %v15947_v22 = vpop.eup %15946  ;;  %15958 = vtanh.f32 %v4387_v7  ;;  %v4396_v0 = vadd.f32 1.0, %v15945_v61  ;;  %v4494_v36 = vrot.slane %v17756_v39, 7  ;;  %v4507_v48 = vadd.f32 %v4492_v59, %v4084_v27  ;;  %v15169_v61 = vld [vmem:[#allocation2 + $0xe0] sm:$0xff] }
 0x49d   :  { %v15949_v57 = vpop.eup %15948  ;;  %v4397_v30 = vadd.f32 1.0, %v15947_v22  ;;  %v4495_v52 = vrot.slane %v17756_v39, 1  ;;  %v4496_v8 = vrot.slane %v17756_v39, 2  ;;  %v4508_v26 = vadd.f32 %v4493_v38, %v4088_v54  ;;  %5388 = vmatpush.bf16.msra.mxu3 %v15170_v42  ;;  %5147 = vmatpush.bf16.msra.mxu1 %v15153_v44 }
 0x49e   :  { %v15951_v11 = vpop.eup %15950  ;;  %v4398_v9 = vadd.f32 1.0, %v15949_v57  ;;  %v4404_v7 = vmul.f32 0.5, %v4396_v0  ;;  %15960 = vtanh.f32 %v4505_v20  ;;  %v17802_v59 = vmul.f32 0.5, %v4267_v19  ;;  %5014 = vmatpush.bf16.msra.mxu0 %v15145_v1 }
 0x49f   :  { %v15953_v60 = vpop.eup %15952  ;;  %v4399_v62 = vadd.f32 1.0, %v15951_v11  ;;  %v4405_v3 = vmul.f32 0.5, %v4397_v30  ;;  %15962 = vtanh.f32 %v4506_v23  ;;  %v17804_v38 = vmul.f32 0.5, %v4269_v29  ;;  %5280 = vmatpush.bf16.msra.mxu2 %v15161_v56 }
 0x4a0   :  { %v15955_v27 = vpop.eup %15954  ;;  %v4400_v15 = vadd.f32 1.0, %v15953_v60  ;;  %v4406_v43 = vmul.f32 0.5, %v4398_v9  ;;  %v18796_v20 = vunpack.c.l.bf16 %v17732_v41  ;;  %15964 = vtanh.f32 %v4507_v48  ;;  %v15144_v60 = vld [vmem:[#allocation2 + $0x18] sm:$0xff]  ;;  %v15166_v41 = vld [vmem:[#allocation2 + $0xc8] sm:$0xff] }
 0x4a1   :  { %v15957_v54 = vpop.eup %15956  ;;  %v4401_v22 = vadd.f32 1.0, %v15955_v27  ;;  %v4407_v28 = vmul.f32 0.5, %v4399_v62  ;;  %v18797_v19 = vunpack.c.l.bf16 %v17716_v63  ;;  %v18798_v23 = vunpack.c.l.bf16 %v17734_v51  ;;  %v15152_v62 = vld [vmem:[#allocation2 + $0x58] sm:$0xff]  ;;  %5389 = vmatpush.bf16.msra.mxu3 %v15169_v61 }
 0x4a2   :  { %v4509_v0 = vadd.f32 %v4494_v36, %v18796_v20  ;;  %v15959_v35 = vpop.eup %15958  ;;  %15966 = vtanh.f32 %v4508_v26  ;;  %v17813_v30 = vmul.f32 0.5, %v4270_v5  ;;  %v18799_v29 = vrot.slane %v17666_v21, 7  ;;  %v15160_v21 = vld [vmem:[#allocation2 + $0x98] sm:$0xff]  ;;  %5015 = vmatpush.bf16.msra.mxu0 %v15144_v60  ;;  %5148 = vmatpush.bf16.msra.mxu1 %v15152_v62 }
 0x4a3   :  { %v4510_v57 = vadd.f32 %v17756_v39, %v18797_v19  ;;  %v4511_v18 = vadd.f32 %v4495_v52, %v18798_v23  ;;  %v18800_v11 = vrot.slane %v17673_v14, 7  ;;  %v18801_v36 = vunpack.c.l.bf16 %v17736_v47  ;;  %5281 = vmatpush.bf16.msra.mxu2 %v15160_v21  ;;  %v15167_v23 = vld [vmem:[#allocation2 + $0xd0] sm:$0xff]  ;;  %v15141_v21 = vld [vmem:[#allocation2] sm:$0xff] }
 0x4a4   :  { %v4678_v42 = vmul.f32 %v18799_v29, %v4404_v7  ;;  %v4402_v39 = vadd.f32 1.0, %v15957_v54  ;;  %v4408_v27 = vmul.f32 0.5, %v4400_v15  ;;  %v18802_v52 = vrot.slane %v17676_v31, 7  ;;  %v15168_v7 = vld [vmem:[#allocation2 + $0xd8] sm:$0xff]  ;;  %v15961_v14 = vpop.eup %15960 }
 0x4a5   :  { %v4679_v9 = vmul.f32 %v18800_v11, %v4405_v3  ;;  %v4512_v48 = vadd.f32 %v4496_v8, %v18801_v36  ;;  %v4599_v5 = vrot.slane %v17758_v17, 3  ;;  %v4403_v3 = vadd.f32 1.0, %v15959_v35  ;;  %v15963_v1 = vpop.eup %15962  ;;  %v15151_v35 = vld [vmem:[#allocation2 + $0x50] sm:$0xff]  ;;  %5390 = vmatpush.bf16.msra.mxu3 %v15168_v7  ;;  %v15149_v7 = vld [vmem:[#allocation2 + $0x40] sm:$0xff] }
 0x4a6   :  { %v4680_v26 = vmul.f32 %v18802_v52, %v4406_v43  ;;  %v4409_v20 = vmul.f32 0.5, %v4401_v22  ;;  %15968 = vtanh.f32 %v4509_v0  ;;  %v4600_v8 = vrot.slane %v17758_v17, 4  ;;  %v15965_v43 = vpop.eup %15964  ;;  %v15143_v0 = vld [vmem:[#allocation2 + $0x10] sm:$0xff]  ;;  %5149 = vmatpush.bf16.msra.mxu1 %v15151_v35 }
 0x4a7   :  { %v18803_v44 = vrot.slane %v17679_v10, 7  ;;  %15970 = vtanh.f32 %v4510_v57  ;;  %v4686_v31 = vmul.f32 %v15961_v14, %v17779_v2  ;;  %v4601_v15 = vrot.slane %v17758_v17, 5  ;;  %5016 = vmatpush.bf16.msra.mxu0 %v15143_v0 }
 0x4a8   :  { %15972 = vtanh.f32 %v4511_v18  ;;  %v4687_v56 = vmul.f32 %v15963_v1, %v17784_v24  ;;  %v4602_v61 = vrot.slane %v17758_v17, 6  ;;  %v4603_v22 = vrot.slane %v17758_v17, 7  ;;  %v15967_v10 = vpop.eup %15966  ;;  %v15159_v24 = vld [vmem:[#allocation2 + $0x90] sm:$0xff] }
 0x4a9   :  { %v17827_v54 = vmul.f32 %v18803_v44, %v4407_v28  ;;  %v4688_v28 = vmul.f32 %v15965_v43, %v17787_v40  ;;  %v17835_v19 = vadd.f32 %v4686_v31, %v4678_v42  ;;  %v4604_v2 = vrot.slane %v17758_v17, 1  ;;  %5282 = vmatpush.bf16.msra.mxu2 %v15159_v24  ;;  %5391 = vmatpush.bf16.msra.mxu3 %v15167_v23 }
 0x4aa   :  { %v4614_v57 = vadd.f32 %v4599_v5, %v4077_v37  ;;  %15974 = vtanh.f32 %v4512_v48  ;;  %v17840_v18 = vadd.f32 %v4687_v56, %v4679_v9  ;;  %v4615_v29 = vadd.f32 %v4600_v8, %v4081_v49  ;;  %v15142_v49 = vld [vmem:[#allocation2 + $0x8] sm:$0xff]  ;;  %v15165_v8 = vld [vmem:[#allocation2 + $0xc0] sm:$0xff] }
 0x4ab   :  { %v4616_v40 = vadd.f32 %v4601_v15, %v4085_v46  ;;  %v4410_v42 = vmul.f32 0.5, %v4402_v39  ;;  %v18804_v11 = vrot.slane %v17682_v55, 7  ;;  %v17848_v60 = vadd.f32 %v4688_v28, %v4680_v26  ;;  %v15150_v55 = vld [vmem:[#allocation2 + $0x48] sm:$0xff]  ;;  %5017 = vmatpush.bf16.msra.mxu0 %v15142_v49 }
 0x4ac   :  { %v4617_v12 = vadd.f32 %v4602_v61, %v4089_v25  ;;  %v15969_v37 = vpop.eup %15968  ;;  %v4689_v48 = vmul.f32 %v15967_v10, %v17791_v4  ;;  %15976 = vtanh.f32 %v17835_v19  ;;  %v4605_v32 = vrot.slane %v17758_v17, 2  ;;  %v15158_v9 = vld [vmem:[#allocation2 + $0x88] sm:$0xff]  ;;  %5150 = vmatpush.bf16.msra.mxu1 %v15150_v55 }
 0x4ad   :  { %v4682_v36 = vmul.f32 %v18804_v11, %v4408_v27  ;;  %v4618_v13 = vadd.f32 %v4603_v22, %v4093_v50  ;;  %v15971_v46 = vpop.eup %15970  ;;  %15978 = vtanh.f32 %v17840_v18  ;;  %v4619_v16 = vadd.f32 %v17758_v17, %v4097_v34  ;;  %5283 = vmatpush.bf16.msra.mxu2 %v15158_v9  ;;  %5392 = vmatpush.bf16.msra.mxu3 %v15166_v41 }
 0x4ae   :  { %v4620_v25 = vadd.f32 %v4604_v2, %v4101_v33  ;;  %v4622_v4 = vmul.f32 0.5, %v4614_v57  ;;  %v15973_v50 = vpop.eup %15972  ;;  %15980 = vtanh.f32 %v17848_v60  ;;  %v4623_v62 = vmul.f32 0.5, %v4615_v29 }
 0x4af   :  { %v4624_v39 = vmul.f32 0.5, %v4616_v40  ;;  %v4625_v27 = vmul.f32 0.5, %v4617_v12  ;;  %v4411_v52 = vmul.f32 0.5, %v4403_v3  ;;  %v4626_v26 = vmul.f32 0.5, %v4618_v13  ;;  %v15157_v3 = vld [vmem:[#allocation2 + $0x80] sm:$0xff]  ;;  %5018 = vmatpush.bf16.msra.mxu0 %v15141_v21 }
 0x4b0   :  { %15982 = vtanh.f32 %v4622_v4  ;;  %v4105_v63 = vunpack.c.h.bf16 %v17736_v47  ;;  %v15975_v34 = vpop.eup %15974  ;;  %v18805_v51 = vrot.slane %v17690_v45, 7  ;;  %v4690_v33 = vmul.f32 %v15969_v37, %v17802_v59  ;;  %5151 = vmatpush.bf16.msra.mxu1 %v15149_v7 }
 0x4b1   :  { %v4627_v5 = vmul.f32 0.5, %v4619_v16  ;;  %15984 = vtanh.f32 %v4623_v62  ;;  %v4691_v14 = vmul.f32 %v15971_v46, %v17781_v53  ;;  %v4628_v1 = vmul.f32 0.5, %v4620_v25  ;;  %5284 = vmatpush.bf16.msra.mxu2 %v15157_v3  ;;  %5393 = vmatpush.bf16.msra.mxu3 %v15165_v8 }
 0x4b2   :  { %v4683_v17 = vmul.f32 %v18805_v51, %v4409_v20  ;;  %15986 = vtanh.f32 %v4624_v39  ;;  %v4621_v47 = vadd.f32 %v4605_v32, %v4105_v63  ;;  %v15977_v44 = vpop.eup %15976  ;;  %v18806_v45 = vrot.slane %v17685_v58, 7 }
 0x4b3   :  { %v17872_v59 = vadd.f32 %v4689_v48, %v17827_v54  ;;  %15988 = vtanh.f32 %v4625_v27  ;;  %v4692_v31 = vmul.f32 %v15973_v50, %v17804_v38  ;;  %v15979_v15 = vpop.eup %15978  ;;  %v18807_v43 = vrot.slane %v17663_v6, 7 }
 0x4b4   :  { %v4684_v20 = vmul.f32 %v18806_v45, %v4410_v42  ;;  %15990 = vtanh.f32 %v4626_v26  ;;  %v4629_v53 = vmul.f32 0.5, %v4621_v47  ;;  %v4693_v61 = vmul.f32 %v15975_v34, %v17813_v30  ;;  %v15981_v22 = vpop.eup %15980 }
 0x4b5   :  { %v4685_v56 = vmul.f32 %v18807_v43, %v4411_v52  ;;  %15992 = vtanh.f32 %v4627_v5  ;;  %v17878_v58 = vadd.f32 %v4690_v33, %v4682_v36  ;;  %v17880_v54 = vadd.f32 %v4691_v14, %v4683_v17 }
 0x4b6   :  { %v15983_v0 = vpop.eup %15982  ;;  %15994 = vtanh.f32 %v4628_v1  ;;  %v17882_v10 = vadd.f32 %v4692_v31, %v4684_v20 }
 0x4b7   :  { %v15985_v38 = vpop.eup %15984  ;;  %v4638_v35 = vadd.f32 1.0, %v15983_v0  ;;  %15996 = vtanh.f32 %v4629_v53  ;;  %v17884_v30 = vadd.f32 %v4693_v61, %v4685_v56 }
 0x4b8   :  { %v15987_v6 = vpop.eup %15986  ;;  %v4639_v28 = vadd.f32 1.0, %v15985_v38  ;;  %15998 = vtanh.f32 %v17872_v59 }
 0x4b9   :  { %v15989_v2 = vpop.eup %15988  ;;  %v4640_v57 = vadd.f32 1.0, %v15987_v6  ;;  %v4646_v24 = vmul.f32 0.5, %v4638_v35  ;;  %16000 = vtanh.f32 %v17878_v58 }
 0x4ba   :  { %v15991_v23 = vpop.eup %15990  ;;  %v4641_v29 = vadd.f32 1.0, %v15989_v2  ;;  %v4647_v40 = vmul.f32 0.5, %v4639_v28  ;;  %16002 = vtanh.f32 %v17880_v54 }
 0x4bb   :  { %v15993_v42 = vpop.eup %15992  ;;  %v4648_v11 = vmul.f32 0.5, %v4640_v57  ;;  %v4710_v36 = vmul.f32 %v15977_v44, %v4646_v24  ;;  %v4642_v12 = vadd.f32 1.0, %v15991_v23  ;;  %16004 = vtanh.f32 %v17882_v10 }
 0x4bc   :  { %v15995_v37 = vpop.eup %15994  ;;  %v4711_v48 = vmul.f32 %v15979_v15, %v4647_v40  ;;  %v4643_v32 = vadd.f32 1.0, %v15993_v42  ;;  %16006 = vtanh.f32 %v17884_v30  ;;  %v4649_v49 = vmul.f32 0.5, %v4641_v29 }
 0x4bd   :  { %v15997_v13 = vpop.eup %15996  ;;  %4787 = vst [vmem:[#allocation9] sm:$0x20] %v4710_v36  ;;  %v4644_v55 = vadd.f32 1.0, %v15995_v37  ;;  %v4712_v46 = vmul.f32 %v15981_v22, %v4648_v11  ;;  %v4907_v16 = vpack.c.bf16 %v4710_v36, %v4710_v36  ;;  %v4650_v9 = vmul.f32 0.5, %v4642_v12  ;;  %v4806_v11 = vpop.permute.xlu0 %4805 }
 0x4be   :  { %v15999_v25 = vpop.eup %15998  ;;  %4788 = vst [vmem:[#allocation9 + $0x10] sm:$0x20] %v4711_v48  ;;  %v4645_v4 = vadd.f32 1.0, %v15997_v13  ;;  %v4908_v41 = vpack.c.bf16 %v4711_v48, %v4711_v48  ;;  %v4651_v62 = vmul.f32 0.5, %v4643_v32  ;;  %v4810_v36 = vpop.permute.xlu1 %4809 }
 0x4bf   :  { %v16001_v50 = vpop.eup %16000  ;;  %v4713_v39 = vmul.f32 %v15999_v25, %v4649_v49  ;;  %4789 = vst [vmem:[#allocation9 + $0x20] sm:$0x20] %v4712_v46  ;;  %v4909_v27 = vpack.c.bf16 %v4712_v46, %v4712_v46  ;;  %v4939_v52 = vunpack.c.l.b16 %v4907_v16  ;;  %v4652_v63 = vmul.f32 0.5, %v4644_v55  ;;  %v4814_v37 = vpop.permute.xlu2 %4813 }
 0x4c0   :  { %v16003_v26 = vpop.eup %16002  ;;  %v4653_v34 = vmul.f32 0.5, %v4645_v4  ;;  %v4714_v51 = vmul.f32 %v16001_v50, %v4650_v9  ;;  %v4940_v17 = vunpack.c.l.b16 %v4908_v41  ;;  %v4837_v55 = vrot.slane %v4814_v37, 3 }
 0x4c1   :  { %v16005_v33 = vpop.eup %16004  ;;  %v4715_v5 = vmul.f32 %v16003_v26, %v4651_v62  ;;  %4790 = vst [vmem:[#allocation9 + $0x30] sm:$0x20] %v4713_v39  ;;  %v4910_v21 = vpack.c.bf16 %v4713_v39, %v4713_v39  ;;  %v4941_v7 = vunpack.c.l.b16 %v4909_v27  ;;  %v4947_v14 = vrot.slane %v4939_v52, 5  ;;  %v17898_v62 = vld [vmem:[#allocation6] sm:$0x88] }
 0x4c2   :  { %v16007_v3 = vpop.eup %16006  ;;  %v4716_v8 = vmul.f32 %v16005_v33, %v4652_v63  ;;  %4791 = vst [vmem:[#allocation9 + $0x40] sm:$0x20] %v4714_v51  ;;  %v4911_v47 = vpack.c.bf16 %v4714_v51, %v4714_v51  ;;  %v4948_v1 = vrot.slane %v4940_v17, 4  ;;  %v4835_v46 = vrot.slane %v4806_v11, 3  ;;  %v17903_v27 = vld [vmem:[#allocation6 + $0x20] sm:$0x88] }
 0x4c3   :  { %v4717_v44 = vmul.f32 %v16007_v3, %v4653_v34  ;;  %4792 = vst [vmem:[#allocation9 + $0x50] sm:$0x20] %v4715_v5  ;;  %v4912_v45 = vpack.c.bf16 %v4715_v5, %v4715_v5  ;;  %v4942_v20 = vunpack.c.l.b16 %v4910_v21  ;;  %v4950_v31 = vrot.slane %v4941_v7, 3  ;;  %v17905_v52 = vld [vmem:[#allocation6 + $0x40] sm:$0x88] }
 0x4c4   :  { %4793 = vst [vmem:[#allocation9 + $0x60] sm:$0x20] %v4716_v8  ;;  %v4913_v15 = vpack.c.bf16 %v4716_v8, %v4716_v8  ;;  %v4943_v53 = vunpack.c.l.b16 %v4911_v47  ;;  %v4949_v43 = vsel %vm99_vm0, %v4948_v1, %v4947_v14  ;;  %v4836_v16 = vrot.slane %v4810_v36, 3  ;;  %v17907_v26 = vld [vmem:[#allocation6 + $0x60] sm:$0x88] }
 0x4c5   :  { %4794 = vst [vmem:[#allocation9 + $0x70] sm:$0x20] %v4717_v44  ;;  %v4914_v56 = vpack.c.bf16 %v4717_v44, %v4717_v44  ;;  %v4951_v61 = vsel %vm102_vm1, %v4950_v31, %v4949_v43  ;;  %v4952_v22 = vrot.slane %v4942_v20, 2  ;;  %v4944_v35 = vunpack.c.l.b16 %v4912_v45  ;;  %v4818_v12 = vpop.permute.xlu0 %4817  ;;  %v17932_v21 = vld [vmem:[#allocation6 + $0xa0] sm:$0x88] }
 0x4c6   :  { %v4945_v0 = vunpack.c.l.b16 %v4913_v15  ;;  %v4954_v38 = vrot.slane %v4943_v53, 1  ;;  %v4822_v48 = vpop.permute.xlu1 %4821  ;;  %v4838_v9 = vrot.slane %v4818_v12, 3  ;;  %v17910_v63 = vmul.f32 %v4835_v46, %v17835_v19  ;;  %v17930_v19 = vld [vmem:[#allocation6 + $0x80] sm:$0x88]  ;;  %v17950_v20 = vld [vmem:[#allocation6 + $0xc8] sm:$0x88] }
 0x4c7   :  { %v4946_v6 = vunpack.c.l.b16 %v4914_v56  ;;  %v4953_v28 = vsel %vm105_vm2, %v4952_v22, %v4951_v61  ;;  %v4826_v13 = vpop.permute.xlu2 %4825  ;;  %v4839_v41 = vrot.slane %v4822_v48, 3  ;;  %v17913_v34 = vmul.f32 %v4836_v16, %v17840_v18  ;;  %v17934_v18 = vld [vmem:[#allocation6 + $0xc0] sm:$0x88]  ;;  %v17956_v56 = vld [vmem:[#allocation6 + $0x8] sm:$0x88] }
 0x4c8   :  { %v4955_v2 = vsel %vm108_vm3, %v4954_v38, %v4953_v28  ;;  %v4957_v57 = vrot.slane %v4945_v0, 7  ;;  %v4840_v4 = vrot.slane %v4826_v13, 3  ;;  %v17916_v51 = vmul.f32 %v4837_v55, %v17848_v60  ;;  %v17936_v60 = vld [vmem:[#allocation6 + $0xe0] sm:$0x88]  ;;  %v17958_v61 = vld [vmem:[#allocation6 + $0x28] sm:$0x88] }
 0x4c9   :  { %v4956_v24 = vsel %vm111_vm4, %v4944_v35, %v4955_v2  ;;  %v4959_v23 = vrot.slane %v4946_v6, 6  ;;  %v17919_v17 = vmul.f32 %v4838_v9, %v17872_v59  ;;  %v4875_v59 = vunpack.c.l.bf16 %v17898_v62  ;;  %v17960_v22 = vld [vmem:[#allocation6 + $0x48] sm:$0x88] }
 0x4ca   :  { %v4958_v29 = vsel %vm114_vm5, %v4957_v57, %v4956_v24  ;;  %v17925_v33 = vmul.f32 %v4840_v4, %v17880_v54  ;;  %v4879_v7 = vunpack.c.l.bf16 %v17903_v27  ;;  %v4887_v54 = vunpack.c.l.bf16 %v17907_v26 }
 0x4cb   :  { %v4960_v40 = vsel %vm117_vm6, %v4959_v23, %v4958_v29  ;;  %v5464_v3 = vrot.slane %v17913_v34, 7  ;;  %v5465_v8 = vrot.slane %v17916_v51, 7  ;;  %v4891_v31 = vunpack.c.l.bf16 %v17930_v19 }
 0x4cc   :  { %v4961_v42 = vpack.c.b16 %v4960_v40, %v4960_v40  ;;  %v4895_v15 = vunpack.c.l.bf16 %v17932_v21  ;;  %v4899_v53 = vunpack.c.l.bf16 %v17934_v18  ;;  %v4903_v43 = vunpack.c.l.bf16 %v17936_v60  ;;  %v17972_v40 = vld [vmem:[#allocation6 + $0x68] sm:$0x88] }
 0x4cd   :  { %v4834_v32 = vpop.permute.xlu0 %4833  ;;  %v4876_v0 = vunpack.c.h.bf16 %v17898_v62  ;;  %v4880_v38 = vunpack.c.h.bf16 %v17903_v27  ;;  %v4884_v35 = vunpack.c.h.bf16 %v17905_v52  ;;  %v4900_v6 = vunpack.c.h.bf16 %v17934_v18 }
 0x4ce   :  { %5019 = vmatmul.bf16.vlgmr.msra.gmra.mxu0 %v4961_v42  ;;  %5152 = vmatmul.bf16.vlgmr.msra.gmra.mxu1 %v4961_v42  ;;  %v4830_v49 = vpop.permute.xlu1 %4829  ;;  %v4842_v25 = vrot.slane %v4834_v32, 3  ;;  %v4888_v28 = vunpack.c.h.bf16 %v17907_v26  ;;  %v4892_v2 = vunpack.c.h.bf16 %v17930_v19  ;;  %v4896_v57 = vunpack.c.h.bf16 %v17932_v21 }
 0x4cf   :  { %5285 = vmatmul.bf16.vlgmr.msra.gmra.mxu2 %v4961_v42  ;;  %5394 = vmatmul.bf16.vlgmr.msra.gmra.mxu3 %v4961_v42  ;;  %v4841_v50 = vrot.slane %v4830_v49, 3  ;;  %v4904_v24 = vunpack.c.h.bf16 %v17936_v60  ;;  %v4877_v42 = vunpack.c.l.bf16 %v17956_v56  ;;  %v4881_v11 = vunpack.c.l.bf16 %v17958_v61  ;;  %v17978_v49 = vld [vmem:[#allocation6 + $0x88] sm:$0x88] }
 0x4d0   :  { %v17901_v39 = vmul.f32 %v4842_v25, %v17884_v30  ;;  %v17922_v30 = vmul.f32 %v4839_v41, %v17878_v58  ;;  %v4883_v58 = vunpack.c.l.bf16 %v17905_v52  ;;  %v4885_v36 = vunpack.c.l.bf16 %v17960_v22  ;;  %v15196_v60 = vld [vmem:[#allocation2 + $0xb8] sm:$0xff] }
 0x4d1   :  { %v17928_v5 = vmul.f32 %v4841_v50, %v17882_v10  ;;  %v5463_v10 = vrot.slane %v17910_v63, 7  ;;  %v4901_v12 = vunpack.c.l.bf16 %v17950_v20  ;;  %v4889_v52 = vunpack.c.l.bf16 %v17972_v40  ;;  %6078 = vmatpush.bf16.msrb.mxu2 %v15196_v60 }
 0x4d2   :  { %v4893_v26 = vunpack.c.l.bf16 %v17978_v49  ;;  %v4886_v18 = vunpack.c.h.bf16 %v17960_v22  ;;  %v18810_v22 = vunpack.c.h.bf16 %v17978_v49 }
 0x54b   :  { %v5020_v23 = vpop.f32.mrf.mxu0  ;;  %v17970_v29 = vpop.f32.mrf.mxu1 }
 0x54c   :  { %v5025_v37 = vrot.slane %v5020_v23, 2  ;;  %v5026_v48 = vrot.slane %v5020_v23, 3  ;;  %v5027_v32 = vrot.slane %v5020_v23, 4  ;;  %v5028_v13 = vrot.slane %v5020_v23, 5 }
 0x54d   :  { %v5029_v55 = vrot.slane %v5020_v23, 6  ;;  %v5030_v46 = vrot.slane %v5020_v23, 7  ;;  %v5031_v16 = vrot.slane %v5020_v23, 1  ;;  %v5046_v25 = vadd.f32 %v5020_v23, %v4899_v53 }
 0x54e   :  { %v5040_v4 = vadd.f32 %v5025_v37, %v4875_v59  ;;  %v5041_v9 = vadd.f32 %v5026_v48, %v4879_v7  ;;  %v5042_v41 = vadd.f32 %v5027_v32, %v4883_v58  ;;  %v5043_v50 = vadd.f32 %v5028_v13, %v4887_v54  ;;  %v17985_v54 = vld [vmem:[#allocation6 + $0xa8] sm:$0x88] }
 0x54f   :  { %v5044_v62 = vadd.f32 %v5029_v55, %v4891_v31  ;;  %v5054_v27 = vmul.f32 0.5, %v5046_v25  ;;  %v5045_v19 = vadd.f32 %v5030_v46, %v4895_v15  ;;  %v5047_v44 = vadd.f32 %v5031_v16, %v4903_v43  ;;  %v17994_v37 = vld [vmem:[#allocation6 + $0xe8] sm:$0x88] }
 0x550   :  { %v5048_v21 = vmul.f32 0.5, %v5040_v4  ;;  %v5049_v14 = vmul.f32 0.5, %v5041_v9  ;;  %v5050_v45 = vmul.f32 0.5, %v5042_v41  ;;  %v5051_v1 = vmul.f32 0.5, %v5043_v50 }
 0x551   :  { %v5052_v47 = vmul.f32 0.5, %v5044_v62  ;;  %16008 = vtanh.f32 %v5054_v27  ;;  %v5158_v59 = vrot.slane %v17970_v29, 2  ;;  %v5159_v7 = vrot.slane %v17970_v29, 3 }
 0x552   :  { %16010 = vtanh.f32 %v5048_v21  ;;  %v5160_v58 = vrot.slane %v17970_v29, 4  ;;  %v17987_v31 = vpop.f32.mrf.mxu2  ;;  %v17989_v53 = vpop.f32.mrf.mxu3  ;;  %v5161_v15 = vrot.slane %v17970_v29, 5  ;;  %v5162_v43 = vrot.slane %v17970_v29, 6 }
 0x553   :  { %16012 = vtanh.f32 %v5049_v14  ;;  %v5163_v23 = vrot.slane %v17970_v29, 7  ;;  %v5022_v48 = vpop.f32.mrf.mxu0  ;;  %v5155_v32 = vpop.f32.mrf.mxu1  ;;  %v5053_v13 = vmul.f32 0.5, %v5045_v19  ;;  %v5173_v55 = vadd.f32 %v5158_v59, %v4876_v0 }
 0x554   :  { %16014 = vtanh.f32 %v5050_v45  ;;  %v5174_v46 = vadd.f32 %v5159_v7, %v4880_v38  ;;  %v5055_v16 = vmul.f32 0.5, %v5047_v44  ;;  %v5175_v25 = vadd.f32 %v5160_v58, %v4884_v35 }
 0x555   :  { %v5176_v4 = vadd.f32 %v5161_v15, %v4888_v28  ;;  %v4897_v9 = vunpack.c.l.bf16 %v17985_v54  ;;  %16016 = vtanh.f32 %v5051_v1  ;;  %v5164_v14 = vrot.slane %v17970_v29, 1 }
 0x556   :  { %v5177_v41 = vadd.f32 %v5162_v43, %v4892_v2  ;;  %v4905_v50 = vunpack.c.l.bf16 %v17994_v37  ;;  %16018 = vtanh.f32 %v5052_v47  ;;  %v5178_v27 = vadd.f32 %v5163_v23, %v4896_v57 }
 0x557   :  { %v16009_v62 = vpop.eup %16008  ;;  %v5181_v21 = vmul.f32 0.5, %v5173_v55  ;;  %v5182_v48 = vmul.f32 0.5, %v5174_v46  ;;  %16020 = vtanh.f32 %v5053_v13  ;;  %v5179_v44 = vadd.f32 %v17970_v29, %v4900_v6  ;;  %v15180_v13 = vld [vmem:[#allocation2 + $0x38] sm:$0xff] }
 0x558   :  { %v16011_v19 = vpop.eup %16010  ;;  %v5183_v45 = vmul.f32 0.5, %v5175_v25  ;;  %16022 = vtanh.f32 %v5055_v16  ;;  %v5184_v38 = vmul.f32 0.5, %v5176_v4  ;;  %v4878_v35 = vunpack.c.h.bf16 %v17956_v56  ;;  %v15188_v55 = vld [vmem:[#allocation2 + $0x78] sm:$0xff]  ;;  %5812 = vmatpush.bf16.msrb.mxu0 %v15180_v13  ;;  %v15191_v56 = vld [vmem:[#allocation2 + $0x90] sm:$0xff] }
 0x559   :  { %v16013_v1 = vpop.eup %16012  ;;  %v4882_v28 = vunpack.c.h.bf16 %v17958_v61  ;;  %v5180_v2 = vadd.f32 %v5164_v14, %v4904_v24  ;;  %v5185_v57 = vmul.f32 0.5, %v5177_v41  ;;  %16024 = vtanh.f32 %v5181_v21  ;;  %v15204_v4 = vld [vmem:[#allocation2 + $0xf8] sm:$0xff]  ;;  %5945 = vmatpush.bf16.msrb.mxu1 %v15188_v55 }
 0x55a   :  { %v16015_v47 = vpop.eup %16014  ;;  %v5288_v59 = vpop.f32.mrf.mxu2  ;;  %v5064_v29 = vadd.f32 1.0, %v16011_v19  ;;  %v5070_v7 = vadd.f32 1.0, %v16009_v62  ;;  %v5186_v58 = vmul.f32 0.5, %v5178_v27  ;;  %16026 = vtanh.f32 %v5182_v48  ;;  %6187 = vmatpush.bf16.msrb.mxu3 %v15204_v4  ;;  %v15186_v4 = vld [vmem:[#allocation2 + $0x68] sm:$0xff]  ;;  %v15185_v62 = vld [vmem:[#allocation2 + $0x60] sm:$0xff] }
 0x55b   :  { %v5397_v6 = vpop.f32.mrf.mxu3  ;;  %v16017_v15 = vpop.eup %16016  ;;  %v5065_v43 = vadd.f32 1.0, %v16013_v1  ;;  %v5187_v23 = vmul.f32 0.5, %v5179_v44  ;;  %16028 = vtanh.f32 %v5183_v45  ;;  %v5291_v32 = vrot.slane %v17987_v31, 2  ;;  %v15187_v59 = vld [vmem:[#allocation2 + $0x70] sm:$0xff] }
 0x55c   :  { %v16019_v24 = vpop.eup %16018  ;;  %v5066_v46 = vadd.f32 1.0, %v16015_v47  ;;  %16030 = vtanh.f32 %v5184_v38  ;;  %v5292_v16 = vrot.slane %v17987_v31, 3  ;;  %v5293_v41 = vrot.slane %v17987_v31, 4  ;;  %v15195_v6 = vld [vmem:[#allocation2 + $0xb0] sm:$0xff] }
 0x55d   :  { %v16021_v14 = vpop.eup %16020  ;;  %16032 = vtanh.f32 %v5185_v57  ;;  %v18014_v48 = vmul.f32 0.5, %v5064_v29  ;;  %v18016_v19 = vmul.f32 0.5, %v5070_v7  ;;  %v5188_v44 = vmul.f32 0.5, %v5180_v2  ;;  %v15179_v57 = vld [vmem:[#allocation2 + $0x30] sm:$0xff]  ;;  %5946 = vmatpush.bf16.msrb.mxu1 %v15187_v59  ;;  %6079 = vmatpush.bf16.msrb.mxu2 %v15195_v6 }
 0x55e   :  { %v16023_v21 = vpop.eup %16022  ;;  %16034 = vtanh.f32 %v5186_v58  ;;  %v5067_v1 = vadd.f32 1.0, %v16017_v15  ;;  %v18018_v38 = vmul.f32 0.5, %v5065_v43  ;;  %v5306_v47 = vadd.f32 %v5291_v32, %v4877_v42  ;;  %v15203_v58 = vld [vmem:[#allocation2 + $0xf0] sm:$0xff]  ;;  %5813 = vmatpush.bf16.msrb.mxu0 %v15179_v57  ;;  %v15178_v32 = vld [vmem:[#allocation2 + $0x28] sm:$0xff] }
 0x55f   :  { %v16025_v45 = vpop.eup %16024  ;;  %16036 = vtanh.f32 %v5187_v23  ;;  %v5068_v29 = vadd.f32 1.0, %v16019_v24  ;;  %v18022_v55 = vmul.f32 0.5, %v5066_v46  ;;  %v5307_v2 = vadd.f32 %v5292_v16, %v4881_v11  ;;  %6188 = vmatpush.bf16.msrb.mxu3 %v15203_v58  ;;  %v15194_v11 = vld [vmem:[#allocation2 + $0xa8] sm:$0xff] }
 0x560   :  { %v16027_v13 = vpop.eup %16026  ;;  %v5197_v7 = vadd.f32 1.0, %v16025_v45  ;;  %v5069_v15 = vadd.f32 1.0, %v16021_v14  ;;  %v5294_v23 = vrot.slane %v17987_v31, 5  ;;  %v5308_v42 = vadd.f32 %v5293_v41, %v4885_v36  ;;  %v15202_v16 = vld [vmem:[#allocation2 + $0xe8] sm:$0xff] }
 0x561   :  { %v16029_v60 = vpop.eup %16028  ;;  %v5198_v43 = vadd.f32 1.0, %v16027_v13  ;;  %v5071_v46 = vadd.f32 1.0, %v16023_v21  ;;  %16038 = vtanh.f32 %v5188_v44  ;;  %v5295_v0 = vrot.slane %v17987_v31, 6  ;;  %5947 = vmatpush.bf16.msrb.mxu1 %v15186_v4  ;;  %6080 = vmatpush.bf16.msrb.mxu2 %v15194_v11 }
 0x562   :  { %v16031_v24 = vpop.eup %16030  ;;  %v5199_v45 = vadd.f32 1.0, %v16029_v60  ;;  %v5205_v13 = vmul.f32 0.5, %v5197_v7  ;;  %v5296_v27 = vrot.slane %v17987_v31, 7  ;;  %v5297_v36 = vrot.slane %v17987_v31, 1  ;;  %5814 = vmatpush.bf16.msrb.mxu0 %v15178_v32  ;;  %v15177_v7 = vld [vmem:[#allocation2 + $0x20] sm:$0xff] }
 0x563   :  { %v16033_v14 = vpop.eup %16032  ;;  %16040 = vtanh.f32 %v5306_v47  ;;  %v18032_v57 = vmul.f32 0.5, %v5067_v1  ;;  %v5200_v59 = vadd.f32 1.0, %v16031_v24  ;;  %v5206_v21 = vmul.f32 0.5, %v5198_v43  ;;  %6189 = vmatpush.bf16.msrb.mxu3 %v15202_v16  ;;  %v15201_v43 = vld [vmem:[#allocation2 + $0xe0] sm:$0xff] }
 0x564   :  { %v16035_v41 = vpop.eup %16034  ;;  %16042 = vtanh.f32 %v5307_v2  ;;  %v18034_v60 = vmul.f32 0.5, %v5068_v29  ;;  %v5201_v6 = vadd.f32 1.0, %v16033_v14  ;;  %v5309_v58 = vadd.f32 %v5294_v23, %v4889_v52  ;;  %v15193_v29 = vld [vmem:[#allocation2 + $0xa0] sm:$0xff] }
 0x565   :  { %v16037_v44 = vpop.eup %16036  ;;  %16044 = vtanh.f32 %v5308_v42  ;;  %v18038_v25 = vmul.f32 0.5, %v5069_v15  ;;  %v18040_v47 = vmul.f32 0.5, %v5071_v46  ;;  %v5207_v1 = vmul.f32 0.5, %v5199_v45  ;;  %5948 = vmatpush.bf16.msrb.mxu1 %v15185_v62  ;;  %6081 = vmatpush.bf16.msrb.mxu2 %v15193_v29  ;;  %v15192_v45 = vld [vmem:[#allocation2 + $0x98] sm:$0xff] }
 0x566   :  { %v5310_v2 = vadd.f32 %v5295_v0, %v4893_v26  ;;  %v5479_v52 = vmul.f32 %v5463_v10, %v5205_v13  ;;  %v5311_v23 = vadd.f32 %v5296_v27, %v4897_v9  ;;  %v5312_v15 = vadd.f32 %v17987_v31, %v4901_v12  ;;  %5815 = vmatpush.bf16.msrb.mxu0 %v15177_v7  ;;  %v15176_v12 = vld [vmem:[#allocation2 + $0x18] sm:$0xff]  ;;  %v15183_v7 = vld [vmem:[#allocation2 + $0x50] sm:$0xff] }
 0x567   :  { %v5313_v42 = vadd.f32 %v5297_v36, %v4905_v50  ;;  %v16039_v32 = vpop.eup %16038  ;;  %v5202_v4 = vadd.f32 1.0, %v16035_v41  ;;  %v5203_v26 = vadd.f32 1.0, %v16037_v44  ;;  %v5208_v0 = vmul.f32 0.5, %v5200_v59  ;;  %6190 = vmatpush.bf16.msrb.mxu3 %v15201_v43  ;;  %v15200_v13 = vld [vmem:[#allocation2 + $0xd8] sm:$0xff] }
 0x568   :  { %v5480_v24 = vmul.f32 %v5464_v3, %v5206_v21  ;;  %v5209_v63 = vmul.f32 0.5, %v5201_v6  ;;  %16046 = vtanh.f32 %v5309_v58  ;;  %v5400_v10 = vrot.slane %v17989_v53, 2  ;;  %v15184_v3 = vld [vmem:[#allocation2 + $0x58] sm:$0xff]  ;;  %v15175_v21 = vld [vmem:[#allocation2 + $0x10] sm:$0xff] }
 0x569   :  { %v16041_v46 = vpop.eup %16040  ;;  %v5401_v9 = vrot.slane %v17989_v53, 3  ;;  %v5481_v50 = vmul.f32 %v5465_v8, %v5207_v1  ;;  %16048 = vtanh.f32 %v5310_v2  ;;  %v5402_v34 = vrot.slane %v17989_v53, 4  ;;  %5949 = vmatpush.bf16.msrb.mxu1 %v15184_v3  ;;  %6082 = vmatpush.bf16.msrb.mxu2 %v15192_v45  ;;  %v15199_v2 = vld [vmem:[#allocation2 + $0xd0] sm:$0xff] }
 0x56a   :  { %v16043_v31 = vpop.eup %16042  ;;  %v5487_v27 = vmul.f32 %v16041_v46, %v18014_v48  ;;  %16050 = vtanh.f32 %v5311_v23  ;;  %v5403_v62 = vrot.slane %v17989_v53, 5  ;;  %v5404_v14 = vrot.slane %v17989_v53, 6  ;;  %5816 = vmatpush.bf16.msrb.mxu0 %v15176_v12 }
 0x56b   :  { %v16045_v11 = vpop.eup %16044  ;;  %v5488_v16 = vmul.f32 %v16043_v31, %v18018_v38  ;;  %16052 = vtanh.f32 %v5312_v15  ;;  %v5405_v48 = vrot.slane %v17989_v53, 7  ;;  %v5415_v41 = vadd.f32 %v5400_v10, %v4878_v35  ;;  %6191 = vmatpush.bf16.msrb.mxu3 %v15200_v13 }
 0x56c   :  { %v5489_v51 = vmul.f32 %v16045_v11, %v18022_v55  ;;  %v18065_v8 = vadd.f32 %v5487_v27, %v5479_v52  ;;  %v5416_v38 = vadd.f32 %v5401_v9, %v4882_v28  ;;  %v5417_v59 = vadd.f32 %v5402_v34, %v4886_v18  ;;  %v15190_v9 = vld [vmem:[#allocation2 + $0x88] sm:$0xff] }
 0x56d   :  { %v18068_v36 = vadd.f32 %v5488_v16, %v5480_v24  ;;  %v5204_v44 = vadd.f32 1.0, %v16039_v32  ;;  %16054 = vtanh.f32 %v5313_v42  ;;  %v18808_v6 = vunpack.c.h.bf16 %v17972_v40  ;;  %5950 = vmatpush.bf16.msrb.mxu1 %v15183_v7  ;;  %6083 = vmatpush.bf16.msrb.mxu2 %v15191_v56 }
 0x56e   :  { %v18076_v55 = vadd.f32 %v5489_v51, %v5481_v50  ;;  %v16047_v35 = vpop.eup %16046  ;;  %v5210_v1 = vmul.f32 0.5, %v5202_v4  ;;  %v18809_v61 = vrot.slane %v17919_v17, 7  ;;  %16056 = vtanh.f32 %v18065_v8  ;;  %5817 = vmatpush.bf16.msrb.mxu0 %v15175_v21  ;;  %v15198_v50 = vld [vmem:[#allocation2 + $0xc8] sm:$0xff] }
 0x56f   :  { %v5418_v58 = vadd.f32 %v5403_v62, %v18808_v6  ;;  %v5419_v18 = vadd.f32 %v5404_v14, %v18810_v22  ;;  %v16049_v29 = vpop.eup %16048  ;;  %v5211_v43 = vmul.f32 0.5, %v5203_v26  ;;  %16058 = vtanh.f32 %v18068_v36  ;;  %6192 = vmatpush.bf16.msrb.mxu3 %v15199_v2  ;;  %v15220_v6 = vld [vmem:[#allocation2 + $0x78] sm:$0xff] }
 0x570   :  { %v5482_v28 = vmul.f32 %v18809_v61, %v5208_v0  ;;  %v5406_v40 = vrot.slane %v17989_v53, 1  ;;  %v18811_v52 = vunpack.c.h.bf16 %v17985_v54  ;;  %v16051_v15 = vpop.eup %16050  ;;  %v18812_v17 = vunpack.c.h.bf16 %v17950_v20  ;;  %v15174_v0 = vld [vmem:[#allocation2 + $0x8] sm:$0xff] }
 0x571   :  { %v5423_v32 = vmul.f32 0.5, %v5415_v41  ;;  %v5424_v4 = vmul.f32 0.5, %v5416_v38  ;;  %v5425_v49 = vmul.f32 0.5, %v5417_v59  ;;  %v16053_v24 = vpop.eup %16052  ;;  %v18813_v26 = vrot.slane %v17922_v30, 7  ;;  %v15182_v54 = vld [vmem:[#allocation2 + $0x48] sm:$0xff]  ;;  %6084 = vmatpush.bf16.msrb.mxu2 %v15190_v9 }
 0x572   :  { %v5420_v23 = vadd.f32 %v5405_v48, %v18811_v52  ;;  %v5421_v42 = vadd.f32 %v17989_v53, %v18812_v17  ;;  %16060 = vtanh.f32 %v18076_v55  ;;  %v5426_v10 = vmul.f32 0.5, %v5418_v58  ;;  %5818 = vmatpush.bf16.msrb.mxu0 %v15174_v0  ;;  %5951 = vmatpush.bf16.msrb.mxu1 %v15182_v54  ;;  %v15189_v48 = vld [vmem:[#allocation2 + $0x80] sm:$0xff]  ;;  %v15228_v58 = vld [vmem:[#allocation2 + $0xb8] sm:$0xff]  ;;  %v15227_v52 = vld [vmem:[#allocation2 + $0xb0] sm:$0xff] }
 0x573   :  { %v5483_v46 = vmul.f32 %v18813_v26, %v5209_v63  ;;  %v4906_v20 = vunpack.c.h.bf16 %v17994_v37  ;;  %v5212_v12 = vmul.f32 0.5, %v5204_v44  ;;  %v5490_v53 = vmul.f32 %v16047_v35, %v18032_v57  ;;  %v16055_v27 = vpop.eup %16054  ;;  %v15173_v57 = vld [vmem:[#allocation2] sm:$0xff]  ;;  %6193 = vmatpush.bf16.msrb.mxu3 %v15198_v50  ;;  %v15236_v35 = vld [vmem:[#allocation2 + $0xf8] sm:$0xff]  ;;  %v15226_v50 = vld [vmem:[#allocation2 + $0xa8] sm:$0xff] }
 0x574   :  { %v5427_v31 = vmul.f32 0.5, %v5419_v18  ;;  %16062 = vtanh.f32 %v5423_v32  ;;  %v5491_v30 = vmul.f32 %v16049_v29, %v18034_v60  ;;  %v5428_v63 = vmul.f32 0.5, %v5420_v23  ;;  %v16057_v3 = vpop.eup %16056  ;;  %v15181_v60 = vld [vmem:[#allocation2 + $0x40] sm:$0xff]  ;;  %v15211_v18 = vld [vmem:[#allocation2 + $0x30] sm:$0xff] }
 0x575   :  { %16064 = vtanh.f32 %v5424_v4  ;;  %v5422_v34 = vadd.f32 %v5406_v40, %v4906_v20  ;;  %v18814_v45 = vrot.slane %v17925_v33, 7  ;;  %v5492_v16 = vmul.f32 %v16051_v15, %v18038_v25  ;;  %v16059_v62 = vpop.eup %16058  ;;  %v15197_v25 = vld [vmem:[#allocation2 + $0xc0] sm:$0xff]  ;;  %6085 = vmatpush.bf16.msrb.mxu2 %v15189_v48  ;;  %v15219_v40 = vld [vmem:[#allocation2 + $0x70] sm:$0xff] }
 0x576   :  { %v5429_v37 = vmul.f32 0.5, %v5421_v42  ;;  %16066 = vtanh.f32 %v5425_v49  ;;  %v18815_v14 = vrot.slane %v17928_v5, 7  ;;  %v5493_v51 = vmul.f32 %v16053_v24, %v18016_v19  ;;  %v15212_v5 = vld [vmem:[#allocation2 + $0x38] sm:$0xff]  ;;  %5819 = vmatpush.bf16.msrb.mxu0 %v15173_v57  ;;  %5952 = vmatpush.bf16.msrb.mxu1 %v15181_v60  ;;  %v15235_v42 = vld [vmem:[#allocation2 + $0xf0] sm:$0xff] }
 0x577   :  { %v5484_v11 = vmul.f32 %v18814_v45, %v5210_v1  ;;  %16068 = vtanh.f32 %v5426_v10  ;;  %v5430_v41 = vmul.f32 0.5, %v5422_v34  ;;  %v18104_v33 = vadd.f32 %v5490_v53, %v5482_v28  ;;  %6194 = vmatpush.bf16.msrb.mxu3 %v15197_v25  ;;  %v15210_v10 = vld [vmem:[#allocation2 + $0x28] sm:$0xff] }
 0x578   :  { %v5485_v13 = vmul.f32 %v18815_v14, %v5211_v43  ;;  %16070 = vtanh.f32 %v5427_v31  ;;  %v18816_v38 = vrot.slane %v17901_v39, 7  ;;  %v5494_v21 = vmul.f32 %v16055_v27, %v18040_v47  ;;  %v16061_v44 = vpop.eup %16060  ;;  %v15218_v31 = vld [vmem:[#allocation2 + $0x68] sm:$0xff] }
 0x579   :  { %16072 = vtanh.f32 %v5428_v63  ;;  %v18109_v19 = vadd.f32 %v5491_v30, %v5483_v46  ;;  %v18111_v56 = vadd.f32 %v5492_v16, %v5484_v11  ;;  %6879 = vmatpush.bf16.msra.mxu2 %v15228_v58 }
 0x57a   :  { %v5486_v59 = vmul.f32 %v18816_v38, %v5212_v12  ;;  %v16063_v7 = vpop.eup %16062  ;;  %16074 = vtanh.f32 %v5429_v37  ;;  %v18113_v39 = vadd.f32 %v5493_v51, %v5485_v13  ;;  %6613 = vmatpush.bf16.msra.mxu0 %v15212_v5  ;;  %6746 = vmatpush.bf16.msra.mxu1 %v15220_v6 }
 0x57b   :  { %v16065_v1 = vpop.eup %16064  ;;  %v5439_v61 = vadd.f32 1.0, %v16063_v7  ;;  %16076 = vtanh.f32 %v5430_v41  ;;  %6988 = vmatpush.bf16.msra.mxu3 %v15236_v35 }
 0x57c   :  { %v16067_v47 = vpop.eup %16066  ;;  %v5440_v28 = vadd.f32 1.0, %v16065_v1  ;;  %v18115_v22 = vadd.f32 %v5494_v21, %v5486_v59  ;;  %16078 = vtanh.f32 %v18104_v33 }
 0x57d   :  { %v16069_v2 = vpop.eup %16068  ;;  %v5441_v29 = vadd.f32 1.0, %v16067_v47  ;;  %v5447_v43 = vmul.f32 0.5, %v5439_v61  ;;  %16080 = vtanh.f32 %v18109_v19  ;;  %6880 = vmatpush.bf16.msra.mxu2 %v15227_v52 }
 0x57e   :  { %v16071_v23 = vpop.eup %16070  ;;  %v5442_v15 = vadd.f32 1.0, %v16069_v2  ;;  %v5448_v17 = vmul.f32 0.5, %v5440_v28  ;;  %16082 = vtanh.f32 %v18111_v56  ;;  %6614 = vmatpush.bf16.msra.mxu0 %v15211_v18  ;;  %6747 = vmatpush.bf16.msra.mxu1 %v15219_v40 }
 0x57f   :  { %v16073_v32 = vpop.eup %16072  ;;  %v5449_v4 = vmul.f32 0.5, %v5441_v29  ;;  %v5511_v49 = vmul.f32 %v16057_v3, %v5447_v43  ;;  %v5443_v0 = vadd.f32 1.0, %v16071_v23  ;;  %16084 = vtanh.f32 %v18113_v39  ;;  %6989 = vmatpush.bf16.msra.mxu3 %v15235_v42  ;;  %v15234_v3 = vld [vmem:[#allocation2 + $0xe8] sm:$0xff] }
 0x580   :  { %v16075_v24 = vpop.eup %16074  ;;  %v5512_v26 = vmul.f32 %v16059_v62, %v5448_v17  ;;  %v5444_v46 = vadd.f32 1.0, %v16073_v32  ;;  %16086 = vtanh.f32 %v18115_v22  ;;  %v5450_v9 = vmul.f32 0.5, %v5442_v15 }
 0x581   :  { %v16077_v54 = vpop.eup %16076  ;;  %5588 = vst [vmem:[#allocation9] sm:$0x40] %v5511_v49  ;;  %v5445_v20 = vadd.f32 1.0, %v16075_v24  ;;  %v5513_v12 = vmul.f32 %v16061_v44, %v5449_v4  ;;  %v5708_v53 = vpack.c.bf16 %v5511_v49, %v5511_v49  ;;  %v5451_v63 = vmul.f32 0.5, %v5443_v0  ;;  %6881 = vmatpush.bf16.msra.mxu2 %v15226_v50  ;;  %v15233_v50 = vld [vmem:[#allocation2 + $0xe0] sm:$0xff] }
 0x582   :  { %v16079_v27 = vpop.eup %16078  ;;  %5589 = vst [vmem:[#allocation9 + $0x10] sm:$0x40] %v5512_v26  ;;  %v5446_v30 = vadd.f32 1.0, %v16077_v54  ;;  %v5709_v34 = vpack.c.bf16 %v5512_v26, %v5512_v26  ;;  %v5452_v11 = vmul.f32 0.5, %v5444_v46  ;;  %6615 = vmatpush.bf16.msra.mxu0 %v15210_v10  ;;  %6748 = vmatpush.bf16.msra.mxu1 %v15218_v31  ;;  %v5607_v26 = vpop.permute.xlu2 %5606 }
 0x583   :  { %v16081_v45 = vpop.eup %16080  ;;  %v5514_v16 = vmul.f32 %v16079_v27, %v5450_v9  ;;  %5590 = vst [vmem:[#allocation9 + $0x20] sm:$0x40] %v5513_v12  ;;  %v5710_v37 = vpack.c.bf16 %v5513_v12, %v5513_v12  ;;  %v5740_v57 = vunpack.c.l.b16 %v5708_v53  ;;  %v5453_v14 = vmul.f32 0.5, %v5445_v20  ;;  %6990 = vmatpush.bf16.msra.mxu3 %v15234_v3  ;;  %v5611_v46 = vpop.permute.xlu0 %5610  ;;  %v15209_v20 = vld [vmem:[#allocation2 + $0x20] sm:$0xff]  ;;  %v15216_v3 = vld [vmem:[#allocation2 + $0x58] sm:$0xff] }
 0x584   :  { %v16083_v62 = vpop.eup %16082  ;;  %v5454_v13 = vmul.f32 0.5, %v5446_v30  ;;  %v5515_v51 = vmul.f32 %v16081_v45, %v5451_v63  ;;  %v5741_v60 = vunpack.c.l.b16 %v5709_v34  ;;  %v5615_v9 = vpop.permute.xlu1 %5614  ;;  %v15217_v12 = vld [vmem:[#allocation2 + $0x60] sm:$0xff]  ;;  %v15208_v34 = vld [vmem:[#allocation2 + $0x18] sm:$0xff] }
 0x585   :  { %v16085_v48 = vpop.eup %16084  ;;  %v5516_v41 = vmul.f32 %v16083_v62, %v5452_v11  ;;  %5591 = vst [vmem:[#allocation9 + $0x30] sm:$0x40] %v5514_v16  ;;  %v5711_v25 = vpack.c.bf16 %v5514_v16, %v5514_v16  ;;  %v5742_v38 = vunpack.c.l.b16 %v5710_v37  ;;  %v5748_v59 = vrot.slane %v5740_v57, 6  ;;  %v15225_v53 = vld [vmem:[#allocation2 + $0xa0] sm:$0xff]  ;;  %v15224_v45 = vld [vmem:[#allocation2 + $0x98] sm:$0xff] }
 0x586   :  { %v16087_v21 = vpop.eup %16086  ;;  %v5517_v5 = vmul.f32 %v16085_v48, %v5453_v14  ;;  %5592 = vst [vmem:[#allocation9 + $0x40] sm:$0x40] %v5515_v51  ;;  %v5712_v44 = vpack.c.bf16 %v5515_v51, %v5515_v51  ;;  %v5749_v6 = vrot.slane %v5741_v60, 5  ;;  %6616 = vmatpush.bf16.msra.mxu0 %v15209_v20  ;;  %6749 = vmatpush.bf16.msra.mxu1 %v15217_v12  ;;  %v15232_v11 = vld [vmem:[#allocation2 + $0xd8] sm:$0xff]  ;;  %v5636_v16 = vrot.slane %v5607_v26, 2 }
 0x587   :  { %v5518_v58 = vmul.f32 %v16087_v21, %v5454_v13  ;;  %5593 = vst [vmem:[#allocation9 + $0x50] sm:$0x40] %v5516_v41  ;;  %v5713_v7 = vpack.c.bf16 %v5516_v41, %v5516_v41  ;;  %v5743_v35 = vunpack.c.l.b16 %v5711_v25  ;;  %v5751_v1 = vrot.slane %v5742_v38, 4  ;;  %6882 = vmatpush.bf16.msra.mxu2 %v15225_v53  ;;  %6991 = vmatpush.bf16.msra.mxu3 %v15233_v50  ;;  %v18135_v41 = vld [vmem:[#allocation6] sm:$0x88] }
 0x588   :  { %5594 = vst [vmem:[#allocation9 + $0x60] sm:$0x40] %v5517_v5  ;;  %v5714_v61 = vpack.c.bf16 %v5517_v5, %v5517_v5  ;;  %v5744_v47 = vunpack.c.l.b16 %v5712_v44  ;;  %v5750_v28 = vsel %vm99_vm0, %v5749_v6, %v5748_v59  ;;  %v5637_v37 = vrot.slane %v5611_v46, 2  ;;  %v18137_v25 = vld [vmem:[#allocation6 + $0x20] sm:$0x88] }
 0x589   :  { %5595 = vst [vmem:[#allocation9 + $0x70] sm:$0x40] %v5518_v58  ;;  %v5715_v18 = vpack.c.bf16 %v5518_v58, %v5518_v58  ;;  %v5745_v2 = vunpack.c.l.b16 %v5713_v7  ;;  %v5752_v29 = vsel %vm102_vm1, %v5751_v1, %v5750_v28  ;;  %v5753_v43 = vrot.slane %v5743_v35, 3  ;;  %v18139_v38 = vld [vmem:[#allocation6 + $0x40] sm:$0x88] }
 0x58a   :  { %v5755_v40 = vrot.slane %v5744_v47, 2  ;;  %v5746_v17 = vunpack.c.l.b16 %v5714_v61  ;;  %v5619_v10 = vpop.permute.xlu2 %5618  ;;  %6617 = vmatpush.bf16.msra.mxu0 %v15208_v34  ;;  %6750 = vmatpush.bf16.msra.mxu1 %v15216_v3  ;;  %v5638_v13 = vrot.slane %v5615_v9, 2  ;;  %v18145_v59 = vmul.f32 %v5637_v37, %v18068_v36  ;;  %v18147_v21 = vld [vmem:[#allocation6 + $0x60] sm:$0x88]  ;;  %v18201_v9 = vld [vmem:[#allocation6 + $0x68] sm:$0x88] }
 0x58b   :  { %v5747_v52 = vunpack.c.l.b16 %v5715_v18  ;;  %v5754_v23 = vsel %vm105_vm2, %v5753_v43, %v5752_v29  ;;  %v5757_v15 = vrot.slane %v5745_v2, 1  ;;  %v5623_v54 = vpop.permute.xlu0 %5622  ;;  %v5639_v14 = vrot.slane %v5619_v10, 2  ;;  %6883 = vmatpush.bf16.msra.mxu2 %v15224_v45  ;;  %6992 = vmatpush.bf16.msra.mxu3 %v15232_v11  ;;  %v18162_v58 = vld [vmem:[#allocation6 + $0x80] sm:$0x88]  ;;  %v18181_v43 = vld [vmem:[#allocation6 + $0xe8] sm:$0x88] }
 0x58c   :  { %v5756_v42 = vsel %vm108_vm3, %v5755_v40, %v5754_v23  ;;  %v5627_v63 = vpop.permute.xlu1 %5626  ;;  %v5640_v51 = vrot.slane %v5623_v54, 2  ;;  %v18150_v5 = vmul.f32 %v5638_v13, %v18076_v55  ;;  %v18164_v36 = vld [vmem:[#allocation6 + $0xa0] sm:$0x88]  ;;  %v5676_v55 = vunpack.c.l.bf16 %v18135_v41  ;;  %v18205_v53 = vld [vmem:[#allocation6 + $0x88] sm:$0x88] }
 0x58d   :  { %v5758_v32 = vsel %vm111_vm4, %v5757_v15, %v5756_v42  ;;  %v5760_v4 = vrot.slane %v5747_v52, 7  ;;  %v5641_v60 = vrot.slane %v5627_v63, 2  ;;  %v18166_v7 = vld [vmem:[#allocation6 + $0xc0] sm:$0x88]  ;;  %v5692_v40 = vunpack.c.l.bf16 %v18162_v58  ;;  %v18189_v42 = vld [vmem:[#allocation6 + $0x28] sm:$0x88] }
 0x58e   :  { %v5759_v49 = vsel %vm114_vm5, %v5746_v17, %v5758_v32  ;;  %v18156_v44 = vmul.f32 %v5640_v51, %v18109_v19  ;;  %v18168_v35 = vld [vmem:[#allocation6 + $0xe0] sm:$0x88]  ;;  %v5684_v19 = vunpack.c.l.bf16 %v18139_v38  ;;  %v5696_v52 = vunpack.c.l.bf16 %v18164_v36  ;;  %v18187_v17 = vld [vmem:[#allocation6 + $0x8] sm:$0x88] }
 0x58f   :  { %v5761_v0 = vsel %vm117_vm6, %v5760_v4, %v5759_v49  ;;  %v18159_v6 = vmul.f32 %v5641_v60, %v18111_v56  ;;  %v5688_v56 = vunpack.c.l.bf16 %v18147_v21  ;;  %v5700_v23 = vunpack.c.l.bf16 %v18166_v7  ;;  %v18191_v32 = vld [vmem:[#allocation6 + $0x48] sm:$0x88] }
 0x590   :  { %v5762_v24 = vpack.c.b16 %v5761_v0, %v5761_v0  ;;  %v5704_v15 = vunpack.c.l.bf16 %v18168_v35  ;;  %v5677_v4 = vunpack.c.h.bf16 %v18135_v41  ;;  %v5681_v49 = vunpack.c.h.bf16 %v18137_v25  ;;  %v18211_v11 = vld [vmem:[#allocation6 + $0xa8] sm:$0x88] }
 0x591   :  { %v5685_v0 = vunpack.c.h.bf16 %v18139_v38  ;;  %v5689_v26 = vunpack.c.h.bf16 %v18147_v21  ;;  %v5693_v46 = vunpack.c.h.bf16 %v18162_v58  ;;  %v5697_v10 = vunpack.c.h.bf16 %v18164_v36 }
 0x592   :  { %5820 = vmatmul.bf16.vlgmr.msrb.gmra.mxu0 %v5762_v24  ;;  %5953 = vmatmul.bf16.vlgmr.msrb.gmra.mxu1 %v5762_v24  ;;  %v5631_v31 = vpop.permute.xlu2 %5630  ;;  %v5701_v54 = vunpack.c.h.bf16 %v18166_v7  ;;  %v5682_v50 = vunpack.c.l.bf16 %v18189_v42  ;;  %v5690_v13 = vunpack.c.l.bf16 %v18201_v9  ;;  %v5694_v58 = vunpack.c.l.bf16 %v18205_v53 }
 0x593   :  { %6086 = vmatmul.bf16.vlgmr.msrb.gmra.mxu2 %v5762_v24  ;;  %6195 = vmatmul.bf16.vlgmr.msrb.gmra.mxu3 %v5762_v24  ;;  %v5635_v27 = vpop.permute.xlu0 %5634  ;;  %v5642_v30 = vrot.slane %v5631_v31, 2  ;;  %v5705_v24 = vunpack.c.h.bf16 %v18168_v35  ;;  %v5678_v31 = vunpack.c.l.bf16 %v18187_v17  ;;  %v5698_v1 = vunpack.c.l.bf16 %v18211_v11 }
 0x594   :  { %v5643_v57 = vrot.slane %v5635_v27, 2  ;;  %v5686_v27 = vunpack.c.l.bf16 %v18191_v32 }
 0x595   :  { %v18130_v62 = vmul.f32 %v5642_v30, %v18113_v39  ;;  %v18142_v39 = vmul.f32 %v5636_v16, %v18065_v8  ;;  %v5706_v30 = vunpack.c.l.bf16 %v18181_v43 }
 0x596   :  { %v18133_v48 = vmul.f32 %v5643_v57, %v18115_v22  ;;  %v18153_v22 = vmul.f32 %v5639_v14, %v18104_v33  ;;  %v5680_v33 = vunpack.c.l.bf16 %v18137_v25  ;;  %v18213_v14 = vld [vmem:[#allocation6 + $0xc8] sm:$0x88] }
 0x597   :  { %v5702_v2 = vunpack.c.l.bf16 %v18213_v14 }
 0x60f   :  { %v5821_v20 = vpop.f32.mrf.mxu0  ;;  %v18203_v12 = vpop.f32.mrf.mxu1 }
 0x610   :  { %v5826_v63 = vrot.slane %v5821_v20, 1  ;;  %v5827_v34 = vrot.slane %v5821_v20, 2  ;;  %v5828_v3 = vrot.slane %v5821_v20, 3  ;;  %v5829_v45 = vrot.slane %v5821_v20, 4 }
 0x611   :  { %v5830_v16 = vrot.slane %v5821_v20, 5  ;;  %v5831_v37 = vrot.slane %v5821_v20, 6  ;;  %v5848_v57 = vadd.f32 %v5821_v20, %v5704_v15  ;;  %v5832_v18 = vrot.slane %v5821_v20, 7  ;;  %v15267_v15 = vld [vmem:[#allocation2 + $0xf0] sm:$0xff] }
 0x612   :  { %v5841_v51 = vadd.f32 %v5826_v63, %v5676_v55  ;;  %v5842_v60 = vadd.f32 %v5827_v34, %v5680_v33  ;;  %v5843_v41 = vadd.f32 %v5828_v3, %v5684_v19  ;;  %v5844_v25 = vadd.f32 %v5829_v45, %v5688_v56 }
 0x613   :  { %v5845_v38 = vadd.f32 %v5830_v16, %v5692_v40  ;;  %v5856_v21 = vmul.f32 0.5, %v5848_v57  ;;  %v5846_v28 = vadd.f32 %v5831_v37, %v5696_v52  ;;  %v5959_v55 = vrot.slane %v18203_v12, 1 }
 0x614   :  { %v5849_v8 = vmul.f32 0.5, %v5841_v51  ;;  %v5850_v29 = vmul.f32 0.5, %v5842_v60  ;;  %v5851_v47 = vmul.f32 0.5, %v5843_v41  ;;  %v5852_v61 = vmul.f32 0.5, %v5844_v25 }
 0x615   :  { %16088 = vtanh.f32 %v5856_v21  ;;  %v5960_v33 = vrot.slane %v18203_v12, 2  ;;  %v5961_v19 = vrot.slane %v18203_v12, 3  ;;  %v5853_v63 = vmul.f32 0.5, %v5845_v38 }
 0x616   :  { %v18223_v56 = vpop.f32.mrf.mxu2  ;;  %v18225_v40 = vpop.f32.mrf.mxu3  ;;  %16090 = vtanh.f32 %v5849_v8  ;;  %v5962_v34 = vrot.slane %v18203_v12, 4  ;;  %v5963_v20 = vrot.slane %v18203_v12, 5  ;;  %v5964_v45 = vrot.slane %v18203_v12, 6 }
 0x617   :  { %v5823_v52 = vpop.f32.mrf.mxu0  ;;  %v5956_v3 = vpop.f32.mrf.mxu1  ;;  %16092 = vtanh.f32 %v5850_v29  ;;  %v5974_v16 = vadd.f32 %v5959_v55, %v5677_v4  ;;  %v5975_v37 = vadd.f32 %v5960_v33, %v5681_v49  ;;  %v5854_v57 = vmul.f32 0.5, %v5846_v28  ;;  %v15215_v4 = vld [vmem:[#allocation2 + $0x50] sm:$0xff] }
 0x618   :  { %v5965_v51 = vrot.slane %v18203_v12, 7  ;;  %v5976_v60 = vadd.f32 %v5961_v19, %v5685_v0  ;;  %v5977_v41 = vadd.f32 %v5962_v34, %v5689_v26  ;;  %v5847_v25 = vadd.f32 %v5832_v18, %v5700_v23  ;;  %v15207_v3 = vld [vmem:[#allocation2 + $0x10] sm:$0xff]  ;;  %6751 = vmatpush.bf16.msra.mxu1 %v15215_v4 }
 0x619   :  { %16094 = vtanh.f32 %v5851_v47  ;;  %v5679_v8 = vunpack.c.h.bf16 %v18187_v17  ;;  %v5683_v38 = vunpack.c.h.bf16 %v18189_v42  ;;  %v5978_v21 = vadd.f32 %v5963_v20, %v5693_v46  ;;  %v15223_v49 = vld [vmem:[#allocation2 + $0x90] sm:$0xff]  ;;  %6618 = vmatpush.bf16.msra.mxu0 %v15207_v3  ;;  %v15256_v42 = vld [vmem:[#allocation2 + $0x98] sm:$0xff] }
 0x61a   :  { %16096 = vtanh.f32 %v5852_v61  ;;  %v5982_v29 = vmul.f32 0.5, %v5974_v16  ;;  %v5983_v52 = vmul.f32 0.5, %v5975_v37  ;;  %v5979_v0 = vadd.f32 %v5964_v45, %v5697_v10  ;;  %v15231_v47 = vld [vmem:[#allocation2 + $0xd0] sm:$0xff]  ;;  %6884 = vmatpush.bf16.msra.mxu2 %v15223_v49  ;;  %v15206_v45 = vld [vmem:[#allocation2 + $0x8] sm:$0xff] }
 0x61b   :  { %v16089_v28 = vpop.eup %16088  ;;  %16098 = vtanh.f32 %v5853_v63  ;;  %v5984_v26 = vmul.f32 0.5, %v5976_v60  ;;  %v5687_v18 = vunpack.c.h.bf16 %v18191_v32  ;;  %v5980_v61 = vadd.f32 %v5965_v51, %v5701_v54  ;;  %6993 = vmatpush.bf16.msra.mxu3 %v15231_v47  ;;  %v15214_v16 = vld [vmem:[#allocation2 + $0x48] sm:$0xff]  ;;  %v15205_v47 = vld [vmem:[#allocation2] sm:$0xff] }
 0x61c   :  { %v16091_v23 = vpop.eup %16090  ;;  %16100 = vtanh.f32 %v5854_v57  ;;  %v5985_v46 = vmul.f32 0.5, %v5977_v41  ;;  %v5691_v55 = vunpack.c.h.bf16 %v18201_v9  ;;  %v5855_v19 = vmul.f32 0.5, %v5847_v25  ;;  %v15222_v37 = vld [vmem:[#allocation2 + $0x88] sm:$0xff]  ;;  %6752 = vmatpush.bf16.msra.mxu1 %v15214_v16 }
 0x61d   :  { %v16093_v33 = vpop.eup %16092  ;;  %v5981_v36 = vadd.f32 %v18203_v12, %v5705_v24  ;;  %16102 = vtanh.f32 %v5982_v29  ;;  %v5695_v10 = vunpack.c.h.bf16 %v18205_v53  ;;  %v5872_v7 = vadd.f32 1.0, %v16089_v28  ;;  %v15230_v12 = vld [vmem:[#allocation2 + $0xc8] sm:$0xff]  ;;  %6619 = vmatpush.bf16.msra.mxu0 %v15206_v45  ;;  %v15252_v45 = vld [vmem:[#allocation2 + $0x78] sm:$0xff]  ;;  %v15247_v53 = vld [vmem:[#allocation2 + $0x50] sm:$0xff] }
 0x61e   :  { %v6089_v63 = vpop.f32.mrf.mxu2  ;;  %v6198_v34 = vpop.f32.mrf.mxu3  ;;  %v5986_v54 = vmul.f32 0.5, %v5978_v21  ;;  %16104 = vtanh.f32 %v5983_v52  ;;  %v5699_v20 = vunpack.c.h.bf16 %v18211_v11  ;;  %v5865_v51 = vadd.f32 1.0, %v16091_v23  ;;  %6885 = vmatpush.bf16.msra.mxu2 %v15222_v37  ;;  %v15213_v23 = vld [vmem:[#allocation2 + $0x40] sm:$0xff] }
 0x61f   :  { %v16095_v57 = vpop.eup %16094  ;;  %v5987_v35 = vmul.f32 0.5, %v5979_v0  ;;  %16106 = vtanh.f32 %v5984_v26  ;;  %v6092_v24 = vrot.slane %v18223_v56, 1  ;;  %v5866_v41 = vadd.f32 1.0, %v16093_v33  ;;  %6994 = vmatpush.bf16.msra.mxu3 %v15230_v12  ;;  %v15229_v63 = vld [vmem:[#allocation2 + $0xc0] sm:$0xff]  ;;  %v15244_v34 = vld [vmem:[#allocation2 + $0x38] sm:$0xff] }
 0x620   :  { %v16097_v60 = vpop.eup %16096  ;;  %v5988_v25 = vmul.f32 0.5, %v5980_v61  ;;  %16108 = vtanh.f32 %v5985_v46  ;;  %v6093_v29 = vrot.slane %v18223_v56, 2  ;;  %v5989_v52 = vmul.f32 0.5, %v5981_v36  ;;  %v15221_v61 = vld [vmem:[#allocation2 + $0x80] sm:$0xff]  ;;  %6753 = vmatpush.bf16.msra.mxu1 %v15213_v23 }
 0x621   :  { %v16099_v21 = vpop.eup %16098  ;;  %16110 = vtanh.f32 %v5855_v19  ;;  %v6094_v3 = vrot.slane %v18223_v56, 3  ;;  %v5703_v4 = vunpack.c.h.bf16 %v18213_v14  ;;  %v5867_v28 = vadd.f32 1.0, %v16095_v57  ;;  %6620 = vmatpush.bf16.msra.mxu0 %v15205_v47  ;;  %v15260_v57 = vld [vmem:[#allocation2 + $0xb8] sm:$0xff]  ;;  %v15263_v14 = vld [vmem:[#allocation2 + $0xd0] sm:$0xff] }
 0x622   :  { %v16101_v49 = vpop.eup %16100  ;;  %v18250_v0 = vmul.f32 0.5, %v5872_v7  ;;  %16112 = vtanh.f32 %v5986_v54  ;;  %v6095_v26 = vrot.slane %v18223_v56, 4  ;;  %v5868_v33 = vadd.f32 1.0, %v16097_v60  ;;  %6886 = vmatpush.bf16.msra.mxu2 %v15221_v61  ;;  %v15259_v61 = vld [vmem:[#allocation2 + $0xb0] sm:$0xff] }
 0x623   :  { %v16103_v46 = vpop.eup %16102  ;;  %v18253_v19 = vmul.f32 0.5, %v5865_v51  ;;  %16114 = vtanh.f32 %v5987_v35  ;;  %v6107_v36 = vadd.f32 %v6092_v24, %v5678_v31  ;;  %v18257_v7 = vmul.f32 0.5, %v5866_v41  ;;  %v15268_v51 = vld [vmem:[#allocation2 + $0xf8] sm:$0xff]  ;;  %6995 = vmatpush.bf16.msra.mxu3 %v15229_v63 }
 0x624   :  { %v16105_v16 = vpop.eup %16104  ;;  %16116 = vtanh.f32 %v5988_v25  ;;  %v5998_v54 = vadd.f32 1.0, %v16103_v46  ;;  %v6108_v37 = vadd.f32 %v6093_v29, %v5682_v50  ;;  %v5869_v35 = vadd.f32 1.0, %v16099_v21  ;;  %7539 = vmatpush.bf16.msrb.mxu1 %v15252_v45 }
 0x625   :  { %v16107_v12 = vpop.eup %16106  ;;  %v5999_v60 = vadd.f32 1.0, %v16105_v16  ;;  %v6096_v31 = vrot.slane %v18223_v56, 5  ;;  %v6109_v24 = vadd.f32 %v6094_v3, %v5686_v27  ;;  %16118 = vtanh.f32 %v5989_v52  ;;  %7406 = vmatpush.bf16.msrb.mxu0 %v15244_v34  ;;  %v15243_v27 = vld [vmem:[#allocation2 + $0x30] sm:$0xff] }
 0x626   :  { %v16109_v41 = vpop.eup %16108  ;;  %v6000_v25 = vadd.f32 1.0, %v16107_v12  ;;  %v6097_v46 = vrot.slane %v18223_v56, 6  ;;  %v6110_v50 = vadd.f32 %v6095_v26, %v5690_v13  ;;  %v5870_v21 = vadd.f32 1.0, %v16101_v49  ;;  %7672 = vmatpush.bf16.msrb.mxu2 %v15260_v57  ;;  %v15251_v3 = vld [vmem:[#allocation2 + $0x70] sm:$0xff] }
 0x627   :  { %v16111_v29 = vpop.eup %16110  ;;  %v6001_v47 = vadd.f32 1.0, %v16109_v41  ;;  %v6098_v23 = vrot.slane %v18223_v56, 7  ;;  %16120 = vtanh.f32 %v6107_v36  ;;  %7781 = vmatpush.bf16.msrb.mxu3 %v15268_v51  ;;  %v5875_v63 = vmul.f32 0.5, %v5867_v28  ;;  %v15242_v28 = vld [vmem:[#allocation2 + $0x28] sm:$0xff] }
 0x628   :  { %v16113_v52 = vpop.eup %16112  ;;  %v6006_v16 = vmul.f32 0.5, %v5998_v54  ;;  %v6007_v12 = vmul.f32 0.5, %v5999_v60  ;;  %16122 = vtanh.f32 %v6108_v37  ;;  %v5876_v26 = vmul.f32 0.5, %v5868_v33  ;;  %7540 = vmatpush.bf16.msrb.mxu1 %v15251_v3  ;;  %v15250_v54 = vld [vmem:[#allocation2 + $0x68] sm:$0xff]  ;;  %v15249_v3 = vld [vmem:[#allocation2 + $0x60] sm:$0xff] }
 0x629   :  { %v16115_v13 = vpop.eup %16114  ;;  %v6008_v34 = vmul.f32 0.5, %v6000_v25  ;;  %v6111_v49 = vadd.f32 %v6096_v31, %v5694_v58  ;;  %16124 = vtanh.f32 %v6109_v24  ;;  %v18270_v36 = vadd.f32 1.0, %v16111_v29  ;;  %7407 = vmatpush.bf16.msrb.mxu0 %v15243_v27  ;;  %v15266_v31 = vld [vmem:[#allocation2 + $0xe8] sm:$0xff] }
 0x62a   :  { %v16117_v45 = vpop.eup %16116  ;;  %v18272_v57 = vmul.f32 0.5, %v5869_v35  ;;  %v6112_v51 = vadd.f32 %v6097_v46, %v5698_v1  ;;  %16126 = vtanh.f32 %v6110_v50  ;;  %v18276_v37 = vmul.f32 0.5, %v5870_v21  ;;  %7673 = vmatpush.bf16.msrb.mxu2 %v15259_v61  ;;  %v15258_v35 = vld [vmem:[#allocation2 + $0xa8] sm:$0xff] }
 0x62b   :  { %v6009_v33 = vmul.f32 0.5, %v6001_v47  ;;  %v6113_v58 = vadd.f32 %v6098_v23, %v5702_v2  ;;  %v6114_v60 = vadd.f32 %v18223_v56, %v5706_v30  ;;  %7782 = vmatpush.bf16.msrb.mxu3 %v15267_v15  ;;  %v16119_v1 = vpop.eup %16118  ;;  %v6002_v24 = vadd.f32 1.0, %v16113_v52 }
 0x62c   :  { %v6003_v41 = vadd.f32 1.0, %v16115_v13  ;;  %v18817_v25 = vrot.slane %v18142_v39, 7  ;;  %v18818_v50 = vrot.slane %v18145_v59, 7  ;;  %v6004_v47 = vadd.f32 1.0, %v16117_v45  ;;  %7541 = vmatpush.bf16.msrb.mxu1 %v15250_v54  ;;  %v15241_v59 = vld [vmem:[#allocation2 + $0x20] sm:$0xff] }
 0x62d   :  { %v16121_v21 = vpop.eup %16120  ;;  %v18819_v2 = vrot.slane %v18150_v5, 7  ;;  %16128 = vtanh.f32 %v6111_v49  ;;  %v6201_v30 = vrot.slane %v18225_v40, 1  ;;  %v6202_v27 = vrot.slane %v18225_v40, 2  ;;  %7408 = vmatpush.bf16.msrb.mxu0 %v15242_v28  ;;  %v15265_v13 = vld [vmem:[#allocation2 + $0xe0] sm:$0xff] }
 0x62e   :  { %v6280_v46 = vmul.f32 %v18817_v25, %v6006_v16  ;;  %v6281_v29 = vmul.f32 %v18818_v50, %v6007_v12  ;;  %v16123_v15 = vpop.eup %16122  ;;  %16130 = vtanh.f32 %v6112_v51  ;;  %v6288_v56 = vmul.f32 %v16121_v21, %v18253_v19  ;;  %7674 = vmatpush.bf16.msrb.mxu2 %v15258_v35  ;;  %v15257_v19 = vld [vmem:[#allocation2 + $0xa0] sm:$0xff]  ;;  %v15248_v35 = vld [vmem:[#allocation2 + $0x58] sm:$0xff] }
 0x62f   :  { %v6282_v23 = vmul.f32 %v18819_v2, %v6008_v34  ;;  %v6203_v39 = vrot.slane %v18225_v40, 3  ;;  %v16125_v61 = vpop.eup %16124  ;;  %v18820_v52 = vrot.slane %v18153_v22, 7  ;;  %16132 = vtanh.f32 %v6113_v58  ;;  %7783 = vmatpush.bf16.msrb.mxu3 %v15266_v31 }
 0x630   :  { %v6289_v16 = vmul.f32 %v16123_v15, %v18257_v7  ;;  %v6204_v12 = vrot.slane %v18225_v40, 4  ;;  %v16127_v34 = vpop.eup %16126  ;;  %16134 = vtanh.f32 %v6114_v60  ;;  %v6290_v49 = vmul.f32 %v16125_v61, %v5875_v63  ;;  %7542 = vmatpush.bf16.msrb.mxu1 %v15249_v3 }
 0x631   :  { %v6283_v5 = vmul.f32 %v18820_v52, %v6009_v33  ;;  %v18297_v45 = vadd.f32 %v6288_v56, %v6280_v46  ;;  %v6205_v51 = vrot.slane %v18225_v40, 5  ;;  %v6291_v28 = vmul.f32 %v16127_v34, %v5876_v26  ;;  %7409 = vmatpush.bf16.msrb.mxu0 %v15241_v59  ;;  %v15240_v26 = vld [vmem:[#allocation2 + $0x18] sm:$0xff] }
 0x632   :  { %v18300_v54 = vadd.f32 %v6289_v16, %v6281_v29  ;;  %v6206_v22 = vrot.slane %v18225_v40, 6  ;;  %v6216_v7 = vadd.f32 %v6201_v30, %v5679_v8  ;;  %v18305_v33 = vadd.f32 %v6290_v49, %v6282_v23  ;;  %7675 = vmatpush.bf16.msrb.mxu2 %v15257_v19  ;;  %v15264_v8 = vld [vmem:[#allocation2 + $0xd8] sm:$0xff]  ;;  %v15239_v30 = vld [vmem:[#allocation2 + $0x10] sm:$0xff]  ;;  %v15254_v49 = vld [vmem:[#allocation2 + $0x88] sm:$0xff] }
 0x633   :  { %v6207_v58 = vrot.slane %v18225_v40, 7  ;;  %v6217_v60 = vadd.f32 %v6202_v27, %v5683_v38  ;;  %v6218_v63 = vadd.f32 %v6203_v39, %v5687_v18  ;;  %v16129_v31 = vpop.eup %16128  ;;  %v6005_v25 = vadd.f32 1.0, %v16119_v1  ;;  %7784 = vmatpush.bf16.msrb.mxu3 %v15265_v13 }
 0x634   :  { %v18312_v46 = vadd.f32 %v6291_v28, %v6283_v5  ;;  %16136 = vtanh.f32 %v18297_v45  ;;  %v6219_v17 = vadd.f32 %v6204_v12, %v5691_v55  ;;  %v16131_v38 = vpop.eup %16130  ;;  %v5879_v32 = vmul.f32 0.5, %v18270_v36  ;;  %7543 = vmatpush.bf16.msrb.mxu1 %v15248_v35  ;;  %v15261_v35 = vld [vmem:[#allocation2 + $0xc0] sm:$0xff] }
 0x635   :  { %v6010_v18 = vmul.f32 0.5, %v6002_v24  ;;  %16138 = vtanh.f32 %v18300_v54  ;;  %v6220_v1 = vadd.f32 %v6205_v51, %v5695_v10  ;;  %v16133_v50 = vpop.eup %16132  ;;  %v6011_v29 = vmul.f32 0.5, %v6003_v41  ;;  %7410 = vmatpush.bf16.msrb.mxu0 %v15240_v26  ;;  %v15253_v26 = vld [vmem:[#allocation2 + $0x80] sm:$0xff] }
 0x636   :  { %v6012_v21 = vmul.f32 0.5, %v6004_v47  ;;  %16140 = vtanh.f32 %v18305_v33  ;;  %v6221_v9 = vadd.f32 %v6206_v22, %v5699_v20  ;;  %v16135_v55 = vpop.eup %16134  ;;  %v6222_v2 = vadd.f32 %v6207_v58, %v5703_v4  ;;  %7676 = vmatpush.bf16.msrb.mxu2 %v15256_v42  ;;  %v15255_v20 = vld [vmem:[#allocation2 + $0x90] sm:$0xff]  ;;  %v15245_v58 = vld [vmem:[#allocation2 + $0x40] sm:$0xff] }
 0x637   :  { %v6224_v23 = vmul.f32 0.5, %v6216_v7  ;;  %v6225_v36 = vmul.f32 0.5, %v6217_v60  ;;  %v6226_v24 = vmul.f32 0.5, %v6218_v63  ;;  %v6013_v10 = vmul.f32 0.5, %v6005_v25  ;;  %7785 = vmatpush.bf16.msrb.mxu3 %v15264_v8 }
 0x638   :  { %16142 = vtanh.f32 %v18312_v46  ;;  %v18821_v41 = vunpack.c.h.bf16 %v18181_v43  ;;  %v6227_v11 = vmul.f32 0.5, %v6219_v17  ;;  %v18822_v4 = vrot.slane %v18156_v44, 7  ;;  %7544 = vmatpush.bf16.msrb.mxu1 %v15247_v53  ;;  %v15238_v44 = vld [vmem:[#allocation2 + $0x8] sm:$0xff] }
 0x639   :  { %v6292_v56 = vmul.f32 %v16129_v31, %v18272_v57  ;;  %v6228_v27 = vmul.f32 0.5, %v6220_v1  ;;  %16144 = vtanh.f32 %v6224_v23  ;;  %v18823_v59 = vrot.slane %v18159_v6, 7  ;;  %7411 = vmatpush.bf16.msrb.mxu0 %v15239_v30  ;;  %v15246_v57 = vld [vmem:[#allocation2 + $0x48] sm:$0xff] }
 0x63a   :  { %v6223_v47 = vadd.f32 %v18225_v40, %v18821_v41  ;;  %v6284_v15 = vmul.f32 %v18822_v4, %v6010_v18  ;;  %v16137_v39 = vpop.eup %16136  ;;  %v6293_v43 = vmul.f32 %v16131_v38, %v18276_v37  ;;  %v6229_v61 = vmul.f32 0.5, %v6221_v9  ;;  %7677 = vmatpush.bf16.msrb.mxu2 %v15255_v20 }
 0x63b   :  { %v6285_v3 = vmul.f32 %v18823_v59, %v6011_v29  ;;  %16146 = vtanh.f32 %v6225_v36  ;;  %v16139_v40 = vpop.eup %16138  ;;  %v18824_v52 = vrot.slane %v18130_v62, 7  ;;  %v6294_v16 = vmul.f32 %v16133_v50, %v5879_v32  ;;  %7786 = vmatpush.bf16.msrb.mxu3 %v15263_v14  ;;  %v15262_v62 = vld [vmem:[#allocation2 + $0xc8] sm:$0xff] }
 0x63c   :  { %v6230_v12 = vmul.f32 0.5, %v6222_v2  ;;  %16148 = vtanh.f32 %v6226_v24  ;;  %v16141_v19 = vpop.eup %16140  ;;  %v18825_v13 = vrot.slane %v18133_v48, 7  ;;  %v6295_v34 = vmul.f32 %v16135_v55, %v18250_v0  ;;  %7545 = vmatpush.bf16.msrb.mxu1 %v15246_v57  ;;  %v15237_v48 = vld [vmem:[#allocation2] sm:$0xff] }
 0x63d   :  { %v6286_v5 = vmul.f32 %v18824_v52, %v6012_v21  ;;  %v6231_v37 = vmul.f32 0.5, %v6223_v47  ;;  %16150 = vtanh.f32 %v6227_v11  ;;  %v18341_v51 = vadd.f32 %v6292_v56, %v6284_v15  ;;  %7412 = vmatpush.bf16.msrb.mxu0 %v15238_v44 }
 0x63e   :  { %v6287_v6 = vmul.f32 %v18825_v13, %v6013_v10  ;;  %16152 = vtanh.f32 %v6228_v27  ;;  %v16143_v28 = vpop.eup %16142  ;;  %v18343_v22 = vadd.f32 %v6293_v43, %v6285_v3  ;;  %7678 = vmatpush.bf16.msrb.mxu2 %v15254_v49 }
 0x63f   :  { %16154 = vtanh.f32 %v6229_v61  ;;  %v16145_v7 = vpop.eup %16144  ;;  %v18345_v0 = vadd.f32 %v6294_v16, %v6286_v5  ;;  %7787 = vmatpush.bf16.msrb.mxu3 %v15262_v62 }
 0x640   :  { %16156 = vtanh.f32 %v6230_v12  ;;  %v6240_v63 = vadd.f32 1.0, %v16145_v7  ;;  %v18347_v31 = vadd.f32 %v6295_v34, %v6287_v6  ;;  %7546 = vmatpush.bf16.msrb.mxu1 %v15245_v58 }
 0x641   :  { %v16147_v60 = vpop.eup %16146  ;;  %16158 = vtanh.f32 %v6231_v37  ;;  %7413 = vmatpush.bf16.msrb.mxu0 %v15237_v48 }
 0x642   :  { %v16149_v25 = vpop.eup %16148  ;;  %v6241_v17 = vadd.f32 1.0, %v16147_v60  ;;  %16160 = vtanh.f32 %v18341_v51  ;;  %v6248_v38 = vmul.f32 0.5, %v6240_v63  ;;  %7679 = vmatpush.bf16.msrb.mxu2 %v15253_v26 }
 0x643   :  { %v16151_v42 = vpop.eup %16150  ;;  %v6242_v8 = vadd.f32 1.0, %v16149_v25  ;;  %16162 = vtanh.f32 %v18343_v22  ;;  %7788 = vmatpush.bf16.msrb.mxu3 %v15261_v35 }
 0x644   :  { %v16153_v32 = vpop.eup %16152  ;;  %v6243_v18 = vadd.f32 1.0, %v16151_v42  ;;  %v6249_v1 = vmul.f32 0.5, %v6241_v17  ;;  %16164 = vtanh.f32 %v18345_v0  ;;  %v6312_v9 = vmul.f32 %v16137_v39, %v6248_v38 }
 0x645   :  { %v16155_v50 = vpop.eup %16154  ;;  %v6244_v29 = vadd.f32 1.0, %v16153_v32  ;;  %v6250_v21 = vmul.f32 0.5, %v6242_v8  ;;  %16166 = vtanh.f32 %v18347_v31 }
 0x646   :  { %v16157_v55 = vpop.eup %16156  ;;  %v6245_v2 = vadd.f32 1.0, %v16155_v50  ;;  %v6251_v23 = vmul.f32 0.5, %v6243_v18  ;;  %v6313_v36 = vmul.f32 %v16139_v40, %v6249_v1  ;;  %6389 = vst [vmem:[#allocation9] sm:$0x80] %v6312_v9  ;;  %v6509_v41 = vpack.c.bf16 %v6312_v9, %v6312_v9 }
 0x647   :  { %v16159_v24 = vpop.eup %16158  ;;  %v6252_v30 = vmul.f32 0.5, %v6244_v29  ;;  %v6314_v53 = vmul.f32 %v16141_v19, %v6250_v21  ;;  %v6246_v10 = vadd.f32 1.0, %v16157_v55 }
 0x648   :  { %v16161_v47 = vpop.eup %16160  ;;  %6390 = vst [vmem:[#allocation9 + $0x10] sm:$0x80] %v6313_v36  ;;  %v6247_v11 = vadd.f32 1.0, %v16159_v24  ;;  %v6253_v20 = vmul.f32 0.5, %v6245_v2  ;;  %v6315_v14 = vmul.f32 %v16143_v28, %v6251_v23  ;;  %v6510_v4 = vpack.c.bf16 %v6313_v36, %v6313_v36 }
 0x649   :  { %v16163_v15 = vpop.eup %16162  ;;  %6391 = vst [vmem:[#allocation9 + $0x20] sm:$0x80] %v6314_v53  ;;  %v6254_v56 = vmul.f32 0.5, %v6246_v10  ;;  %v6316_v27 = vmul.f32 %v16161_v47, %v6252_v30  ;;  %v6511_v39 = vpack.c.bf16 %v6314_v53, %v6314_v53  ;;  %v6541_v59 = vunpack.c.l.b16 %v6509_v41 }
 0x64a   :  { %v16165_v3 = vpop.eup %16164  ;;  %v6255_v43 = vmul.f32 0.5, %v6247_v11  ;;  %v6317_v61 = vmul.f32 %v16163_v15, %v6253_v20  ;;  %6392 = vst [vmem:[#allocation9 + $0x30] sm:$0x80] %v6315_v14  ;;  %v6512_v40 = vpack.c.bf16 %v6315_v14, %v6315_v14  ;;  %v6542_v52 = vunpack.c.l.b16 %v6510_v4  ;;  %v15276_v11 = vld [vmem:[#allocation2 + $0x38] sm:$0xff] }
 0x64b   :  { %v16167_v5 = vpop.eup %16166  ;;  %v6318_v16 = vmul.f32 %v16165_v3, %v6254_v56  ;;  %6393 = vst [vmem:[#allocation9 + $0x40] sm:$0x80] %v6316_v27  ;;  %v6513_v12 = vpack.c.bf16 %v6316_v27, %v6316_v27  ;;  %v6543_v44 = vunpack.c.l.b16 %v6511_v39  ;;  %v6549_v57 = vrot.slane %v6541_v59, 7  ;;  %v15284_v20 = vld [vmem:[#allocation2 + $0x78] sm:$0xff] }
 0x64c   :  { %v6319_v19 = vmul.f32 %v16167_v5, %v6255_v43  ;;  %6394 = vst [vmem:[#allocation9 + $0x50] sm:$0x80] %v6317_v61  ;;  %v6514_v13 = vpack.c.bf16 %v6317_v61, %v6317_v61  ;;  %v6544_v6 = vunpack.c.l.b16 %v6512_v40  ;;  %v6550_v34 = vrot.slane %v6542_v52, 6  ;;  %v15292_v15 = vld [vmem:[#allocation2 + $0xb8] sm:$0xff] }
 0x64d   :  { %6395 = vst [vmem:[#allocation9 + $0x60] sm:$0x80] %v6318_v16  ;;  %v6515_v37 = vpack.c.bf16 %v6318_v16, %v6318_v16  ;;  %v6545_v49 = vunpack.c.l.b16 %v6513_v12  ;;  %v6552_v62 = vrot.slane %v6543_v44, 5  ;;  %v7166_v28 = vrot.slane %v6312_v9, 7  ;;  %v15300_v56 = vld [vmem:[#allocation2 + $0xf8] sm:$0xff]  ;;  %v15283_v12 = vld [vmem:[#allocation2 + $0x70] sm:$0xff] }
 0x64e   :  { %6396 = vst [vmem:[#allocation9 + $0x70] sm:$0x80] %v6319_v19  ;;  %v6516_v7 = vpack.c.bf16 %v6319_v19, %v6319_v19  ;;  %v6546_v48 = vunpack.c.l.b16 %v6514_v13  ;;  %v6551_v58 = vsel %vm99_vm0, %v6550_v34, %v6549_v57  ;;  %v6554_v60 = vrot.slane %v6544_v6, 4  ;;  %v15291_v6 = vld [vmem:[#allocation2 + $0xb0] sm:$0xff] }
 0x64f   :  { %v6547_v63 = vunpack.c.l.b16 %v6515_v37  ;;  %v6553_v26 = vsel %vm102_vm1, %v6552_v62, %v6551_v58  ;;  %v6556_v35 = vrot.slane %v6545_v49, 3  ;;  %v7167_v25 = vrot.slane %v6313_v36, 7  ;;  %7190 = vst [vmem:[#allocation9 + $0x8] sm:$0x1] %v7166_v28  ;;  %v15299_v34 = vld [vmem:[#allocation2 + $0xf0] sm:$0xff] }
 0x650   :  { %v6548_v17 = vunpack.c.l.b16 %v6516_v7  ;;  %v6555_v42 = vsel %vm105_vm2, %v6554_v60, %v6553_v26  ;;  %v6558_v8 = vrot.slane %v6546_v48, 2  ;;  %v7168_v38 = vrot.slane %v6314_v53, 7 }
 0x651   :  { %v6557_v32 = vsel %vm108_vm3, %v6556_v35, %v6555_v42  ;;  %v6560_v18 = vrot.slane %v6547_v63, 1  ;;  %v7169_v1 = vrot.slane %v6315_v14, 7  ;;  %v7170_v50 = vrot.slane %v6316_v27, 7  ;;  %7191 = vst [vmem:[#allocation9 + $0x18] sm:$0x1] %v7167_v25  ;;  %v15282_v42 = vld [vmem:[#allocation2 + $0x68] sm:$0xff] }
 0x652   :  { %v6559_v29 = vsel %vm111_vm4, %v6558_v8, %v6557_v32  ;;  %v7171_v21 = vrot.slane %v6317_v61, 7  ;;  %v7172_v9 = vrot.slane %v6318_v16, 7  ;;  %v18358_v55 = vrot.slane %v6319_v19, 7  ;;  %7192 = vst [vmem:[#allocation9 + $0x28] sm:$0x1] %v7168_v38  ;;  %v15275_v16 = vld [vmem:[#allocation2 + $0x30] sm:$0xff] }
 0x653   :  { %v6561_v2 = vsel %vm114_vm5, %v6560_v18, %v6559_v29  ;;  %7193 = vst [vmem:[#allocation9 + $0x38] sm:$0x1] %v7169_v1  ;;  %v7302_v23 = vpack.c.bf16 %v7166_v28, %v7166_v28  ;;  %v7303_v36 = vpack.c.bf16 %v7167_v25, %v7167_v25  ;;  %v7304_v24 = vpack.c.bf16 %v7168_v38, %v7168_v38 }
 0x654   :  { %v6562_v30 = vsel %vm117_vm6, %v6548_v17, %v6561_v2  ;;  %7194 = vst [vmem:[#allocation9 + $0x48] sm:$0x1] %v7170_v50  ;;  %v7305_v53 = vpack.c.bf16 %v7169_v1, %v7169_v1  ;;  %v7306_v10 = vpack.c.bf16 %v7170_v50, %v7170_v50  ;;  %v7307_v41 = vpack.c.bf16 %v7171_v21, %v7171_v21  ;;  %v15274_v17 = vld [vmem:[#allocation2 + $0x28] sm:$0xff] }
 0x655   :  { %v6563_v47 = vpack.c.b16 %v6562_v30, %v6562_v30  ;;  %7195 = vst [vmem:[#allocation9 + $0x58] sm:$0x1] %v7171_v21  ;;  %v7308_v14 = vpack.c.bf16 %v7172_v9, %v7172_v9  ;;  %v7309_v4 = vpack.c.bf16 %v18358_v55, %v18358_v55  ;;  %v7335_v27 = vunpack.c.l.b16 %v7303_v36  ;;  %v15273_v36 = vld [vmem:[#allocation2 + $0x20] sm:$0xff] }
 0x656   :  { %7196 = vst [vmem:[#allocation9 + $0x68] sm:$0x1] %v7172_v9  ;;  %v7336_v39 = vunpack.c.l.b16 %v7304_v24  ;;  %v7337_v59 = vunpack.c.l.b16 %v7305_v53  ;;  %v7338_v3 = vunpack.c.l.b16 %v7306_v10  ;;  %v7339_v43 = vunpack.c.l.b16 %v7307_v41  ;;  %v15281_v24 = vld [vmem:[#allocation2 + $0x60] sm:$0xff] }
 0x657   :  { %6621 = vmatmul.bf16.vlgmr.msra.gmra.mxu0 %v6563_v47  ;;  %6754 = vmatmul.bf16.vlgmr.msra.gmra.mxu1 %v6563_v47  ;;  %7197 = vst [vmem:[#allocation9 + $0x78] sm:$0x1] %v18358_v55  ;;  %v18365_v61 = vrot.slane %v7166_v28, 7  ;;  %v7334_v40 = vunpack.c.l.b16 %v7302_v23  ;;  %v7342_v52 = vrot.slane %v7335_v27, 7  ;;  %v7340_v44 = vunpack.c.l.b16 %v7308_v14  ;;  %v15289_v10 = vld [vmem:[#allocation2 + $0xa0] sm:$0xff] }
 0x658   :  { %6887 = vmatmul.bf16.vlgmr.msra.gmra.mxu2 %v6563_v47  ;;  %6996 = vmatmul.bf16.vlgmr.msra.gmra.mxu3 %v6563_v47  ;;  %v7344_v5 = vrot.slane %v7336_v39, 6  ;;  %v7341_v57 = vunpack.c.l.b16 %v7309_v4  ;;  %v7346_v19 = vrot.slane %v7337_v59, 5  ;;  %v7960_v13 = vrot.slane %v7167_v25, 7  ;;  %v15297_v41 = vld [vmem:[#allocation2 + $0xe0] sm:$0xff] }
 0x659   :  { %8207 = vmatpush.bf16.msra.mxu0 %v15276_v11  ;;  %8340 = vmatpush.bf16.msra.mxu1 %v15284_v20  ;;  %7983 = vst [vmem:[#allocation9 + $0x8] sm:$0x2] %v18365_v61  ;;  %v7343_v37 = vsel %vm99_vm0, %v7342_v52, %v7334_v40  ;;  %v7961_v49 = vrot.slane %v7168_v38, 7  ;;  %v7962_v62 = vrot.slane %v7169_v1, 7  ;;  %v7963_v28 = vrot.slane %v7170_v50, 7  ;;  %v15290_v1 = vld [vmem:[#allocation2 + $0xa8] sm:$0xff] }
 0x65a   :  { %8473 = vmatpush.bf16.msra.mxu2 %v15292_v15  ;;  %8582 = vmatpush.bf16.msra.mxu3 %v15300_v56  ;;  %v7345_v7 = vsel %vm102_vm1, %v7344_v5, %v7343_v37  ;;  %v7348_v48 = vrot.slane %v7338_v3, 4  ;;  %v7350_v58 = vrot.slane %v7339_v43, 3  ;;  %v18370_v60 = vrot.slane %v7171_v21, 7  ;;  %7984 = vst [vmem:[#allocation9 + $0x18] sm:$0x2] %v7960_v13  ;;  %v15298_v50 = vld [vmem:[#allocation2 + $0xe8] sm:$0xff] }
 0x65b   :  { %v7347_v63 = vsel %vm105_vm2, %v7346_v19, %v7345_v7  ;;  %v18373_v26 = vrot.slane %v7172_v9, 7  ;;  %7985 = vst [vmem:[#allocation9 + $0x28] sm:$0x2] %v7961_v49  ;;  %v8103_v35 = vpack.c.bf16 %v18365_v61, %v18365_v61  ;;  %v8105_v25 = vpack.c.bf16 %v7961_v49, %v7961_v49  ;;  %v15272_v43 = vld [vmem:[#allocation2 + $0x18] sm:$0xff]  ;;  %v15279_v7 = vld [vmem:[#allocation2 + $0x50] sm:$0xff] }
 0x65c   :  { %v7349_v8 = vsel %vm108_vm3, %v7348_v48, %v7347_v63  ;;  %v7352_v38 = vrot.slane %v7340_v44, 2  ;;  %v18379_v32 = vrot.slane %v18358_v55, 7  ;;  %7986 = vst [vmem:[#allocation9 + $0x38] sm:$0x2] %v7962_v62  ;;  %v8104_v18 = vpack.c.bf16 %v7960_v13, %v7960_v13  ;;  %v15280_v40 = vld [vmem:[#allocation2 + $0x58] sm:$0xff]  ;;  %v15295_v63 = vld [vmem:[#allocation2 + $0xd0] sm:$0xff] }
 0x65d   :  { %8208 = vmatpush.bf16.msra.mxu0 %v15275_v16  ;;  %8341 = vmatpush.bf16.msra.mxu1 %v15283_v12  ;;  %v7351_v29 = vsel %vm111_vm4, %v7350_v58, %v7349_v8  ;;  %7987 = vst [vmem:[#allocation9 + $0x48] sm:$0x2] %v7963_v28  ;;  %v8106_v21 = vpack.c.bf16 %v7962_v62, %v7962_v62  ;;  %v8135_v2 = vunpack.c.l.b16 %v8103_v35  ;;  %v7354_v23 = vrot.slane %v7341_v57, 1  ;;  %v15296_v12 = vld [vmem:[#allocation2 + $0xd8] sm:$0xff] }
 0x65e   :  { %8474 = vmatpush.bf16.msra.mxu2 %v15291_v6  ;;  %8583 = vmatpush.bf16.msra.mxu3 %v15299_v34  ;;  %v7353_v9 = vsel %vm114_vm5, %v7352_v38, %v7351_v29  ;;  %7988 = vst [vmem:[#allocation9 + $0x58] sm:$0x2] %v18370_v60  ;;  %v8137_v55 = vunpack.c.l.b16 %v8105_v25  ;;  %v8107_v30 = vpack.c.bf16 %v7963_v28, %v7963_v28  ;;  %v8136_v53 = vunpack.c.l.b16 %v8104_v18 }
 0x65f   :  { %7989 = vst [vmem:[#allocation9 + $0x68] sm:$0x2] %v18373_v26  ;;  %v7355_v47 = vsel %vm117_vm6, %v7354_v23, %v7353_v9  ;;  %v8138_v11 = vunpack.c.l.b16 %v8106_v21  ;;  %v8143_v20 = vrot.slane %v8135_v2, 1  ;;  %v8108_v4 = vpack.c.bf16 %v18370_v60, %v18370_v60  ;;  %v15286_v9 = vld [vmem:[#allocation2 + $0x88] sm:$0xff] }
 0x660   :  { %7990 = vst [vmem:[#allocation9 + $0x78] sm:$0x2] %v18379_v32  ;;  %v8145_v14 = vrot.slane %v8137_v55, 7  ;;  %v8760_v15 = vrot.slane %v18365_v61, 7  ;;  %v18391_v27 = vrot.slane %v7960_v13, 7  ;;  %v18393_v39 = vrot.slane %v7961_v49, 7 }
 0x661   :  { %8209 = vmatpush.bf16.msra.mxu0 %v15274_v17  ;;  %8342 = vmatpush.bf16.msra.mxu1 %v15282_v42  ;;  %v8144_v56 = vsel %vm99_vm0, %v8136_v53, %v8143_v20  ;;  %v18395_v59 = vrot.slane %v7962_v62, 7  ;;  %v7356_v3 = vpack.c.b16 %v7355_v47, %v7355_v47  ;;  %v8139_v52 = vunpack.c.l.b16 %v8107_v30  ;;  %v15288_v61 = vld [vmem:[#allocation2 + $0x98] sm:$0xff]  ;;  %v15294_v2 = vld [vmem:[#allocation2 + $0xc8] sm:$0xff] }
 0x662   :  { %8475 = vmatpush.bf16.msra.mxu2 %v15290_v1  ;;  %8584 = vmatpush.bf16.msra.mxu3 %v15298_v50  ;;  %v8146_v5 = vsel %vm102_vm1, %v8145_v14, %v8144_v56  ;;  %v18398_v16 = vrot.slane %v7963_v28, 7  ;;  %8784 = vst [vmem:[#allocation9 + $0x8] sm:$0x4] %v8760_v15  ;;  %v8147_v44 = vrot.slane %v8138_v11, 6  ;;  %v18401_v57 = vrot.slane %v18370_v60, 7  ;;  %v15271_v28 = vld [vmem:[#allocation2 + $0x10] sm:$0xff] }
 0x663   :  { %8785 = vst [vmem:[#allocation9 + $0x18] sm:$0x4] %v18391_v27  ;;  %v8904_v19 = vpack.c.bf16 %v8760_v15, %v8760_v15  ;;  %v8109_v13 = vpack.c.bf16 %v18373_v26, %v18373_v26  ;;  %v18407_v6 = vrot.slane %v18373_v26, 7  ;;  %v8905_v34 = vpack.c.bf16 %v18391_v27, %v18391_v27  ;;  %v15287_v60 = vld [vmem:[#allocation2 + $0x90] sm:$0xff]  ;;  %v15270_v1 = vld [vmem:[#allocation2 + $0x8] sm:$0xff]  ;;  %v15269_v14 = vld [vmem:[#allocation2] sm:$0xff] }
 0x664   :  { %8786 = vst [vmem:[#allocation9 + $0x28] sm:$0x4] %v18393_v39  ;;  %v8140_v37 = vunpack.c.l.b16 %v8108_v4  ;;  %v8148_v49 = vsel %vm105_vm2, %v8147_v44, %v8146_v5  ;;  %v18414_v62 = vrot.slane %v18379_v32, 7  ;;  %v8149_v48 = vrot.slane %v8139_v52, 5  ;;  %v15277_v4 = vld [vmem:[#allocation2 + $0x40] sm:$0xff]  ;;  %v15308_v52 = vld [vmem:[#allocation2 + $0x38] sm:$0xff] }
 0x665   :  { %8210 = vmatpush.bf16.msra.mxu0 %v15273_v36  ;;  %8343 = vmatpush.bf16.msra.mxu1 %v15281_v24  ;;  %8787 = vst [vmem:[#allocation9 + $0x38] sm:$0x4] %v18395_v59  ;;  %v18419_v58 = vrot.slane %v18393_v39, 7  ;;  %v8110_v26 = vpack.c.bf16 %v18379_v32, %v18379_v32  ;;  %v8936_v35 = vunpack.c.l.b16 %v8904_v19  ;;  %v8937_v25 = vunpack.c.l.b16 %v8905_v34  ;;  %v15278_v32 = vld [vmem:[#allocation2 + $0x48] sm:$0xff]  ;;  %v15316_v5 = vld [vmem:[#allocation2 + $0x78] sm:$0xff] }
 0x666   :  { %8476 = vmatpush.bf16.msra.mxu2 %v15289_v10  ;;  %8585 = vmatpush.bf16.msra.mxu3 %v15297_v41  ;;  %8788 = vst [vmem:[#allocation9 + $0x48] sm:$0x4] %v18398_v16  ;;  %v8141_v17 = vunpack.c.l.b16 %v8109_v13  ;;  %v8150_v42 = vsel %vm108_vm3, %v8149_v48, %v8148_v49  ;;  %v8151_v8 = vrot.slane %v8140_v37, 4  ;;  %v8907_v38 = vpack.c.bf16 %v18395_v59, %v18395_v59  ;;  %v15332_v44 = vld [vmem:[#allocation2 + $0xf8] sm:$0xff]  ;;  %v15323_v48 = vld [vmem:[#allocation2 + $0xb0] sm:$0xff] }
 0x667   :  { %7414 = vmatmul.bf16.vlgmr.msrb.gmra.mxu0 %v7356_v3  ;;  %7547 = vmatmul.bf16.vlgmr.msrb.gmra.mxu1 %v7356_v3  ;;  %8789 = vst [vmem:[#allocation9 + $0x58] sm:$0x4] %v18401_v57  ;;  %v8944_v18 = vrot.slane %v8936_v35, 2  ;;  %v8906_v50 = vpack.c.bf16 %v18393_v39, %v18393_v39  ;;  %v8945_v29 = vrot.slane %v8937_v25, 1  ;;  %v18432_v21 = vrot.slane %v8760_v15, 7 }
 0x668   :  { %7680 = vmatmul.bf16.vlgmr.msrb.gmra.mxu2 %v7356_v3  ;;  %7789 = vmatmul.bf16.vlgmr.msrb.gmra.mxu3 %v7356_v3  ;;  %8790 = vst [vmem:[#allocation9 + $0x68] sm:$0x4] %v18407_v6  ;;  %v8142_v23 = vunpack.c.l.b16 %v8110_v26  ;;  %v8152_v55 = vsel %vm111_vm4, %v8151_v8, %v8150_v42  ;;  %v18436_v36 = vrot.slane %v18391_v27, 7  ;;  %v8153_v24 = vrot.slane %v8141_v17, 3  ;;  %v15293_v3 = vld [vmem:[#allocation2 + $0xc0] sm:$0xff] }
 0x669   :  { %8211 = vmatpush.bf16.msra.mxu0 %v15272_v43  ;;  %8344 = vmatpush.bf16.msra.mxu1 %v15280_v40  ;;  %8791 = vst [vmem:[#allocation9 + $0x78] sm:$0x4] %v18414_v62  ;;  %v8908_v30 = vpack.c.bf16 %v18398_v16, %v18398_v16  ;;  %v18441_v53 = vrot.slane %v18395_v59, 7  ;;  %v18444_v10 = vrot.slane %v18398_v16, 7  ;;  %v8909_v41 = vpack.c.bf16 %v18401_v57, %v18401_v57  ;;  %v15285_v59 = vld [vmem:[#allocation2 + $0x80] sm:$0xff] }
 0x66a   :  { %8477 = vmatpush.bf16.msra.mxu2 %v15288_v61  ;;  %8586 = vmatpush.bf16.msra.mxu3 %v15296_v12  ;;  %9587 = vst [vmem:[#allocation9 + $0x28] sm:$0x8] %v18419_v58  ;;  %v8939_v47 = vunpack.c.l.b16 %v8907_v38  ;;  %v8946_v11 = vsel %vm99_vm0, %v8945_v29, %v8944_v18  ;;  %v18450_v20 = vrot.slane %v18401_v57, 7  ;;  %v8154_v15 = vsel %vm114_vm5, %v8153_v24, %v8152_v55  ;;  %v15324_v12 = vld [vmem:[#allocation2 + $0xb8] sm:$0xff]  ;;  %v15306_v29 = vld [vmem:[#allocation2 + $0x28] sm:$0xff] }
 0x66b   :  { %9585 = vst [vmem:[#allocation9 + $0x8] sm:$0x8] %v18432_v21  ;;  %v8910_v56 = vpack.c.bf16 %v18407_v6, %v18407_v6  ;;  %v8938_v27 = vunpack.c.l.b16 %v8906_v50  ;;  %v18457_v39 = vrot.slane %v18407_v6, 7  ;;  %v8155_v43 = vrot.slane %v8142_v23, 2  ;;  %v15322_v24 = vld [vmem:[#allocation2 + $0xa8] sm:$0xff] }
 0x66c   :  { %9586 = vst [vmem:[#allocation9 + $0x18] sm:$0x8] %v18436_v36  ;;  %v18461_v40 = vrot.slane %v18414_v62, 7  ;;  %v8940_v16 = vunpack.c.l.b16 %v8908_v30  ;;  %v8911_v19 = vpack.c.bf16 %v18414_v62, %v18414_v62  ;;  %v8941_v13 = vunpack.c.l.b16 %v8909_v41  ;;  %v15307_v62 = vld [vmem:[#allocation2 + $0x30] sm:$0xff]  ;;  %v15330_v30 = vld [vmem:[#allocation2 + $0xe8] sm:$0xff] }
 0x66d   :  { %8212 = vmatpush.bf16.msra.mxu0 %v15271_v28  ;;  %8345 = vmatpush.bf16.msra.mxu1 %v15279_v7  ;;  %9588 = vst [vmem:[#allocation9 + $0x38] sm:$0x8] %v18441_v53  ;;  %v8947_v61 = vsel %vm102_vm1, %v8938_v27, %v8946_v11  ;;  %v8156_v57 = vsel %vm117_vm6, %v8155_v43, %v8154_v15  ;;  %v8948_v6 = vrot.slane %v8939_v47, 7  ;;  %v18470_v34 = vunpack.c.l.b16 %v8910_v56  ;;  %v15315_v28 = vld [vmem:[#allocation2 + $0x70] sm:$0xff] }
 0x66e   :  { %8478 = vmatpush.bf16.msra.mxu2 %v15287_v60  ;;  %8587 = vmatpush.bf16.msra.mxu3 %v15295_v63  ;;  %9589 = vst [vmem:[#allocation9 + $0x48] sm:$0x8] %v18444_v10  ;;  %v8157_v49 = vpack.c.b16 %v8156_v57, %v8156_v57  ;;  %v8950_v7 = vrot.slane %v8940_v16, 6  ;;  %v15331_v60 = vld [vmem:[#allocation2 + $0xf0] sm:$0xff]  ;;  %v18475_v63 = vunpack.c.l.b16 %v8911_v19  ;;  %v8952_v26 = vrot.slane %v8941_v13, 5  ;;  %v15321_v16 = vld [vmem:[#allocation2 + $0xa0] sm:$0xff] }
 0x66f   :  { %9590 = vst [vmem:[#allocation9 + $0x58] sm:$0x8] %v18450_v20  ;;  %v8949_v37 = vsel %vm105_vm2, %v8948_v6, %v8947_v61  ;;  %v18478_v35 = vrot.slane %v18432_v21, 7  ;;  %v18481_v25 = vrot.slane %v18436_v36, 7  ;;  %v8954_v42 = vrot.slane %v18470_v34, 4  ;;  %v15329_v61 = vld [vmem:[#allocation2 + $0xe0] sm:$0xff] }
 0x670   :  { %9591 = vst [vmem:[#allocation9 + $0x68] sm:$0x8] %v18457_v39  ;;  %v8951_v17 = vsel %vm108_vm3, %v8950_v7, %v8949_v37  ;;  %v18486_v8 = vrot.slane %v18419_v58, 7  ;;  %v18489_v38 = vrot.slane %v18441_v53, 7  ;;  %v18492_v18 = vrot.slane %v18444_v10, 7 }
 0x671   :  { %8213 = vmatpush.bf16.msra.mxu0 %v15270_v1  ;;  %8346 = vmatpush.bf16.msra.mxu1 %v15278_v32  ;;  %9592 = vst [vmem:[#allocation9 + $0x78] sm:$0x8] %v18461_v40  ;;  %v18495_v1 = vrot.slane %v18450_v20, 7  ;;  %v18498_v32 = vrot.slane %v18457_v39, 7  ;;  %v18501_v50 = vrot.slane %v18461_v40, 7  ;;  %v10506_v23 = vpack.c.bf16 %v18478_v35, %v18478_v35 }
 0x672   :  { %8479 = vmatpush.bf16.msra.mxu2 %v15286_v9  ;;  %8588 = vmatpush.bf16.msra.mxu3 %v15294_v2  ;;  %v15314_v9 = vld [vmem:[#allocation2 + $0x68] sm:$0xff]  ;;  %v9705_v2 = vpack.c.bf16 %v18432_v21, %v18432_v21  ;;  %10386 = vst [vmem:[#allocation9 + $0x8] sm:$0x10] %v18478_v35  ;;  %v10507_v55 = vpack.c.bf16 %v18481_v25, %v18481_v25  ;;  %v8956_v43 = vrot.slane %v18475_v63, 3 }
 0x673   :  { %v9706_v41 = vpack.c.bf16 %v18436_v36, %v18436_v36  ;;  %10387 = vst [vmem:[#allocation9 + $0x18] sm:$0x10] %v18481_v25  ;;  %v10508_v21 = vpack.c.bf16 %v18486_v8, %v18486_v8  ;;  %v10509_v47 = vpack.c.bf16 %v18489_v38, %v18489_v38  ;;  %v8953_v11 = vsel %vm111_vm4, %v8952_v26, %v8951_v17 }
 0x674   :  { %10388 = vst [vmem:[#allocation9 + $0x28] sm:$0x10] %v18486_v8  ;;  %v10512_v36 = vpack.c.bf16 %v18498_v32, %v18498_v32  ;;  %v10510_v15 = vpack.c.bf16 %v18492_v18, %v18492_v18  ;;  %v10513_v56 = vpack.c.bf16 %v18501_v50, %v18501_v50  ;;  %v10538_v27 = vunpack.c.l.b16 %v10506_v23 }
 0x675   :  { %8214 = vmatpush.bf16.msra.mxu0 %v15269_v14  ;;  %8347 = vmatpush.bf16.msra.mxu1 %v15277_v4  ;;  %v9707_v14 = vpack.c.bf16 %v18419_v58, %v18419_v58  ;;  %v10511_v4 = vpack.c.bf16 %v18495_v1, %v18495_v1  ;;  %10389 = vst [vmem:[#allocation9 + $0x38] sm:$0x10] %v18489_v38  ;;  %v15305_v58 = vld [vmem:[#allocation2 + $0x20] sm:$0xff]  ;;  %v18534_v13 = vunpack.c.l.b16 %v9705_v2  ;;  %v18536_v6 = vunpack.c.l.b16 %v9706_v41  ;;  %v15328_v2 = vld [vmem:[#allocation2 + $0xd8] sm:$0xff] }
 0x676   :  { %8480 = vmatpush.bf16.msra.mxu2 %v15285_v59  ;;  %8589 = vmatpush.bf16.msra.mxu3 %v15293_v3  ;;  %v10539_v59 = vunpack.c.l.b16 %v10507_v55  ;;  %v15313_v3 = vld [vmem:[#allocation2 + $0x60] sm:$0xff]  ;;  %10390 = vst [vmem:[#allocation9 + $0x48] sm:$0x10] %v18492_v18  ;;  %v10544_v57 = vunpack.c.l.b16 %v10512_v36  ;;  %v10545_v19 = vunpack.c.l.b16 %v10513_v56  ;;  %v10546_v34 = vrot.slane %v10538_v27, 4  ;;  %v15327_v36 = vld [vmem:[#allocation2 + $0xd0] sm:$0xff] }
 0x677   :  { %10391 = vst [vmem:[#allocation9 + $0x58] sm:$0x10] %v18495_v1  ;;  %v18545_v55 = vrot.slane %v18478_v35, 7 }
 0x678   :  { %8215 = vmatmul.bf16.vlgmr.msra.gmra.mxu0 %v8157_v49  ;;  %8348 = vmatmul.bf16.vlgmr.msra.gmra.mxu1 %v8157_v49  ;;  %10392 = vst [vmem:[#allocation9 + $0x68] sm:$0x10] %v18498_v32  ;;  %v10547_v37 = vrot.slane %v10539_v59, 3 }
 0x679   :  { %9008 = vmatpush.bf16.msrb.mxu0 %v15308_v52  ;;  %9141 = vmatpush.bf16.msrb.mxu1 %v15316_v5  ;;  %v10540_v52 = vunpack.c.l.b16 %v10508_v21  ;;  %v10541_v5 = vunpack.c.l.b16 %v10509_v47  ;;  %10393 = vst [vmem:[#allocation9 + $0x78] sm:$0x10] %v18501_v50  ;;  %v18555_v21 = vrot.slane %v18489_v38, 7  ;;  %v18558_v47 = vrot.slane %v18492_v18, 7  ;;  %v15303_v38 = vld [vmem:[#allocation2 + $0x10] sm:$0xff] }
 0x67a   :  { %9274 = vmatpush.bf16.msrb.mxu2 %v15324_v12  ;;  %9383 = vmatpush.bf16.msrb.mxu3 %v15332_v44  ;;  %v8955_v12 = vsel %vm114_vm5, %v8954_v42, %v8953_v11  ;;  %v10543_v44 = vunpack.c.l.b16 %v10511_v4  ;;  %v10548_v26 = vsel %vm99_vm0, %v10547_v37, %v10546_v34  ;;  %v10556_v42 = vrot.slane %v10544_v57, 6  ;;  %11187 = vst [vmem:[#allocation9 + $0x8] sm:$0x20] %v18545_v55  ;;  %v15311_v18 = vld [vmem:[#allocation2 + $0x50] sm:$0xff]  ;;  %v15302_v57 = vld [vmem:[#allocation2 + $0x8] sm:$0xff] }
 0x67b   :  { %8481 = vmatmul.bf16.vlgmr.msra.gmra.mxu2 %v8157_v49  ;;  %8590 = vmatmul.bf16.vlgmr.msra.gmra.mxu3 %v8157_v49  ;;  %v18539_v49 = vunpack.c.l.b16 %v9707_v14  ;;  %v10551_v7 = vrot.slane %v10541_v5, 1  ;;  %v18561_v11 = vrot.slane %v18495_v1, 7  ;;  %v18565_v14 = vrot.slane %v18498_v32, 7  ;;  %v15319_v4 = vld [vmem:[#allocation2 + $0x90] sm:$0xff]  ;;  %11190 = vst [vmem:[#allocation9 + $0x38] sm:$0x20] %v18555_v21 }
 0x67c   :  { %v10554_v17 = vrot.slane %v10543_v44, 7  ;;  %v11310_v56 = vpack.c.bf16 %v18555_v21, %v18555_v21  ;;  %v11311_v27 = vpack.c.bf16 %v18558_v47, %v18558_v47  ;;  %v18598_v5 = vsel %vm117_vm6, %v8956_v43, %v8955_v12  ;;  %11191 = vst [vmem:[#allocation9 + $0x48] sm:$0x20] %v18558_v47  ;;  %v15318_v34 = vld [vmem:[#allocation2 + $0x88] sm:$0xff] }
 0x67d   :  { %9009 = vmatpush.bf16.msrb.mxu0 %v15307_v62  ;;  %9142 = vmatpush.bf16.msrb.mxu1 %v15315_v28  ;;  %v10542_v62 = vunpack.c.l.b16 %v10510_v15  ;;  %v10549_v28 = vrot.slane %v10540_v52, 2  ;;  %v9745_v37 = vrot.slane %v18534_v13, 3  ;;  %11192 = vst [vmem:[#allocation9 + $0x58] sm:$0x20] %v18561_v11  ;;  %v15326_v43 = vld [vmem:[#allocation2 + $0xc8] sm:$0xff] }
 0x67e   :  { %9275 = vmatpush.bf16.msrb.mxu2 %v15323_v48  ;;  %9384 = vmatpush.bf16.msrb.mxu3 %v15331_v60  ;;  %v15304_v48 = vld [vmem:[#allocation2 + $0x18] sm:$0xff]  ;;  %11193 = vst [vmem:[#allocation9 + $0x68] sm:$0x20] %v18565_v14 }
 0x67f   :  { %v15312_v60 = vld [vmem:[#allocation2 + $0x58] sm:$0xff]  ;;  %v10550_v23 = vsel %vm102_vm1, %v10549_v28, %v10548_v26  ;;  %v11343_v28 = vunpack.c.l.b16 %v11311_v27  ;;  %v9746_v26 = vrot.slane %v18536_v6, 2 }
 0x680   :  { %v10552_v41 = vsel %vm105_vm2, %v10551_v7, %v10550_v23  ;;  %v15356_v27 = vld [vmem:[#allocation2 + $0xb8] sm:$0xff] }
 0x681   :  { %9010 = vmatpush.bf16.msrb.mxu0 %v15306_v29  ;;  %9143 = vmatpush.bf16.msrb.mxu1 %v15314_v9  ;;  %v10558_v29 = vrot.slane %v10545_v19, 5  ;;  %v15320_v9 = vld [vmem:[#allocation2 + $0x98] sm:$0xff]  ;;  %v10553_v35 = vsel %vm108_vm3, %v10542_v62, %v10552_v41  ;;  %v15310_v19 = vld [vmem:[#allocation2 + $0x48] sm:$0xff]  ;;  %v11342_v62 = vunpack.c.l.b16 %v11310_v56  ;;  %v18608_v41 = vrot.slane %v18545_v55, 7 }
 0x682   :  { %9276 = vmatpush.bf16.msrb.mxu2 %v15322_v24  ;;  %9385 = vmatpush.bf16.msrb.mxu3 %v15330_v30  ;;  %v18548_v24 = vrot.slane %v18481_v25, 7  ;;  %v18551_v30 = vrot.slane %v18486_v8, 7  ;;  %v18568_v25 = vrot.slane %v18501_v50, 7  ;;  %v11307_v8 = vpack.c.bf16 %v18545_v55, %v18545_v55  ;;  %v15325_v55 = vld [vmem:[#allocation2 + $0xc0] sm:$0xff] }
 0x683   :  { %v10555_v1 = vsel %vm111_vm4, %v10554_v17, %v10553_v35  ;;  %v15301_v35 = vld [vmem:[#allocation2] sm:$0xff]  ;;  %11988 = vst [vmem:[#allocation9 + $0x8] sm:$0x40] %v18608_v41 }
 0x684   :  { %11188 = vst [vmem:[#allocation9 + $0x18] sm:$0x20] %v18548_v24  ;;  %v11308_v32 = vpack.c.bf16 %v18548_v24, %v18548_v24  ;;  %v11309_v50 = vpack.c.bf16 %v18551_v30, %v18551_v30  ;;  %v10557_v15 = vsel %vm114_vm5, %v10556_v42, %v10555_v1  ;;  %v11314_v52 = vpack.c.bf16 %v18568_v25, %v18568_v25 }
 0x685   :  { %9011 = vmatpush.bf16.msrb.mxu0 %v15305_v58  ;;  %9144 = vmatpush.bf16.msrb.mxu1 %v15313_v3  ;;  %11189 = vst [vmem:[#allocation9 + $0x28] sm:$0x20] %v18551_v30  ;;  %v18586_v59 = vsel %vm117_vm6, %v10558_v29, %v10557_v15  ;;  %v11312_v58 = vpack.c.bf16 %v18561_v11, %v18561_v11  ;;  %v11352_v42 = vrot.slane %v11342_v62, 2  ;;  %v11354_v29 = vrot.slane %v11343_v28, 1  ;;  %v15348_v15 = vld [vmem:[#allocation2 + $0x78] sm:$0xff]  ;;  %v15339_v28 = vld [vmem:[#allocation2 + $0x30] sm:$0xff] }
 0x686   :  { %9277 = vmatpush.bf16.msrb.mxu2 %v15321_v16  ;;  %9386 = vmatpush.bf16.msrb.mxu3 %v15329_v61  ;;  %v11313_v3 = vpack.c.bf16 %v18565_v14, %v18565_v14  ;;  %v11339_v16 = vunpack.c.l.b16 %v11307_v8  ;;  %v11340_v61 = vunpack.c.l.b16 %v11308_v32  ;;  %v11341_v44 = vunpack.c.l.b16 %v11309_v50  ;;  %11194 = vst [vmem:[#allocation9 + $0x78] sm:$0x20] %v18568_v25  ;;  %v15309_v8 = vld [vmem:[#allocation2 + $0x40] sm:$0xff] }
 0x687   :  { %v11346_v12 = vunpack.c.l.b16 %v11314_v52  ;;  %v11344_v17 = vunpack.c.l.b16 %v11312_v58  ;;  %v18612_v6 = vrot.slane %v18548_v24, 7  ;;  %v18615_v1 = vrot.slane %v18551_v30, 7  ;;  %v15340_v30 = vld [vmem:[#allocation2 + $0x38] sm:$0xff] }
 0x688   :  { %v11345_v63 = vunpack.c.l.b16 %v11313_v3  ;;  %v11347_v7 = vrot.slane %v11339_v16, 5  ;;  %v18618_v32 = vrot.slane %v18555_v21, 7  ;;  %v18628_v24 = vrot.slane %v18565_v14, 7  ;;  %v15364_v14 = vld [vmem:[#allocation2 + $0xf8] sm:$0xff] }
 0x689   :  { %9012 = vmatpush.bf16.msrb.mxu0 %v15304_v48  ;;  %9145 = vmatpush.bf16.msrb.mxu1 %v15312_v60  ;;  %v11348_v48 = vrot.slane %v11340_v61, 4  ;;  %v11350_v60 = vrot.slane %v11341_v44, 3  ;;  %v11359_v23 = vrot.slane %v11346_v12, 6  ;;  %v18633_v56 = vrot.slane %v18568_v25, 7  ;;  %11989 = vst [vmem:[#allocation9 + $0x18] sm:$0x40] %v18612_v6 }
 0x68a   :  { %9278 = vmatpush.bf16.msrb.mxu2 %v15320_v9  ;;  %9387 = vmatpush.bf16.msrb.mxu3 %v15328_v2  ;;  %v11357_v2 = vrot.slane %v11345_v63, 7  ;;  %11990 = vst [vmem:[#allocation9 + $0x28] sm:$0x40] %v18615_v1  ;;  %v12110_v3 = vpack.c.bf16 %v18615_v1, %v18615_v1  ;;  %v12111_v25 = vpack.c.bf16 %v18618_v32, %v18618_v32  ;;  %v9748_v16 = vrot.slane %v18539_v49, 1  ;;  %v15347_v63 = vld [vmem:[#allocation2 + $0x70] sm:$0xff] }
 0x68b   :  { %v11349_v9 = vsel %vm99_vm0, %v11348_v48, %v11347_v7  ;;  %11991 = vst [vmem:[#allocation9 + $0x38] sm:$0x40] %v18618_v32  ;;  %v8958_v49 = vpack.c.b16 %v18598_v5, %v18598_v5  ;;  %v15355_v48 = vld [vmem:[#allocation2 + $0xb0] sm:$0xff]  ;;  %v9709_v5 = vpack.c.bf16 %v18444_v10, %v18444_v10 }
 0x68c   :  { %v12142_v12 = vunpack.c.l.b16 %v12110_v3  ;;  %v12143_v7 = vunpack.c.l.b16 %v12111_v25  ;;  %11994 = vst [vmem:[#allocation9 + $0x68] sm:$0x40] %v18628_v24 }
 0x68d   :  { %9013 = vmatpush.bf16.msrb.mxu0 %v15303_v38  ;;  %9146 = vmatpush.bf16.msrb.mxu1 %v15311_v18  ;;  %v15317_v38 = vld [vmem:[#allocation2 + $0x80] sm:$0xff]  ;;  %v11351_v18 = vsel %vm102_vm1, %v11350_v60, %v11349_v9  ;;  %v15363_v60 = vld [vmem:[#allocation2 + $0xf0] sm:$0xff]  ;;  %11995 = vst [vmem:[#allocation9 + $0x78] sm:$0x40] %v18633_v56 }
 0x68e   :  { %9279 = vmatpush.bf16.msrb.mxu2 %v15319_v4  ;;  %9388 = vmatpush.bf16.msrb.mxu3 %v15327_v36  ;;  %v11353_v50 = vsel %vm105_vm2, %v11352_v42, %v11351_v18  ;;  %v18622_v4 = vrot.slane %v18558_v47, 7  ;;  %v18625_v36 = vrot.slane %v18561_v11, 7  ;;  %v12108_v47 = vpack.c.bf16 %v18608_v41, %v18608_v41 }
 0x68f   :  { %v11355_v21 = vsel %vm108_vm3, %v11354_v29, %v11353_v50  ;;  %v12109_v11 = vpack.c.bf16 %v18612_v6, %v18612_v6  ;;  %v12151_v9 = vrot.slane %v12142_v12, 4  ;;  %v12766_v50 = vrot.slane %v18612_v6, 7  ;;  %v15337_v6 = vld [vmem:[#allocation2 + $0x20] sm:$0xff] }
 0x690   :  { %v11356_v58 = vsel %vm111_vm4, %v11344_v17, %v11355_v21  ;;  %v12112_v52 = vpack.c.bf16 %v18622_v4, %v18622_v4  ;;  %v12113_v44 = vpack.c.bf16 %v18625_v36, %v18625_v36  ;;  %11992 = vst [vmem:[#allocation9 + $0x48] sm:$0x40] %v18622_v4  ;;  %v9708_v17 = vpack.c.bf16 %v18441_v53, %v18441_v53  ;;  %v15362_v21 = vld [vmem:[#allocation2 + $0xe8] sm:$0xff] }
 0x691   :  { %9014 = vmatpush.bf16.msrb.mxu0 %v15302_v57  ;;  %9147 = vmatpush.bf16.msrb.mxu1 %v15310_v19  ;;  %v11358_v61 = vsel %vm114_vm5, %v11357_v2, %v11356_v58  ;;  %v12115_v19 = vpack.c.bf16 %v18633_v56, %v18633_v56  ;;  %v12141_v62 = vunpack.c.l.b16 %v12109_v11  ;;  %11993 = vst [vmem:[#allocation9 + $0x58] sm:$0x40] %v18625_v36  ;;  %v15513_v53 = vrot.slane %v18343_v22, 59 }
 0x692   :  { %9280 = vmatpush.bf16.msrb.mxu2 %v15318_v34  ;;  %9389 = vmatpush.bf16.msrb.mxu3 %v15326_v43  ;;  %v18654_v57 = vsel %vm117_vm6, %v11359_v23, %v11358_v61  ;;  %v12140_v34 = vunpack.c.l.b16 %v12108_v47  ;;  %v9747_v43 = vsel %vm99_vm0, %v9746_v26, %v9745_v37  ;;  %v12144_v42 = vunpack.c.l.b16 %v12112_v52  ;;  %12790 = vst [vmem:[#allocation9 + $0x18] sm:$0x80] %v12766_v50 }
 0x693   :  { %v12114_v37 = vpack.c.bf16 %v18628_v24, %v18628_v24  ;;  %v12145_v26 = vunpack.c.l.b16 %v12113_v44  ;;  %v12149_v29 = vrot.slane %v12141_v62, 5  ;;  %v9710_v2 = vpack.c.bf16 %v18450_v20, %v18450_v20  ;;  %v15353_v62 = vld [vmem:[#allocation2 + $0xa0] sm:$0xff]  ;;  %v15351_v20 = vld [vmem:[#allocation2 + $0x90] sm:$0xff] }
 0x694   :  { %v12148_v13 = vrot.slane %v12140_v34, 6  ;;  %v18676_v10 = vsel %vm102_vm1, %v9748_v16, %v9747_v43  ;;  %v12147_v23 = vunpack.c.l.b16 %v12115_v19  ;;  %v12155_v11 = vrot.slane %v12144_v42, 2 }
 0x695   :  { %9015 = vmatpush.bf16.msrb.mxu0 %v15301_v35  ;;  %9148 = vmatpush.bf16.msrb.mxu1 %v15309_v8  ;;  %v12153_v35 = vrot.slane %v12143_v7, 3  ;;  %v15338_v8 = vld [vmem:[#allocation2 + $0x28] sm:$0xff]  ;;  %v12146_v58 = vunpack.c.l.b16 %v12114_v37  ;;  %v12157_v25 = vrot.slane %v12145_v26, 1  ;;  %v12770_v52 = vrot.slane %v18625_v36, 7  ;;  %v15344_v26 = vld [vmem:[#allocation2 + $0x58] sm:$0xff] }
 0x696   :  { %9281 = vmatpush.bf16.msrb.mxu2 %v15317_v38  ;;  %9390 = vmatpush.bf16.msrb.mxu3 %v15325_v55  ;;  %v15346_v38 = vld [vmem:[#allocation2 + $0x68] sm:$0xff]  ;;  %v12150_v18 = vsel %vm99_vm0, %v12149_v29, %v12148_v13  ;;  %v12765_v55 = vrot.slane %v18608_v41, 7  ;;  %v12771_v16 = vrot.slane %v18628_v24, 7  ;;  %v12805_v61 = vrot.slane %v12766_v50, 7  ;;  %v15335_v41 = vld [vmem:[#allocation2 + $0x10] sm:$0xff] }
 0x697   :  { %v12152_v47 = vsel %vm102_vm1, %v12151_v9, %v12150_v18  ;;  %v12160_v19 = vrot.slane %v12147_v23, 7  ;;  %v12772_v34 = vrot.slane %v18633_v56, 7  ;;  %v12812_v56 = vrot.slane %v12770_v52, 3  ;;  %12794 = vst [vmem:[#allocation9 + $0x58] sm:$0x80] %v12770_v52  ;;  %v15358_v52 = vld [vmem:[#allocation2 + $0xc8] sm:$0xff] }
 0x698   :  { %9016 = vmatmul.bf16.vlgmr.msrb.gmra.mxu0 %v8958_v49  ;;  %9149 = vmatmul.bf16.vlgmr.msrb.gmra.mxu1 %v8958_v49  ;;  %v12154_v3 = vsel %vm105_vm2, %v12153_v35, %v12152_v47  ;;  %12789 = vst [vmem:[#allocation9 + $0x8] sm:$0x80] %v12765_v55  ;;  %v15509_v13 = vrot.slane %v18300_v54, 63  ;;  %v15510_v37 = vrot.slane %v18305_v33, 62  ;;  %v15511_v35 = vrot.slane %v18312_v46, 61 }
 0x699   :  { %9809 = vmatpush.bf16.msra.mxu0 %v15340_v30  ;;  %9942 = vmatpush.bf16.msra.mxu1 %v15348_v15  ;;  %v12767_v30 = vrot.slane %v18615_v1, 7  ;;  %v15354_v15 = vld [vmem:[#allocation2 + $0xa8] sm:$0xff]  ;;  %v12156_v1 = vsel %vm108_vm3, %v12155_v11, %v12154_v3  ;;  %12795 = vst [vmem:[#allocation9 + $0x68] sm:$0x80] %v12771_v16  ;;  %v12816_v9 = vrot.slane %v12772_v34, 1  ;;  %v9740_v54 = vunpack.c.l.b16 %v9708_v17 }
 0x69a   :  { %10075 = vmatpush.bf16.msra.mxu2 %v15356_v27  ;;  %10184 = vmatpush.bf16.msra.mxu3 %v15364_v14  ;;  %v12768_v27 = vrot.slane %v18618_v32, 7  ;;  %v12769_v14 = vrot.slane %v18622_v4, 7  ;;  %v15345_v32 = vld [vmem:[#allocation2 + $0x60] sm:$0xff]  ;;  %v12158_v4 = vsel %vm111_vm4, %v12157_v25, %v12156_v1  ;;  %12796 = vst [vmem:[#allocation9 + $0x78] sm:$0x80] %v12772_v34  ;;  %v15512_v18 = vrot.slane %v18341_v51, 60 }
 0x69b   :  { %9282 = vmatmul.bf16.vlgmr.msrb.gmra.mxu2 %v8958_v49  ;;  %9391 = vmatmul.bf16.vlgmr.msrb.gmra.mxu3 %v8958_v49  ;;  %v12806_v44 = vrot.slane %v12767_v30, 6  ;;  %12791 = vst [vmem:[#allocation9 + $0x28] sm:$0x80] %v12767_v30  ;;  %v15361_v49 = vld [vmem:[#allocation2 + $0xe0] sm:$0xff]  ;;  %v12159_v24 = vsel %vm114_vm5, %v12146_v58, %v12158_v4  ;;  %v9711_v50 = vpack.c.bf16 %v18457_v39, %v18457_v39  ;;  %v9742_v17 = vunpack.c.l.b16 %v9710_v2  ;;  %v15359_v2 = vld [vmem:[#allocation2 + $0xd0] sm:$0xff]  ;;  %v15342_v3 = vld [vmem:[#allocation2 + $0x48] sm:$0xff] }
 0x69c   :  { %v12808_v36 = vrot.slane %v12768_v27, 5  ;;  %12792 = vst [vmem:[#allocation9 + $0x38] sm:$0x80] %v12768_v27  ;;  %v12810_v43 = vrot.slane %v12769_v14, 4  ;;  %v18696_v12 = vsel %vm117_vm6, %v12160_v19, %v12159_v24  ;;  %v15514_v39 = vrot.slane %v18345_v0, 58  ;;  %v15350_v25 = vld [vmem:[#allocation2 + $0x88] sm:$0xff] }
 0x69d   :  { %9810 = vmatpush.bf16.msra.mxu0 %v15339_v28  ;;  %9943 = vmatpush.bf16.msra.mxu1 %v15347_v63  ;;  %v9741_v28 = vunpack.c.l.b16 %v9709_v5  ;;  %v12807_v63 = vsel %vm99_vm0, %v12806_v44, %v12805_v61  ;;  %12793 = vst [vmem:[#allocation9 + $0x48] sm:$0x80] %v12769_v14  ;;  %v12814_v5 = vrot.slane %v12771_v16, 2  ;;  %v15508_v47 = vrot.slane %v18347_v31, 49  ;;  %v15334_v31 = vld [vmem:[#allocation2 + $0x8] sm:$0xff]  ;;  %v15333_v16 = vld [vmem:[#allocation2] sm:$0xff] }
 0x69e   :  { %10076 = vmatpush.bf16.msra.mxu2 %v15355_v48  ;;  %10185 = vmatpush.bf16.msra.mxu3 %v15363_v60  ;;  %v12809_v7 = vsel %vm102_vm1, %v12808_v36, %v12807_v63  ;;  %v15501_v48 = vrot.slane %v18297_v45, 49  ;;  %v15336_v60 = vld [vmem:[#allocation2 + $0x18] sm:$0xff]  ;;  %12820 = vst [vmem:[#allocation4 - $0x7] sm:$0x80] %v12765_v55  ;;  %v15343_v55 = vld [vmem:[#allocation2 + $0x50] sm:$0xff]  ;;  %v9743_v0 = vunpack.c.l.b16 %v9711_v50  ;;  %v9753_v58 = vrot.slane %v9742_v17, 6 }
 0x69f   :  { %v12811_v42 = vsel %vm105_vm2, %v12810_v43, %v12809_v7  ;;  %v15352_v45 = vld [vmem:[#allocation2 + $0x98] sm:$0xff]  ;;  %v15341_v61 = vld [vmem:[#allocation2 + $0x40] sm:$0xff]  ;;  %v15371_v63 = vld [vmem:[#allocation2 + $0x30] sm:$0xff]  ;;  %12864 = dma.vmem_to_hbm [thread:$0]  %s12857_s18, 2048, %s12859_s16, [#allocation8], %s16279_s19, %s16279_s19, %s16280_s20  }
 0x6a0   :  { %v12813_v29 = vsel %vm108_vm3, %v12812_v56, %v12811_v42  ;;  %v12733_v23 = vrot.slane %v15501_v48, 7  ;;  %v9755_v1 = vrot.slane %v9743_v0, 5  ;;  %v15357_v4 = vld [vmem:[#allocation2 + $0xc0] sm:$0xff]  ;;  %v15372_v34 = vld [vmem:[#allocation2 + $0x38] sm:$0xff]  ;;  %v15379_v43 = vld [vmem:[#allocation2 + $0x70] sm:$0xff] }
 0x6a1   :  { %9811 = vmatpush.bf16.msra.mxu0 %v15338_v8  ;;  %9944 = vmatpush.bf16.msra.mxu1 %v15346_v38  ;;  %v15360_v8 = vld [vmem:[#allocation2 + $0xd8] sm:$0xff]  ;;  %v12815_v33 = vsel %vm111_vm4, %v12814_v5, %v12813_v29  ;;  %v12832_v38 = vsel %vm99_vm0, %v15510_v37, %v15509_v13  ;;  %v15387_v7 = vld [vmem:[#allocation2 + $0xb0] sm:$0xff]  ;;  %v15370_v48 = vld [vmem:[#allocation2 + $0x28] sm:$0xff] }
 0x6a2   :  { %10077 = vmatpush.bf16.msra.mxu2 %v15354_v15  ;;  %10186 = vmatpush.bf16.msra.mxu3 %v15362_v21  ;;  %v12817_v46 = vsel %vm114_vm5, %v12816_v9, %v12815_v33  ;;  %v12834_v30 = vsel %vm102_vm1, %v15511_v35, %v12832_v38  ;;  %v9750_v15 = vsel %vm105_vm2, %v9740_v54, %v18676_v10  ;;  %v9751_v21 = vrot.slane %v9741_v28, 7  ;;  %v15380_v36 = vld [vmem:[#allocation2 + $0x78] sm:$0xff]  ;;  %v15395_v56 = vld [vmem:[#allocation2 + $0xf0] sm:$0xff]  ;;  %v15386_v42 = vld [vmem:[#allocation2 + $0xa8] sm:$0xff] }
 0x6a3   :  { %12821 = vst [vmem:[#allocation4 + $0x1] sm:$0x7f] %v12817_v46  ;;  %v12836_v51 = vsel %vm105_vm2, %v15512_v18, %v12834_v30  ;;  %v9712_v10 = vpack.c.bf16 %v18461_v40, %v18461_v40  ;;  %v15394_v5 = vld [vmem:[#allocation2 + $0xe8] sm:$0xff]  ;;  %v15369_v13 = vld [vmem:[#allocation2 + $0x20] sm:$0xff]  ;;  %v15368_v9 = vld [vmem:[#allocation2 + $0x18] sm:$0xff] }
 0x6a4   :  { %v12838_v22 = vsel %vm108_vm3, %v15513_v53, %v12836_v51  ;;  %12845 = vst [vmem:[#allocation5 - $0x7] sm:$0x80] %v12733_v23  ;;  %v9752_v27 = vsel %vm108_vm3, %v9751_v21, %v9750_v15  ;;  %v15377_v37 = vld [vmem:[#allocation2 + $0x60] sm:$0xff]  ;;  %v15384_v35 = vld [vmem:[#allocation2 + $0x98] sm:$0xff]  ;;  %v15375_v54 = vld [vmem:[#allocation2 + $0x50] sm:$0xff] }
 0x6a5   :  { %9812 = vmatpush.bf16.msra.mxu0 %v15337_v6  ;;  %9945 = vmatpush.bf16.msra.mxu1 %v15345_v32  ;;  %v12840_v11 = vsel %vm111_vm4, %v15514_v39, %v12838_v22  ;;  %12850 = vst [vmem:[#allocation10 - $0x7] sm:$0x80] %v12733_v23  ;;  %v9744_v40 = vunpack.c.l.b16 %v9712_v10  ;;  %v9754_v6 = vsel %vm111_vm4, %v9753_v58, %v9752_v27  ;;  %v15349_v32 = vld [vmem:[#allocation2 + $0x80] sm:$0xff]  ;;  %v15376_v23 = vld [vmem:[#allocation2 + $0x58] sm:$0xff]  ;;  %v15383_v33 = vld [vmem:[#allocation2 + $0x90] sm:$0xff] }
 0x6a6   :  { %10078 = vmatpush.bf16.msra.mxu2 %v15353_v62  ;;  %10187 = vmatpush.bf16.msra.mxu3 %v15361_v49  ;;  %v12842_v14 = vsel %vm114_vm5, %v15508_v47, %v12840_v11  ;;  %v9756_v44 = vsel %vm114_vm5, %v9755_v1, %v9754_v6  ;;  %v15388_v62 = vld [vmem:[#allocation2 + $0xb8] sm:$0xff]  ;;  %v15393_v29 = vld [vmem:[#allocation2 + $0xe0] sm:$0xff]  ;;  %v15391_v38 = vld [vmem:[#allocation2 + $0xd0] sm:$0xff]  ;;  %v10560_v47 = vpack.c.b16 %v18586_v59, %v18586_v59 }
 0x6a7   :  { %12846 = vst [vmem:[#allocation5 + $0x1] sm:$0x7f] %v12842_v14  ;;  %v9757_v19 = vrot.slane %v9744_v40, 4  ;;  %v15396_v49 = vld [vmem:[#allocation2 + $0xf8] sm:$0xff]  ;;  %v15366_v18 = vld [vmem:[#allocation2 + $0x8] sm:$0xff]  ;;  %v15365_v53 = vld [vmem:[#allocation2] sm:$0xff] }
 0x6a8   :  { %12851 = vst [vmem:[#allocation10 + $0x1] sm:$0x7f] %v12842_v14  ;;  %v15374_v50 = vld [vmem:[#allocation2 + $0x48] sm:$0xff]  ;;  %v15373_v17 = vld [vmem:[#allocation2 + $0x40] sm:$0xff]  ;;  %v15404_v39 = vld [vmem:[#allocation2 + $0x38] sm:$0xff] }
 0x6a9   :  { %9813 = vmatpush.bf16.msra.mxu0 %v15336_v60  ;;  %9946 = vmatpush.bf16.msra.mxu1 %v15344_v26  ;;  %v9758_v28 = vsel %vm117_vm6, %v9757_v19, %v9756_v44  ;;  %v15378_v60 = vld [vmem:[#allocation2 + $0x68] sm:$0xff]  ;;  %v15385_v26 = vld [vmem:[#allocation2 + $0xa0] sm:$0xff]  ;;  %v15428_v21 = vld [vmem:[#allocation2 + $0xf8] sm:$0xff]  ;;  %12875 = dma.vmem_to_hbm [thread:$0]  %s12871_s22, 128, %s12873_s25, [#allocation11]  }
 0x6aa   :  { %10079 = vmatpush.bf16.msra.mxu2 %v15352_v45  ;;  %10188 = vmatpush.bf16.msra.mxu3 %v15360_v8  ;;  %v9759_v24 = vpack.c.b16 %v9758_v28, %v9758_v28  ;;  %v15392_v45 = vld [vmem:[#allocation2 + $0xd8] sm:$0xff]  ;;  %v15367_v8 = vld [vmem:[#allocation2 + $0x10] sm:$0xff]  ;;  %v15382_v46 = vld [vmem:[#allocation2 + $0x88] sm:$0xff] }
 0x6ab   :  { %v15390_v30 = vld [vmem:[#allocation2 + $0xc8] sm:$0xff]  ;;  %v15381_v15 = vld [vmem:[#allocation2 + $0x80] sm:$0xff]  ;;  %v15403_v22 = vld [vmem:[#allocation2 + $0x30] sm:$0xff] }
 0x6ac   :  { %v15389_v51 = vld [vmem:[#allocation2 + $0xc0] sm:$0xff]  ;;  %v15427_v10 = vld [vmem:[#allocation2 + $0xf0] sm:$0xff]  ;;  %v15402_v27 = vld [vmem:[#allocation2 + $0x28] sm:$0xff] }
 0x6ad   :  { %9814 = vmatpush.bf16.msra.mxu0 %v15335_v41  ;;  %9947 = vmatpush.bf16.msra.mxu1 %v15343_v55  ;;  %v15412_v41 = vld [vmem:[#allocation2 + $0x78] sm:$0xff]  ;;  %v15410_v14 = vld [vmem:[#allocation2 + $0x68] sm:$0xff]  ;;  %v15399_v19 = vld [vmem:[#allocation2 + $0x10] sm:$0xff] }
 0x6ae   :  { %10080 = vmatpush.bf16.msra.mxu2 %v15351_v20  ;;  %10189 = vmatpush.bf16.msra.mxu3 %v15359_v2  ;;  %v15420_v55 = vld [vmem:[#allocation2 + $0xb8] sm:$0xff]  ;;  %v15411_v20 = vld [vmem:[#allocation2 + $0x70] sm:$0xff]  ;;  %v15418_v58 = vld [vmem:[#allocation2 + $0xa8] sm:$0xff] }
 0x6af   :  { %v15419_v2 = vld [vmem:[#allocation2 + $0xb0] sm:$0xff]  ;;  %v15426_v59 = vld [vmem:[#allocation2 + $0xe8] sm:$0xff]  ;;  %v15408_v44 = vld [vmem:[#allocation2 + $0x58] sm:$0xff] }
 0x6b1   :  { %9815 = vmatpush.bf16.msra.mxu0 %v15334_v31  ;;  %9948 = vmatpush.bf16.msra.mxu1 %v15342_v3  ;;  %v15401_v31 = vld [vmem:[#allocation2 + $0x20] sm:$0xff] }
 0x6b2   :  { %10081 = vmatpush.bf16.msra.mxu2 %v15350_v25  ;;  %10190 = vmatpush.bf16.msra.mxu3 %v15358_v52  ;;  %v15409_v3 = vld [vmem:[#allocation2 + $0x60] sm:$0xff] }
 0x6b3   :  { %v15417_v25 = vld [vmem:[#allocation2 + $0xa0] sm:$0xff] }
 0x6b4   :  { %v15425_v52 = vld [vmem:[#allocation2 + $0xe0] sm:$0xff] }
 0x6b5   :  { %9816 = vmatpush.bf16.msra.mxu0 %v15333_v16  ;;  %9949 = vmatpush.bf16.msra.mxu1 %v15341_v61  ;;  %v15400_v61 = vld [vmem:[#allocation2 + $0x18] sm:$0xff] }
 0x6b6   :  { %10082 = vmatpush.bf16.msra.mxu2 %v15349_v32  ;;  %10191 = vmatpush.bf16.msra.mxu3 %v15357_v4  ;;  %v15416_v32 = vld [vmem:[#allocation2 + $0x98] sm:$0xff] }
 0x6b7   :  { %v15424_v4 = vld [vmem:[#allocation2 + $0xd8] sm:$0xff] }
 0x6b8   :  { %9817 = vmatmul.bf16.vlgmr.msra.gmra.mxu0 %v9759_v24  ;;  %9950 = vmatmul.bf16.vlgmr.msra.gmra.mxu1 %v9759_v24 }
 0x6b9   :  { %10610 = vmatpush.bf16.msrb.mxu0 %v15372_v34  ;;  %10743 = vmatpush.bf16.msrb.mxu1 %v15380_v36  ;;  %v15407_v34 = vld [vmem:[#allocation2 + $0x50] sm:$0xff] }
 0x6ba   :  { %10876 = vmatpush.bf16.msrb.mxu2 %v15388_v62  ;;  %10985 = vmatpush.bf16.msrb.mxu3 %v15396_v49  ;;  %v15415_v36 = vld [vmem:[#allocation2 + $0x90] sm:$0xff] }
 0x6bb   :  { %10083 = vmatmul.bf16.vlgmr.msra.gmra.mxu2 %v9759_v24  ;;  %10192 = vmatmul.bf16.vlgmr.msra.gmra.mxu3 %v9759_v24  ;;  %v15423_v62 = vld [vmem:[#allocation2 + $0xd0] sm:$0xff] }
 0x6bd   :  { %10611 = vmatpush.bf16.msrb.mxu0 %v15371_v63  ;;  %10744 = vmatpush.bf16.msrb.mxu1 %v15379_v43  ;;  %v15398_v43 = vld [vmem:[#allocation2 + $0x8] sm:$0xff] }
 0x6be   :  { %10877 = vmatpush.bf16.msrb.mxu2 %v15387_v7  ;;  %10986 = vmatpush.bf16.msrb.mxu3 %v15395_v56  ;;  %v15406_v7 = vld [vmem:[#allocation2 + $0x48] sm:$0xff] }
 0x6bf   :  { %v15414_v56 = vld [vmem:[#allocation2 + $0x88] sm:$0xff] }
 0x6c1   :  { %10612 = vmatpush.bf16.msrb.mxu0 %v15370_v48  ;;  %10745 = vmatpush.bf16.msrb.mxu1 %v15378_v60  ;;  %v15422_v48 = vld [vmem:[#allocation2 + $0xc8] sm:$0xff]  ;;  %v15397_v60 = vld [vmem:[#allocation2] sm:$0xff] }
 0x6c2   :  { %10878 = vmatpush.bf16.msrb.mxu2 %v15386_v42  ;;  %10987 = vmatpush.bf16.msrb.mxu3 %v15394_v5  ;;  %v15405_v42 = vld [vmem:[#allocation2 + $0x40] sm:$0xff] }
 0x6c3   :  { %v15413_v5 = vld [vmem:[#allocation2 + $0x80] sm:$0xff] }
 0x6c5   :  { %10613 = vmatpush.bf16.msrb.mxu0 %v15369_v13  ;;  %10746 = vmatpush.bf16.msrb.mxu1 %v15377_v37  ;;  %v15421_v13 = vld [vmem:[#allocation2 + $0xc0] sm:$0xff]  ;;  %v15436_v37 = vld [vmem:[#allocation2 + $0x38] sm:$0xff] }
 0x6c6   :  { %10879 = vmatpush.bf16.msrb.mxu2 %v15385_v26  ;;  %10988 = vmatpush.bf16.msrb.mxu3 %v15393_v29  ;;  %v15444_v26 = vld [vmem:[#allocation2 + $0x78] sm:$0xff] }
 0x6c9   :  { %10614 = vmatpush.bf16.msrb.mxu0 %v15368_v9  ;;  %10747 = vmatpush.bf16.msrb.mxu1 %v15376_v23  ;;  %v15452_v23 = vld [vmem:[#allocation2 + $0xb8] sm:$0xff] }
 0x6ca   :  { %10880 = vmatpush.bf16.msrb.mxu2 %v15384_v35  ;;  %10989 = vmatpush.bf16.msrb.mxu3 %v15392_v45  ;;  %v15460_v35 = vld [vmem:[#allocation2 + $0xf8] sm:$0xff] }
 0x6cd   :  { %10615 = vmatpush.bf16.msrb.mxu0 %v15367_v8  ;;  %10748 = vmatpush.bf16.msrb.mxu1 %v15375_v54  ;;  %v11361_v54 = vpack.c.b16 %v18654_v57, %v18654_v57  ;;  %v15458_v57 = vld [vmem:[#allocation2 + $0xe8] sm:$0xff] }
 0x6ce   :  { %10881 = vmatpush.bf16.msrb.mxu2 %v15383_v33  ;;  %10990 = vmatpush.bf16.msrb.mxu3 %v15391_v38  ;;  %v15435_v33 = vld [vmem:[#allocation2 + $0x30] sm:$0xff] }
 0x6cf   :  { %v15443_v38 = vld [vmem:[#allocation2 + $0x70] sm:$0xff] }
 0x6d1   :  { %10616 = vmatpush.bf16.msrb.mxu0 %v15366_v18  ;;  %10749 = vmatpush.bf16.msrb.mxu1 %v15374_v50  ;;  %v15451_v18 = vld [vmem:[#allocation2 + $0xb0] sm:$0xff] }
 0x6d2   :  { %10882 = vmatpush.bf16.msrb.mxu2 %v15382_v46  ;;  %10991 = vmatpush.bf16.msrb.mxu3 %v15390_v30  ;;  %v15459_v50 = vld [vmem:[#allocation2 + $0xf0] sm:$0xff]  ;;  %v15434_v46 = vld [vmem:[#allocation2 + $0x28] sm:$0xff] }
 0x6d3   :  { %v15442_v30 = vld [vmem:[#allocation2 + $0x68] sm:$0xff] }
 0x6d4   :  { %v6622_v11 = vpop.f32.mrf.mxu0  ;;  %v6755_v0 = vpop.f32.mrf.mxu1 }
 0x6d5   :  { %10617 = vmatpush.bf16.msrb.mxu0 %v15365_v53  ;;  %10750 = vmatpush.bf16.msrb.mxu1 %v15373_v17 }
 0x6d6   :  { %10883 = vmatpush.bf16.msrb.mxu2 %v15381_v15  ;;  %10992 = vmatpush.bf16.msrb.mxu3 %v15389_v51  ;;  %v15450_v15 = vld [vmem:[#allocation2 + $0xa8] sm:$0xff] }
 0x6d8   :  { %10618 = vmatmul.bf16.vlgmr.msrb.gmra.mxu0 %v10560_v47  ;;  %10751 = vmatmul.bf16.vlgmr.msrb.gmra.mxu1 %v10560_v47 }
 0x6d9   :  { %11411 = vmatpush.bf16.msra.mxu0 %v15404_v39  ;;  %11544 = vmatpush.bf16.msra.mxu1 %v15412_v41  ;;  %v15433_v41 = vld [vmem:[#allocation2 + $0x20] sm:$0xff] }
 0x6da   :  { %11677 = vmatpush.bf16.msra.mxu2 %v15420_v55  ;;  %11786 = vmatpush.bf16.msra.mxu3 %v15428_v21  ;;  %v15441_v55 = vld [vmem:[#allocation2 + $0x60] sm:$0xff] }
 0x6db   :  { %10884 = vmatmul.bf16.vlgmr.msrb.gmra.mxu2 %v10560_v47  ;;  %10993 = vmatmul.bf16.vlgmr.msrb.gmra.mxu3 %v10560_v47  ;;  %v6888_v40 = vpop.f32.mrf.mxu2  ;;  %v6997_v6 = vpop.f32.mrf.mxu3  ;;  %v15449_v21 = vld [vmem:[#allocation2 + $0xa0] sm:$0xff] }
 0x6dc   :  { %v6624_v1 = vpop.f32.mrf.mxu0  ;;  %v6757_v16 = vpop.f32.mrf.mxu1  ;;  %v15457_v47 = vld [vmem:[#allocation2 + $0xe0] sm:$0xff]  ;;  %v15446_v40 = vld [vmem:[#allocation2 + $0x88] sm:$0xff] }
 0x6dd   :  { %11412 = vmatpush.bf16.msra.mxu0 %v15403_v22  ;;  %11545 = vmatpush.bf16.msra.mxu1 %v15411_v20  ;;  %v15432_v22 = vld [vmem:[#allocation2 + $0x18] sm:$0xff]  ;;  %v15454_v6 = vld [vmem:[#allocation2 + $0xc8] sm:$0xff] }
 0x6de   :  { %11678 = vmatpush.bf16.msra.mxu2 %v15419_v2  ;;  %11787 = vmatpush.bf16.msra.mxu3 %v15427_v10  ;;  %v15440_v20 = vld [vmem:[#allocation2 + $0x58] sm:$0xff] }
 0x6df   :  { %v15448_v2 = vld [vmem:[#allocation2 + $0x98] sm:$0xff] }
 0x6e0   :  { %v15456_v10 = vld [vmem:[#allocation2 + $0xd8] sm:$0xff] }
 0x6e1   :  { %11413 = vmatpush.bf16.msra.mxu0 %v15402_v27  ;;  %11546 = vmatpush.bf16.msra.mxu1 %v15410_v14 }
 0x6e2   :  { %11679 = vmatpush.bf16.msra.mxu2 %v15418_v58  ;;  %11788 = vmatpush.bf16.msra.mxu3 %v15426_v59  ;;  %v15431_v58 = vld [vmem:[#allocation2 + $0x10] sm:$0xff] }
 0x6e3   :  { %v6890_v49 = vpop.f32.mrf.mxu2  ;;  %v6999_v28 = vpop.f32.mrf.mxu3  ;;  %v15439_v59 = vld [vmem:[#allocation2 + $0x50] sm:$0xff] }
 0x6e4   :  { %v7415_v24 = vpop.f32.mrf.mxu0  ;;  %v7548_v63 = vpop.f32.mrf.mxu1 }
 0x6e5   :  { %11414 = vmatpush.bf16.msra.mxu0 %v15401_v31  ;;  %11547 = vmatpush.bf16.msra.mxu1 %v15409_v3  ;;  %v15447_v31 = vld [vmem:[#allocation2 + $0x90] sm:$0xff] }
 0x6e6   :  { %11680 = vmatpush.bf16.msra.mxu2 %v15417_v25  ;;  %11789 = vmatpush.bf16.msra.mxu3 %v15425_v52  ;;  %v15455_v3 = vld [vmem:[#allocation2 + $0xd0] sm:$0xff]  ;;  %v15430_v25 = vld [vmem:[#allocation2 + $0x8] sm:$0xff] }
 0x6e7   :  { %v15438_v52 = vld [vmem:[#allocation2 + $0x48] sm:$0xff] }
 0x6e9   :  { %11415 = vmatpush.bf16.msra.mxu0 %v15400_v61  ;;  %11548 = vmatpush.bf16.msra.mxu1 %v15408_v44  ;;  %v15429_v61 = vld [vmem:[#allocation2] sm:$0xff] }
 0x6ea   :  { %11681 = vmatpush.bf16.msra.mxu2 %v15416_v32  ;;  %11790 = vmatpush.bf16.msra.mxu3 %v15424_v4  ;;  %v15437_v44 = vld [vmem:[#allocation2 + $0x40] sm:$0xff] }
 0x6eb   :  { %v7681_v29 = vpop.f32.mrf.mxu2  ;;  %v7790_v9 = vpop.f32.mrf.mxu3  ;;  %v15445_v32 = vld [vmem:[#allocation2 + $0x80] sm:$0xff] }
 0x6ec   :  { %v7417_v45 = vpop.f32.mrf.mxu0  ;;  %v7550_v8 = vpop.f32.mrf.mxu1  ;;  %v15453_v4 = vld [vmem:[#allocation2 + $0xc0] sm:$0xff] }
 0x6ed   :  { %11416 = vmatpush.bf16.msra.mxu0 %v15399_v19  ;;  %11549 = vmatpush.bf16.msra.mxu1 %v15407_v34  ;;  %v12162_v19 = vpack.c.b16 %v18696_v12, %v18696_v12 }
 0x6ee   :  { %11682 = vmatpush.bf16.msra.mxu2 %v15415_v36  ;;  %11791 = vmatpush.bf16.msra.mxu3 %v15423_v62 }
 0x6f1   :  { %11417 = vmatpush.bf16.msra.mxu0 %v15398_v43  ;;  %11550 = vmatpush.bf16.msra.mxu1 %v15406_v7 }
 0x6f2   :  { %11683 = vmatpush.bf16.msra.mxu2 %v15414_v56  ;;  %11792 = vmatpush.bf16.msra.mxu3 %v15422_v48 }
 0x6f3   :  { %v7683_v53 = vpop.f32.mrf.mxu2  ;;  %v7792_v17 = vpop.f32.mrf.mxu3 }
 0x6f5   :  { %11418 = vmatpush.bf16.msra.mxu0 %v15397_v60  ;;  %11551 = vmatpush.bf16.msra.mxu1 %v15405_v42  ;;  %v8216_v51 = vpop.f32.mrf.mxu0  ;;  %v8349_v39 = vpop.f32.mrf.mxu1 }
 0x6f6   :  { %11684 = vmatpush.bf16.msra.mxu2 %v15413_v5  ;;  %11793 = vmatpush.bf16.msra.mxu3 %v15421_v13 }
 0x6f8   :  { %11419 = vmatmul.bf16.vlgmr.msra.gmra.mxu0 %v11361_v54  ;;  %11552 = vmatmul.bf16.vlgmr.msra.gmra.mxu1 %v11361_v54 }
 0x6f9   :  { %12212 = vmatpush.bf16.msrb.mxu0 %v15436_v37  ;;  %12345 = vmatpush.bf16.msrb.mxu1 %v15444_v26 }
 0x6fa   :  { %12478 = vmatpush.bf16.msrb.mxu2 %v15452_v23  ;;  %12587 = vmatpush.bf16.msrb.mxu3 %v15460_v35 }
 0x6fb   :  { %11685 = vmatmul.bf16.vlgmr.msra.gmra.mxu2 %v11361_v54  ;;  %11794 = vmatmul.bf16.vlgmr.msra.gmra.mxu3 %v11361_v54 }
 0x6fd   :  { %12213 = vmatpush.bf16.msrb.mxu0 %v15435_v33  ;;  %12346 = vmatpush.bf16.msrb.mxu1 %v15443_v38  ;;  %v8218_v27 = vpop.f32.mrf.mxu0  ;;  %v8351_v14 = vpop.f32.mrf.mxu1 }
 0x6fe   :  { %12479 = vmatpush.bf16.msrb.mxu2 %v15451_v18  ;;  %12588 = vmatpush.bf16.msrb.mxu3 %v15459_v50  ;;  %v8482_v11 = vpop.f32.mrf.mxu2  ;;  %v8591_v0 = vpop.f32.mrf.mxu3 }
 0x701   :  { %12214 = vmatpush.bf16.msrb.mxu0 %v15434_v46  ;;  %12347 = vmatpush.bf16.msrb.mxu1 %v15442_v30 }
 0x702   :  { %12480 = vmatpush.bf16.msrb.mxu2 %v15450_v15  ;;  %12589 = vmatpush.bf16.msrb.mxu3 %v15458_v57 }
 0x705   :  { %12215 = vmatpush.bf16.msrb.mxu0 %v15433_v41  ;;  %12348 = vmatpush.bf16.msrb.mxu1 %v15441_v55 }
 0x706   :  { %12481 = vmatpush.bf16.msrb.mxu2 %v15449_v21  ;;  %12590 = vmatpush.bf16.msrb.mxu3 %v15457_v47  ;;  %v8484_v1 = vpop.f32.mrf.mxu2  ;;  %v8593_v16 = vpop.f32.mrf.mxu3 }
 0x709   :  { %12216 = vmatpush.bf16.msrb.mxu0 %v15432_v22  ;;  %12349 = vmatpush.bf16.msrb.mxu1 %v15440_v20 }
 0x70a   :  { %12482 = vmatpush.bf16.msrb.mxu2 %v15448_v2  ;;  %12591 = vmatpush.bf16.msrb.mxu3 %v15456_v10 }
 0x70d   :  { %12217 = vmatpush.bf16.msrb.mxu0 %v15431_v58  ;;  %12350 = vmatpush.bf16.msrb.mxu1 %v15439_v59 }
 0x70e   :  { %12483 = vmatpush.bf16.msrb.mxu2 %v15447_v31  ;;  %12592 = vmatpush.bf16.msrb.mxu3 %v15455_v3 }
 0x711   :  { %12218 = vmatpush.bf16.msrb.mxu0 %v15430_v25  ;;  %12351 = vmatpush.bf16.msrb.mxu1 %v15438_v52 }
 0x712   :  { %12484 = vmatpush.bf16.msrb.mxu2 %v15446_v40  ;;  %12593 = vmatpush.bf16.msrb.mxu3 %v15454_v6 }
 0x715   :  { %12219 = vmatpush.bf16.msrb.mxu0 %v15429_v61  ;;  %12352 = vmatpush.bf16.msrb.mxu1 %v15437_v44  ;;  %v9017_v34 = vpop.f32.mrf.mxu0  ;;  %v9150_v36 = vpop.f32.mrf.mxu1 }
 0x716   :  { %12485 = vmatpush.bf16.msrb.mxu2 %v15445_v32  ;;  %12594 = vmatpush.bf16.msrb.mxu3 %v15453_v4 }
 0x718   :  { %12220 = vmatmul.bf16.vlgmr.msrb.gmra.mxu0 %v12162_v19  ;;  %12353 = vmatmul.bf16.vlgmr.msrb.gmra.mxu1 %v12162_v19 }
 0x719   :  { %12486 = vmatmul.bf16.vlgmr.msrb.gmra.mxu2 %v12162_v19  ;;  %12595 = vmatmul.bf16.vlgmr.msrb.gmra.mxu3 %v12162_v19 }
 0x71d   :  { %v9019_v28 = vpop.f32.mrf.mxu0  ;;  %v9152_v24 = vpop.f32.mrf.mxu1 }
 0x71e   :  { %v9283_v62 = vpop.f32.mrf.mxu2  ;;  %v9392_v49 = vpop.f32.mrf.mxu3 }
 0x726   :  { %v9285_v12 = vpop.f32.mrf.mxu2  ;;  %v9394_v63 = vpop.f32.mrf.mxu3 }
 0x735   :  { %v9818_v43 = vpop.f32.mrf.mxu0  ;;  %v9951_v7 = vpop.f32.mrf.mxu1 }
 0x73d   :  { %v9820_v60 = vpop.f32.mrf.mxu0  ;;  %v9953_v42 = vpop.f32.mrf.mxu1 }
 0x73e   :  { %v10084_v56 = vpop.f32.mrf.mxu2  ;;  %v10193_v48 = vpop.f32.mrf.mxu3 }
 0x746   :  { %v10086_v5 = vpop.f32.mrf.mxu2  ;;  %v10195_v13 = vpop.f32.mrf.mxu3 }
 0x755   :  { %v10619_v37 = vpop.f32.mrf.mxu0  ;;  %v10752_v26 = vpop.f32.mrf.mxu1 }
 0x75d   :  { %v10621_v23 = vpop.f32.mrf.mxu0  ;;  %v10754_v35 = vpop.f32.mrf.mxu1 }
 0x75e   :  { %v10885_v29 = vpop.f32.mrf.mxu2  ;;  %v10994_v9 = vpop.f32.mrf.mxu3 }
 0x766   :  { %v10887_v45 = vpop.f32.mrf.mxu2  ;;  %v10996_v8 = vpop.f32.mrf.mxu3 }
 0x775   :  { %v11420_v54 = vpop.f32.mrf.mxu0  ;;  %v11553_v33 = vpop.f32.mrf.mxu1 }
 0x77d   :  { %v11422_v50 = vpop.f32.mrf.mxu0  ;;  %v11555_v46 = vpop.f32.mrf.mxu1 }
 0x77e   :  { %v11686_v38 = vpop.f32.mrf.mxu2  ;;  %v11795_v18 = vpop.f32.mrf.mxu3 }
 0x786   :  { %v11688_v30 = vpop.f32.mrf.mxu2  ;;  %v11797_v53 = vpop.f32.mrf.mxu3 }
 0x795   :  { %v12221_v17 = vpop.f32.mrf.mxu0  ;;  %v12354_v15 = vpop.f32.mrf.mxu1 }
 0x79c   :  { %v12487_v57 = vpop.f32.mrf.mxu2  ;;  %v12596_v51 = vpop.f32.mrf.mxu3 }
 0x79d   :  { %v12223_v39 = vpop.f32.mrf.mxu0  ;;  %v12356_v41 = vpop.f32.mrf.mxu1 }
 0x7a4   :  { %v12489_v55 = vpop.f32.mrf.mxu2  ;;  %v12598_v21 = vpop.f32.mrf.mxu3 }
 0x7a5   :  { %16268 = dma.done.wait [#allocation8], 2048  }
 0x7a6   :  { %16269 = vsyncadd [#allocation8], 4294965248 }
 0x7a7   :  { %16270 = dma.done.wait [#allocation11], 128  }
 0x7a8   :  { %16271 = vsyncadd [#allocation11], 4294967168 }
 0x7a9   :  { %12884 = vsyncpa [#allocation7], 1 }
 0x7aa   :  { %12885 = vsyncpa [#allocation8], 1 }
 0x7ab   :  { %12886 = vsyncpa [#allocation11], 1 }
 0x7ac   :  { %12887 = vsyncmov [#allocation3] }
 0x7af   :  { %s12888_s3 = vpop.sfrf %12887 }
 0x7b0   :  { %p14948_p0 = scmp.ne.s32.totalorder %s12888_s3, 0 }
 0x7b2   :  { %12892 = shalt.err (%p14948_p0)  }

</bundles_post_ra>
